<compile_context>
chip_gen: v7x
topology: tpu7x:2x2x1
jax: 0.10.0
libtpu: 0.0.40
codegen_flags: <defaults>
</compile_context>

<pallas_src>
import jax
import jax.numpy as jnp
from jax.experimental import pallas as pl
from jax.experimental.pallas import tpu as pltpu

N_CH = 13          # input channels (chess planes)
HID = 128          # trunk width
H = W = 8          # board spatial size (forced by Linear(1000,.) / Linear(100,.))
HP = WP = 10       # spatial size with 1-px zero border
SP_ROWS = HP * WP  # 100 flat padded positions per image
PAD_ROWS = 104     # + 4 slack rows so shifted tap windows stay in-bounds
ROWS = H * WP      # 80 conv-output rows per image (8 valid + 2 junk cols / row)
INT_LO = WP + 1    # flat offset of interior position (1, 1)
N_LAYERS = 13      # l1..l13 hold unique weights used by forward (l14 unused)
N_STEPS = 14       # 14 trunk applications: l1..l13, then l2 again
PROB_OUT = 1968
PROB_PAD = 2048    # lane-dense padded prob width (16 * 128)


# ----------------------------------------------------------------------------
# Fused trunk kernel: all 14 residual-block steps + 1x1 head convs.
# grid = (batch_tiles, 14); weights are VMEM-resident, indexed per step.
# ----------------------------------------------------------------------------
def _trunk_kernel(ids_ref, x_ref, w1_ref, w2_ref, bn_ref, wh_ref, bnh_ref,
                  mask_ref, out_ref, act_ref, hpad_ref, patch_ref):
    l = pl.program_id(1)
    nb = act_ref.shape[0]
    m = nb * ROWS

    @pl.when(l == 0)
    def _():
        # New batch tile: stage the zero-padded input; zero only hpad's border
        # rows once (interior rows INT_LO..INT_LO+ROWS are rewritten each step).
        act_ref[...] = x_ref[...]
        hpad_ref[:, :INT_LO, :] = jnp.zeros((nb, INT_LO, HID), jnp.bfloat16)
        hpad_ref[:, INT_LO + ROWS:, :] = jnp.zeros(
            (nb, PAD_ROWS - INT_LO - ROWS, HID), jnp.bfloat16)

    li = ids_ref[l]                 # layer id for this step (step 13 -> l2)
    w1 = w1_ref[li]                 # (1152, 128) bf16, resident weight stack
    w2 = w2_ref[li]
    bn = bn_ref[li]                 # (4, 128) f32: [s1, b1, s2, b2]
    mask = mask_ref[...]            # (80, 128) f32: 0 on the 2 junk cols / row

    def im2col(src_ref):
        # 9 contiguous row-shifted copies (flat tap offsets dy*WP + dx).
        for t in range(9):
            dy, dx = divmod(t, 3)
            k = dy * WP + dx
            patch_ref[:, :, t * HID:(t + 1) * HID] = src_ref[:, k:k + ROWS, :]
        return patch_ref[...].reshape(m, 9 * HID)

    # ---- conv1: single (m, 1152) @ (1152, 128) MXU matmul + BN1 + ReLU ----
    h = jnp.dot(im2col(act_ref), w1, preferred_element_type=jnp.float32)
    h = h.reshape(nb, ROWS, HID) * bn[0] + bn[1]
    h = jnp.maximum(h, 0.0) * mask
    hpad_ref[:, INT_LO:INT_LO + ROWS, :] = h.astype(jnp.bfloat16)

    # ---- conv2 + BN2 (+ residual for l > 0) + ReLU ----
    y = jnp.dot(im2col(hpad_ref), w2, preferred_element_type=jnp.float32)
    y = y.reshape(nb, ROWS, HID) * bn[2] + bn[3]

    @pl.when(l == 0)
    def _():
        y0 = jnp.maximum(y, 0.0) * mask          # x1 = relu(l1(x)), no residual
        act_ref[:, INT_LO:INT_LO + ROWS, :] = y0.astype(jnp.bfloat16)

    @pl.when(l > 0)
    def _():
        res = act_ref[:, INT_LO:INT_LO + ROWS, :].astype(jnp.float32)
        yr = jnp.maximum(y + res, 0.0) * mask
        act_ref[:, INT_LO:INT_LO + ROWS, :] = yr.astype(jnp.bfloat16)

        # ---- final step: fused 1x1 head convs + BN (+ ReLU on value ch).
        # Border rows of the padded 10x10 head maps are constants and are
        # folded into the dense-head biases at init time.
        @pl.when(l == pl.num_programs(1) - 1)
        def _():
            xh = yr.reshape(m, HID).astype(jnp.bfloat16)
            z = jnp.dot(xh, wh_ref[...], preferred_element_type=jnp.float32)
            bnh = bnh_ref[...]                   # (2, 128): [scale, bias]
            z = z * bnh[0] + bnh[1]
            lane = jax.lax.broadcasted_iota(jnp.int32, z.shape, 1)
            z = jnp.where(lane == 10, jnp.maximum(z, 0.0), z)   # ReLU: value ch
            out_ref[...] = z.reshape(nb, ROWS, HID).astype(out_ref.dtype)


def _trunk_batch_tile(n):
    # Cap 32 (M = 2560 im2col rows/step); >= 2 tiles whenever n >= 2 so the
    # "parallel" batch axis can span both v7x TensorCores.
    if n >= 64:
        return 32
    nb = 1
    while nb * 4 <= n:
        nb *= 2
    return nb


def trunk_forward(x_flat, mask, nb, trunk_p, head_p):
    n = x_flat.shape[0]
    layer_ids = jnp.array(list(range(N_LAYERS)) + [1], jnp.int32)   # step 13 -> l2

    grid_spec = pltpu.PrefetchScalarGridSpec(
        num_scalar_prefetch=1,
        grid=(n // nb, N_STEPS),
        in_specs=[
            pl.BlockSpec((nb, PAD_ROWS, HID), lambda b, l, ids: (b, 0, 0)),
            # resident weight stacks (constant block index -> DMAed once)
            pl.BlockSpec((N_LAYERS, 9 * HID, HID), lambda b, l, ids: (0, 0, 0)),
            pl.BlockSpec((N_LAYERS, 9 * HID, HID), lambda b, l, ids: (0, 0, 0)),
            pl.BlockSpec((N_LAYERS, 4, HID), lambda b, l, ids: (0, 0, 0)),
            pl.BlockSpec((HID, HID), lambda b, l, ids: (0, 0)),
            pl.BlockSpec((2, HID), lambda b, l, ids: (0, 0)),
            pl.BlockSpec((ROWS, HID), lambda b, l, ids: (0, 0)),
        ],
        out_specs=pl.BlockSpec((nb, ROWS, HID), lambda b, l, ids: (b, 0, 0)),
        scratch_shapes=[
            pltpu.VMEM((nb, PAD_ROWS, HID), jnp.bfloat16),    # persistent act
            pltpu.VMEM((nb, PAD_ROWS, HID), jnp.bfloat16),    # conv2 staging
            pltpu.VMEM((nb, ROWS, 9 * HID), jnp.bfloat16),    # im2col patches
        ],
    )
    return pl.pallas_call(
        _trunk_kernel,
        out_shape=jax.ShapeDtypeStruct((n, ROWS, HID), jnp.bfloat16),
        grid_spec=grid_spec,
        compiler_params=pltpu.CompilerParams(
            dimension_semantics=("parallel", "arbitrary"),
            vmem_limit_bytes=48 * 1024 * 1024),
    )(layer_ids, x_flat, trunk_p["w1"], trunk_p["w2"], trunk_p["bn"],
      head_p["whead"], head_p["bnhead"], mask)


# ----------------------------------------------------------------------------
# Dense heads (batch-tiled pallas_call):
#   prob : Linear(1000,1968) -> ReLU -> Softmax  (border rows folded into bias)
#   value: Linear(100,64) -> ReLU -> Linear(64,1) -> Tanh  (same border fold)
# ----------------------------------------------------------------------------
def _head_kernel(fp_ref, fv_ref, wfc_ref, bfc_ref, wv1_ref, bv1_ref,
                 wv2_ref, bv2_ref, prob_ref, val_ref):
    z = jnp.dot(fp_ref[...], wfc_ref[...],
                preferred_element_type=jnp.float32) + bfc_ref[...]
    z = jnp.maximum(z, 0.0)
    lane = jax.lax.broadcasted_iota(jnp.int32, z.shape, 1)
    z = jnp.where(lane < PROB_OUT, z, -1e30)          # exclude lane padding
    z = z - jnp.max(z, axis=1, keepdims=True)
    e = jnp.exp(z)
    prob_ref[...] = e / jnp.sum(e, axis=1, keepdims=True)

    v = jnp.dot(fv_ref[...], wv1_ref[...],
                preferred_element_type=jnp.float32) + bv1_ref[...]
    v = jnp.maximum(v, 0.0).astype(jnp.bfloat16)
    v = jnp.dot(v, wv2_ref[...], preferred_element_type=jnp.float32) + bv2_ref[...]
    val_ref[...] = jnp.tanh(v)


def _head_tile(n):
    if n <= 256:
        return n
    for tb in (256, 128, 64, 32, 16, 8):
        if n % tb == 0:
            return tb
    return n


def head_dense(fp, fv, hp):
    n = fp.shape[0]
    tb = _head_tile(n)
    return pl.pallas_call(
        _head_kernel,
        out_shape=(jax.ShapeDtypeStruct((n, PROB_PAD), jnp.float32),
                   jax.ShapeDtypeStruct((n, 1), jnp.float32)),
        grid=(n // tb,),
        in_specs=[
            pl.BlockSpec((tb, 10 * H * W), lambda i: (i, 0)),
            pl.BlockSpec((tb, H * W), lambda i: (i, 0)),
            pl.BlockSpec((10 * H * W, PROB_PAD), lambda i: (0, 0)),
            pl.BlockSpec((1, PROB_PAD), lambda i: (0, 0)),
            pl.BlockSpec((H * W, 64), lambda i: (0, 0)),
            pl.BlockSpec((1, 64), lambda i: (0, 0)),
            pl.BlockSpec((64, 1), lambda i: (0, 0)),
            pl.BlockSpec((1, 1), lambda i: (0, 0)),
        ],
        out_specs=(pl.BlockSpec((tb, PROB_PAD), lambda i: (i, 0)),
                   pl.BlockSpec((tb, 1), lambda i: (i, 0))),
        compiler_params=pltpu.CompilerParams(
            dimension_semantics=("parallel",),
            vmem_limit_bytes=48 * 1024 * 1024),
    )(fp, fv, hp["wfc"], hp["bfc"], hp["wv1"], hp["bv1"], hp["wv2"], hp["bv2"])


# ----------------------------------------------------------------------------
# Parameter init (deterministic; shapes from ChessNetCompat.__init__)
# ----------------------------------------------------------------------------
def init_params(key):
    kit = iter(jax.random.split(key, 96))

    def nrm(shape, std):
        return jax.random.normal(next(kit), shape, jnp.float32) * std

    def conv3x3_im2col(cin):
        w = nrm((HID, cin, 3, 3), 1.0 / (cin * 9) ** 0.5)           # PyTorch OIHW
        wk = jnp.transpose(w, (2, 3, 1, 0)).reshape(9, cin, HID)    # (tap, Cin, Cout)
        if cin < HID:
            wk = jnp.pad(wk, ((0, 0), (0, HID - cin), (0, 0)))      # zero-pad Cin
        return wk.reshape(9 * HID, HID)                             # (1152, 128)

    def bn_fold(c):
        eps = 1e-5
        gamma = 1.0 + 0.1 * jax.random.normal(next(kit), (c,), jnp.float32)
        beta = 0.1 * jax.random.normal(next(kit), (c,), jnp.float32)
        return gamma / jnp.sqrt(1.0 + eps), beta   # running_mean=0, running_var=1

    w1_l, w2_l, bn_l = [], [], []
    for li in range(N_LAYERS):                     # l1..l13 (l14 unused by forward)
        cin = N_CH if li == 0 else HID
        w1 = conv3x3_im2col(cin)
        s1, b1 = bn_fold(HID)
        w2 = conv3x3_im2col(HID)
        s2, b2 = bn_fold(HID)
        w1_l.append(w1)
        w2_l.append(w2)
        bn_l.append(jnp.stack([s1, b1, s2, b2]))
    trunk = dict(
        w1=jnp.stack(w1_l).astype(jnp.bfloat16),   # (13, 1152, 128)
        w2=jnp.stack(w2_l).astype(jnp.bfloat16),   # (13, 1152, 128)
        bn=jnp.stack(bn_l).astype(jnp.float32),    # (13, 4, 128)
    )

    # ---- head 1x1 convs (prob: 10 ch, value: 1 ch) packed into 128 lanes ----
    wp = nrm((10, HID), 1.0 / HID ** 0.5)          # PyTorch (out, in)
    sp, bp = bn_fold(10)
    wv = nrm((1, HID), 1.0 / HID ** 0.5)
    sv, bv = bn_fold(1)
    whead = jnp.zeros((HID, HID), jnp.float32)
    whead = whead.at[:, :10].set(wp.T).at[:, 10].set(wv[0])
    bn_scale = jnp.zeros((HID,), jnp.float32).at[:10].set(sp).at[10].set(sv[0])
    bn_bias = jnp.zeros((HID,), jnp.float32).at[:10].set(bp).at[10].set(bv[0])
    bnhead = jnp.stack([bn_scale, bn_bias])        # (2, 128)

    # ---- prob dense: Linear(1000, 1968), padded to 2048 output lanes.
    # Border positions of the padded 10x10 head map contribute the constant BN
    # bias bp[c]; fold into the Linear bias; keep only the 64 interior rows per
    # channel, re-ordered to the trunk output's (y, x, c) flatten order.
    w_fc = nrm((PROB_OUT, 1000), 1.0 / 1000 ** 0.5)
    b_fc = nrm((PROB_OUT,), 1.0 / 1000 ** 0.5)
    wfcT = jnp.pad(w_fc.T, ((0, 0), (0, PROB_PAD - PROB_OUT)))      # (1000, 2048)
    bfc = jnp.pad(b_fc, (0, PROB_PAD - PROB_OUT))
    W4 = wfcT.reshape(10, HP, WP, PROB_PAD)                         # [c, y, x, o]
    border = jnp.ones((HP, WP), jnp.float32).at[1:1 + H, 1:1 + W].set(0.0)
    wfc_int = jnp.transpose(W4[:, 1:1 + H, 1:1 + W, :], (1, 2, 0, 3)
                            ).reshape(10 * H * W, PROB_PAD)
    bfc_eff = bfc + jnp.einsum("c,yx,cyxo->o", bp, border, W4)

    # ---- value dense: Linear(100, 64) with the same border fold, then (64, 1).
    w_v1 = nrm((64, 100), 0.1)
    b_v1 = nrm((64,), 0.1)
    Wv3 = w_v1.T.reshape(HP, WP, 64)                                # [y, x, k]
    wv1_int = Wv3[1:1 + H, 1:1 + W, :].reshape(H * W, 64)
    bv1_eff = b_v1 + jnp.maximum(bv[0], 0.0) * jnp.einsum("yx,yxk->k", border, Wv3)
    w_v2 = nrm((1, 64), 0.125)
    b_v2 = nrm((1,), 0.125)

    head = dict(
        whead=whead.astype(jnp.bfloat16),
        bnhead=bnhead.astype(jnp.float32),
        wfc=wfc_int.astype(jnp.bfloat16),           # (640, 2048)
        bfc=bfc_eff.reshape(1, PROB_PAD).astype(jnp.float32),
        wv1=wv1_int.astype(jnp.bfloat16),           # (64, 64)
        bv1=bv1_eff.reshape(1, 64).astype(jnp.float32),
        wv2=w_v2.T.astype(jnp.bfloat16),            # (64, 1)
        bv2=b_v2.reshape(1, 1).astype(jnp.float32),
    )
    return dict(trunk=trunk, head=head)


# ----------------------------------------------------------------------------
# Full forward: 2 pallas_calls + tiny XLA glue (pad / reshape / slice).
# ----------------------------------------------------------------------------
@jax.jit
def chessnet_forward(x_nchw, params):
    n = x_nchw.shape[0]
    nb = _trunk_batch_tile(n)
    n_pad = -(-n // nb) * nb

    # NCHW -> zero-padded flat-spatial NHWC bf16, channels 13 -> 128, batch pad
    x = jnp.transpose(x_nchw, (0, 2, 3, 1)).astype(jnp.bfloat16)
    x = jnp.pad(x, ((0, n_pad - n), (1, 1), (1, 1), (0, HID - N_CH)))
    x = x.reshape(n_pad, SP_ROWS, HID)
    x = jnp.pad(x, ((0, 0), (0, PAD_ROWS - SP_ROWS), (0, 0)))   # (n_pad, 104, 128)

    # multiplicative mask zeroing the 2 junk output columns per spatial row
    mask = jnp.broadcast_to(
        jnp.tile((jnp.arange(WP) < W).astype(jnp.float32), H)[:, None],
        (ROWS, HID))

    h = trunk_forward(x, mask, nb, params["trunk"], params["head"])  # (n_pad,80,128)
    h = h.reshape(n_pad, H, WP, HID)[:, :, :W, :]                    # drop junk cols

    # (y, x, c)-ordered flatten; wfc rows were re-ordered to match at init.
    fp = h[..., :10].reshape(n_pad, 10 * H * W)
    fv = h[..., 10].reshape(n_pad, H * W)

    prob_pad, val = head_dense(fp, fv, params["head"])
    return prob_pad[:n, :PROB_OUT], val[:n]


if __name__ == "__main__":
    key = jax.random.PRNGKey(0)
    kx, kp = jax.random.split(key)
    x = jax.random.normal(kx, (2, N_CH, H, W), jnp.float32)   # NCHW, like PyTorch
    params = init_params(kp)

    prob, val = chessnet_forward(x, params)
    jax.block_until_ready((prob, val))

    assert prob.shape == (2, PROB_OUT) and val.shape == (2, 1)
    assert bool(jnp.all(jnp.isfinite(prob))) and bool(jnp.all(jnp.isfinite(val)))
    assert bool(jnp.allclose(jnp.sum(prob, axis=1), 1.0, atol=1e-4))
    assert bool(jnp.all(jnp.abs(val) <= 1.0))
    print("KERNEL_OK")
</pallas_src>

<mosaic_0001>
module attributes {stable_mosaic.version = 11 : i64} {
  func.func @_trunk_kernel(%arg0: i32, %arg1: i32, %arg2: memref<14xi32, #tpu.memory_space<smem>>, %arg3: memref<1x104x128xbf16, #tpu.memory_space<vmem>>, %arg4: memref<13x1152x128xbf16, #tpu.memory_space<vmem>>, %arg5: memref<13x1152x128xbf16, #tpu.memory_space<vmem>>, %arg6: memref<13x4x128xf32, #tpu.memory_space<vmem>>, %arg7: memref<128x128xbf16, #tpu.memory_space<vmem>>, %arg8: memref<2x128xf32, #tpu.memory_space<vmem>>, %arg9: memref<80x128xf32, #tpu.memory_space<vmem>>, %arg10: memref<1x80x128xbf16, #tpu.memory_space<vmem>>, %arg11: memref<1x104x128xbf16, #tpu.memory_space<vmem>>, %arg12: memref<1x104x128xbf16, #tpu.memory_space<vmem>>, %arg13: memref<1x80x1152xbf16, #tpu.memory_space<vmem>>) attributes {dimension_semantics = [#tpu.dimension_semantics<parallel>, #tpu.dimension_semantics<arbitrary>], iteration_bounds = array<i64: 2, 14>, scalar_prefetch = 1 : i64, scratch_operands = 3 : i64, tpu.core_type = #tpu.core_type<tc>, window_params = [{transform_indices = @transform_0, window_bounds = array<i64: 1, 104, 128>}, {pipeline_mode = #tpu.pipeline_mode<synchronous>, transform_indices = @transform_1, window_bounds = array<i64: 13, 1152, 128>}, {pipeline_mode = #tpu.pipeline_mode<synchronous>, transform_indices = @transform_2, window_bounds = array<i64: 13, 1152, 128>}, {pipeline_mode = #tpu.pipeline_mode<synchronous>, transform_indices = @transform_3, window_bounds = array<i64: 13, 4, 128>}, {pipeline_mode = #tpu.pipeline_mode<synchronous>, transform_indices = @transform_4, window_bounds = array<i64: 128, 128>}, {pipeline_mode = #tpu.pipeline_mode<synchronous>, transform_indices = @transform_5, window_bounds = array<i64: 2, 128>}, {pipeline_mode = #tpu.pipeline_mode<synchronous>, transform_indices = @transform_6, window_bounds = array<i64: 80, 128>}, {transform_indices = @transform_7, window_bounds = array<i64: 1, 80, 128>}]} {
    %c0_i32 = arith.constant 0 : i32
    %0 = arith.cmpi eq, %arg1, %c0_i32 : i32
    %1 = arith.extui %0 : i1 to i32
    %c0_i32_0 = arith.constant 0 : i32
    %2 = arith.cmpi ne, %1, %c0_i32_0 : i32
    scf.if %2 {
      %c0_115 = arith.constant 0 : index
      %c0_116 = arith.constant 0 : index
      %c0_117 = arith.constant 0 : index
      %91 = vector.load %arg3[%c0_115, %c0_116, %c0_117] : memref<1x104x128xbf16, #tpu.memory_space<vmem>>, vector<1x104x128xbf16>
      %c0_118 = arith.constant 0 : index
      %c0_119 = arith.constant 0 : index
      %c0_120 = arith.constant 0 : index
      %92 = vector.load %arg11[%c0_118, %c0_119, %c0_120] : memref<1x104x128xbf16, #tpu.memory_space<vmem>>, vector<1x104x128xbf16>
      tpu.vector_store %arg11[%c0_118, %c0_119, %c0_120], %91 {strides = array<i32>} : memref<1x104x128xbf16, #tpu.memory_space<vmem>>, vector<1x104x128xbf16>,
      %cst_121 = arith.constant 0.000000e+00 : bf16
      %93 = vector.broadcast %cst_121 : bf16 to vector<1x11x128xbf16>
      %c0_122 = arith.constant 0 : index
      %c0_123 = arith.constant 0 : index
      %c0_124 = arith.constant 0 : index
      %94 = vector.load %arg12[%c0_122, %c0_123, %c0_124] : memref<1x104x128xbf16, #tpu.memory_space<vmem>>, vector<1x11x128xbf16>
      tpu.vector_store %arg12[%c0_122, %c0_123, %c0_124], %93 {strides = array<i32>} : memref<1x104x128xbf16, #tpu.memory_space<vmem>>, vector<1x11x128xbf16>,
      %cst_125 = arith.constant 0.000000e+00 : bf16
      %95 = vector.broadcast %cst_125 : bf16 to vector<1x13x128xbf16>
      %c0_126 = arith.constant 0 : index
      %c91 = arith.constant 91 : index
      %c0_127 = arith.constant 0 : index
      %96 = vector.load %arg12[%c0_126, %c91, %c0_127] : memref<1x104x128xbf16, #tpu.memory_space<vmem>>, vector<1x13x128xbf16>
      tpu.vector_store %arg12[%c0_126, %c91, %c0_127], %95 {strides = array<i32>} : memref<1x104x128xbf16, #tpu.memory_space<vmem>>, vector<1x13x128xbf16>,
    } else {
    }
    %3 = arith.index_cast %arg1 : i32 to index
    %4 = memref.load %arg2[%3] : memref<14xi32, #tpu.memory_space<smem>>
    %5 = arith.index_cast %4 : i32 to index
    %c0 = arith.constant 0 : index
    %c0_1 = arith.constant 0 : index
    %6 = vector.load %arg4[%5, %c0, %c0_1] : memref<13x1152x128xbf16, #tpu.memory_space<vmem>>, vector<1x1152x128xbf16>
    %7 = vector.shape_cast %6 : vector<1x1152x128xbf16> to vector<1152x128xbf16>
    %8 = arith.index_cast %4 : i32 to index
    %c0_2 = arith.constant 0 : index
    %c0_3 = arith.constant 0 : index
    %9 = vector.load %arg5[%8, %c0_2, %c0_3] : memref<13x1152x128xbf16, #tpu.memory_space<vmem>>, vector<1x1152x128xbf16>
    %10 = vector.shape_cast %9 : vector<1x1152x128xbf16> to vector<1152x128xbf16>
    %11 = arith.index_cast %4 : i32 to index
    %c0_4 = arith.constant 0 : index
    %c0_5 = arith.constant 0 : index
    %12 = vector.load %arg6[%11, %c0_4, %c0_5] : memref<13x4x128xf32, #tpu.memory_space<vmem>>, vector<1x4x128xf32>
    %13 = vector.shape_cast %12 : vector<1x4x128xf32> to vector<4x128xf32>
    %c0_6 = arith.constant 0 : index
    %c0_7 = arith.constant 0 : index
    %14 = vector.load %arg9[%c0_6, %c0_7] : memref<80x128xf32, #tpu.memory_space<vmem>>, vector<80x128xf32>
    %c0_8 = arith.constant 0 : index
    %c0_9 = arith.constant 0 : index
    %c0_10 = arith.constant 0 : index
    %15 = vector.load %arg11[%c0_8, %c0_9, %c0_10] : memref<1x104x128xbf16, #tpu.memory_space<vmem>>, vector<1x80x128xbf16>
    %c0_11 = arith.constant 0 : index
    %c0_12 = arith.constant 0 : index
    %c0_13 = arith.constant 0 : index
    %16 = vector.load %arg13[%c0_11, %c0_12, %c0_13] : memref<1x80x1152xbf16, #tpu.memory_space<vmem>>, vector<1x80x128xbf16>
    tpu.vector_store %arg13[%c0_11, %c0_12, %c0_13], %15 {strides = array<i32>} : memref<1x80x1152xbf16, #tpu.memory_space<vmem>>, vector<1x80x128xbf16>,
    %c0_14 = arith.constant 0 : index
    %c1 = arith.constant 1 : index
    %c0_15 = arith.constant 0 : index
    %17 = vector.load %arg11[%c0_14, %c1, %c0_15] : memref<1x104x128xbf16, #tpu.memory_space<vmem>>, vector<1x80x128xbf16>
    %c0_16 = arith.constant 0 : index
    %c0_17 = arith.constant 0 : index
    %c128 = arith.constant 128 : index
    %18 = vector.load %arg13[%c0_16, %c0_17, %c128] : memref<1x80x1152xbf16, #tpu.memory_space<vmem>>, vector<1x80x128xbf16>
    tpu.vector_store %arg13[%c0_16, %c0_17, %c128], %17 {strides = array<i32>} : memref<1x80x1152xbf16, #tpu.memory_space<vmem>>, vector<1x80x128xbf16>,
    %c0_18 = arith.constant 0 : index
    %c2 = arith.constant 2 : index
    %c0_19 = arith.constant 0 : index
    %19 = vector.load %arg11[%c0_18, %c2, %c0_19] : memref<1x104x128xbf16, #tpu.memory_space<vmem>>, vector<1x80x128xbf16>
    %c0_20 = arith.constant 0 : index
    %c0_21 = arith.constant 0 : index
    %c256 = arith.constant 256 : index
    %20 = vector.load %arg13[%c0_20, %c0_21, %c256] : memref<1x80x1152xbf16, #tpu.memory_space<vmem>>, vector<1x80x128xbf16>
    tpu.vector_store %arg13[%c0_20, %c0_21, %c256], %19 {strides = array<i32>} : memref<1x80x1152xbf16, #tpu.memory_space<vmem>>, vector<1x80x128xbf16>,
    %c0_22 = arith.constant 0 : index
    %c10 = arith.constant 10 : index
    %c0_23 = arith.constant 0 : index
    %21 = vector.load %arg11[%c0_22, %c10, %c0_23] : memref<1x104x128xbf16, #tpu.memory_space<vmem>>, vector<1x80x128xbf16>
    %c0_24 = arith.constant 0 : index
    %c0_25 = arith.constant 0 : index
    %c384 = arith.constant 384 : index
    %22 = vector.load %arg13[%c0_24, %c0_25, %c384] : memref<1x80x1152xbf16, #tpu.memory_space<vmem>>, vector<1x80x128xbf16>
    tpu.vector_store %arg13[%c0_24, %c0_25, %c384], %21 {strides = array<i32>} : memref<1x80x1152xbf16, #tpu.memory_space<vmem>>, vector<1x80x128xbf16>,
    %c0_26 = arith.constant 0 : index
    %c11 = arith.constant 11 : index
    %c0_27 = arith.constant 0 : index
    %23 = vector.load %arg11[%c0_26, %c11, %c0_27] : memref<1x104x128xbf16, #tpu.memory_space<vmem>>, vector<1x80x128xbf16>
    %c0_28 = arith.constant 0 : index
    %c0_29 = arith.constant 0 : index
    %c512 = arith.constant 512 : index
    %24 = vector.load %arg13[%c0_28, %c0_29, %c512] : memref<1x80x1152xbf16, #tpu.memory_space<vmem>>, vector<1x80x128xbf16>
    tpu.vector_store %arg13[%c0_28, %c0_29, %c512], %23 {strides = array<i32>} : memref<1x80x1152xbf16, #tpu.memory_space<vmem>>, vector<1x80x128xbf16>,
    %c0_30 = arith.constant 0 : index
    %c12 = arith.constant 12 : index
    %c0_31 = arith.constant 0 : index
    %25 = vector.load %arg11[%c0_30, %c12, %c0_31] : memref<1x104x128xbf16, #tpu.memory_space<vmem>>, vector<1x80x128xbf16>
    %c0_32 = arith.constant 0 : index
    %c0_33 = arith.constant 0 : index
    %c640 = arith.constant 640 : index
    %26 = vector.load %arg13[%c0_32, %c0_33, %c640] : memref<1x80x1152xbf16, #tpu.memory_space<vmem>>, vector<1x80x128xbf16>
    tpu.vector_store %arg13[%c0_32, %c0_33, %c640], %25 {strides = array<i32>} : memref<1x80x1152xbf16, #tpu.memory_space<vmem>>, vector<1x80x128xbf16>,
    %c0_34 = arith.constant 0 : index
    %c20 = arith.constant 20 : index
    %c0_35 = arith.constant 0 : index
    %27 = vector.load %arg11[%c0_34, %c20, %c0_35] : memref<1x104x128xbf16, #tpu.memory_space<vmem>>, vector<1x80x128xbf16>
    %c0_36 = arith.constant 0 : index
    %c0_37 = arith.constant 0 : index
    %c768 = arith.constant 768 : index
    %28 = vector.load %arg13[%c0_36, %c0_37, %c768] : memref<1x80x1152xbf16, #tpu.memory_space<vmem>>, vector<1x80x128xbf16>
    tpu.vector_store %arg13[%c0_36, %c0_37, %c768], %27 {strides = array<i32>} : memref<1x80x1152xbf16, #tpu.memory_space<vmem>>, vector<1x80x128xbf16>,
    %c0_38 = arith.constant 0 : index
    %c21 = arith.constant 21 : index
    %c0_39 = arith.constant 0 : index
    %29 = vector.load %arg11[%c0_38, %c21, %c0_39] : memref<1x104x128xbf16, #tpu.memory_space<vmem>>, vector<1x80x128xbf16>
    %c0_40 = arith.constant 0 : index
    %c0_41 = arith.constant 0 : index
    %c896 = arith.constant 896 : index
    %30 = vector.load %arg13[%c0_40, %c0_41, %c896] : memref<1x80x1152xbf16, #tpu.memory_space<vmem>>, vector<1x80x128xbf16>
    tpu.vector_store %arg13[%c0_40, %c0_41, %c896], %29 {strides = array<i32>} : memref<1x80x1152xbf16, #tpu.memory_space<vmem>>, vector<1x80x128xbf16>,
    %c0_42 = arith.constant 0 : index
    %c22 = arith.constant 22 : index
    %c0_43 = arith.constant 0 : index
    %31 = vector.load %arg11[%c0_42, %c22, %c0_43] : memref<1x104x128xbf16, #tpu.memory_space<vmem>>, vector<1x80x128xbf16>
    %c0_44 = arith.constant 0 : index
    %c0_45 = arith.constant 0 : index
    %c1024 = arith.constant 1024 : index
    %32 = vector.load %arg13[%c0_44, %c0_45, %c1024] : memref<1x80x1152xbf16, #tpu.memory_space<vmem>>, vector<1x80x128xbf16>
    tpu.vector_store %arg13[%c0_44, %c0_45, %c1024], %31 {strides = array<i32>} : memref<1x80x1152xbf16, #tpu.memory_space<vmem>>, vector<1x80x128xbf16>,
    %c0_46 = arith.constant 0 : index
    %c0_47 = arith.constant 0 : index
    %c0_48 = arith.constant 0 : index
    %33 = vector.load %arg13[%c0_46, %c0_47, %c0_48] : memref<1x80x1152xbf16, #tpu.memory_space<vmem>>, vector<1x80x1152xbf16>
    %34 = vector.shape_cast %33 : vector<1x80x1152xbf16> to vector<80x1152xbf16>
    %cst = arith.constant dense<0.000000e+00> : vector<80x128xf32>
    %35 = tpu.matmul %34, %7, %cst {dimension_numbers = #tpu.dot_dimension_numbers<[1], [0], [0], [1], [0, 0, 1, 1], [], []>} : vector<80x1152xbf16>, vector<1152x128xbf16>, vector<80x128xf32> -> vector<80x128xf32>
    %36 = vector.shape_cast %35 : vector<80x128xf32> to vector<1x80x128xf32>
    %37 = vector.extract_strided_slice %13 {offsets = [0, 0], sizes = [1, 128], strides = [1, 1]} : vector<4x128xf32> to vector<1x128xf32>
    %38 = vector.shape_cast %37 : vector<1x128xf32> to vector<128xf32>
    %39 = vector.shape_cast %38 : vector<128xf32> to vector<1x1x128xf32>
    %40 = vector.broadcast %39 : vector<1x1x128xf32> to vector<1x80x128xf32>
    %41 = arith.mulf %36, %40 : vector<1x80x128xf32>
    %42 = vector.extract_strided_slice %13 {offsets = [1, 0], sizes = [1, 128], strides = [1, 1]} : vector<4x128xf32> to vector<1x128xf32>
    %43 = vector.shape_cast %42 : vector<1x128xf32> to vector<128xf32>
    %44 = vector.shape_cast %43 : vector<128xf32> to vector<1x1x128xf32>
    %45 = vector.broadcast %44 : vector<1x1x128xf32> to vector<1x80x128xf32>
    %46 = arith.addf %41, %45 : vector<1x80x128xf32>
    %cst_49 = arith.constant 0.000000e+00 : f32
    %47 = vector.broadcast %cst_49 : f32 to vector<1x80x128xf32>
    %48 = arith.maximumf %46, %47 : vector<1x80x128xf32>
    %49 = vector.shape_cast %14 : vector<80x128xf32> to vector<1x80x128xf32>
    %50 = arith.mulf %48, %49 : vector<1x80x128xf32>
    %51 = arith.truncf %50 : vector<1x80x128xf32> to vector<1x80x128xbf16>
    %c0_50 = arith.constant 0 : index
    %c11_51 = arith.constant 11 : index
    %c0_52 = arith.constant 0 : index
    %52 = vector.load %arg12[%c0_50, %c11_51, %c0_52] : memref<1x104x128xbf16, #tpu.memory_space<vmem>>, vector<1x80x128xbf16>
    tpu.vector_store %arg12[%c0_50, %c11_51, %c0_52], %51 {strides = array<i32>} : memref<1x104x128xbf16, #tpu.memory_space<vmem>>, vector<1x80x128xbf16>,
    %c0_53 = arith.constant 0 : index
    %c0_54 = arith.constant 0 : index
    %c0_55 = arith.constant 0 : index
    %53 = vector.load %arg12[%c0_53, %c0_54, %c0_55] : memref<1x104x128xbf16, #tpu.memory_space<vmem>>, vector<1x80x128xbf16>
    %c0_56 = arith.constant 0 : index
    %c0_57 = arith.constant 0 : index
    %c0_58 = arith.constant 0 : index
    %54 = vector.load %arg13[%c0_56, %c0_57, %c0_58] : memref<1x80x1152xbf16, #tpu.memory_space<vmem>>, vector<1x80x128xbf16>
    tpu.vector_store %arg13[%c0_56, %c0_57, %c0_58], %53 {strides = array<i32>} : memref<1x80x1152xbf16, #tpu.memory_space<vmem>>, vector<1x80x128xbf16>,
    %c0_59 = arith.constant 0 : index
    %c1_60 = arith.constant 1 : index
    %c0_61 = arith.constant 0 : index
    %55 = vector.load %arg12[%c0_59, %c1_60, %c0_61] : memref<1x104x128xbf16, #tpu.memory_space<vmem>>, vector<1x80x128xbf16>
    %c0_62 = arith.constant 0 : index
    %c0_63 = arith.constant 0 : index
    %c128_64 = arith.constant 128 : index
    %56 = vector.load %arg13[%c0_62, %c0_63, %c128_64] : memref<1x80x1152xbf16, #tpu.memory_space<vmem>>, vector<1x80x128xbf16>
    tpu.vector_store %arg13[%c0_62, %c0_63, %c128_64], %55 {strides = array<i32>} : memref<1x80x1152xbf16, #tpu.memory_space<vmem>>, vector<1x80x128xbf16>,
    %c0_65 = arith.constant 0 : index
    %c2_66 = arith.constant 2 : index
    %c0_67 = arith.constant 0 : index
    %57 = vector.load %arg12[%c0_65, %c2_66, %c0_67] : memref<1x104x128xbf16, #tpu.memory_space<vmem>>, vector<1x80x128xbf16>
    %c0_68 = arith.constant 0 : index
    %c0_69 = arith.constant 0 : index
    %c256_70 = arith.constant 256 : index
    %58 = vector.load %arg13[%c0_68, %c0_69, %c256_70] : memref<1x80x1152xbf16, #tpu.memory_space<vmem>>, vector<1x80x128xbf16>
    tpu.vector_store %arg13[%c0_68, %c0_69, %c256_70], %57 {strides = array<i32>} : memref<1x80x1152xbf16, #tpu.memory_space<vmem>>, vector<1x80x128xbf16>,
    %c0_71 = arith.constant 0 : index
    %c10_72 = arith.constant 10 : index
    %c0_73 = arith.constant 0 : index
    %59 = vector.load %arg12[%c0_71, %c10_72, %c0_73] : memref<1x104x128xbf16, #tpu.memory_space<vmem>>, vector<1x80x128xbf16>
    %c0_74 = arith.constant 0 : index
    %c0_75 = arith.constant 0 : index
    %c384_76 = arith.constant 384 : index
    %60 = vector.load %arg13[%c0_74, %c0_75, %c384_76] : memref<1x80x1152xbf16, #tpu.memory_space<vmem>>, vector<1x80x128xbf16>
    tpu.vector_store %arg13[%c0_74, %c0_75, %c384_76], %59 {strides = array<i32>} : memref<1x80x1152xbf16, #tpu.memory_space<vmem>>, vector<1x80x128xbf16>,
    %c0_77 = arith.constant 0 : index
    %c11_78 = arith.constant 11 : index
    %c0_79 = arith.constant 0 : index
    %61 = vector.load %arg12[%c0_77, %c11_78, %c0_79] : memref<1x104x128xbf16, #tpu.memory_space<vmem>>, vector<1x80x128xbf16>
    %c0_80 = arith.constant 0 : index
    %c0_81 = arith.constant 0 : index
    %c512_82 = arith.constant 512 : index
    %62 = vector.load %arg13[%c0_80, %c0_81, %c512_82] : memref<1x80x1152xbf16, #tpu.memory_space<vmem>>, vector<1x80x128xbf16>
    tpu.vector_store %arg13[%c0_80, %c0_81, %c512_82], %61 {strides = array<i32>} : memref<1x80x1152xbf16, #tpu.memory_space<vmem>>, vector<1x80x128xbf16>,
    %c0_83 = arith.constant 0 : index
    %c12_84 = arith.constant 12 : index
    %c0_85 = arith.constant 0 : index
    %63 = vector.load %arg12[%c0_83, %c12_84, %c0_85] : memref<1x104x128xbf16, #tpu.memory_space<vmem>>, vector<1x80x128xbf16>
    %c0_86 = arith.constant 0 : index
    %c0_87 = arith.constant 0 : index
    %c640_88 = arith.constant 640 : index
    %64 = vector.load %arg13[%c0_86, %c0_87, %c640_88] : memref<1x80x1152xbf16, #tpu.memory_space<vmem>>, vector<1x80x128xbf16>
    tpu.vector_store %arg13[%c0_86, %c0_87, %c640_88], %63 {strides = array<i32>} : memref<1x80x1152xbf16, #tpu.memory_space<vmem>>, vector<1x80x128xbf16>,
    %c0_89 = arith.constant 0 : index
    %c20_90 = arith.constant 20 : index
    %c0_91 = arith.constant 0 : index
    %65 = vector.load %arg12[%c0_89, %c20_90, %c0_91] : memref<1x104x128xbf16, #tpu.memory_space<vmem>>, vector<1x80x128xbf16>
    %c0_92 = arith.constant 0 : index
    %c0_93 = arith.constant 0 : index
    %c768_94 = arith.constant 768 : index
    %66 = vector.load %arg13[%c0_92, %c0_93, %c768_94] : memref<1x80x1152xbf16, #tpu.memory_space<vmem>>, vector<1x80x128xbf16>
    tpu.vector_store %arg13[%c0_92, %c0_93, %c768_94], %65 {strides = array<i32>} : memref<1x80x1152xbf16, #tpu.memory_space<vmem>>, vector<1x80x128xbf16>,
    %c0_95 = arith.constant 0 : index
    %c21_96 = arith.constant 21 : index
    %c0_97 = arith.constant 0 : index
    %67 = vector.load %arg12[%c0_95, %c21_96, %c0_97] : memref<1x104x128xbf16, #tpu.memory_space<vmem>>, vector<1x80x128xbf16>
    %c0_98 = arith.constant 0 : index
    %c0_99 = arith.constant 0 : index
    %c896_100 = arith.constant 896 : index
    %68 = vector.load %arg13[%c0_98, %c0_99, %c896_100] : memref<1x80x1152xbf16, #tpu.memory_space<vmem>>, vector<1x80x128xbf16>
    tpu.vector_store %arg13[%c0_98, %c0_99, %c896_100], %67 {strides = array<i32>} : memref<1x80x1152xbf16, #tpu.memory_space<vmem>>, vector<1x80x128xbf16>,
    %c0_101 = arith.constant 0 : index
    %c22_102 = arith.constant 22 : index
    %c0_103 = arith.constant 0 : index
    %69 = vector.load %arg12[%c0_101, %c22_102, %c0_103] : memref<1x104x128xbf16, #tpu.memory_space<vmem>>, vector<1x80x128xbf16>
    %c0_104 = arith.constant 0 : index
    %c0_105 = arith.constant 0 : index
    %c1024_106 = arith.constant 1024 : index
    %70 = vector.load %arg13[%c0_104, %c0_105, %c1024_106] : memref<1x80x1152xbf16, #tpu.memory_space<vmem>>, vector<1x80x128xbf16>
    tpu.vector_store %arg13[%c0_104, %c0_105, %c1024_106], %69 {strides = array<i32>} : memref<1x80x1152xbf16, #tpu.memory_space<vmem>>, vector<1x80x128xbf16>,
    %c0_107 = arith.constant 0 : index
    %c0_108 = arith.constant 0 : index
    %c0_109 = arith.constant 0 : index
    %71 = vector.load %arg13[%c0_107, %c0_108, %c0_109] : memref<1x80x1152xbf16, #tpu.memory_space<vmem>>, vector<1x80x1152xbf16>
    %72 = vector.shape_cast %71 : vector<1x80x1152xbf16> to vector<80x1152xbf16>
    %cst_110 = arith.constant dense<0.000000e+00> : vector<80x128xf32>
    %73 = tpu.matmul %72, %10, %cst_110 {dimension_numbers = #tpu.dot_dimension_numbers<[1], [0], [0], [1], [0, 0, 1, 1], [], []>} : vector<80x1152xbf16>, vector<1152x128xbf16>, vector<80x128xf32> -> vector<80x128xf32>
    %74 = vector.shape_cast %73 : vector<80x128xf32> to vector<1x80x128xf32>
    %75 = vector.extract_strided_slice %13 {offsets = [2, 0], sizes = [1, 128], strides = [1, 1]} : vector<4x128xf32> to vector<1x128xf32>
    %76 = vector.shape_cast %75 : vector<1x128xf32> to vector<128xf32>
    %77 = vector.shape_cast %76 : vector<128xf32> to vector<1x1x128xf32>
    %78 = vector.broadcast %77 : vector<1x1x128xf32> to vector<1x80x128xf32>
    %79 = arith.mulf %74, %78 : vector<1x80x128xf32>
    %80 = vector.extract_strided_slice %13 {offsets = [3, 0], sizes = [1, 128], strides = [1, 1]} : vector<4x128xf32> to vector<1x128xf32>
    %81 = vector.shape_cast %80 : vector<1x128xf32> to vector<128xf32>
    %82 = vector.shape_cast %81 : vector<128xf32> to vector<1x1x128xf32>
    %83 = vector.broadcast %82 : vector<1x1x128xf32> to vector<1x80x128xf32>
    %84 = arith.addf %79, %83 : vector<1x80x128xf32>
    %c0_i32_111 = arith.constant 0 : i32
    %85 = arith.cmpi eq, %arg1, %c0_i32_111 : i32
    %86 = arith.extui %85 : i1 to i32
    %c0_i32_112 = arith.constant 0 : i32
    %87 = arith.cmpi ne, %86, %c0_i32_112 : i32
    scf.if %87 {
      %cst_115 = arith.constant 0.000000e+00 : f32
      %91 = vector.broadcast %cst_115 : f32 to vector<1x80x128xf32>
      %92 = arith.maximumf %84, %91 : vector<1x80x128xf32>
      %93 = vector.shape_cast %14 : vector<80x128xf32> to vector<1x80x128xf32>
      %94 = arith.mulf %92, %93 : vector<1x80x128xf32>
      %95 = arith.truncf %94 : vector<1x80x128xf32> to vector<1x80x128xbf16>
      %c0_116 = arith.constant 0 : index
      %c11_117 = arith.constant 11 : index
      %c0_118 = arith.constant 0 : index
      %96 = vector.load %arg11[%c0_116, %c11_117, %c0_118] : memref<1x104x128xbf16, #tpu.memory_space<vmem>>, vector<1x80x128xbf16>
      tpu.vector_store %arg11[%c0_116, %c11_117, %c0_118], %95 {strides = array<i32>} : memref<1x104x128xbf16, #tpu.memory_space<vmem>>, vector<1x80x128xbf16>,
    } else {
    }
    %c0_i32_113 = arith.constant 0 : i32
    %88 = arith.cmpi sgt, %arg1, %c0_i32_113 : i32
    %89 = arith.extui %88 : i1 to i32
    %c0_i32_114 = arith.constant 0 : i32
    %90 = arith.cmpi ne, %89, %c0_i32_114 : i32
    scf.if %90 {
      %c0_115 = arith.constant 0 : index
      %c11_116 = arith.constant 11 : index
      %c0_117 = arith.constant 0 : index
      %91 = vector.load %arg11[%c0_115, %c11_116, %c0_117] : memref<1x104x128xbf16, #tpu.memory_space<vmem>>, vector<1x80x128xbf16>
      %92 = arith.extf %91 : vector<1x80x128xbf16> to vector<1x80x128xf32>
      %93 = arith.addf %84, %92 : vector<1x80x128xf32>
      %cst_118 = arith.constant 0.000000e+00 : f32
      %94 = vector.broadcast %cst_118 : f32 to vector<1x80x128xf32>
      %95 = arith.maximumf %93, %94 : vector<1x80x128xf32>
      %96 = vector.shape_cast %14 : vector<80x128xf32> to vector<1x80x128xf32>
      %97 = arith.mulf %95, %96 : vector<1x80x128xf32>
      %98 = arith.truncf %97 : vector<1x80x128xf32> to vector<1x80x128xbf16>
      %c0_119 = arith.constant 0 : index
      %c11_120 = arith.constant 11 : index
      %c0_121 = arith.constant 0 : index
      %99 = vector.load %arg11[%c0_119, %c11_120, %c0_121] : memref<1x104x128xbf16, #tpu.memory_space<vmem>>, vector<1x80x128xbf16>
      tpu.vector_store %arg11[%c0_119, %c11_120, %c0_121], %98 {strides = array<i32>} : memref<1x104x128xbf16, #tpu.memory_space<vmem>>, vector<1x80x128xbf16>,
      %c13_i32 = arith.constant 13 : i32
      %100 = arith.cmpi eq, %arg1, %c13_i32 : i32
      %101 = arith.extui %100 : i1 to i32
      %c0_i32_122 = arith.constant 0 : i32
      %102 = arith.cmpi ne, %101, %c0_i32_122 : i32
      scf.if %102 {
        %103 = vector.shape_cast %97 : vector<1x80x128xf32> to vector<80x128xf32>
        %104 = arith.truncf %103 : vector<80x128xf32> to vector<80x128xbf16>
        %c0_123 = arith.constant 0 : index
        %c0_124 = arith.constant 0 : index
        %105 = vector.load %arg7[%c0_123, %c0_124] : memref<128x128xbf16, #tpu.memory_space<vmem>>, vector<128x128xbf16>
        %cst_125 = arith.constant dense<0.000000e+00> : vector<80x128xf32>
        %106 = tpu.matmul %104, %105, %cst_125 {dimension_numbers = #tpu.dot_dimension_numbers<[1], [0], [0], [1], [0, 0, 1, 1], [], []>} : vector<80x128xbf16>, vector<128x128xbf16>, vector<80x128xf32> -> vector<80x128xf32>
        %c0_126 = arith.constant 0 : index
        %c0_127 = arith.constant 0 : index
        %107 = vector.load %arg8[%c0_126, %c0_127] : memref<2x128xf32, #tpu.memory_space<vmem>>, vector<2x128xf32>
        %108 = vector.extract_strided_slice %107 {offsets = [0, 0], sizes = [1, 128], strides = [1, 1]} : vector<2x128xf32> to vector<1x128xf32>
        %109 = vector.shape_cast %108 : vector<1x128xf32> to vector<128xf32>
        %110 = vector.shape_cast %109 : vector<128xf32> to vector<1x128xf32>
        %111 = vector.broadcast %110 : vector<1x128xf32> to vector<80x128xf32>
        %112 = arith.mulf %106, %111 : vector<80x128xf32>
        %113 = vector.extract_strided_slice %107 {offsets = [1, 0], sizes = [1, 128], strides = [1, 1]} : vector<2x128xf32> to vector<1x128xf32>
        %114 = vector.shape_cast %113 : vector<1x128xf32> to vector<128xf32>
        %115 = vector.shape_cast %114 : vector<128xf32> to vector<1x128xf32>
        %116 = vector.broadcast %115 : vector<1x128xf32> to vector<80x128xf32>
        %117 = arith.addf %112, %116 : vector<80x128xf32>
        %118 = tpu.iota {dimensions = array<i32: 1>} : vector<80x128xi32>
        %c10_i32 = arith.constant 10 : i32
        %119 = vector.broadcast %c10_i32 : i32 to vector<80x128xi32>
        %120 = arith.cmpi eq, %118, %119 : vector<80x128xi32>
        %cst_128 = arith.constant 0.000000e+00 : f32
        %121 = vector.broadcast %cst_128 : f32 to vector<80x128xf32>
        %122 = arith.maximumf %117, %121 : vector<80x128xf32>
        %123 = arith.select %120, %122, %117 : vector<80x128xi1>, vector<80x128xf32>
        %124 = vector.shape_cast %123 : vector<80x128xf32> to vector<1x80x128xf32>
        %125 = arith.truncf %124 : vector<1x80x128xf32> to vector<1x80x128xbf16>
        %c0_129 = arith.constant 0 : index
        %c0_130 = arith.constant 0 : index
        %c0_131 = arith.constant 0 : index
        %126 = vector.load %arg10[%c0_129, %c0_130, %c0_131] : memref<1x80x128xbf16, #tpu.memory_space<vmem>>, vector<1x80x128xbf16>
        tpu.vector_store %arg10[%c0_129, %c0_130, %c0_131], %125 {strides = array<i32>} : memref<1x80x128xbf16, #tpu.memory_space<vmem>>, vector<1x80x128xbf16>,
      } else {
      }
    } else {
    }
    return
  }
  func.func @transform_0(%arg0: i32, %arg1: i32, %arg2: memref<14xi32, #tpu.memory_space<smem>>) -> (i32, i32, i32) {
    %c0_i32 = arith.constant 0 : i32
    %c0_i32_0 = arith.constant 0 : i32
    %c0_i32_1 = arith.constant 0 : i32
    return %arg0, %c0_i32, %c0_i32_0 : i32, i32, i32
  }
  func.func @transform_1(%arg0: i32, %arg1: i32, %arg2: memref<14xi32, #tpu.memory_space<smem>>) -> (i32, i32, i32) {
    %c0_i32 = arith.constant 0 : i32
    %c0_i32_0 = arith.constant 0 : i32
    %c0_i32_1 = arith.constant 0 : i32
    %c0_i32_2 = arith.constant 0 : i32
    return %c0_i32, %c0_i32_0, %c0_i32_1 : i32, i32, i32
  }
  func.func @transform_2(%arg0: i32, %arg1: i32, %arg2: memref<14xi32, #tpu.memory_space<smem>>) -> (i32, i32, i32) {
    %c0_i32 = arith.constant 0 : i32
    %c0_i32_0 = arith.constant 0 : i32
    %c0_i32_1 = arith.constant 0 : i32
    %c0_i32_2 = arith.constant 0 : i32
    return %c0_i32, %c0_i32_0, %c0_i32_1 : i32, i32, i32
  }
  func.func @transform_3(%arg0: i32, %arg1: i32, %arg2: memref<14xi32, #tpu.memory_space<smem>>) -> (i32, i32, i32) {
    %c0_i32 = arith.constant 0 : i32
    %c0_i32_0 = arith.constant 0 : i32
    %c0_i32_1 = arith.constant 0 : i32
    %c0_i32_2 = arith.constant 0 : i32
    return %c0_i32, %c0_i32_0, %c0_i32_1 : i32, i32, i32
  }
  func.func @transform_4(%arg0: i32, %arg1: i32, %arg2: memref<14xi32, #tpu.memory_space<smem>>) -> (i32, i32) {
    %c0_i32 = arith.constant 0 : i32
    %c0_i32_0 = arith.constant 0 : i32
    %c0_i32_1 = arith.constant 0 : i32
    return %c0_i32, %c0_i32_0 : i32, i32
  }
  func.func @transform_5(%arg0: i32, %arg1: i32, %arg2: memref<14xi32, #tpu.memory_space<smem>>) -> (i32, i32) {
    %c0_i32 = arith.constant 0 : i32
    %c0_i32_0 = arith.constant 0 : i32
    %c0_i32_1 = arith.constant 0 : i32
    return %c0_i32, %c0_i32_0 : i32, i32
  }
  func.func @transform_6(%arg0: i32, %arg1: i32, %arg2: memref<14xi32, #tpu.memory_space<smem>>) -> (i32, i32) {
    %c0_i32 = arith.constant 0 : i32
    %c0_i32_0 = arith.constant 0 : i32
    %c0_i32_1 = arith.constant 0 : i32
    return %c0_i32, %c0_i32_0 : i32, i32
  }
  func.func @transform_7(%arg0: i32, %arg1: i32, %arg2: memref<14xi32, #tpu.memory_space<smem>>) -> (i32, i32, i32) {
    %c0_i32 = arith.constant 0 : i32
    %c0_i32_0 = arith.constant 0 : i32
    %c0_i32_1 = arith.constant 0 : i32
    return %arg0, %c0_i32, %c0_i32_0 : i32, i32, i32
  }
}

module attributes {stable_mosaic.version = 11 : i64} {
  func.func @_head_kernel(%arg0: i32, %arg1: memref<2x640xbf16, #tpu.memory_space<vmem>>, %arg2: memref<2x64xbf16, #tpu.memory_space<vmem>>, %arg3: memref<640x2048xbf16, #tpu.memory_space<vmem>>, %arg4: memref<1x2048xf32, #tpu.memory_space<vmem>>, %arg5: memref<64x64xbf16, #tpu.memory_space<vmem>>, %arg6: memref<1x64xf32, #tpu.memory_space<vmem>>, %arg7: memref<64x1xbf16, #tpu.memory_space<vmem>>, %arg8: memref<1x1xf32, #tpu.memory_space<vmem>>, %arg9: memref<2x2048xf32, #tpu.memory_space<vmem>>, %arg10: memref<2x1xf32, #tpu.memory_space<vmem>>) attributes {dimension_semantics = [#tpu.dimension_semantics<parallel>], iteration_bounds = array<i64: 1>, scalar_prefetch = 0 : i64, scratch_operands = 0 : i64, tpu.core_type = #tpu.core_type<tc>, window_params = [{transform_indices = @transform_0, window_bounds = array<i64: 2, 640>}, {transform_indices = @transform_1, window_bounds = array<i64: 2, 64>}, {pipeline_mode = #tpu.pipeline_mode<synchronous>, transform_indices = @transform_2, window_bounds = array<i64: 640, 2048>}, {pipeline_mode = #tpu.pipeline_mode<synchronous>, transform_indices = @transform_3, window_bounds = array<i64: 1, 2048>}, {pipeline_mode = #tpu.pipeline_mode<synchronous>, transform_indices = @transform_4, window_bounds = array<i64: 64, 64>}, {pipeline_mode = #tpu.pipeline_mode<synchronous>, transform_indices = @transform_5, window_bounds = array<i64: 1, 64>}, {pipeline_mode = #tpu.pipeline_mode<synchronous>, transform_indices = @transform_6, window_bounds = array<i64: 64, 1>}, {pipeline_mode = #tpu.pipeline_mode<synchronous>, transform_indices = @transform_7, window_bounds = array<i64: 1, 1>}, {transform_indices = @transform_8, window_bounds = array<i64: 2, 2048>}, {transform_indices = @transform_9, window_bounds = array<i64: 2, 1>}]} {
    %c0 = arith.constant 0 : index
    %c0_0 = arith.constant 0 : index
    %0 = vector.load %arg1[%c0, %c0_0] : memref<2x640xbf16, #tpu.memory_space<vmem>>, vector<2x640xbf16>
    %c0_1 = arith.constant 0 : index
    %c0_2 = arith.constant 0 : index
    %1 = vector.load %arg3[%c0_1, %c0_2] : memref<640x2048xbf16, #tpu.memory_space<vmem>>, vector<640x2048xbf16>
    %cst = arith.constant dense<0.000000e+00> : vector<2x2048xf32>
    %2 = tpu.matmul %0, %1, %cst {dimension_numbers = #tpu.dot_dimension_numbers<[1], [0], [0], [1], [0, 0, 1, 1], [], []>} : vector<2x640xbf16>, vector<640x2048xbf16>, vector<2x2048xf32> -> vector<2x2048xf32>
    %c0_3 = arith.constant 0 : index
    %c0_4 = arith.constant 0 : index
    %3 = vector.load %arg4[%c0_3, %c0_4] : memref<1x2048xf32, #tpu.memory_space<vmem>>, vector<1x2048xf32>
    %4 = vector.broadcast %3 : vector<1x2048xf32> to vector<2x2048xf32>
    %5 = arith.addf %2, %4 : vector<2x2048xf32>
    %cst_5 = arith.constant 0.000000e+00 : f32
    %6 = vector.broadcast %cst_5 : f32 to vector<2x2048xf32>
    %7 = arith.maximumf %5, %6 : vector<2x2048xf32>
    %8 = tpu.iota {dimensions = array<i32: 1>} : vector<2x2048xi32>
    %c1968_i32 = arith.constant 1968 : i32
    %9 = vector.broadcast %c1968_i32 : i32 to vector<2x2048xi32>
    %10 = arith.cmpi slt, %8, %9 : vector<2x2048xi32>
    %cst_6 = arith.constant -1.000000e+30 : f32
    %11 = vector.broadcast %cst_6 : f32 to vector<2x2048xf32>
    %12 = arith.select %10, %7, %11 : vector<2x2048xi1>, vector<2x2048xf32>
    %cst_7 = arith.constant dense<0xFF800000> : vector<2xf32>
    %13 = vector.multi_reduction <maximumf>, %12, %cst_7 [1] : vector<2x2048xf32> to vector<2xf32>
    %14 = vector.shape_cast %13 : vector<2xf32> to vector<2x1xf32>
    %15 = vector.broadcast %14 : vector<2x1xf32> to vector<2x2048xf32>
    %16 = arith.subf %12, %15 : vector<2x2048xf32>
    %17 = math.exp %16 : vector<2x2048xf32>
    %cst_8 = arith.constant dense<0.000000e+00> : vector<2xf32>
    %18 = vector.multi_reduction <add>, %17, %cst_8 [1] : vector<2x2048xf32> to vector<2xf32>
    %19 = vector.shape_cast %18 : vector<2xf32> to vector<2x1xf32>
    %20 = vector.broadcast %19 : vector<2x1xf32> to vector<2x2048xf32>
    %21 = arith.divf %17, %20 : vector<2x2048xf32>
    %c0_9 = arith.constant 0 : index
    %c0_10 = arith.constant 0 : index
    %22 = vector.load %arg9[%c0_9, %c0_10] : memref<2x2048xf32, #tpu.memory_space<vmem>>, vector<2x2048xf32>
    tpu.vector_store %arg9[%c0_9, %c0_10], %21 {strides = array<i32>} : memref<2x2048xf32, #tpu.memory_space<vmem>>, vector<2x2048xf32>,
    %c0_11 = arith.constant 0 : index
    %c0_12 = arith.constant 0 : index
    %23 = vector.load %arg2[%c0_11, %c0_12] : memref<2x64xbf16, #tpu.memory_space<vmem>>, vector<2x64xbf16>
    %c0_13 = arith.constant 0 : index
    %c0_14 = arith.constant 0 : index
    %24 = vector.load %arg5[%c0_13, %c0_14] : memref<64x64xbf16, #tpu.memory_space<vmem>>, vector<64x64xbf16>
    %cst_15 = arith.constant dense<0.000000e+00> : vector<2x64xf32>
    %25 = tpu.matmul %23, %24, %cst_15 {dimension_numbers = #tpu.dot_dimension_numbers<[1], [0], [0], [1], [0, 0, 1, 1], [], []>} : vector<2x64xbf16>, vector<64x64xbf16>, vector<2x64xf32> -> vector<2x64xf32>
    %c0_16 = arith.constant 0 : index
    %c0_17 = arith.constant 0 : index
    %26 = vector.load %arg6[%c0_16, %c0_17] : memref<1x64xf32, #tpu.memory_space<vmem>>, vector<1x64xf32>
    %27 = vector.broadcast %26 : vector<1x64xf32> to vector<2x64xf32>
    %28 = arith.addf %25, %27 : vector<2x64xf32>
    %cst_18 = arith.constant 0.000000e+00 : f32
    %29 = vector.broadcast %cst_18 : f32 to vector<2x64xf32>
    %30 = arith.maximumf %28, %29 : vector<2x64xf32>
    %31 = arith.truncf %30 : vector<2x64xf32> to vector<2x64xbf16>
    %c0_19 = arith.constant 0 : index
    %c0_20 = arith.constant 0 : index
    %32 = vector.load %arg7[%c0_19, %c0_20] : memref<64x1xbf16, #tpu.memory_space<vmem>>, vector<64x1xbf16>
    %cst_21 = arith.constant dense<0.000000e+00> : vector<2x1xf32>
    %33 = tpu.matmul %31, %32, %cst_21 {dimension_numbers = #tpu.dot_dimension_numbers<[1], [0], [0], [1], [0, 0, 1, 1], [], []>} : vector<2x64xbf16>, vector<64x1xbf16>, vector<2x1xf32> -> vector<2x1xf32>
    %c0_22 = arith.constant 0 : index
    %c0_23 = arith.constant 0 : index
    %34 = vector.load %arg8[%c0_22, %c0_23] : memref<1x1xf32, #tpu.memory_space<vmem>>, vector<1x1xf32>
    %35 = vector.broadcast %34 : vector<1x1xf32> to vector<2x1xf32>
    %36 = arith.addf %33, %35 : vector<2x1xf32>
    %37 = math.tanh %36 : vector<2x1xf32>
    %c0_24 = arith.constant 0 : index
    %c0_25 = arith.constant 0 : index
    %38 = vector.load %arg10[%c0_24, %c0_25] : memref<2x1xf32, #tpu.memory_space<vmem>>, vector<2x1xf32>
    tpu.vector_store %arg10[%c0_24, %c0_25], %37 {strides = array<i32>} : memref<2x1xf32, #tpu.memory_space<vmem>>, vector<2x1xf32>,
    return
  }
  func.func @transform_0(%arg0: i32) -> (i32, i32) {
    %c0_i32 = arith.constant 0 : i32
    %c0_i32_0 = arith.constant 0 : i32
    return %arg0, %c0_i32 : i32, i32
  }
  func.func @transform_1(%arg0: i32) -> (i32, i32) {
    %c0_i32 = arith.constant 0 : i32
    %c0_i32_0 = arith.constant 0 : i32
    return %arg0, %c0_i32 : i32, i32
  }
  func.func @transform_2(%arg0: i32) -> (i32, i32) {
    %c0_i32 = arith.constant 0 : i32
    %c0_i32_0 = arith.constant 0 : i32
    %c0_i32_1 = arith.constant 0 : i32
    return %c0_i32, %c0_i32_0 : i32, i32
  }
  func.func @transform_3(%arg0: i32) -> (i32, i32) {
    %c0_i32 = arith.constant 0 : i32
    %c0_i32_0 = arith.constant 0 : i32
    %c0_i32_1 = arith.constant 0 : i32
    return %c0_i32, %c0_i32_0 : i32, i32
  }
  func.func @transform_4(%arg0: i32) -> (i32, i32) {
    %c0_i32 = arith.constant 0 : i32
    %c0_i32_0 = arith.constant 0 : i32
    %c0_i32_1 = arith.constant 0 : i32
    return %c0_i32, %c0_i32_0 : i32, i32
  }
  func.func @transform_5(%arg0: i32) -> (i32, i32) {
    %c0_i32 = arith.constant 0 : i32
    %c0_i32_0 = arith.constant 0 : i32
    %c0_i32_1 = arith.constant 0 : i32
    return %c0_i32, %c0_i32_0 : i32, i32
  }
  func.func @transform_6(%arg0: i32) -> (i32, i32) {
    %c0_i32 = arith.constant 0 : i32
    %c0_i32_0 = arith.constant 0 : i32
    %c0_i32_1 = arith.constant 0 : i32
    return %c0_i32, %c0_i32_0 : i32, i32
  }
  func.func @transform_7(%arg0: i32) -> (i32, i32) {
    %c0_i32 = arith.constant 0 : i32
    %c0_i32_0 = arith.constant 0 : i32
    %c0_i32_1 = arith.constant 0 : i32
    return %c0_i32, %c0_i32_0 : i32, i32
  }
  func.func @transform_8(%arg0: i32) -> (i32, i32) {
    %c0_i32 = arith.constant 0 : i32
    %c0_i32_0 = arith.constant 0 : i32
    return %arg0, %c0_i32 : i32, i32
  }
  func.func @transform_9(%arg0: i32) -> (i32, i32) {
    %c0_i32 = arith.constant 0 : i32
    %c0_i32_0 = arith.constant 0 : i32
    return %arg0, %c0_i32 : i32, i32
  }
}

</mosaic_0001>

<bundles_post_ra>
// kernel: tile.8
= control target key start
LH: loop header
LB: loop body
LE: loop exit
PB: predicated region body
PF: predicated region fallthrough
CT: control target
= control target key end

     0   :  { %s22_s0 = inlined_call_operand.vmem [shape: f32[10], index: 0, kind: input, shape index: {}]   ;;  %s23_s1 = inlined_call_operand.vmem [shape: f32[8,10], index: 1, kind: output, shape index: {}]  }
   0x1   :  { %v4_v0 = vld [vmem:[%s22_s0] ss:$0 sm:$0xff] }
   0x2   :  { %5 = vst [vmem:[%s23_s1] sm:$0xff] %v4_v0 }

// kernel: squeeze.1
= control target key start
LH: loop header
LB: loop body
LE: loop exit
PB: predicated region body
PF: predicated region fallthrough
CT: control target
= control target key end

     0   :  { %s52_s8 = smov 3  ;;  %s45_s9 = smov 3  ;;  %vm35_vm0 = vcmask 64512   ;;  %vm42_vm1 = vcmask 523712   ;;  %vm49_vm2 = vcmask 458112   ;;  %vm56_vm3 = vcmask 392512   ;;  %s131_s0 = inlined_call_operand.vmem [shape: bf16[2,8,8,1], index: 0, kind: input, shape index: {}]   ;;  %s132_s1 = inlined_call_operand.vmem [shape: bf16[2,64], index: 1, kind: output, shape index: {}]  }
   0x1   :  { %v96_v0 = vld [vmem:[%s131_s0] sm:$0xff]   ;;  %s38_s0 = smov 3  ;;  %s59_s10 = smov 3  ;;  %vm63_vm4 = vcmask 326912   ;;  %vm70_vm5 = vcmask 261312   ;;  %vm77_vm6 = vcmask 195712  }
   0x2   :  { %v97_v1 = vunpack.c.l.bf16 %v96_v0  ;;  %v98_v2 = vunpack.c.h.bf16 %v96_v0  ;;  %s33_s11 = smov 3  ;;  %s107_s12 = smov 56   ;;  %vm84_vm7 = vcmask 130112   ;;  %v114_v19 = vmov 0.0  }
   0x3   :  { %s108_s13 = smov 40   ;;  %s66_s14 = smov 3 }
   0x4   :  { %19 = vst [vmem:[#allocation1 + $0x8] sm:$0xff] %v98_v2  ;;  %32 = vst [vmem:[#allocation1] sm:$0xff] %v97_v1  ;;  %s73_s15 = smov 3  ;;  %s109_s16 = smov 48  }
   0x5   :  { %s110_s17 = smov 32   ;;  %s80_s18 = smov 3 }
   0x6   :  { %s111_s19 = smov 24   ;;  %s112_s20 = smov 16  }
   0x7   :  { %s113_s21 = smov 8  }
   0xb   :  { %v39_v3 = vld [vmem:[#allocation1 + $0x7] ss:$8 sm:%s38_s0]   ;;  %v53_v4 = vld [vmem:[#allocation1 + $0x5] ss:$8 sm:%s52_s8]   ;;  %v46_v5 = vld [vmem:[#allocation1 + $0x6] ss:$8 sm:%s45_s9]  }
   0xc   :  { %40 = vrot.lane.b32.xlu0 %v39_v3, %s107_s12  ;;  %54 = vrot.lane.b32.xlu1 %v53_v4, %s108_s13  ;;  %v60_v6 = vld [vmem:[#allocation1 + $0x4] ss:$8 sm:%s59_s10]   ;;  %v34_v7 = vld [vmem:[#allocation1] ss:$8 sm:%s33_s11]  }
   0xd   :  { %36 = vst.msk [vmem:[#allocation0] sm:$0x3] %vm35_vm0, %v34_v7   ;;  %v67_v8 = vld [vmem:[#allocation1 + $0x3] ss:$8 sm:%s66_s14]   ;;  %v74_v9 = vld [vmem:[#allocation1 + $0x2] ss:$8 sm:%s73_s15]  }
   0xe   :  { %v81_v10 = vld [vmem:[#allocation1 + $0x1] ss:$8 sm:%s80_s18]  }
  0x10   :  { %47 = vrot.lane.b32.xlu0 %v46_v5, %s109_s16  ;;  %61 = vrot.lane.b32.xlu1 %v60_v6, %s110_s17 }
  0x14   :  { %68 = vrot.lane.b32.xlu0 %v67_v8, %s111_s19  ;;  %75 = vrot.lane.b32.xlu1 %v74_v9, %s112_s20 }
  0x18   :  { %82 = vrot.lane.b32.xlu0 %v81_v10, %s113_s21 }
  0x7e   :  { %v41_v11 = vpop.permute.xlu0 %40   ;;  %v55_v12 = vpop.permute.xlu1 %54  }
  0x7f   :  { %43 = vst.msk [vmem:[#allocation0] sm:$0x3] %vm42_vm1, %v41_v11  }
  0x82   :  { %v48_v13 = vpop.permute.xlu0 %47   ;;  %v62_v14 = vpop.permute.xlu1 %61  }
  0x83   :  { %50 = vst.msk [vmem:[#allocation0] sm:$0x3] %vm49_vm2, %v48_v13  }
  0x84   :  { %57 = vst.msk [vmem:[#allocation0] sm:$0x3] %vm56_vm3, %v55_v12  }
  0x85   :  { %64 = vst.msk [vmem:[#allocation0] sm:$0x3] %vm63_vm4, %v62_v14  }
  0x86   :  { %v69_v15 = vpop.permute.xlu0 %68   ;;  %v76_v16 = vpop.permute.xlu1 %75  }
  0x87   :  { %71 = vst.msk [vmem:[#allocation0] sm:$0x3] %vm70_vm5, %v69_v15  }
  0x88   :  { %78 = vst.msk [vmem:[#allocation0] sm:$0x3] %vm77_vm6, %v76_v16  }
  0x8a   :  { %v83_v17 = vpop.permute.xlu0 %82  }
  0x8b   :  { %85 = vst.msk [vmem:[#allocation0] sm:$0x3] %vm84_vm7, %v83_v17  }
  0x92   :  { %v90_v18 = vld [vmem:[#allocation0] sm:$0x3] }
  0x93   :  { %v91_v20 = vpack.c.bf16 %v114_v19, %v90_v18 }
  0x95   :  { %93 = vst [vmem:[%s132_s1] sm:$0x1] %v91_v20 }

// kernel: chessnet_forward.2
= control target key start
LH: loop header
LB: loop body
LE: loop exit
PB: predicated region body
PF: predicated region fallthrough
CT: control target
= control target key end

     0   :  { %s7375_s0 = inlined_call_operand.hbm [shape: s32[14], index: 0, kind: input, shape index: {}]   ;;  %s7376_s1 = inlined_call_operand.vmem [shape: bf16[2,104,128], index: 1, kind: input, shape index: {}]   ;;  %s7377_s2 = inlined_call_operand.hbm [shape: bf16[13,1152,128], index: 2, kind: input, shape index: {}]   ;;  %s7378_s3 = inlined_call_operand.hbm [shape: bf16[13,1152,128], index: 3, kind: input, shape index: {}]   ;;  %s7379_s4 = inlined_call_operand.hbm [shape: f32[13,4,128], index: 4, kind: input, shape index: {}]   ;;  %s7380_s5 = inlined_call_operand.hbm [shape: bf16[128,128], index: 5, kind: input, shape index: {}]   ;;  %s7381_s6 = inlined_call_operand.hbm [shape: f32[2,128], index: 6, kind: input, shape index: {}]   ;;  %s7382_s7 = inlined_call_operand.vmem [shape: f32[80,128], index: 7, kind: input, shape index: {}]   ;;  %s7383_s8 = inlined_call_operand.vmem [shape: bf16[2,80,128], index: 8, kind: output, shape index: {}]  }
   0x1   :  { %7389 = sst [smem:[#allocation19_spill]] %s7377_s2  ;;  %s6035_s29 = scalar_lea.hbm %s7375_s0, 16 }
   0x2   :  { %7390 = sst [smem:[#allocation20_spill]] %s7378_s3  ;;  %p6036_p0 = scmp.ne.s32.totalorder %s7375_s0, %s6035_s29 }
   0x3   :  { %p6039_p1 = scmp.lt.u32.totalorder %s6035_s29, %s7375_s0 }
   0x5   :  { %p6041_p2 = pnand %p6039_p1, %p6036_p0 }
   0x7   :  { %6044 = shalt.err (!%p6041_p2)  }
   0x8   :  { %s6239_s12 = smov [#allocation6]  }
   0x9   :  { %14 = dma.hbm_to_smem %s7375_s0, 16, %s6239_s12, [#allocation5] }
   0xa   :  { %6205 = dma.done.wait [#allocation5], 16 }
   0xb   :  { %6206 = vsyncadd [#allocation5], 4294967280 }
   0xc   :  { %16 = sfence }
   0xd   :  { %17 = vsyncpa [#allocation8], 0 }
   0xe   :  { %18 = vsyncpa [#allocation10], 0 }
   0xf   :  { %19 = vsyncpa [#allocation13], 0  ;;  %s6309_s15 = smov 0   ;;  %s6311_s16 = smov 0  }
  0x10   :  { %s6313_s17 = smov 0   ;;  %s6315_s18 = smov 0  }
  0x11   :  { %s6317_s19 = smov 0  }
  0x12 LB: > { %s4729_s0 = sadd.s32 4294967295, %s6237_s19   ;;  %p4731_p3 = scmp.ge.s32.totalorder %s6237_s19, 1  ;;  %s6237_s19 = sphi %s6317_s19, %s25_s19   ;;  %s6233_s18 = sphi %s6315_s18, %s7410_s18   ;;  %s6229_s17 = sphi %s6313_s17, %s7409_s17   ;;  %s6225_s16 = sphi %s6311_s16, %s7408_s16   ;;  %s6221_s15 = sphi %s6309_s15, %s7407_s15  }
  0x13   : > { %p220_p4 = scmp.lt.s32.totalorder %s6237_s19, 29  ;;  %p6337_p5 = scmp.eq.s32.totalorder %s4729_s0, 0 }
  0x14   : > { %s6240_s22 = smov [#allocation9]   ;;  %s6241_s24 = smov [#allocation12]  }
  0x15   : > { %s7391_s20 = scalar_select %p6337_p5, 1, 0 }
  0x16   : > { %p6341_p6 = pnand %p4731_p3, %p220_p4  ;;  %s245_s23 = sshll.u32 %s6240_s22, 4  ;;  %s246_s23 = int_to_ptr.vmem [resolvable:$true] %s245_s23 }
  0x17   : > { %s271_s25 = sshll.u32 %s6241_s24, 4  ;;  %s7394_s3 = sld [smem:[#allocation20_spill]]  ;;  %s6347_s25 = int_to_ptr.vmem [resolvable:$true] %s271_s25 }
  0x18   : > { %s7392_s21 = scalar_select %p6341_p6, 1, 0 }
  0x19   : > { %p5697_p7 = pneg %p6341_p6 }
  0x1b   : > { %p6351_p8 = pnand %p6337_p5, %p5697_p7 }
  0x1d   : > { %s6045_s29 = scalar_lea.hbm %s7394_s3, 119808  ;;  %p6363_p10 = pneg %p6351_p8 }
  0x1e   : > { %p6046_p9 = scmp.ne.s32.totalorder %s7394_s3, %s6045_s29  ;;  %p6052_p13 = scmp.lt.u32.totalorder %s6045_s29, %s7394_s3 }
  0x20   : > { %p6048_p11 = pnand %p6363_p10, %p6046_p9 }
  0x22   : > { %p6049_p12 = pneg %p6048_p11 }
  0x24   : > { %p6054_p0 = pnand %p6052_p13, %p6049_p12 }
  0x26   : > { %6057 = shalt.err (!%p6054_p0)
}
  0x27   : > { %s6058_s13 = scalar_lea.vmem %s246_s23, 119808  ;;  %p6066_p4 = scmp.lt.s32.totalorder %s246_s23, %s246_s23 }
  0x28   : > { %p6059_p1 = scmp.ne.s32.totalorder %s246_s23, %s6058_s13  ;;  %p6067_p7 = scmp.lt.s32.totalorder %s6058_s13, %s6058_s13 }
  0x2a   : > { %p6061_p2 = pnand %p6059_p1, %p6363_p10  ;;  %p6068_p5 = por %p6067_p7, %p6066_p4 }
  0x2c   : > { %p6062_p3 = pneg %p6061_p2 }
  0x2e   : > { %p6069_p6 = pnand %p6068_p5, %p6062_p3 }
  0x30   : > { %6072 = shalt.err (!%p6069_p6)
}
  0x31   : > { %s7387_s14 = smov 64   ;;  %s6243_s0 = smov 4  }
  0x32   : > { %5703 = dma.hbm_to_vmem [thread:$0]  (!%p6351_p8), %s7394_s3, 119808, %s246_s23, [#allocation10], %s7387_s14, %s7387_s14, %s6243_s0  }
  0x33   : > { %s6073_s29 = scalar_lea.hbm %s7380_s5, 1024 }
  0x34   : > { %p6074_p5 = scmp.ne.s32.totalorder %s7380_s5, %s6073_s29  ;;  %p6080_p11 = scmp.lt.u32.totalorder %s6073_s29, %s7380_s5 }
  0x36   : > { %p6076_p6 = pnand %p6074_p5, %p6363_p10 }
  0x38   : > { %p6077_p9 = pneg %p6076_p6 }
  0x3a   : > { %p6082_p12 = pnand %p6080_p11, %p6077_p9 }
  0x3c   : > { %6085 = shalt.err (!%p6082_p12)
}
  0x3d   : > { %s6086_s23 = scalar_lea.vmem %s6347_s25, 1024  ;;  %p6094_p2 = scmp.lt.s32.totalorder %s6347_s25, %s6347_s25 }
  0x3e   : > { %p6087_p13 = scmp.ne.s32.totalorder %s6347_s25, %s6086_s23  ;;  %p6095_p3 = scmp.lt.s32.totalorder %s6086_s23, %s6086_s23 }
  0x40   : > { %p6089_p0 = pnand %p6087_p13, %p6363_p10  ;;  %p6096_p4 = por %p6095_p3, %p6094_p2 }
  0x42   : > { %p6090_p1 = pneg %p6089_p0 }
  0x44   : > { %p6097_p7 = pnand %p6096_p4, %p6090_p1 }
  0x46   : > { %6100 = shalt.err (!%p6097_p7)
}
  0x47   : > { %5709 = dma.hbm_to_vmem [thread:$0]  (!%p6351_p8), %s7380_s5, 1024, %s6347_s25, [#allocation13], %s7387_s14, %s7387_s14, %s6243_s0  }
  0x48   : > { %s34_s24 = sadd.s32 1, %s6229_s17  ;;  %s37_s27 = sadd.s32 1, %s6233_s18 }
  0x49   : > { %p35_p5 = scmp.ge.s32.totalorder %s34_s24, 14  ;;  %s6244_s28 = smov [#allocation7]  }
  0x4a   : > { %s232_s29 = sshll.u32 %s6244_s28, 4  ;;  %s6245_s30 = smov [#allocation11]   ;;  %s233_s29 = int_to_ptr.vmem [resolvable:$true] %s232_s29 }
  0x4b   : > { %s7412_s24 = smov (%p35_p5, %s34_s24), 0  ;;  %s7414_s27 = smov (!%p35_p5, %s37_s27), %s6233_s18 }
  0x4c   : > { %s258_s9 = sshll.u32 %s6245_s30, 4  ;;  %s7396_s2 = sld [smem:[#allocation19_spill]]  ;;  %s259_s9 = int_to_ptr.vmem [resolvable:$true] %s258_s9 }
  0x52   : > { %s6101_s23 = scalar_lea.hbm %s7396_s2, 119808 }
  0x53   : > { %p6102_p9 = scmp.ne.s32.totalorder %s7396_s2, %s6101_s23  ;;  %p6108_p13 = scmp.lt.u32.totalorder %s6101_s23, %s7396_s2 }
  0x55   : > { %p6104_p11 = pnand %p6102_p9, %p6363_p10 }
  0x57   : > { %p6105_p12 = pneg %p6104_p11 }
  0x59   : > { %p6110_p0 = pnand %p6108_p13, %p6105_p12 }
  0x5b   : > { %6113 = shalt.err (!%p6110_p0)
}
  0x5c   : > { %s6114_s28 = scalar_lea.vmem %s233_s29, 119808  ;;  %p6122_p4 = scmp.lt.s32.totalorder %s233_s29, %s233_s29 }
  0x5d   : > { %p6115_p1 = scmp.ne.s32.totalorder %s233_s29, %s6114_s28  ;;  %p6123_p7 = scmp.lt.s32.totalorder %s6114_s28, %s6114_s28 }
  0x5f   : > { %p6117_p2 = pnand %p6115_p1, %p6363_p10  ;;  %p6124_p5 = por %p6123_p7, %p6122_p4 }
  0x61   : > { %p6118_p3 = pneg %p6117_p2 }
  0x63   : > { %p6125_p6 = pnand %p6124_p5, %p6118_p3 }
  0x65   : > { %6128 = shalt.err (!%p6125_p6)
}
  0x66   : > { %s7397_s30 = smov 64   ;;  %p7398_p9 = scmp.ge.s32.totalorder %s7414_s27, 2 }
  0x67   : > { %5700 = dma.hbm_to_vmem [thread:$0]  (!%p6351_p8), %s7396_s2, 119808, %s233_s29, [#allocation8], %s7397_s30, %s7397_s30, %s6243_s0  }
  0x68   : > { %s7416_s27 = smov (%p7398_p9, %s7414_s27), 0  ;;  %s6129_s13 = scalar_lea.hbm %s7379_s4, 832 }
  0x69   : > { %p6130_p6 = scmp.ne.s32.totalorder %s7379_s4, %s6129_s13  ;;  %p6136_p13 = scmp.lt.u32.totalorder %s6129_s13, %s7379_s4 }
  0x6b   : > { %p6132_p11 = pnand %p6130_p6, %p6363_p10 }
  0x6d   : > { %p6133_p12 = pneg %p6132_p11 }
  0x6f   : > { %p6138_p0 = pnand %p6136_p13, %p6133_p12 }
  0x71   : > { %6141 = shalt.err (!%p6138_p0)
}
  0x72   : > { %s6142_s29 = scalar_lea.vmem %s259_s9, 832  ;;  %p6150_p4 = scmp.lt.s32.totalorder %s259_s9, %s259_s9 }
  0x73   : > { %p6143_p1 = scmp.ne.s32.totalorder %s259_s9, %s6142_s29  ;;  %p6151_p7 = scmp.lt.s32.totalorder %s6142_s29, %s6142_s29 }
  0x75   : > { %p6145_p2 = pnand %p6143_p1, %p6363_p10  ;;  %p6152_p5 = por %p6151_p7, %p6150_p4 }
  0x77   : > { %p6146_p3 = pneg %p6145_p2 }
  0x79   : > { %p6153_p9 = pnand %p6152_p5, %p6146_p3 }
  0x7b   : > { %6156 = shalt.err (!%p6153_p9)
}
  0x7c   : > { %5706 = dma.hbm_to_vmem [thread:$0]  (!%p6351_p8), %s7379_s4, 832, %s259_s9, [#allocation10], %s7397_s30, %s7397_s30, %s6243_s0  }
  0x7d   : > { %s6246_s11 = smov [#allocation14]   ;;  %s6157_s22 = scalar_lea.hbm %s7381_s6, 32 }
  0x7e   : > { %s285_s12 = sshll.u32 %s6246_s11, 4  ;;  %p6158_p6 = scmp.ne.s32.totalorder %s7381_s6, %s6157_s22  ;;  %s286_s12 = int_to_ptr.vmem [resolvable:$true] %s285_s12 }
  0x7f   : > { %p6164_p13 = scmp.lt.u32.totalorder %s6157_s22, %s7381_s6 }
  0x80   : > { %p6160_p11 = pnand %p6158_p6, %p6363_p10 }
  0x82   : > { %p6161_p12 = pneg %p6160_p11 }
  0x84   : > { %p6166_p0 = pnand %p6164_p13, %p6161_p12 }
  0x86   : > { %6169 = shalt.err (!%p6166_p0)
}
  0x87   : > { %s6170_s0 = scalar_lea.vmem %s286_s12, 32  ;;  %p6178_p4 = scmp.lt.s32.totalorder %s286_s12, %s286_s12 }
  0x88   : > { %p6171_p1 = scmp.ne.s32.totalorder %s286_s12, %s6170_s0  ;;  %p6179_p7 = scmp.lt.s32.totalorder %s6170_s0, %s6170_s0 }
  0x8a   : > { %p6173_p2 = pnand %p6171_p1, %p6363_p10  ;;  %p6180_p5 = por %p6179_p7, %p6178_p4 }
  0x8c   : > { %p6174_p3 = pneg %p6173_p2 }
  0x8e   : > { %p6181_p9 = pnand %p6180_p5, %p6174_p3 }
  0x90   : > { %6184 = shalt.err (!%p6181_p9)
}
  0x91   : > { %5712 = dma.hbm_to_vmem [thread:$0]  (!%p6351_p8), %s7381_s6, 32, %s286_s12, [#allocation13]  }
  0x92   : > { %p7399_p6 = scmp.ne.s32.totalorder %s7392_s21, 0 }
  0x93   : > { %p7400_p11 = scmp.ne.s32.totalorder (!%p7399_p6), %s7391_s20, 0 }
  0x94   : > { %309 = sbr.rel (%p7399_p6) target bundleno = 1211 (0x4bb), region = 48 }
  0x9b   : > { %6208 = dma.done.wait (%p7400_p11), [#allocation8], 119808  }
  0x9c   : > { %6210 = vsyncadd (%p7400_p11), [#allocation8], 4294847488 }
  0x9d   : > { %6212 = dma.done.wait (%p7400_p11), [#allocation10], 120640  }
  0x9e   : > { %6214 = vsyncadd (%p7400_p11), [#allocation10], 4294846656 }
  0x9f   : > { %6216 = dma.done.wait (%p7400_p11), [#allocation13], 1056  }
  0xa0   : > { %6218 = vsyncadd (%p7400_p11), [#allocation13], 4294966240  ;;  %p357_p8 = scmp.lt.s32.totalorder %s6225_s16, 1  ;;  %p4746_p10 = scmp.ne.s32.totalorder %s6221_s15, 0 }
  0xa1   : > { %vm399_vm0 = vcmask (!%p4746_p10), 1041408   ;;  %vm405_vm1 = vcmask (!%p4746_p10), 1043457   ;;  %v6247_v6 = vmov (!%p4746_p10), 0   ;;  %vm400_vm2 = vsmask.f32 (!%p4746_p10), 1280 }
  0xa2   : > { %s7418_s16 = smov (!%p357_p8, %s6225_s16), 1  ;;  %371 = sbr.rel (%p4746_p10) target bundleno = 171 (0xab), region = 72 }
  0xa3   : > { %s5675_s2 = smul.u32 52, %s7418_s16  ;;  %398 = vst [vmem:[#allocation3] sm:$0xf] (!%p4746_p10), %v6247_v6  ;;  %411 = vst [vmem:[#allocation3 + $0x30] sm:$0xf] (!%p4746_p10), %v6247_v6 }
  0xa4   : > { %s5676_s21 = smul.u32 40, %s7418_s16  ;;  %vm401_vm3 = vmand (!%p4746_p10), %vm399_vm0, %vm400_vm2  ;;  %v402_v8 = vld [vmem:[#allocation3 + $0x4] sm:$0x3] (!%p4746_p10)  ;;  %vm406_vm4 = vsmask.f32 (!%p4746_p10), 7942 }
  0xa5   : > { %s361_s3 = scalar_lea.vmem %s7376_s1, %s5675_s2  ;;  %v403_v9 = vsel (!%p4746_p10), %vm401_vm3, 0, %v402_v8  ;;  %vm407_vm5 = vmand (!%p4746_p10), %vm405_vm1, %vm406_vm4  ;;  %v408_v10 = vld [vmem:[#allocation3 + $0x2c] sm:$0xe] (!%p4746_p10) }
  0xa6   : > { %s6498_s12 = scalar_lea.vmem %s7383_s8, %s5676_s21  ;;  %v372_v0 = vld [vmem:[%s361_s3] sm:$0xff] (!%p4746_p10)   ;;  %v374_v1 = vld [vmem:[%s361_s3 + $0x8] sm:$0xff] (!%p4746_p10)   ;;  %v376_v2 = vld [vmem:[%s361_s3 + $0x10] sm:$0xff] (!%p4746_p10)   ;;  %404 = vst [vmem:[#allocation3 + $0x4] sm:$0x3] (!%p4746_p10), %v403_v9  ;;  %v409_v11 = vsel (!%p4746_p10), %vm407_vm5, 0, %v408_v10 }
  0xa7   : > { %385 = vst [vmem:[#allocation2] sm:$0xff] (!%p4746_p10), %v372_v0   ;;  %387 = vst [vmem:[#allocation2 + $0x8] sm:$0xff] (!%p4746_p10), %v374_v1   ;;  %v378_v3 = vld [vmem:[%s361_s3 + $0x18] sm:$0xff] (!%p4746_p10)   ;;  %v380_v4 = vld [vmem:[%s361_s3 + $0x20] sm:$0xff] (!%p4746_p10)  }
  0xa8   : > { %389 = vst [vmem:[#allocation2 + $0x10] sm:$0xff] (!%p4746_p10), %v376_v2   ;;  %v382_v5 = vld [vmem:[%s361_s3 + $0x28] sm:$0xff] (!%p4746_p10)   ;;  %391 = vst [vmem:[#allocation2 + $0x18] sm:$0xff] (!%p4746_p10), %v378_v3   ;;  %v384_v7 = vld [vmem:[%s361_s3 + $0x30] sm:$0xf] (!%p4746_p10) }
  0xa9   : > { %393 = vst [vmem:[#allocation2 + $0x20] sm:$0xff] %v380_v4   ;;  %395 = vst [vmem:[#allocation2 + $0x28] sm:$0xff] %v382_v5  }
  0xaa   : > { %397 = vst [vmem:[#allocation2 + $0x30] sm:$0xf] %v384_v7  ;;  %410 = vst [vmem:[#allocation3 + $0x2c] sm:$0xe] %v409_v11 }
  0xab PF: > { %s6506_s16 = sld [smem:[#allocation6 + %s6221_s15]]  ;;  %vm803_vm6 = vsmask.f32 7424  ;;  %vm897_vm7 = vcmask 1046528   ;;  %vm1121_vm8 = vcmask 1045504   ;;  %vm6249_vm11 = vmmov 0  }
  0xac   : > { %vm1018_vm9 = vsmask.f32 6400  ;;  %vm1242_vm10 = vsmask.f32 5376  ;;  %vm1345_vm12 = vcmask 1044480   ;;  %vm2400_vm13 = vcmask 1043457  }
  0xad   : > { %vm2401_vm14 = vsmask.f32 7942  ;;  %vm2287_vm15 = vsmask.f32 1280  ;;  %vm2288_vm0 = vsmask.f32 5392 }
  0xae   : > { %vm6794_vm1 = vmand %vm2400_vm13, %vm2401_vm14  ;;  %vm2415_vm3 = vcmask 1041408  }
  0xaf   : > { %vm6807_vm2 = vmor %vm2287_vm15, %vm2288_vm0 }
  0xb0   : > { %v5808_v12 = vld [vmem:[#allocation2] sm:$0xff]   ;;  %v6508_v13 = vld [vmem:[#allocation2 + $0x8] sm:$0xff]   ;;  %vm6929_vm4 = vmand %vm2415_vm3, %vm2287_vm15 }
  0xb1   : > { %v805_v14 = vshrl.u32 %v5808_v12, 16  ;;  %v807_v15 = vshll.u32 %v5808_v12, 16  ;;  %v812_v16 = vshll.u32 %v6508_v13, 16  ;;  %v6511_v17 = vld [vmem:[#allocation2 + $0xc] sm:$0xff]   ;;  %v5810_v19 = vld [vmem:[#allocation2 + $0x4] sm:$0xfe]  }
  0xb2   : > { %v959_v21 = vrot.slane %v6511_v17, 1  ;;  %s5053_s20 = smul.u32 576, %s6506_s16  ;;  %v958_v23 = vrot.slane %v5810_v19, 1  ;;  %v5813_v49 = vld [vmem:[#allocation2] sm:$0xfe]   ;;  %v5814_v51 = vld [vmem:[#allocation2 + $0x8] sm:$0xff]  }
  0xb3   : > { %v809_v18 = vrot.slane %v807_v15, 1  ;;  %v6513_v20 = vrot.slane %v812_v16, 1  ;;  %v898_v57 = vrot.slane %v5813_v49, 1  ;;  %v5812_v59 = vld [vmem:[#allocation2] sm:$0xff]   ;;  %v899_v60 = vrot.slane %v5814_v51, 1  ;;  %v5819_v5 = vld [vmem:[#allocation2 + $0x10] sm:$0xff]  }
  0xb4   : > { %v960_v25 = vsel %vm897_vm7, %v958_v23, %v959_v21  ;;  %s6524_s23 = scalar_lea.vmem [#allocation7], %s5053_s20  ;;  %v816_v3 = vshrl.u32 %v6508_v13, 16  ;;  %v5820_v6 = vld [vmem:[#allocation2 + $0x14] sm:$0xff]   ;;  %v820_v8 = vshll.u32 %v5819_v5, 16  ;;  %v5821_v9 = vld [vmem:[#allocation2 + $0x8] sm:$0xff]   ;;  %v824_v23 = vshrl.u32 %v5819_v5, 16 }
  0xb5   : > { %v810_v22 = vor.u32 %v809_v18, %v805_v14  ;;  %v5776_v26 = vld [vmem:[%s6524_s23 + $0x40] sm:$0xff]   ;;  %1949 = vmatprep.mubr.bf16.mxu1 %v960_v25  ;;  %v5780_v30 = vld [vmem:[%s6524_s23 + $0x48] sm:$0xff]   ;;  %v5784_v34 = vld [vmem:[%s6524_s23 + $0x50] sm:$0xff]   ;;  %v900_v0 = vsel %vm897_vm7, %v898_v57, %v899_v60  ;;  %v961_v10 = vrot.slane %v5820_v6, 1  ;;  %s6663_s13 = scalar_lea.vmem [#allocation9], %s5053_s20  ;;  %s4749_s22 = sshll.u32 %s6506_s16, 2 }
  0xb6   : > { %v5777_v27 = vld [vmem:[%s6524_s23 + $0xc0] sm:$0xff]   ;;  %5144 = vmatprep.subr.bf16.mxu0 %v5776_v26  ;;  %v5781_v31 = vld [vmem:[%s6524_s23 + $0xc8] sm:$0xff]   ;;  %v5785_v35 = vld [vmem:[%s6524_s23 + $0xd0] sm:$0xff]   ;;  %v818_v7 = vor.u32 %v816_v3, %v6513_v20  ;;  %v822_v12 = vrot.slane %v820_v8, 1  ;;  %s6749_s25 = scalar_lea.vmem [#allocation11], %s4749_s22 }
  0xb7   : > { %v815_v24 = vsel %vm803_vm6, %v810_v22, %v6513_v20  ;;  %v5778_v28 = vld [vmem:[%s6524_s23] sm:$0xff]   ;;  %5190 = vmatprep.subr.bf16.mxu1 %v5777_v27  ;;  %v5782_v32 = vld [vmem:[%s6524_s23 + $0x8] sm:$0xff]   ;;  %v5786_v36 = vld [vmem:[%s6524_s23 + $0x10] sm:$0xff]   ;;  %v962_v14 = vsel %vm897_vm7, %v959_v21, %v961_v10 }
  0xb8   : > { %1876 = vmatprep.mubr.bf16.mxu0 %v815_v24  ;;  %v5779_v29 = vld [vmem:[%s6524_s23 + $0x80] sm:$0xff]   ;;  %5145 = vmatpush3.bf16.msra.mxu0 %v5778_v28  ;;  %v5783_v33 = vld [vmem:[%s6524_s23 + $0x88] sm:$0xff]   ;;  %v5787_v37 = vld [vmem:[%s6524_s23 + $0x90] sm:$0xff]   ;;  %v823_v18 = vsel %vm803_vm6, %v818_v7, %v822_v12  ;;  %v826_v25 = vor.u32 %v824_v23, %v822_v12  ;;  %v6248_v23 = vmov 0.0  }
  0xb9   : > { %5191 = vmatpush3.bf16.msra.mxu1 %v5779_v29  ;;  %5146 = vmatprep.subr.bf16.mxu0 %v5780_v30  ;;  %v5788_v38 = vld [vmem:[%s6524_s23 + $0x58] sm:$0xff]   ;;  %v5792_v42 = vld [vmem:[%s6524_s23 + $0x60] sm:$0xff]   ;;  %v5796_v46 = vld [vmem:[%s6524_s23 + $0x68] sm:$0xff]  }
  0xba   : > { %5192 = vmatprep.subr.bf16.mxu1 %v5781_v31  ;;  %v5789_v39 = vld [vmem:[%s6524_s23 + $0xd8] sm:$0xff]   ;;  %v5793_v43 = vld [vmem:[%s6524_s23 + $0xe0] sm:$0xff]   ;;  %v5797_v47 = vld [vmem:[%s6524_s23 + $0xe8] sm:$0xff]  }
  0xbb   : > { %v5790_v40 = vld [vmem:[%s6524_s23 + $0x18] sm:$0xff]   ;;  %v5794_v44 = vld [vmem:[%s6524_s23 + $0x20] sm:$0xff]   ;;  %v5798_v48 = vld [vmem:[%s6524_s23 + $0x28] sm:$0xff]  }
  0xbc   : > { %5147 = vmatpush3.bf16.msra.mxu0 %v5782_v32  ;;  %v5791_v41 = vld [vmem:[%s6524_s23 + $0x98] sm:$0xff]   ;;  %v5795_v45 = vld [vmem:[%s6524_s23 + $0xa0] sm:$0xff]   ;;  %v5799_v50 = vld [vmem:[%s6524_s23 + $0xa8] sm:$0xff]  }
  0xbd   : > { %5193 = vmatpush3.bf16.msra.mxu1 %v5783_v33  ;;  %5148 = vmatprep.subr.bf16.mxu0 %v5784_v34  ;;  %v5800_v52 = vld [vmem:[%s6524_s23 + $0x70] sm:$0xff]   ;;  %v5804_v56 = vld [vmem:[%s6524_s23 + $0x78] sm:$0xff]   ;;  %v5815_v63 = vld [vmem:[%s6524_s23 + $0x140] sm:$0xff]  }
  0xbe   : > { %5194 = vmatprep.subr.bf16.mxu1 %v5785_v35  ;;  %v5801_v53 = vld [vmem:[%s6524_s23 + $0xf0] sm:$0xff]   ;;  %v5805_v58 = vld [vmem:[%s6524_s23 + $0xf8] sm:$0xff]   ;;  %v5816_v1 = vld [vmem:[%s6524_s23 + $0x100] sm:$0xff]  }
  0xbf   : > { %v5802_v54 = vld [vmem:[%s6524_s23 + $0x30] sm:$0xff]   ;;  %v5806_v61 = vld [vmem:[%s6524_s23 + $0x38] sm:$0xff]   ;;  %v5817_v2 = vld [vmem:[%s6524_s23 + $0x148] sm:$0xff]  }
  0xc0   : > { %5149 = vmatpush3.bf16.msra.mxu0 %v5786_v36  ;;  %v5803_v55 = vld [vmem:[%s6524_s23 + $0xb0] sm:$0xff]   ;;  %v5807_v62 = vld [vmem:[%s6524_s23 + $0xb8] sm:$0xff]   ;;  %v5818_v4 = vld [vmem:[%s6524_s23 + $0x108] sm:$0xff]  }
  0xc1   : > { %5195 = vmatpush3.bf16.msra.mxu1 %v5787_v37  ;;  %5150 = vmatprep.subr.bf16.mxu0 %v5788_v38  ;;  %v5822_v11 = vld [vmem:[#allocation2 + $0x10] sm:$0xff]   ;;  %v5824_v16 = vld [vmem:[%s6524_s23 + $0x1c0] sm:$0xff]   ;;  %v5827_v17 = vld [vmem:[%s6524_s23 + $0x1c8] sm:$0xff]  }
  0xc2   : > { %5196 = vmatprep.subr.bf16.mxu1 %v5789_v39  ;;  %v5823_v13 = vld [vmem:[%s6524_s23 + $0x150] sm:$0xff]   ;;  %v901_v15 = vrot.slane %v5822_v11, 1  ;;  %v5826_v22 = vld [vmem:[%s6524_s23 + $0x180] sm:$0xff]   ;;  %v5828_v21 = vld [vmem:[#allocation2 + $0x18] sm:$0xff]  }
  0xc3   : > { %v5825_v19 = vld [vmem:[%s6524_s23 + $0x110] sm:$0xff]   ;;  %v5829_v24 = vld [vmem:[#allocation2 + $0x1c] sm:$0xff]   ;;  %v828_v26 = vshll.u32 %v5828_v21, 16  ;;  %v5831_v29 = vld [vmem:[%s6524_s23 + $0x188] sm:$0xff]  }
  0xc4   : > { %5151 = vmatpush3.bf16.msra.mxu0 %v5790_v40  ;;  %v902_v20 = vsel %vm897_vm7, %v899_v60, %v901_v15  ;;  %v5830_v27 = vld [vmem:[%s6524_s23 + $0x158] sm:$0xff]   ;;  %v963_v28 = vrot.slane %v5829_v24, 1  ;;  %v5832_v31 = vld [vmem:[#allocation2 + $0x10] sm:$0xff]   ;;  %v5837_v40 = vld [vmem:[%s6524_s23 + $0x160] sm:$0xff]  }
  0xc5   : > { %5197 = vmatpush3.bf16.msra.mxu1 %v5791_v41  ;;  %5152 = vmatprep.subr.bf16.mxu0 %v5792_v42  ;;  %v830_v30 = vrot.slane %v828_v26, 1  ;;  %v5833_v33 = vld [vmem:[#allocation2 + $0x18] sm:$0xff]   ;;  %v5835_v37 = vld [vmem:[%s6524_s23 + $0x1d0] sm:$0xff]   ;;  %v5838_v41 = vld [vmem:[%s6524_s23 + $0x120] sm:$0xff]   ;;  %v832_v42 = vshrl.u32 %v5828_v21, 16 }
  0xc6   : > { %5198 = vmatprep.subr.bf16.mxu1 %v5793_v43  ;;  %v964_v32 = vsel %vm897_vm7, %v961_v10, %v963_v28  ;;  %v5834_v35 = vld [vmem:[%s6524_s23 + $0x118] sm:$0xff]   ;;  %v903_v36 = vrot.slane %v5833_v33, 1  ;;  %v5836_v38 = vld [vmem:[%s6524_s23 + $0x190] sm:$0xff]   ;;  %v5846_v57 = vld [vmem:[%s6524_s23 + $0x128] sm:$0xff]  }
  0xc7   : > { %v831_v34 = vsel %vm803_vm6, %v826_v25, %v830_v30  ;;  %v5839_v43 = vld [vmem:[%s6524_s23 + $0x1d8] sm:$0xff]   ;;  %v5848_v60 = vld [vmem:[%s6524_s23 + $0x1a0] sm:$0xff]   ;;  %v5854_v5 = vld [vmem:[%s6524_s23 + $0x1a8] sm:$0xff]  }
  0xc8   : > { %5153 = vmatpush3.bf16.msra.mxu0 %v5794_v44  ;;  %v904_v39 = vsel %vm897_vm7, %v901_v15, %v903_v36  ;;  %v5840_v44 = vld [vmem:[#allocation2 + $0x20] sm:$0xff]   ;;  %v5856_v11 = vld [vmem:[#allocation2 + $0x28] ss:$0 sps:$4 sm:$0x11]   ;;  %v5858_v12 = vld [vmem:[%s6524_s23 + $0x178] sm:$0xff]  }
  0xc9   : > { %5199 = vmatpush3.bf16.msra.mxu1 %v5795_v45  ;;  %5154 = vmatprep.subr.bf16.mxu0 %v5796_v46  ;;  %v5841_v45 = vld [vmem:[#allocation2 + $0x24] sm:$0xff]   ;;  %v834_v46 = vor.u32 %v832_v42, %v830_v30  ;;  %v5859_v15 = vld [vmem:[%s6524_s23 + $0x1b0] sm:$0xff]   ;;  %v5864_v21 = vld [vmem:[%s6524_s23 + $0x1b8] sm:$0xff]  }
  0xca   : > { %5200 = vmatprep.subr.bf16.mxu1 %v5797_v47  ;;  %v836_v47 = vshll.u32 %v5840_v44, 16  ;;  %v965_v49 = vrot.slane %v5841_v45, 1  ;;  %v5855_v7 = vld [vmem:[#allocation2 + $0x20] sm:$0xff]   ;;  %v5866_v25 = vld [vmem:[#allocation2 + $0xc] sm:$0xff]  }
  0xcb   : > { %v5865_v26 = vld [vmem:[#allocation2 + $0x4] sm:$0xfe]  }
  0xcc   : > { %5155 = vmatpush3.bf16.msra.mxu0 %v5798_v48  ;;  %v5842_v48 = vld [vmem:[%s6524_s23 + $0x198] sm:$0xff]   ;;  %v838_v51 = vrot.slane %v836_v47, 1  ;;  %v1020_v30 = vshrl.u32 %v5865_v26, 16 }
  0xcd   : > { %5201 = vmatpush3.bf16.msra.mxu1 %v5799_v50  ;;  %5156 = vmatprep.subr.bf16.mxu0 %v5800_v52  ;;  %v5843_v50 = vld [vmem:[#allocation2 + $0x18] sm:$0xff]   ;;  %v5844_v52 = vld [vmem:[#allocation2 + $0x20] sm:$0xff]  }
  0xce   : > { %5202 = vmatprep.subr.bf16.mxu1 %v5801_v53  ;;  %v966_v53 = vsel %vm897_vm7, %v963_v28, %v965_v49  ;;  %v1028_v28 = vshrl.u32 %v5866_v25, 16 }
  0xd0   : > { %5157 = vmatpush3.bf16.msra.mxu0 %v5802_v54  ;;  %v5845_v54 = vld [vmem:[%s6524_s23 + $0x168] sm:$0xff]   ;;  %v1030_v33 = vrot.slane %v1028_v28, 1 }
  0xd1   : > { %5203 = vmatpush3.bf16.msra.mxu1 %v5803_v55  ;;  %5158 = vmatprep.subr.bf16.mxu0 %v5804_v56  ;;  %v839_v55 = vsel %vm803_vm6, %v834_v46, %v838_v51  ;;  %v905_v56 = vrot.slane %v5844_v52, 1  ;;  %v5871_v52 = vld [vmem:[#allocation2 + $0x10] sm:$0xff]  }
  0xd2   : > { %5204 = vmatprep.subr.bf16.mxu1 %v5805_v58  ;;  %v5847_v58 = vld [vmem:[%s6524_s23 + $0x1e0] sm:$0xff]  }
  0xd4   : > { %5159 = vmatpush3.bf16.msra.mxu0 %v5806_v61  ;;  %v840_v61 = vshrl.u32 %v5840_v44, 16 }
  0xd5   : > { %5205 = vmatpush3.bf16.msra.mxu1 %v5807_v62  ;;  %5236 = vmatprep.subr.bf16.mxu0 %v5815_v63  ;;  %v5849_v62 = vld [vmem:[%s6524_s23 + $0x170] sm:$0xff]   ;;  %v5850_v63 = vld [vmem:[%s6524_s23 + $0x1e8] sm:$0xff]  }
  0xd6   : > { %5282 = vmatprep.subr.bf16.mxu1 %v5824_v16  ;;  %v842_v3 = vor.u32 %v840_v61, %v838_v51 }
  0xd7   : > { %1877 = vmatmul.mubr.bf16.vlgmr.msra.gmra.mrb[0].mxu0 %v5812_v59  ;;  %v906_v59 = vsel %vm897_vm7, %v903_v36, %v905_v56  ;;  %v1022_v36 = vrot.slane %v1020_v30, 1  ;;  %v5883_v30 = vld [vmem:[%s6524_s23 + $0x220] sm:$0xff]  }
  0xd8   : > { %1950 = vmatmul.mubr.bf16.vlgmr.msra.gmra.mrb[0].mxu1 %v900_v0  ;;  %5237 = vmatpush3.bf16.msra.mxu0 %v5816_v1  ;;  %v5851_v0 = vld [vmem:[#allocation2 + $0x28] ss:$0 sps:$4 sm:$0x11]   ;;  %v5852_v1 = vld [vmem:[#allocation2 + $0x2c] ss:$0 sps:$4 sm:$0x11]  }
  0xd9   : > { %5238 = vmatprep.subr.bf16.mxu0 %v5817_v2  ;;  %1957 = vmatprep.mubr.bf16.mxu1 %v962_v14  ;;  %v5853_v2 = vld [vmem:[%s6524_s23 + $0x130] sm:$0xff]   ;;  %v967_v6 = vrot.slane %v5852_v1, 1  ;;  %v907_v14 = vrot.slane %v5856_v11, 1  ;;  %v5876_v1 = vld [vmem:[#allocation2 + $0x18] sm:$0xff]  }
  0xda   : > { %1884 = vmatprep.mubr.bf16.mxu0 %v823_v18  ;;  %5283 = vmatpush3.bf16.msra.mxu1 %v5826_v22  ;;  %v5860_v18 = vld [vmem:[%s6524_s23 + $0x138] sm:$0xff]   ;;  %v5863_v22 = vld [vmem:[#allocation2 + $0xc] sm:$0xff]  }
  0xdb   : > { %5284 = vmatprep.subr.bf16.mxu1 %v5827_v17  ;;  %v968_v10 = vsel %vm897_vm7, %v965_v49, %v967_v6  ;;  %v908_v16 = vsel %vm897_vm7, %v905_v56, %v907_v14  ;;  %v1123_v24 = vrot.slane %v5863_v22, 2  ;;  %v5870_v49 = vld [vmem:[#allocation2 + $0x8] sm:$0xfc]   ;;  %v1183_v56 = vrot.slane %v5871_v52, 2  ;;  %v5879_v14 = vld [vmem:[#allocation2 + $0x1c] sm:$0xff]  }
  0xdc   : > { %5239 = vmatpush3.bf16.msra.mxu0 %v5818_v4  ;;  %v844_v4 = vshll.u32 %v5851_v0, 16  ;;  %v1046_v22 = vshrl.u32 %v5879_v14, 16  ;;  %v5887_v52 = vld [vmem:[#allocation2 + $0x28] sm:$0xff]  }
  0xdd   : > { %5240 = vmatprep.subr.bf16.mxu0 %v5823_v13 }
  0xde   : > { %5285 = vmatpush3.bf16.msra.mxu1 %v5831_v29  ;;  %v846_v8 = vrot.slane %v844_v4, 1  ;;  %v1031_v29 = vshll.u32 %v5866_v25, 16 }
  0xdf   : > { %1885 = vmatmul.mubr.bf16.gmra.mrb[4].mxu0 %v5821_v9  ;;  %5286 = vmatprep.subr.bf16.mxu1 %v5835_v37  ;;  %v5857_v9 = vld [vmem:[%s6524_s23 + $0x1f0] sm:$0xff]  }
  0xe0   : > { %1958 = vmatmul.mubr.bf16.gmra.mrb[4].mxu1 %v902_v20  ;;  %5241 = vmatpush3.bf16.msra.mxu0 %v5825_v19  ;;  %v847_v13 = vsel %vm803_vm6, %v842_v3, %v846_v8  ;;  %v5861_v19 = vld [vmem:[%s6524_s23 + $0x1f8] sm:$0xff]   ;;  %v5862_v20 = vld [vmem:[#allocation2 + $0x4] sm:$0xfc]   ;;  %v1185_v8 = vrot.slane %v5876_v1, 2 }
  0xe1   : > { %5242 = vmatprep.subr.bf16.mxu0 %v5830_v27  ;;  %1965 = vmatprep.mubr.bf16.mxu1 %v964_v32  ;;  %v1122_v17 = vrot.slane %v5862_v20, 2  ;;  %v5867_v32 = vld [vmem:[#allocation2 + $0x8] sm:$0xfc]  }
  0xe2   : > { %1892 = vmatprep.mubr.bf16.mxu0 %v831_v34  ;;  %5287 = vmatpush3.bf16.msra.mxu1 %v5836_v38  ;;  %v1033_v34 = vrot.slane %v1031_v29, 2  ;;  %v1244_v38 = vshrl.u32 %v5867_v32, 16 }
  0xe3   : > { %5288 = vmatprep.subr.bf16.mxu1 %v5839_v43  ;;  %v1124_v27 = vsel %vm1121_vm8, %v1122_v17, %v1123_v24  ;;  %v1049_v17 = vshll.u32 %v5879_v14, 16 }
  0xe4   : > { %5243 = vmatpush3.bf16.msra.mxu0 %v5834_v35  ;;  %v5868_v35 = vld [vmem:[#allocation2 + $0x10] sm:$0xff]   ;;  %v1246_v45 = vrot.slane %v1244_v38, 2  ;;  %v5886_v38 = vld [vmem:[#allocation2 + $0x28] sm:$0xff]  }
  0xe5   : > { %5244 = vmatprep.subr.bf16.mxu0 %v5837_v40  ;;  %v5869_v40 = vld [vmem:[%s6524_s23 + $0x200] sm:$0xff]   ;;  %v1252_v42 = vshrl.u32 %v5868_v35, 16  ;;  %v1255_v43 = vshll.u32 %v5868_v35, 16 }
  0xe6   : > { %5289 = vmatpush3.bf16.msra.mxu1 %v5842_v48 }
  0xe7   : > { %1893 = vmatmul.mubr.bf16.gmra.mrb[8].mxu0 %v5832_v31  ;;  %5290 = vmatprep.subr.bf16.mxu1 %v5847_v58  ;;  %v1023_v31 = vshll.u32 %v5865_v26, 16  ;;  %v1254_v47 = vrot.slane %v1252_v42, 2  ;;  %v1257_v48 = vrot.slane %v1255_v43, 3  ;;  %v1048_v26 = vrot.slane %v1046_v22, 1 }
  0xe8   : > { %1966 = vmatmul.mubr.bf16.gmra.mrb[8].mxu1 %v904_v39  ;;  %5245 = vmatpush3.bf16.msra.mxu0 %v5838_v41  ;;  %v1247_v39 = vshll.u32 %v5867_v32, 16  ;;  %v1034_v41 = vor.u32 %v1033_v34, %v1030_v33  ;;  %v5885_v33 = vld [vmem:[#allocation2 + $0x24] sm:$0xff]   ;;  %v1279_v43 = vshrl.u32 %v5886_v38, 16 }
  0xe9   : > { %1973 = vmatprep.mubr.bf16.mxu1 %v966_v53  ;;  %1900 = vmatprep.mubr.bf16.mxu0 %v839_v55  ;;  %v1025_v37 = vrot.slane %v1023_v31, 2  ;;  %v1258_v53 = vor.u32 %v1257_v48, %v1254_v47  ;;  %v5872_v55 = vld [vmem:[%s6524_s23 + $0x208] sm:$0xff]   ;;  %v1282_v47 = vshll.u32 %v5886_v38, 16  ;;  %v5905_v38 = vld [vmem:[%s6663_s13 + $0xc0] sm:$0xff]  }
  0xea   : > { %5246 = vmatprep.subr.bf16.mxu0 %v5845_v54  ;;  %5291 = vmatpush3.bf16.msra.mxu1 %v5848_v60  ;;  %v1249_v46 = vrot.slane %v1247_v39, 3  ;;  %v1182_v54 = vrot.slane %v5870_v49, 2  ;;  %v5884_v31 = vld [vmem:[#allocation2 + $0x24] sm:$0xff]   ;;  %v1055_v39 = vshrl.u32 %v5885_v33, 16 }
  0xeb   : > { %5292 = vmatprep.subr.bf16.mxu1 %v5850_v63  ;;  %v1026_v44 = vor.u32 %v1025_v37, %v1022_v36  ;;  %v1129_v37 = vrot.slane %v5884_v31, 2  ;;  %v5888_v48 = vld [vmem:[%s6524_s23 + $0x228] sm:$0xff]  }
  0xec   : > { %5247 = vmatpush3.bf16.msra.mxu0 %v5846_v57  ;;  %v1250_v51 = vor.u32 %v1249_v46, %v1246_v45  ;;  %v5873_v57 = vld [vmem:[#allocation2 + $0x14] sm:$0xff]   ;;  %v1184_v60 = vsel %vm1121_vm8, %v1182_v54, %v1183_v56  ;;  %v1057_v45 = vrot.slane %v1055_v39, 1  ;;  %v5889_v54 = vld [vmem:[#allocation2 + $0x2c] ss:$0 sps:$4 sm:$0x33]  }
  0xed   : > { %5248 = vmatprep.subr.bf16.mxu0 %v5849_v62  ;;  %v1125_v61 = vrot.slane %v5873_v57, 2  ;;  %v5875_v62 = vld [vmem:[#allocation2 + $0x18] sm:$0xff]   ;;  %v5903_v39 = vld [vmem:[%s6663_s13 + $0x48] sm:$0xff]  }
  0xee   : > { %5293 = vmatpush3.bf16.msra.mxu1 %v5854_v5  ;;  %v1259_v58 = vsel %vm1242_vm10, %v1250_v51, %v1258_v53  ;;  %v1261_v4 = vshrl.u32 %v5875_v62, 16  ;;  %v1264_v5 = vshll.u32 %v5875_v62, 16  ;;  %v1281_v51 = vrot.slane %v1279_v43, 2  ;;  %v5907_v43 = vld [vmem:[%s6663_s13 + $0x50] sm:$0xff]  }
  0xef   : > { %1901 = vmatmul.mubr.bf16.gmra.mrb[12].mxu0 %v5843_v50  ;;  %5294 = vmatprep.subr.bf16.mxu1 %v5857_v9  ;;  %v1035_v50 = vsel %vm1018_vm9, %v1026_v44, %v1034_v41  ;;  %v1126_v3 = vsel %vm1121_vm8, %v1123_v24, %v1125_v61  ;;  %v5878_v9 = vld [vmem:[#allocation2 + $0x1c] sm:$0xff]  }
  0xf0   : > { %1974 = vmatmul.mubr.bf16.gmra.mrb[12].mxu1 %v906_v59  ;;  %5249 = vmatpush3.bf16.msra.mxu0 %v5853_v2  ;;  %v5874_v59 = vld [vmem:[#allocation2 + $0x14] sm:$0xff]   ;;  %v1266_v11 = vrot.slane %v1264_v5, 3  ;;  %v6623_v24 = vld [vmem:[#allocation2 + $0x20] sm:$0xff]  }
  0xf1   : > { %1981 = vmatprep.mubr.bf16.mxu1 %v968_v10  ;;  %1908 = vmatprep.mubr.bf16.mxu0 %v847_v13  ;;  %v1037_v63 = vshrl.u32 %v5874_v59, 16  ;;  %v1040_v0 = vshll.u32 %v5874_v59, 16  ;;  %v5877_v2 = vld [vmem:[%s6524_s23 + $0x210] sm:$0xff]   ;;  %v1263_v10 = vrot.slane %v1261_v4, 2  ;;  %v1127_v13 = vrot.slane %v5878_v9, 2  ;;  %v5894_v5 = vld [vmem:[%s6524_s23 + $0x238] sm:$0xff]  }
  0xf2   : > { %5250 = vmatprep.subr.bf16.mxu0 %v5858_v12  ;;  %5295 = vmatpush3.bf16.msra.mxu1 %v5859_v15  ;;  %v1187_v32 = vrot.slane %v6623_v24, 2  ;;  %v5891_v59 = vld [vmem:[#allocation2 + $0x2c] ss:$0 sps:$4 sm:$0x33]   ;;  %v5897_v24 = vld [vmem:[#allocation2 + $0x18] sm:$0xff]  }
  0xf3   : > { %5296 = vmatprep.subr.bf16.mxu1 %v5861_v19  ;;  %v1039_v6 = vrot.slane %v1037_v63, 1  ;;  %v1267_v15 = vor.u32 %v1266_v11, %v1263_v10  ;;  %v1128_v20 = vsel %vm1121_vm8, %v1125_v61, %v1127_v13  ;;  %v1130_v44 = vsel %vm1121_vm8, %v1127_v13, %v1129_v37  ;;  %v5892_v61 = vld [vmem:[#allocation2 + $0x30] ss:$0 sps:$4 sm:$0x77]  }
  0xf4   : > { %5251 = vmatpush3.bf16.msra.mxu0 %v5860_v18  ;;  %v5880_v18 = vld [vmem:[%s6524_s23 + $0x218] sm:$0xff]   ;;  %v1064_v63 = vshrl.u32 %v5891_v59, 16  ;;  %v5893_v4 = vld [vmem:[#allocation2 + $0x30] ss:$0 sps:$4 sm:$0x33]  }
  0xf5   : > { %5551 = vmatprep.subr.bf16.mxu0 %v6248_v23  ;;  %v1268_v25 = vsel %vm1242_vm10, %v1258_v53, %v1267_v15  ;;  %v1284_v53 = vrot.slane %v1282_v47, 3  ;;  %v5912_v47 = vld [vmem:[%s6663_s13 + $0x18] sm:$0xff]  }
  0xf6   : > { %5297 = vmatpush3.bf16.msra.mxu1 %v5864_v21  ;;  %v5881_v21 = vld [vmem:[#allocation2 + $0x20] sm:$0xff]  }
  0xf7   : > { %1909 = vmatmul.mubr.bf16.gmra.mrb[16].mxu0 %v5855_v7  ;;  %v1042_v7 = vrot.slane %v1040_v0, 2  ;;  %v1270_v28 = vshrl.u32 %v5881_v21, 16  ;;  %v1273_v29 = vshll.u32 %v5881_v21, 16  ;;  %v1285_v57 = vor.u32 %v1284_v53, %v1281_v51  ;;  %v5916_v51 = vld [vmem:[%s6663_s13 + $0xd8] sm:$0xff]   ;;  %v5917_v53 = vld [vmem:[%s6663_s13 + $0x20] sm:$0xff]  }
  0xf8   : > { %1982 = vmatmul.mubr.bf16.gmra.mrb[16].mxu1 %v908_v16  ;;  %2022 = vmatprep.mubr.bf16.mxu0 %v1124_v27  ;;  %v1186_v16 = vsel %vm1121_vm8, %v1183_v56, %v1185_v8  ;;  %v1051_v27 = vrot.slane %v1049_v17, 2  ;;  %v5890_v56 = vld [vmem:[%s6524_s23 + $0x230] sm:$0xff]   ;;  %v1067_v0 = vshll.u32 %v5891_v59, 16 }
  0xf9   : > { %2095 = vmatprep.mubr.bf16.mxu1 %v1259_v58  ;;  %v1043_v12 = vor.u32 %v1042_v7, %v1039_v6  ;;  %v1272_v35 = vrot.slane %v1270_v28, 2  ;;  %v1275_v36 = vrot.slane %v1273_v29, 3  ;;  %v1131_v58 = vrot.slane %v5889_v54, 2 }
  0xfa   : > { %v1052_v34 = vor.u32 %v1051_v27, %v1048_v26  ;;  %v1066_v7 = vrot.slane %v1064_v63, 1  ;;  %v5898_v27 = vld [vmem:[#allocation2 + $0x20] sm:$0xff]  }
  0xfb   : > { %v1044_v19 = vsel %vm1018_vm9, %v1034_v41, %v1043_v12  ;;  %v1276_v42 = vor.u32 %v1275_v36, %v1272_v35  ;;  %v1132_v6 = vsel %vm1121_vm8, %v1129_v37, %v1131_v58  ;;  %v1351_v28 = vrot.slane %v5898_v27, 3  ;;  %v5901_v36 = vld [vmem:[%s6663_s13 + $0x40] sm:$0xff]  }
  0xfc   : > { %v1053_v41 = vsel %vm1018_vm9, %v1043_v12, %v1052_v34  ;;  %5341 = vmatprep.subr.bf16.mxu1 %v5901_v36  ;;  %v5902_v37 = vld [vmem:[%s6663_s13] sm:$0xff]  }
  0xfd   : > { %v1277_v49 = vsel %vm1242_vm10, %v1267_v15, %v1276_v42  ;;  %v1286_v62 = vsel %vm1242_vm10, %v1276_v42, %v1285_v57  ;;  %v1191_v15 = vrot.slane %v5893_v4, 2  ;;  %v5909_v42 = vld [vmem:[%s6663_s13 + $0xc8] sm:$0xff]  }
  0xfe   : > { %v5922_v4 = vld [vmem:[%s6663_s13 + $0x28] sm:$0xff]  }
  0xff   : > { %2023 = vmatmul.mubr.bf16.vlgmr.msra.gmra.mrb[20].mxu0 %v1035_v50  ;;  %v1188_v50 = vsel %vm1121_vm8, %v1185_v8, %v1187_v32  ;;  %v1069_v8 = vrot.slane %v1067_v0, 2  ;;  %v5920_v0 = vld [vmem:[%s6663_s13 + $0x68] sm:$0xff]  }
 0x100   : > { %5552 = vmatpush3.bf16.msra.mxu0 %v5869_v40  ;;  %2096 = vmatmul.mubr.bf16.vlgmr.msra.gmra.mrb[20].mxu1 %v1184_v60  ;;  %v1058_v40 = vshll.u32 %v5885_v33, 16  ;;  %v1189_v60 = vrot.slane %v5887_v52, 2  ;;  %v5900_v33 = vld [vmem:[#allocation2 + $0x30] ss:$0 sps:$4 sm:$0x77]  }
 0x101   : > { %5553 = vmatprep.subr.bf16.mxu0 %v6248_v23  ;;  %2030 = vmatprep.mubr.bf16.mxu0 %v1126_v3  ;;  %v1291_v3 = vshll.u32 %v5892_v61, 16  ;;  %v1070_v12 = vor.u32 %v1069_v8, %v1066_v7  ;;  %v5923_v7 = vld [vmem:[%s6663_s13 + $0xe8] sm:$0xff]  }
 0x102   : > { %2103 = vmatprep.mubr.bf16.mxu1 %v1268_v25  ;;  %v1060_v46 = vrot.slane %v1058_v40, 2  ;;  %v1190_v9 = vsel %vm1121_vm8, %v1187_v32, %v1189_v60  ;;  %v1349_v25 = vrot.slane %v5897_v24, 3  ;;  %5342 = vmatpush3.bf16.msra.mxu1 %v5902_v37  ;;  %v5906_v40 = vld [vmem:[%s6663_s13 + $0x80] sm:$0xff]  }
 0x103   : > { %v1293_v11 = vrot.slane %v1291_v3, 3  ;;  %5343 = vmatprep.subr.bf16.mxu1 %v5903_v39 }
 0x104   : > { %5554 = vmatpush3.bf16.msra.mxu0 %v5872_v55  ;;  %v1061_v55 = vor.u32 %v1060_v46, %v1057_v45  ;;  %v1352_v29 = vsel %vm1345_vm12, %v1349_v25, %v1351_v28  ;;  %v5910_v45 = vld [vmem:[%s6663_s13 + $0x88] sm:$0xff]   ;;  %v5911_v46 = vld [vmem:[%s6663_s13 + $0x58] sm:$0xff]  }
 0x105   : > { %5555 = vmatprep.subr.bf16.mxu0 %v6248_v23 }
 0x106   : > { %v1062_v1 = vsel %vm1018_vm9, %v1052_v34, %v1061_v55  ;;  %v1355_v34 = vrot.slane %v5900_v33, 3 }
 0x107   : > { %2031 = vmatmul.mubr.bf16.gmra.mrb[24].mxu0 %v1044_v19  ;;  %v5895_v19 = vld [vmem:[#allocation2 + $0x8] sm:$0xf8]  }
 0x108   : > { %5556 = vmatpush3.bf16.msra.mxu0 %v5877_v2  ;;  %2038 = vmatprep.mubr.bf16.mxu0 %v1128_v20  ;;  %v1288_v2 = vshrl.u32 %v5892_v61, 16  ;;  %v1192_v20 = vsel %vm1121_vm8, %v1189_v60, %v1191_v15  ;;  %v1346_v22 = vrot.slane %v5895_v19, 3 }
 0x109   : > { %5557 = vmatprep.subr.bf16.mxu0 %v6248_v23  ;;  %2104 = vmatmul.mubr.bf16.gmra.mrb[24].mxu1 %v1186_v16  ;;  %v5896_v16 = vld [vmem:[#allocation2 + $0x10] sm:$0xff]  }
 0x10a   : > { %2111 = vmatprep.mubr.bf16.mxu1 %v1277_v49  ;;  %v1290_v10 = vrot.slane %v1288_v2, 2  ;;  %v1347_v17 = vrot.slane %v5896_v16, 3  ;;  %v5914_v49 = vld [vmem:[%s6663_s13 + $0x90] sm:$0xff]  }
 0x10c   : > { %5558 = vmatpush3.bf16.msra.mxu0 %v5880_v18  ;;  %v1294_v13 = vor.u32 %v1293_v11, %v1290_v10  ;;  %v1071_v18 = vsel %vm1018_vm9, %v1061_v55, %v1070_v12  ;;  %v1348_v21 = vsel %vm1345_vm12, %v1346_v22, %v1347_v17  ;;  %v1350_v26 = vsel %vm1345_vm12, %v1347_v17, %v1349_v25  ;;  %v5925_v12 = vld [vmem:[%s6663_s13 + $0x70] sm:$0xff]  }
 0x10d   : > { %5559 = vmatprep.subr.bf16.mxu0 %v6248_v23  ;;  %v5927_v22 = vld [vmem:[%s6663_s13 + $0xf0] sm:$0xff]  }
 0x10e   : > { %v1295_v14 = vsel %vm1242_vm10, %v1285_v57, %v1294_v13  ;;  %v5919_v57 = vld [vmem:[%s6663_s13 + $0xe0] sm:$0xff]   ;;  %v5926_v13 = vld [vmem:[%s6663_s13 + $0x30] sm:$0xff]  }
 0x10f   : > { %2039 = vmatmul.mubr.bf16.gmra.mrb[28].mxu0 %v1053_v41  ;;  %v5904_v41 = vld [vmem:[%s6663_s13 + $0x8] sm:$0xff]   ;;  %v5928_v17 = vld [vmem:[%s6663_s13 + $0xb0] sm:$0xff]  }
 0x110   : > { %5560 = vmatpush3.bf16.msra.mxu0 %v5883_v30  ;;  %2046 = vmatprep.mubr.bf16.mxu0 %v1130_v44  ;;  %v5899_v30 = vld [vmem:[#allocation2 + $0x28] sm:$0xff]   ;;  %v5908_v44 = vld [vmem:[%s6663_s13 + $0x10] sm:$0xff]  }
 0x111   : > { %5561 = vmatprep.subr.bf16.mxu0 %v6248_v23  ;;  %2112 = vmatmul.mubr.bf16.gmra.mrb[28].mxu1 %v1188_v50  ;;  %v1353_v31 = vrot.slane %v5899_v30, 3  ;;  %v5915_v50 = vld [vmem:[%s6663_s13 + $0x60] sm:$0xff]   ;;  %v5930_v30 = vld [vmem:[%s6663_s13 + $0x38] sm:$0xff]  }
 0x112   : > { %2119 = vmatprep.mubr.bf16.mxu1 %v1286_v62  ;;  %5344 = vmatpush3.bf16.msra.mxu1 %v5904_v41 }
 0x113   : > { %v1354_v32 = vsel %vm1345_vm12, %v1351_v28, %v1353_v31  ;;  %v1356_v35 = vsel %vm1345_vm12, %v1353_v31, %v1355_v34  ;;  %5345 = vmatprep.subr.bf16.mxu1 %v5907_v43  ;;  %v5929_v28 = vld [vmem:[%s6663_s13 + $0x78] sm:$0xff]  }
 0x114   : > { %5562 = vmatpush3.bf16.msra.mxu0 %v5888_v48  ;;  %v5913_v48 = vld [vmem:[%s6663_s13 + $0xd0] sm:$0xff]   ;;  %v5931_v31 = vld [vmem:[%s6663_s13 + $0xf8] sm:$0xff]  }
 0x115   : > { %5563 = vmatprep.subr.bf16.mxu0 %v6248_v23 }
 0x116   : > { %5346 = vmatpush3.bf16.msra.mxu1 %v5908_v44 }
 0x117   : > { %2047 = vmatmul.mubr.bf16.gmra.mrb[32].mxu0 %v1062_v1  ;;  %5347 = vmatprep.subr.bf16.mxu1 %v5911_v46  ;;  %v5921_v1 = vld [vmem:[%s6663_s13 + $0xa0] sm:$0xff]  }
 0x118   : > { %5564 = vmatpush3.bf16.msra.mxu0 %v5890_v56  ;;  %2054 = vmatprep.mubr.bf16.mxu0 %v1132_v6  ;;  %v5918_v56 = vld [vmem:[%s6663_s13 + $0x98] sm:$0xff]   ;;  %v5940_v46 = vld [vmem:[%s6663_s13 + $0x140] sm:$0xff]  }
 0x119   : > { %5565 = vmatprep.subr.bf16.mxu0 %v6248_v23  ;;  %2120 = vmatmul.mubr.bf16.gmra.mrb[32].mxu1 %v1190_v9  ;;  %v5924_v9 = vld [vmem:[%s6663_s13 + $0xa8] sm:$0xff]  }
 0x11a   : > { %2127 = vmatprep.mubr.bf16.mxu1 %v1295_v14  ;;  %5348 = vmatpush3.bf16.msra.mxu1 %v5912_v47 }
 0x11b   : > { %5349 = vmatprep.subr.bf16.mxu1 %v5915_v50 }
 0x11c   : > { %5566 = vmatpush3.bf16.msra.mxu0 %v5894_v5 }
 0x11d   : > { %5387 = vmatprep.subr.bf16.mxu0 %v5905_v38 }
 0x11e   : > { %5350 = vmatpush3.bf16.msra.mxu1 %v5917_v53 }
 0x11f   : > { %2055 = vmatmul.mubr.bf16.gmra.mrb[36].mxu0 %v1071_v18  ;;  %5351 = vmatprep.subr.bf16.mxu1 %v5920_v0 }
 0x120   : > { %5567 = vmatprep.mubr.msk.bf16.mxu0 %vm6249_vm11, %v6248_v23 }
 0x121   : > { %2128 = vmatmul.mubr.bf16.gmra.mrb[36].mxu1 %v1192_v20 }
 0x122   : > { %5352 = vmatpush3.bf16.msra.mxu1 %v5922_v4 }
 0x123   : > { %5353 = vmatprep.subr.bf16.mxu1 %v5925_v12 }
 0x126   : > { %5354 = vmatpush3.bf16.msra.mxu1 %v5926_v13 }
 0x127   : > { %5568 = vmatmul.mubr.bf16.vlgmr.msra.gmra.mrb[40].mxu0 %v1348_v21  ;;  %5355 = vmatprep.subr.bf16.mxu1 %v5929_v28 }
 0x128   : > { %5571 = vmatprep.mubr.msk.bf16.mxu0 %vm6249_vm11, %v6248_v23  ;;  %5388 = vmatpush3.bf16.msra.mxu0 %v5906_v40 }
 0x129   : > { %5389 = vmatprep.subr.bf16.mxu0 %v5909_v42 }
 0x12a   : > { %5356 = vmatpush3.bf16.msra.mxu1 %v5930_v30 }
 0x12b   : > { %5433 = vmatprep.subr.bf16.mxu1 %v5940_v46 }
 0x12c   : > { %5390 = vmatpush3.bf16.msra.mxu0 %v5910_v45 }
 0x12d   : > { %5391 = vmatprep.subr.bf16.mxu0 %v5913_v48  ;;  %v5948_v48 = vld [vmem:[%s6663_s13 + $0x1c0] sm:$0xff]  }
 0x12f   : > { %5572 = vmatmul.mubr.bf16.gmra.mrb[44].mxu0 %v1350_v26 }
 0x130   : > { %5575 = vmatprep.mubr.msk.bf16.mxu0 %vm6249_vm11, %v6248_v23  ;;  %5392 = vmatpush3.bf16.msra.mxu0 %v5914_v49 }
 0x131   : > { %5393 = vmatprep.subr.bf16.mxu0 %v5916_v51 }
 0x134   : > { %5394 = vmatpush3.bf16.msra.mxu0 %v5918_v56 }
 0x135   : > { %5395 = vmatprep.subr.bf16.mxu0 %v5919_v57 }
 0x137   : > { %5576 = vmatmul.mubr.bf16.gmra.mrb[48].mxu0 %v1352_v29 }
 0x138   : > { %5579 = vmatprep.mubr.msk.bf16.mxu0 %vm6249_vm11, %v6248_v23  ;;  %5396 = vmatpush3.bf16.msra.mxu0 %v5921_v1 }
 0x139   : > { %5397 = vmatprep.subr.bf16.mxu0 %v5923_v7 }
 0x13c   : > { %5398 = vmatpush3.bf16.msra.mxu0 %v5924_v9 }
 0x13d   : > { %5399 = vmatprep.subr.bf16.mxu0 %v5927_v22 }
 0x13f   : > { %5580 = vmatmul.mubr.bf16.gmra.mrb[52].mxu0 %v1354_v32  ;;  %v5932_v32 = vld [vmem:[%s6663_s13 + $0xb8] sm:$0xff]  }
 0x140   : > { %5583 = vmatprep.mubr.msk.bf16.mxu0 %vm6249_vm11, %v6248_v23  ;;  %5400 = vmatpush3.bf16.msra.mxu0 %v5928_v17 }
 0x141   : > { %5401 = vmatprep.subr.bf16.mxu0 %v5931_v31 }
 0x144   : > { %5402 = vmatpush3.bf16.msra.mxu0 %v5932_v32 }
 0x145   : > { %5479 = vmatprep.subr.bf16.mxu0 %v5948_v48 }
 0x147   : > { %5584 = vmatmul.mubr.bf16.gmra.mrb[56].mxu0 %v1356_v35 }
 0x1aa   : > { %v5160_v52 = vpop.f32.mrb[0].mxu0 }
 0x1ab   : > { %v5206_v54 = vpop.f32.mrb[0].mxu1  ;;  %v5161_v55 = vpop.f32.mrb[1].mxu0 }
 0x1ac   : > { %v5162_v58 = vadd.f32 %v5161_v55, %v5160_v52  ;;  %v5207_v59 = vpop.f32.mrb[1].mxu1  ;;  %v5163_v60 = vpop.f32.mrb[2].mxu0 }
 0x1ad   : > { %v5208_v61 = vadd.f32 %v5207_v59, %v5206_v54  ;;  %v5209_v62 = vpop.f32.mrb[2].mxu1  ;;  %v5164_v63 = vpop.f32.mrb[3].mxu0 }
 0x1ae   : > { %v5165_v2 = vadd.f32 %v5164_v63, %v5163_v60  ;;  %v5210_v3 = vpop.f32.mrb[3].mxu1 }
 0x1af   : > { %v6687_v5 = vadd.f32 %v5208_v61, %v5162_v58  ;;  %v5211_v6 = vadd.f32 %v5210_v3, %v5209_v62 }
 0x1b1   : > { %v6690_v8 = vadd.f32 %v5211_v6, %v5165_v2 }
 0x1b2   : > { %v5166_v10 = vpop.f32.mrb[4].mxu0 }
 0x1b3   : > { %v5212_v11 = vpop.f32.mrb[4].mxu1  ;;  %v5167_v14 = vpop.f32.mrb[5].mxu0 }
 0x1b4   : > { %v5213_v15 = vpop.f32.mrb[5].mxu1  ;;  %v5168_v16 = vadd.f32 %v5167_v14, %v5166_v10  ;;  %v5169_v19 = vpop.f32.mrb[6].mxu0 }
 0x1b5   : > { %v5214_v18 = vadd.f32 %v5213_v15, %v5212_v11  ;;  %v5215_v20 = vpop.f32.mrb[6].mxu1  ;;  %v5170_v21 = vpop.f32.mrb[7].mxu0 }
 0x1b6   : > { %v5216_v24 = vpop.f32.mrb[7].mxu1  ;;  %v5171_v26 = vadd.f32 %v5170_v21, %v5169_v19 }
 0x1b7   : > { %v6697_v25 = vadd.f32 %v5214_v18, %v5168_v16  ;;  %v5217_v27 = vadd.f32 %v5216_v24, %v5215_v20 }
 0x1b9   : > { %v6700_v29 = vadd.f32 %v5217_v27, %v5171_v26 }
 0x1ba   : > { %v5172_v33 = vpop.f32.mrb[8].mxu0 }
 0x1bb   : > { %v5173_v34 = vpop.f32.mrb[9].mxu0  ;;  %v5218_v35 = vpop.f32.mrb[8].mxu1 }
 0x1bc   : > { %v5174_v36 = vadd.f32 %v5173_v34, %v5172_v33  ;;  %v5175_v37 = vpop.f32.mrb[10].mxu0  ;;  %v5219_v38 = vpop.f32.mrb[9].mxu1 }
 0x1bd   : > { %v5176_v39 = vpop.f32.mrb[11].mxu0  ;;  %v5220_v40 = vadd.f32 %v5219_v38, %v5218_v35  ;;  %v5221_v41 = vpop.f32.mrb[10].mxu1 }
 0x1be   : > { %v5177_v42 = vadd.f32 %v5176_v39, %v5175_v37  ;;  %v5222_v43 = vpop.f32.mrb[11].mxu1 }
 0x1bf   : > { %v6705_v44 = vadd.f32 %v5220_v40, %v5174_v36  ;;  %v5223_v45 = vadd.f32 %v5222_v43, %v5221_v41 }
 0x1c1   : > { %v6708_v47 = vadd.f32 %v5223_v45, %v5177_v42 }
 0x1c2   : > { %v5178_v49 = vpop.f32.mrb[12].mxu0 }
 0x1c3   : > { %v5224_v50 = vpop.f32.mrb[12].mxu1  ;;  %v5179_v51 = vpop.f32.mrb[13].mxu0 }
 0x1c4   : > { %v5180_v52 = vadd.f32 %v5179_v51, %v5178_v49  ;;  %v5225_v53 = vpop.f32.mrb[13].mxu1  ;;  %v5181_v54 = vpop.f32.mrb[14].mxu0 }
 0x1c5   : > { %v5226_v55 = vadd.f32 %v5225_v53, %v5224_v50  ;;  %v5227_v56 = vpop.f32.mrb[14].mxu1  ;;  %v5182_v57 = vpop.f32.mrb[15].mxu0 }
 0x1c6   : > { %v5183_v58 = vadd.f32 %v5182_v57, %v5181_v54  ;;  %v5228_v59 = vpop.f32.mrb[15].mxu1 }
 0x1c7   : > { %v6711_v60 = vadd.f32 %v5226_v55, %v5180_v52  ;;  %v5229_v61 = vadd.f32 %v5228_v59, %v5227_v56 }
 0x1c9   : > { %v6713_v62 = vadd.f32 %v5229_v61, %v5183_v58 }
 0x1ca   : > { %v5184_v63 = vpop.f32.mrb[16].mxu0 }
 0x1cb   : > { %v5185_v0 = vpop.f32.mrb[17].mxu0  ;;  %v5230_v1 = vpop.f32.mrb[16].mxu1 }
 0x1cc   : > { %v5186_v2 = vadd.f32 %v5185_v0, %v5184_v63  ;;  %v5187_v3 = vpop.f32.mrb[18].mxu0  ;;  %v5231_v4 = vpop.f32.mrb[17].mxu1 }
 0x1cd   : > { %v5188_v6 = vpop.f32.mrb[19].mxu0  ;;  %v5232_v7 = vadd.f32 %v5231_v4, %v5230_v1  ;;  %v5233_v9 = vpop.f32.mrb[18].mxu1 }
 0x1ce   : > { %v5189_v10 = vadd.f32 %v5188_v6, %v5187_v3  ;;  %v5234_v11 = vpop.f32.mrb[19].mxu1 }
 0x1cf   : > { %v6715_v12 = vadd.f32 %v5232_v7, %v5186_v2  ;;  %v5235_v13 = vadd.f32 %v5234_v11, %v5233_v9 }
 0x1d1   : > { %v6717_v14 = vadd.f32 %v5235_v13, %v5189_v10 }
 0x1d2   : > { %v5252_v15 = vpop.f32.mrb[20].mxu0 }
 0x1d3   : > { %v5253_v16 = vpop.f32.mrb[21].mxu0  ;;  %v5298_v17 = vpop.f32.mrb[20].mxu1 }
 0x1d4   : > { %v5254_v18 = vadd.f32 %v5253_v16, %v5252_v15  ;;  %v5255_v19 = vpop.f32.mrb[22].mxu0  ;;  %v5299_v24 = vpop.f32.mrb[21].mxu1 }
 0x1d5   : > { %v5256_v20 = vpop.f32.mrb[23].mxu0  ;;  %v5300_v27 = vadd.f32 %v5299_v24, %v5298_v17  ;;  %v5301_v28 = vpop.f32.mrb[22].mxu1 }
 0x1d6   : > { %v2025_v22 = vadd.f32 %v5254_v18, %v6687_v5  ;;  %v5257_v21 = vadd.f32 %v5256_v20, %v5255_v19  ;;  %v5302_v30 = vpop.f32.mrb[23].mxu1 }
 0x1d7   : > { %v5303_v31 = vadd.f32 %v5302_v30, %v5301_v28 }
 0x1d8   : > { %v2028_v26 = vadd.f32 %v5257_v21, %v6690_v8  ;;  %v6721_v32 = vadd.f32 %v5300_v27, %v2025_v22 }
 0x1da   : > { %v6723_v33 = vadd.f32 %v5303_v31, %v2028_v26  ;;  %v5258_v34 = vpop.f32.mrb[24].mxu0 }
 0x1db   : > { %v5259_v35 = vpop.f32.mrb[25].mxu0 }
 0x1dc   : > { %v5260_v36 = vadd.f32 %v5259_v35, %v5258_v34  ;;  %v5261_v37 = vpop.f32.mrb[26].mxu0  ;;  %v5304_v38 = vpop.f32.mrb[24].mxu1 }
 0x1dd   : > { %v5262_v39 = vpop.f32.mrb[27].mxu0  ;;  %v5305_v5 = vpop.f32.mrb[25].mxu1 }
 0x1de   : > { %v2033_v40 = vadd.f32 %v5260_v36, %v6697_v25  ;;  %v5263_v41 = vadd.f32 %v5262_v39, %v5261_v37  ;;  %v5306_v42 = vadd.f32 %v5305_v5, %v5304_v38  ;;  %v5307_v8 = vpop.f32.mrb[26].mxu1  ;;  %v708_v37 = vld [vmem:[%s6749_s25] sm:$0xf] }
 0x1df   : > { %v5308_v43 = vpop.f32.mrb[27].mxu1 }
 0x1e0   : > { %v2036_v45 = vadd.f32 %v5263_v41, %v6700_v29  ;;  %v5309_v46 = vadd.f32 %v5308_v43, %v5307_v8  ;;  %v6727_v48 = vadd.f32 %v5306_v42, %v2033_v40 }
 0x1e2   : > { %v5264_v49 = vpop.f32.mrb[28].mxu0  ;;  %v6729_v50 = vadd.f32 %v5309_v46, %v2036_v45 }
 0x1e3   : > { %v5265_v51 = vpop.f32.mrb[29].mxu0 }
 0x1e4   : > { %v5266_v52 = vadd.f32 %v5265_v51, %v5264_v49  ;;  %v5267_v53 = vpop.f32.mrb[30].mxu0  ;;  %v5310_v54 = vpop.f32.mrb[28].mxu1 }
 0x1e5   : > { %v5268_v55 = vpop.f32.mrb[31].mxu0  ;;  %v5311_v56 = vpop.f32.mrb[29].mxu1 }
 0x1e6   : > { %v2041_v25 = vadd.f32 %v5266_v52, %v6705_v44  ;;  %v5269_v57 = vadd.f32 %v5268_v55, %v5267_v53  ;;  %v5312_v58 = vadd.f32 %v5311_v56, %v5310_v54  ;;  %v5313_v59 = vpop.f32.mrb[30].mxu1  ;;  %v2209_v44 = vlaneseq  ;;  %v6774_v55 = vld [vmem:[%s7382_s7] sm:$0xff] }
 0x1e7   : > { %v5314_v61 = vpop.f32.mrb[31].mxu1 }
 0x1e8   : > { %v2044_v29 = vadd.f32 %v5269_v57, %v6708_v47  ;;  %v5315_v63 = vadd.f32 %v5314_v61, %v5313_v59  ;;  %v6733_v0 = vadd.f32 %v5312_v58, %v2041_v25  ;;  %v6743_v22 = vshrl.u32 %v2209_v44, 7  ;;  %v6780_v25 = vld [vmem:[%s7382_s7 + $0x8] sm:$0xff] }
 0x1ea   : > { %v5270_v1 = vpop.f32.mrb[32].mxu0  ;;  %v6735_v2 = vadd.f32 %v5315_v63, %v2044_v29  ;;  %v2211_v31 = vsub.s32 0, %v6743_v22  ;;  %v2225_v39 = vsub.s32 1, %v6743_v22 }
 0x1eb   : > { %v5271_v3 = vpop.f32.mrb[33].mxu0 }
 0x1ec   : > { %v5272_v4 = vadd.f32 %v5271_v3, %v5270_v1  ;;  %v5273_v6 = vpop.f32.mrb[34].mxu0  ;;  %v5316_v7 = vpop.f32.mrb[32].mxu1  ;;  %v6758_v42 = vrot.slane %v708_v37, %v2211_v31  ;;  %v6765_v45 = vrot.slane %v708_v37, %v2225_v39 }
 0x1ed   : > { %v5274_v9 = vpop.f32.mrb[35].mxu0  ;;  %v5317_v10 = vpop.f32.mrb[33].mxu1 }
 0x1ee   : > { %v2049_v11 = vadd.f32 %v5272_v4, %v6711_v60  ;;  %v5275_v13 = vadd.f32 %v5274_v9, %v5273_v6  ;;  %v5318_v15 = vadd.f32 %v5317_v10, %v5316_v7  ;;  %v5319_v16 = vpop.f32.mrb[34].mxu1 }
 0x1ef   : > { %v5320_v47 = vpop.f32.mrb[35].mxu1 }
 0x1f0   : > { %v2052_v18 = vadd.f32 %v5275_v13, %v6713_v62  ;;  %v5321_v19 = vadd.f32 %v5320_v47, %v5319_v16  ;;  %v6740_v20 = vadd.f32 %v5318_v15, %v2049_v11 }
 0x1f2   : > { %v5276_v17 = vpop.f32.mrb[36].mxu0  ;;  %v6745_v21 = vadd.f32 %v5321_v19, %v2052_v18  ;;  %v2403_v19 = vld [vmem:[#allocation3 + $0x4] sm:$0xe] }
 0x1f3   : > { %v5277_v24 = vpop.f32.mrb[37].mxu0 }
 0x1f4   : > { %v5278_v26 = vadd.f32 %v5277_v24, %v5276_v17  ;;  %v5279_v27 = vpop.f32.mrb[38].mxu0  ;;  %v5322_v60 = vpop.f32.mrb[36].mxu1 }
 0x1f5   : > { %v5280_v28 = vpop.f32.mrb[39].mxu0  ;;  %v5323_v30 = vpop.f32.mrb[37].mxu1 }
 0x1f6   : > { %v2057_v62 = vadd.f32 %v5278_v26, %v6715_v12  ;;  %v5281_v34 = vadd.f32 %v5280_v28, %v5279_v27  ;;  %v5324_v35 = vadd.f32 %v5323_v30, %v5322_v60  ;;  %v5325_v36 = vpop.f32.mrb[38].mxu1  ;;  %v6802_v30 = vld [vmem:[%s7382_s7 + $0x18] sm:$0xff] }
 0x1f7   : > { %v5326_v38 = vpop.f32.mrb[39].mxu1 }
 0x1f8   : > { %v2060_v5 = vadd.f32 %v5281_v34, %v6717_v14  ;;  %v5327_v40 = vadd.f32 %v5326_v38, %v5325_v36  ;;  %v6754_v41 = vadd.f32 %v5324_v35, %v2057_v62 }
 0x1fa   : > { %v2170_v12 = vpop.f32.mrb[40].mxu0  ;;  %v6760_v8 = vadd.f32 %v5327_v40, %v2060_v5 }
 0x1fb   : > { %v2171_v43 = vadd.f32 %v2170_v12, %v6721_v32  ;;  %v5569_v46 = vpop.f32.mrb[41].mxu0 }
 0x1fc   : > { %v2173_v49 = vpop.f32.mrb[42].mxu0 }
 0x1fd   : > { %v2213_v14 = vmul.f32 %v6758_v42, %v2171_v43  ;;  %v2174_v51 = vadd.f32 %v2173_v49, %v6723_v33  ;;  %v5570_v52 = vpop.f32.mrb[43].mxu0 }
 0x1ff   : > { %v2227_v53 = vadd.f32 %v6765_v45, %v2213_v14  ;;  %v2214_v54 = vmul.f32 %v6758_v42, %v2174_v51 }
 0x201   : > { %v2237_v32 = vmax.f32 %v2227_v53, 0.0  ;;  %v2228_v56 = vadd.f32 %v6765_v45, %v2214_v54 }
 0x202   : > { %v2178_v57 = vpop.f32.mrb[44].mxu0 }
 0x203   : > { %v2247_v33 = vmul.f32 %v2237_v32, %v6774_v55  ;;  %v2238_v58 = vmax.f32 %v2228_v56, 0.0  ;;  %v2179_v59 = vadd.f32 %v2178_v57, %v6727_v48  ;;  %v5573_v61 = vpop.f32.mrb[45].mxu0  ;;  %v6823_v56 = vld [vmem:[%s7382_s7 + $0x20] sm:$0xff] }
 0x204   : > { %v2181_v29 = vpop.f32.mrb[46].mxu0 }
 0x205   : > { %v5055_v63 = vpack.c.bf16 %v2247_v33, %v2247_v33  ;;  %v2248_v1 = vmul.f32 %v2238_v58, %v6780_v25  ;;  %v2215_v3 = vmul.f32 %v6758_v42, %v2179_v59  ;;  %v2182_v4 = vadd.f32 %v2181_v29, %v6729_v50  ;;  %v5574_v6 = vpop.f32.mrb[47].mxu0  ;;  %v6792_v50 = vld [vmem:[%s7382_s7 + $0x10] sm:$0xff] }
 0x207   : > { %v2291_v7 = vshrl.u32 %v5055_v63, 16  ;;  %v2294_v9 = vshll.u32 %v5055_v63, 16  ;;  %v5056_v10 = vpack.c.bf16 %v2248_v1, %v2248_v1  ;;  %v2229_v11 = vadd.f32 %v6765_v45, %v2215_v3 }
 0x208   : > { %v2216_v48 = vmul.f32 %v6758_v42, %v2182_v4 }
 0x209   : > { %v2293_v13 = vrot.slane %v2291_v7, 6  ;;  %v2296_v15 = vrot.slane %v2294_v9, 7  ;;  %v2300_v16 = vshrl.u32 %v5056_v10, 16  ;;  %v2303_v47 = vshll.u32 %v5056_v10, 16 }
 0x20a   : > { %v2239_v17 = vmax.f32 %v2229_v11, 0.0  ;;  %v2230_v24 = vadd.f32 %v6765_v45, %v2216_v48  ;;  %v2186_v26 = vpop.f32.mrb[48].mxu0  ;;  %v6832_v11 = vld [vmem:[%s7382_s7 + $0x28] sm:$0xff] }
 0x20b   : > { %v2297_v27 = vor.u32 %v2296_v15, %v2293_v13  ;;  %v2302_v60 = vrot.slane %v2300_v16, 6  ;;  %v2305_v28 = vrot.slane %v2303_v47, 7  ;;  %v2187_v62 = vadd.f32 %v2186_v26, %v6733_v0  ;;  %v5577_v34 = vpop.f32.mrb[49].mxu0 }
 0x20c   : > { %v2249_v36 = vmul.f32 %v2239_v17, %v6792_v50  ;;  %v2240_v37 = vmax.f32 %v2230_v24, 0.0  ;;  %v2189_v38 = vpop.f32.mrb[50].mxu0 }
 0x20d   : > { %v2298_v5 = vrot.slane %v2297_v27, 4  ;;  %v2404_v40 = vsel %vm6794_vm1, %v2297_v27, %v2403_v19  ;;  %v2306_v12 = vor.u32 %v2305_v28, %v2302_v60  ;;  %v2217_v43 = vmul.f32 %v6758_v42, %v2187_v62  ;;  %v5578_v46 = vpop.f32.mrb[51].mxu0 }
 0x20e   : > { %2405 = vst [vmem:[#allocation3 + $0x4] sm:$0xe] %v2404_v40  ;;  %v5057_v0 = vpack.c.bf16 %v2249_v36, %v2249_v36  ;;  %v2250_v49 = vmul.f32 %v2240_v37, %v6802_v30  ;;  %v2190_v14 = vadd.f32 %v2189_v38, %v6735_v2 }
 0x20f   : > { %v2307_v51 = vsel %vm6807_vm2, %v2298_v5, %v2306_v12  ;;  %v2231_v52 = vadd.f32 %v6765_v45, %v2217_v43  ;;  %v2308_v6 = vrot.slane %v2306_v12, 4 }
 0x210   : > { %2406 = vst [vmem:[#allocation3 + $0x8] sm:$0xf] %v2307_v51  ;;  %v2310_v53 = vshrl.u32 %v5057_v0, 16  ;;  %v2313_v54 = vshll.u32 %v5057_v0, 16  ;;  %v5058_v32 = vpack.c.bf16 %v2250_v49, %v2250_v49  ;;  %v2218_v57 = vmul.f32 %v6758_v42, %v2190_v14 }
 0x211   : > { %v2241_v33 = vmax.f32 %v2231_v52, 0.0 }
 0x212   : > { %v2312_v58 = vrot.slane %v2310_v53, 6  ;;  %v2315_v59 = vrot.slane %v2313_v54, 7  ;;  %v2320_v2 = vshrl.u32 %v5058_v32, 16  ;;  %v2323_v61 = vshll.u32 %v5058_v32, 16  ;;  %v2194_v29 = vpop.f32.mrb[52].mxu0  ;;  %v6857_v32 = vld [vmem:[%s7382_s7 + $0x38] sm:$0xff] }
 0x213   : > { %v2251_v63 = vmul.f32 %v2241_v33, %v6823_v56  ;;  %v2232_v1 = vadd.f32 %v6765_v45, %v2218_v57  ;;  %v2195_v3 = vadd.f32 %v2194_v29, %v6740_v20  ;;  %v5581_v4 = vpop.f32.mrb[53].mxu0 }
 0x214   : > { %v2316_v7 = vor.u32 %v2315_v59, %v2312_v58  ;;  %v2322_v9 = vrot.slane %v2320_v2, 6  ;;  %v2325_v10 = vrot.slane %v2323_v61, 7  ;;  %v2197_v48 = vpop.f32.mrb[54].mxu0 }
 0x215   : > { %v5059_v13 = vpack.c.bf16 %v2251_v63, %v2251_v63  ;;  %v2242_v15 = vmax.f32 %v2232_v1, 0.0  ;;  %v2219_v16 = vmul.f32 %v6758_v42, %v2195_v3  ;;  %v2198_v47 = vadd.f32 %v2197_v48, %v6745_v21  ;;  %v5582_v19 = vpop.f32.mrb[55].mxu0  ;;  %v5933_v26 = vld [vmem:[#allocation3] sm:$0xff]  }
 0x216   : > { %v2317_v20 = vsel %vm6807_vm2, %v2308_v6, %v2316_v7  ;;  %v2318_v17 = vrot.slane %v2316_v7, 4  ;;  %v2326_v24 = vor.u32 %v2325_v10, %v2322_v9  ;;  %v6845_v21 = vld [vmem:[%s7382_s7 + $0x30] sm:$0xff]  ;;  %v2507_v0 = vshll.u32 %v5933_v26, 16 }
 0x217   : > { %2407 = vst [vmem:[#allocation3 + $0xc] sm:$0xf] %v2317_v20  ;;  %v2330_v27 = vshrl.u32 %v5059_v13, 16  ;;  %v2333_v60 = vshll.u32 %v5059_v13, 16  ;;  %v2252_v28 = vmul.f32 %v2242_v15, %v6832_v11  ;;  %v2233_v62 = vadd.f32 %v6765_v45, %v2219_v16  ;;  %v6849_v49 = vld [vmem:[#allocation3 + $0x4] sm:$0xfe]  }
 0x218   : > { %v2327_v34 = vsel %vm6807_vm2, %v2318_v17, %v2326_v24  ;;  %v2328_v36 = vrot.slane %v2326_v24, 4  ;;  %v2220_v37 = vmul.f32 %v6758_v42, %v2198_v47  ;;  %v6851_v14 = vld [vmem:[#allocation3] sm:$0xfe]   ;;  %v2505_v2 = vshrl.u32 %v5933_v26, 16  ;;  %v6872_v17 = vld [vmem:[%s7382_s7 + $0x40] sm:$0xff] }
 0x219   : > { %2408 = vst [vmem:[#allocation3 + $0x10] sm:$0xf] %v2327_v34  ;;  %v2332_v38 = vrot.slane %v2330_v27, 6  ;;  %v2335_v5 = vrot.slane %v2333_v60, 7  ;;  %v5060_v40 = vpack.c.bf16 %v2252_v28, %v2252_v28  ;;  %v2243_v12 = vmax.f32 %v2233_v62, 0.0 }
 0x21a   : > { %v2234_v43 = vadd.f32 %v6765_v45, %v2220_v37  ;;  %v2202_v46 = vpop.f32.mrb[56].mxu0  ;;  %v2509_v61 = vrot.slane %v2507_v0, 1  ;;  %v2657_v15 = vrot.slane %v6849_v49, 1  ;;  %v2597_v16 = vrot.slane %v6851_v14, 1  ;;  %v5942_v49 = vld [vmem:[%s6663_s13 + $0x148] sm:$0xff]  }
 0x21b   : > { %v2336_v51 = vor.u32 %v2335_v5, %v2332_v38  ;;  %v2340_v52 = vshrl.u32 %v5060_v40, 16  ;;  %v2343_v53 = vshll.u32 %v5060_v40, 16  ;;  %v2253_v54 = vmul.f32 %v2243_v12, %v6845_v21  ;;  %v5585_v57 = vpop.f32.mrb[57].mxu0  ;;  %v6886_v5 = vld [vmem:[%s7382_s7 + $0x48] sm:$0xff]  ;;  %v5941_v40 = vld [vmem:[%s6663_s13 + $0x100] sm:$0xff]  }
 0x21c   : > { %v2244_v33 = vmax.f32 %v2234_v43, 0.0  ;;  %v2203_v58 = vadd.f32 %v2202_v46, %v6754_v41  ;;  %v2205_v59 = vpop.f32.mrb[58].mxu0  ;;  %v2510_v13 = vor.u32 %v2509_v61, %v2505_v2  ;;  %v5949_v12 = vld [vmem:[%s6663_s13 + $0x180] sm:$0xff]   ;;  %v5952_v14 = vld [vmem:[%s6663_s13 + $0x1c8] sm:$0xff]  }
 0x21d   : > { %v2337_v29 = vsel %vm6807_vm2, %v2328_v36, %v2336_v51  ;;  %v2338_v63 = vrot.slane %v2336_v51, 4  ;;  %v2342_v1 = vrot.slane %v2340_v52, 6  ;;  %v2345_v3 = vrot.slane %v2343_v53, 7  ;;  %v5586_v4 = vpop.f32.mrb[59].mxu0 }
 0x21e   : > { %2409 = vst [vmem:[#allocation3 + $0x14] sm:$0xf] %v2337_v29  ;;  %v5061_v6 = vpack.c.bf16 %v2253_v54, %v2253_v54  ;;  %v2254_v7 = vmul.f32 %v2244_v33, %v6857_v32  ;;  %v2221_v9 = vmul.f32 %v6758_v42, %v2203_v58  ;;  %v2206_v10 = vadd.f32 %v2205_v59, %v6760_v8  ;;  %v6865_v48 = vld [vmem:[#allocation3 + $0x8] sm:$0xff]   ;;  %v5937_v54 = vld [vmem:[#allocation3] sm:$0xff]  }
 0x21f   : > { %v2346_v41 = vor.u32 %v2345_v3, %v2342_v1  ;;  %v6877_v26 = vld [vmem:[#allocation3 + $0x8] sm:$0xff]   ;;  %v2512_v62 = vshll.u32 %v6865_v48, 16 }
 0x220   : > { %v2350_v47 = vshrl.u32 %v5061_v6, 16  ;;  %v2353_v19 = vshll.u32 %v5061_v6, 16  ;;  %v5062_v20 = vpack.c.bf16 %v2254_v7, %v2254_v7  ;;  %v2235_v8 = vadd.f32 %v6765_v45, %v2221_v9  ;;  %v6875_v24 = vld [vmem:[#allocation3 + $0xc] sm:$0xff]   ;;  %v5943_v7 = vld [vmem:[%s6663_s13 + $0x108] sm:$0xff]  }
 0x221   : > { %v2347_v27 = vsel %vm6807_vm2, %v2338_v63, %v2346_v41  ;;  %v2348_v60 = vrot.slane %v2346_v41, 4  ;;  %v2222_v28 = vmul.f32 %v6758_v42, %v2206_v10  ;;  %v2514_v0 = vrot.slane %v2512_v62, 1 }
 0x222   : > { %2410 = vst [vmem:[#allocation3 + $0x18] sm:$0xf] %v2347_v27  ;;  %v2352_v34 = vrot.slane %v2350_v47, 6  ;;  %v2355_v36 = vrot.slane %v2353_v19, 7  ;;  %v2360_v37 = vshrl.u32 %v5062_v20, 16  ;;  %v2363_v38 = vshll.u32 %v5062_v20, 16 }
 0x223   : > { %v2245_v43 = vmax.f32 %v2235_v8, 0.0  ;;  %v2236_v46 = vadd.f32 %v6765_v45, %v2222_v28  ;;  %v2658_v42 = vrot.slane %v6875_v24, 1  ;;  %v2598_v57 = vrot.slane %v6877_v26, 1  ;;  %v5960_v8 = vld [vmem:[%s6663_s13 + $0x1d0] sm:$0xff]   ;;  %v5962_v26 = vld [vmem:[%s6663_s13 + $0x160] sm:$0xff]  }
 0x224   : > { %v2356_v51 = vor.u32 %v2355_v36, %v2352_v34  ;;  %v2362_v52 = vrot.slane %v2360_v37, 6  ;;  %v2365_v53 = vrot.slane %v2363_v38, 7  ;;  %v2515_v59 = vsel %vm803_vm6, %v2510_v13, %v2514_v0  ;;  %v5950_v13 = vld [vmem:[%s6663_s13 + $0x150] sm:$0xff]   ;;  %v5956_v38 = vld [vmem:[%s6663_s13 + $0x158] sm:$0xff]  }
 0x225   : > { %v2255_v33 = vmul.f32 %v2245_v43, %v6872_v17  ;;  %v2246_v58 = vmax.f32 %v2236_v46, 0.0  ;;  %v2659_v45 = vsel %vm897_vm7, %v2657_v15, %v2658_v42  ;;  %v6900_v2 = vld [vmem:[#allocation3 + $0x10] sm:$0xff]   ;;  %3571 = vmatprep.mubr.bf16.mxu1 %v2515_v59  ;;  %v2599_v1 = vsel %vm897_vm7, %v2597_v16, %v2598_v57  ;;  %v5963_v46 = vld [vmem:[%s6663_s13 + $0x1d8] sm:$0xff]  }
 0x226   : > { %v2357_v61 = vsel %vm6807_vm2, %v2348_v60, %v2356_v51  ;;  %v2358_v29 = vrot.slane %v2356_v51, 4  ;;  %v2366_v63 = vor.u32 %v2365_v53, %v2362_v52  ;;  %3644 = vmatprep.mubr.bf16.mxu0 %v2659_v45  ;;  %v6907_v3 = vld [vmem:[#allocation3 + $0x10] sm:$0xff]   ;;  %3572 = vmatmul.mubr.bf16.vlgmr.msra.gmra.mrb[40].mxu1 %v5937_v54  ;;  %v2520_v9 = vshll.u32 %v6900_v2, 16  ;;  %v5946_v53 = vld [vmem:[#allocation3 + $0x8] sm:$0xff]  }
 0x227   : > { %2411 = vst [vmem:[#allocation3 + $0x1c] sm:$0xf] %v2357_v61  ;;  %v5063_v4 = vpack.c.bf16 %v2255_v33, %v2255_v33  ;;  %v2256_v6 = vmul.f32 %v2246_v58, %v6886_v5  ;;  %3645 = vmatmul.mubr.bf16.vlgmr.msra.gmra.mrb[60].mxu0 %v2599_v1  ;;  %5434 = vmatpush3.bf16.msra.mxu1 %v5941_v40  ;;  %v2516_v41 = vshrl.u32 %v6865_v48, 16  ;;  %v5953_v15 = vld [vmem:[%s6663_s13 + $0x188] sm:$0xff]   ;;  %v2600_v28 = vrot.slane %v6907_v3, 1  ;;  %v5951_v48 = vld [vmem:[%s6663_s13 + $0x110] sm:$0xff]  }
 0x228   : > { %v2367_v10 = vsel %vm6807_vm2, %v2358_v29, %v2366_v63  ;;  %5480 = vmatpush3.bf16.msra.mxu0 %v5949_v12  ;;  %5435 = vmatprep.subr.bf16.mxu1 %v5942_v49  ;;  %v2522_v60 = vrot.slane %v2520_v9, 1  ;;  %v5961_v40 = vld [vmem:[%s6663_s13 + $0x190] sm:$0xff]   ;;  %v2368_v49 = vrot.slane %v2366_v63, 4  ;;  %v2417_v54 = vld [vmem:[#allocation3 + $0x2c] sm:$0x3]  ;;  %v2524_v59 = vshrl.u32 %v6900_v2, 16 }
 0x229   : > { %2412 = vst [vmem:[#allocation3 + $0x20] sm:$0xf] %v2367_v10  ;;  %v2370_v16 = vshrl.u32 %v5063_v4, 16  ;;  %v2373_v47 = vshll.u32 %v5063_v4, 16  ;;  %v5064_v19 = vpack.c.bf16 %v2256_v6, %v2256_v6  ;;  %v6917_v20 = vld [vmem:[#allocation3 + $0x14] sm:$0xff]   ;;  %5481 = vmatprep.subr.bf16.mxu0 %v5952_v14  ;;  %v2518_v27 = vor.u32 %v2516_v41, %v2514_v0  ;;  %v5959_v45 = vld [vmem:[%s6663_s13 + $0x118] sm:$0xff]  }
 0x22a   : > { %v2660_v43 = vrot.slane %v6917_v20, 1  ;;  %v2601_v24 = vsel %vm897_vm7, %v2598_v57, %v2600_v28  ;;  %v2526_v57 = vor.u32 %v2524_v59, %v2522_v60  ;;  %v5964_v10 = vld [vmem:[%s6663_s13 + $0x120] sm:$0xff]   ;;  %v5965_v41 = vld [vmem:[%s6663_s13 + $0x198] sm:$0xff]  }
 0x22b   : > { %v2372_v62 = vrot.slane %v2370_v16, 6  ;;  %v2375_v34 = vrot.slane %v2373_v47, 7  ;;  %v2380_v36 = vshrl.u32 %v5064_v19, 16  ;;  %v2383_v37 = vshll.u32 %v5064_v19, 16  ;;  %5436 = vmatpush3.bf16.msra.mxu1 %v5943_v7  ;;  %v5987_v47 = vld [vmem:[#allocation3 + $0x10] sm:$0xff]  }
 0x22c   : > { %v2523_v12 = vsel %vm803_vm6, %v2518_v27, %v2522_v60  ;;  %5482 = vmatpush3.bf16.msra.mxu0 %v5953_v15  ;;  %5437 = vmatprep.subr.bf16.mxu1 %v5950_v13  ;;  %v2661_v33 = vsel %vm897_vm7, %v2658_v42, %v2660_v43  ;;  %v5970_v13 = vld [vmem:[%s6663_s13 + $0x1e0] sm:$0xff]  }
 0x22d   : > { %v2376_v0 = vor.u32 %v2375_v34, %v2372_v62  ;;  %v2382_v14 = vrot.slane %v2380_v36, 6  ;;  %v2385_v51 = vrot.slane %v2383_v37, 7  ;;  %3579 = vmatprep.mubr.bf16.mxu1 %v2523_v12  ;;  %5483 = vmatprep.subr.bf16.mxu0 %v5960_v8  ;;  %v5973_v8 = vld [vmem:[%s6663_s13 + $0x168] sm:$0xff]   ;;  %v5974_v60 = vld [vmem:[%s6663_s13 + $0x1a0] sm:$0xff]  }
 0x22e   : > { %v6936_v58 = vld [vmem:[#allocation3 + $0x18] sm:$0xff]   ;;  %3652 = vmatprep.mubr.bf16.mxu0 %v2661_v33  ;;  %3580 = vmatmul.mubr.bf16.gmra.mrb[44].mxu1 %v5946_v53  ;;  %v5957_v27 = vld [vmem:[#allocation3 + $0x10] sm:$0xff]   ;;  %v6968_v34 = vld [vmem:[#allocation3 + $0x8] sm:$0xfc]   ;;  %v2951_v53 = vshll.u32 %v5987_v47, 16 }
 0x22f   : > { %v2377_v61 = vsel %vm6807_vm2, %v2368_v49, %v2376_v0  ;;  %v2378_v29 = vrot.slane %v2376_v0, 4  ;;  %v2386_v63 = vor.u32 %v2385_v51, %v2382_v14  ;;  %v6947_v42 = vld [vmem:[#allocation3 + $0x18] sm:$0xff]   ;;  %3653 = vmatmul.mubr.bf16.gmra.mrb[64].mxu0 %v2601_v24  ;;  %5438 = vmatpush3.bf16.msra.mxu1 %v5951_v48  ;;  %v2528_v2 = vshll.u32 %v6936_v58, 16 }
 0x230   : > { %2413 = vst [vmem:[#allocation3 + $0x24] sm:$0xf] %v2377_v61  ;;  %v6950_v1 = vld [vmem:[#allocation3 + $0x1c] sm:$0xff]   ;;  %5439 = vmatprep.subr.bf16.mxu1 %v5956_v38  ;;  %5484 = vmatpush3.bf16.msra.mxu0 %v5961_v40  ;;  %v2602_v16 = vrot.slane %v6947_v42, 1  ;;  %v5976_v48 = vld [vmem:[%s6663_s13 + $0x1e8] sm:$0xff]   ;;  %v2948_v40 = vshrl.u32 %v5987_v47, 16 }
 0x231   : > { %v2387_v4 = vsel %vm6807_vm2, %v2378_v29, %v2386_v63  ;;  %v2388_v6 = vrot.slane %v2386_v63, 4  ;;  %v2530_v7 = vrot.slane %v2528_v2, 1  ;;  %v2662_v9 = vrot.slane %v6950_v1, 1  ;;  %5485 = vmatprep.subr.bf16.mxu0 %v5963_v46  ;;  %v5975_v62 = vld [vmem:[%s6663_s13 + $0x128] sm:$0xff]   ;;  %v5978_v38 = vld [vmem:[%s6663_s13 + $0x170] sm:$0xff]   ;;  %v6983_v63 = vld [vmem:[#allocation3 + $0xc] sm:$0xff]  }
 0x232   : > { %2414 = vst [vmem:[#allocation3 + $0x28] sm:$0xf] %v2387_v4  ;;  %v2603_v36 = vsel %vm897_vm7, %v2600_v28, %v2602_v16  ;;  %v2532_v12 = vshrl.u32 %v6936_v58, 16  ;;  %v5977_v0 = vld [vmem:[%s6663_s13 + $0x1a8] sm:$0xff]   ;;  %v5979_v51 = vld [vmem:[%s6663_s13 + $0x130] sm:$0xff]   ;;  %v5993_v58 = vld [vmem:[#allocation3 + $0xc] sm:$0xff]  }
 0x233   : > { %v2418_v15 = vsel %vm6929_vm4, %v2388_v6, %v2417_v54  ;;  %v2531_v19 = vsel %vm803_vm6, %v2526_v57, %v2530_v7  ;;  %v2663_v20 = vsel %vm897_vm7, %v2660_v43, %v2662_v9  ;;  %5440 = vmatpush3.bf16.msra.mxu1 %v5959_v45  ;;  %v5982_v29 = vld [vmem:[%s6663_s13 + $0x1f0] sm:$0xff]   ;;  %v2940_v24 = vshrl.u32 %v6968_v34, 16  ;;  %v5988_v1 = vld [vmem:[%s6663_s13 + $0x178] sm:$0xff]  }
 0x234   : > { %2419 = vst [vmem:[#allocation3 + $0x2c] sm:$0x3] %v2418_v15  ;;  %3587 = vmatprep.mubr.bf16.mxu1 %v2531_v19  ;;  %3660 = vmatprep.mubr.bf16.mxu0 %v2663_v20  ;;  %v2534_v54 = vor.u32 %v2532_v12, %v2530_v7  ;;  %v2943_v2 = vshll.u32 %v6968_v34, 16  ;;  %v5983_v7 = vld [vmem:[#allocation3 + $0x4] sm:$0xfc]   ;;  %v2953_v19 = vrot.slane %v2951_v53, 3 }
 0x235   : > { %5441 = vmatprep.subr.bf16.mxu1 %v5962_v26  ;;  %5486 = vmatpush3.bf16.msra.mxu0 %v5965_v41  ;;  %v5968_v26 = vld [vmem:[#allocation3 + $0x18] sm:$0xff]   ;;  %v2950_v41 = vrot.slane %v2948_v40, 2  ;;  %v5989_v20 = vld [vmem:[%s6663_s13 + $0x138] sm:$0xff]   ;;  %v2819_v34 = vrot.slane %v5983_v7, 2  ;;  %v2820_v42 = vrot.slane %v6983_v63, 2 }
 0x236   : > { %3588 = vmatmul.mubr.bf16.gmra.mrb[48].mxu1 %v5957_v27  ;;  %5487 = vmatprep.subr.bf16.mxu0 %v5970_v13  ;;  %v5992_v27 = vld [vmem:[#allocation3 + $0x4] sm:$0xfe]  }
 0x237   : > { %v5966_v37 = vld [vmem:[#allocation3 + $0x20] sm:$0xff]   ;;  %3661 = vmatmul.mubr.bf16.gmra.mrb[68].mxu0 %v2603_v36  ;;  %5442 = vmatpush3.bf16.msra.mxu1 %v5964_v10  ;;  %v2942_v36 = vrot.slane %v2940_v24, 2  ;;  %v2954_v12 = vor.u32 %v2953_v19, %v2950_v41 }
 0x238   : > { %v6977_v43 = vld [vmem:[#allocation3 + $0x20] sm:$0xff]   ;;  %v2536_v46 = vshll.u32 %v5966_v37, 16  ;;  %5443 = vmatprep.subr.bf16.mxu1 %v5973_v8  ;;  %v2540_v28 = vshrl.u32 %v5966_v37, 16  ;;  %v2945_v37 = vrot.slane %v2943_v2, 3 }
 0x239   : > { %v5967_v49 = vld [vmem:[#allocation3 + $0x24] sm:$0xff]   ;;  %v2604_v3 = vrot.slane %v6977_v43, 1  ;;  %5488 = vmatpush3.bf16.msra.mxu0 %v5974_v60  ;;  %v5985_v10 = vld [vmem:[%s6663_s13 + $0x1b0] sm:$0xff]  }
 0x23a   : > { %v5971_v14 = vld [vmem:[#allocation3 + $0x28] ss:$0 sps:$4 sm:$0x11]   ;;  %v2538_v33 = vrot.slane %v2536_v46, 1  ;;  %v2664_v59 = vrot.slane %v5967_v49, 1  ;;  %5489 = vmatprep.subr.bf16.mxu0 %v5976_v48  ;;  %v2718_v49 = vshrl.u32 %v5992_v27, 16 }
 0x23b   : > { %v2544_v45 = vshll.u32 %v5971_v14, 16  ;;  %v5972_v61 = vld [vmem:[#allocation3 + $0x2c] ss:$0 sps:$4 sm:$0x11]   ;;  %5444 = vmatpush3.bf16.msra.mxu1 %v5975_v62  ;;  %v5990_v8 = vld [vmem:[%s6663_s13 + $0x1f8] sm:$0xff]   ;;  %v5997_v62 = vld [vmem:[#allocation3 + $0x18] sm:$0xff]  }
 0x23c   : > { %v2539_v4 = vsel %vm803_vm6, %v2534_v54, %v2538_v33  ;;  %v2665_v6 = vsel %vm897_vm7, %v2662_v9, %v2664_v59  ;;  %v2542_v57 = vor.u32 %v2540_v28, %v2538_v33  ;;  %5445 = vmatprep.subr.bf16.mxu1 %v5978_v38  ;;  %v2666_v15 = vrot.slane %v5972_v61, 1  ;;  %v5981_v47 = vld [vmem:[#allocation3 + $0x28] ss:$0 sps:$4 sm:$0x11]   ;;  %v7002_v14 = vld [vmem:[#allocation3 + $0x10] sm:$0xff]   ;;  %v5980_v53 = vld [vmem:[#allocation3 + $0x20] sm:$0xff]  }
 0x23d   : > { %3595 = vmatprep.mubr.bf16.mxu1 %v2539_v4  ;;  %3668 = vmatprep.mubr.bf16.mxu0 %v2665_v6  ;;  %v2546_v13 = vrot.slane %v2544_v45, 1  ;;  %v2605_v9 = vsel %vm897_vm7, %v2602_v16, %v2604_v3  ;;  %v2726_v38 = vshrl.u32 %v5993_v58, 16  ;;  %v2729_v16 = vshll.u32 %v5993_v58, 16  ;;  %v5991_v46 = vld [vmem:[%s6663_s13 + $0x1b8] sm:$0xff]   ;;  %v6000_v45 = vld [vmem:[#allocation3 + $0x14] sm:$0xff]  }
 0x23e   : > { %3596 = vmatmul.mubr.bf16.gmra.mrb[52].mxu1 %v5968_v26  ;;  %5490 = vmatpush3.bf16.msra.mxu0 %v5977_v0  ;;  %v2667_v48 = vsel %vm897_vm7, %v2664_v59, %v2666_v15  ;;  %v2606_v40 = vrot.slane %v5981_v47, 1  ;;  %v2721_v0 = vshll.u32 %v5992_v27, 16  ;;  %v2957_v28 = vshrl.u32 %v5997_v62, 16  ;;  %v7005_v59 = vld [vmem:[#allocation3 + $0x14] sm:$0xff]   ;;  %v6003_v24 = vld [vmem:[#allocation3 + $0x20] sm:$0xff]  }
 0x23f   : > { %3669 = vmatmul.mubr.bf16.gmra.mrb[72].mxu0 %v2605_v9  ;;  %v2547_v60 = vsel %vm803_vm6, %v2542_v57, %v2546_v13  ;;  %5446 = vmatpush3.bf16.msra.mxu1 %v5979_v51  ;;  %v2960_v51 = vshll.u32 %v5997_v62, 16  ;;  %v2946_v54 = vor.u32 %v2945_v37, %v2942_v36  ;;  %v2728_v33 = vrot.slane %v2726_v38, 1  ;;  %v5994_v26 = vld [vmem:[#allocation3 + $0x8] sm:$0xfc]   ;;  %v6002_v36 = vld [vmem:[#allocation3 + $0x1c] sm:$0xff]  }
 0x240   : > { %3603 = vmatprep.mubr.bf16.mxu1 %v2547_v60  ;;  %3676 = vmatprep.mubr.bf16.mxu0 %v2667_v48  ;;  %v2731_v58 = vrot.slane %v2729_v16, 2  ;;  %v2607_v61 = vsel %vm897_vm7, %v2604_v3, %v2606_v40  ;;  %v2720_v2 = vrot.slane %v2718_v49, 1  ;;  %v2959_v4 = vrot.slane %v2957_v28, 2  ;;  %v6005_v60 = vld [vmem:[#allocation3 + $0x1c] sm:$0xff]   ;;  %v6009_v40 = vld [vmem:[#allocation3 + $0x28] sm:$0xff]  }
 0x241   : > { %5491 = vmatprep.subr.bf16.mxu0 %v5982_v29  ;;  %5447 = vmatprep.subr.bf16.mxu1 %v5988_v1  ;;  %v2821_v29 = vsel %vm1121_vm8, %v2819_v34, %v2820_v42  ;;  %v2955_v63 = vsel %vm1242_vm10, %v2946_v54, %v2954_v12  ;;  %v2723_v1 = vrot.slane %v2721_v0, 2  ;;  %v2962_v6 = vrot.slane %v2960_v51, 3  ;;  %v6001_v34 = vld [vmem:[#allocation3 + $0x18] sm:$0xff]  }
 0x242   : > { %5492 = vmatpush3.bf16.msra.mxu0 %v5985_v10  ;;  %v2732_v57 = vor.u32 %v2731_v58, %v2728_v33  ;;  %v2880_v43 = vrot.slane %v7002_v14, 2  ;;  %v2735_v7 = vshrl.u32 %v6000_v45, 16  ;;  %v2738_v3 = vshll.u32 %v6000_v45, 16  ;;  %v6004_v33 = vld [vmem:[%s6663_s13 + $0x210] sm:$0xff]   ;;  %v6011_v45 = vld [vmem:[#allocation3 + $0x24] sm:$0xff]  }
 0x243   : > { %5448 = vmatpush3.bf16.msra.mxu1 %v5989_v20  ;;  %5493 = vmatprep.subr.bf16.mxu0 %v5990_v8  ;;  %v2822_v10 = vrot.slane %v7005_v59, 2  ;;  %v2966_v41 = vshrl.u32 %v6003_v24, 16  ;;  %v2724_v13 = vor.u32 %v2723_v1, %v2720_v2  ;;  %v2963_v15 = vor.u32 %v2962_v6, %v2959_v4  ;;  %v5998_v20 = vld [vmem:[%s6663_s13 + $0x200] sm:$0xff]  }
 0x244   : > { %5587 = vmatprep.subr.bf16.mxu1 %v6248_v23  ;;  %v2969_v47 = vshll.u32 %v6003_v24, 16  ;;  %v2879_v19 = vrot.slane %v5994_v26, 2  ;;  %v2737_v9 = vrot.slane %v2735_v7, 1  ;;  %v2740_v27 = vrot.slane %v2738_v3, 2  ;;  %v6008_v24 = vld [vmem:[#allocation3 + $0x24] sm:$0xff]  }
 0x245   : > { %v2733_v8 = vsel %vm1018_vm9, %v2724_v13, %v2732_v57  ;;  %v2823_v62 = vsel %vm1121_vm8, %v2820_v42, %v2822_v10  ;;  %v2968_v37 = vrot.slane %v2966_v41, 2  ;;  %v2964_v38 = vsel %vm1242_vm10, %v2954_v12, %v2963_v15  ;;  %v6014_v6 = vld [vmem:[#allocation3 + $0x30] ss:$0 sps:$4 sm:$0x77]   ;;  %v6007_v26 = vld [vmem:[%s6663_s13 + $0x218] sm:$0xff]  }
 0x246   : > { %3604 = vmatmul.mubr.bf16.gmra.mrb[56].mxu1 %v5980_v53  ;;  %5494 = vmatpush3.bf16.msra.mxu0 %v5991_v46  ;;  %v2881_v48 = vsel %vm1121_vm8, %v2879_v19, %v2880_v43  ;;  %v2971_v16 = vrot.slane %v2969_v47, 3  ;;  %v5999_v46 = vld [vmem:[%s6663_s13 + $0x208] sm:$0xff]   ;;  %v2741_v49 = vor.u32 %v2740_v27, %v2737_v9  ;;  %v2744_v0 = vshrl.u32 %v6005_v60, 16  ;;  %v6010_v19 = vld [vmem:[%s6663_s13 + $0x220] sm:$0xff]  }
 0x247   : > { %3677 = vmatmul.mubr.bf16.gmra.mrb[76].mxu0 %v2607_v61  ;;  %3717 = vmatprep.mubr.bf16.mxu1 %v2821_v29  ;;  %v2747_v14 = vshll.u32 %v6005_v60, 16  ;;  %v2882_v28 = vrot.slane %v6001_v34, 2  ;;  %v2824_v42 = vrot.slane %v6002_v36, 2  ;;  %v2975_v53 = vshrl.u32 %v6009_v40, 16 }
 0x248   : > { %3790 = vmatprep.mubr.bf16.mxu0 %v2955_v63  ;;  %v2972_v51 = vor.u32 %v2971_v16, %v2968_v37  ;;  %v2978_v54 = vshll.u32 %v6009_v40, 16  ;;  %v2742_v12 = vsel %vm1018_vm9, %v2732_v57, %v2741_v49  ;;  %v2746_v59 = vrot.slane %v2744_v0, 1  ;;  %v6006_v63 = vld [vmem:[#allocation3 + $0x20] sm:$0xff]   ;;  %v6017_v9 = vld [vmem:[#allocation3 + $0x2c] ss:$0 sps:$4 sm:$0x33]  }
 0x249   : > { %v2749_v58 = vrot.slane %v2747_v14, 2  ;;  %v2883_v61 = vsel %vm1121_vm8, %v2880_v43, %v2882_v28  ;;  %v2825_v29 = vsel %vm1121_vm8, %v2822_v10, %v2824_v42  ;;  %v2977_v1 = vrot.slane %v2975_v53, 2 }
 0x24a   : > { %v2973_v2 = vsel %vm1242_vm10, %v2963_v15, %v2972_v51  ;;  %v2980_v4 = vrot.slane %v2978_v54, 3  ;;  %v2753_v7 = vshrl.u32 %v6011_v45, 16  ;;  %v2756_v43 = vshll.u32 %v6011_v45, 16 }
 0x24b   : > { %v2750_v57 = vor.u32 %v2749_v58, %v2746_v59  ;;  %v2884_v3 = vrot.slane %v6006_v63, 2  ;;  %v2826_v10 = vrot.slane %v6008_v24, 2  ;;  %v2984_v13 = vshrl.u32 %v6014_v6, 16  ;;  %v6019_v58 = vld [vmem:[%s6663_s13 + $0x238] sm:$0xff]   ;;  %v6021_v63 = vld [vmem:[#allocation3 + $0x10] sm:$0xff]  }
 0x24c   : > { %v2981_v41 = vor.u32 %v2980_v4, %v2977_v1  ;;  %v2987_v47 = vshll.u32 %v6014_v6, 16  ;;  %v2762_v40 = vshrl.u32 %v6017_v9, 16  ;;  %v3042_v1 = vrot.slane %v6021_v63, 3 }
 0x24d   : > { %v2751_v15 = vsel %vm1018_vm9, %v2741_v49, %v2750_v57  ;;  %v2885_v27 = vsel %vm1121_vm8, %v2882_v28, %v2884_v3  ;;  %v2827_v60 = vsel %vm1121_vm8, %v2824_v42, %v2826_v10  ;;  %v2986_v36 = vrot.slane %v2984_v13, 2  ;;  %v6016_v28 = vld [vmem:[%s6663_s13 + $0x230] sm:$0xff]  }
 0x24e   : > { %3718 = vmatmul.mubr.bf16.vlgmr.msra.gmra.mrb[60].mxu1 %v2733_v8  ;;  %v2758_v8 = vrot.slane %v2756_v43, 2  ;;  %v2982_v34 = vsel %vm1242_vm10, %v2972_v51, %v2981_v41  ;;  %v2989_v37 = vrot.slane %v2987_v47, 3  ;;  %v2764_v51 = vrot.slane %v2762_v40, 1  ;;  %v6023_v43 = vld [vmem:[#allocation3 + $0x20] sm:$0xff]  }
 0x24f   : > { %3791 = vmatmul.mubr.bf16.vlgmr.msra.gmra.mrb[80].mxu0 %v2881_v48  ;;  %3725 = vmatprep.mubr.bf16.mxu1 %v2823_v62  ;;  %v6012_v48 = vld [vmem:[#allocation3 + $0x28] sm:$0xff]  }
 0x250   : > { %3798 = vmatprep.mubr.bf16.mxu0 %v2964_v38  ;;  %5588 = vmatpush3.bf16.msra.mxu1 %v5998_v20  ;;  %v2755_v20 = vrot.slane %v2753_v7, 1  ;;  %v6013_v62 = vld [vmem:[#allocation3 + $0x2c] ss:$0 sps:$4 sm:$0x33]   ;;  %v6015_v38 = vld [vmem:[%s6663_s13 + $0x228] sm:$0xff]   ;;  %v2886_v49 = vrot.slane %v6012_v48, 2  ;;  %v2990_v14 = vor.u32 %v2989_v37, %v2986_v36 }
 0x251   : > { %5589 = vmatprep.subr.bf16.mxu1 %v6248_v23  ;;  %v2828_v0 = vrot.slane %v6013_v62, 2 }
 0x252   : > { %v2759_v16 = vor.u32 %v2758_v8, %v2755_v20  ;;  %v2887_v54 = vsel %vm1121_vm8, %v2884_v3, %v2886_v49  ;;  %v2991_v59 = vsel %vm1242_vm10, %v2981_v41, %v2990_v14  ;;  %v3046_v3 = vrot.slane %v6023_v43, 3  ;;  %v6024_v41 = vld [vmem:[#allocation3 + $0x28] sm:$0xff]  }
 0x253   : > { %v3048_v13 = vrot.slane %v6024_v41, 3 }
 0x254   : > { %5590 = vmatpush3.bf16.msra.mxu1 %v5999_v46  ;;  %v2765_v46 = vshll.u32 %v6017_v9, 16  ;;  %v2760_v42 = vsel %vm1018_vm9, %v2750_v57, %v2759_v16 }
 0x255   : > { %5591 = vmatprep.subr.bf16.mxu1 %v6248_v23  ;;  %v3049_v47 = vsel %vm1345_vm12, %v3046_v3, %v3048_v13 }
 0x256   : > { %3726 = vmatmul.mubr.bf16.gmra.mrb[64].mxu1 %v2742_v12  ;;  %v2767_v53 = vrot.slane %v2765_v46, 2  ;;  %v6018_v12 = vld [vmem:[#allocation3 + $0x30] ss:$0 sps:$4 sm:$0x33]  }
 0x257   : > { %3799 = vmatmul.mubr.bf16.gmra.mrb[84].mxu0 %v2883_v61  ;;  %3733 = vmatprep.mubr.bf16.mxu1 %v2825_v29  ;;  %v2888_v61 = vrot.slane %v6018_v12, 2 }
 0x258   : > { %3806 = vmatprep.mubr.bf16.mxu0 %v2973_v2  ;;  %5592 = vmatpush3.bf16.msra.mxu1 %v6004_v33  ;;  %v2829_v33 = vsel %vm1121_vm8, %v2826_v10, %v2828_v0  ;;  %v2768_v45 = vor.u32 %v2767_v53, %v2764_v51  ;;  %v6020_v2 = vld [vmem:[#allocation3 + $0x8] sm:$0xf8]  }
 0x259   : > { %5593 = vmatprep.subr.bf16.mxu1 %v6248_v23  ;;  %v2889_v24 = vsel %vm1121_vm8, %v2886_v49, %v2888_v61  ;;  %v3041_v4 = vrot.slane %v6020_v2, 3 }
 0x25a   : > { %v2769_v29 = vsel %vm1018_vm9, %v2759_v16, %v2768_v45 }
 0x25b   : > { %v3043_v6 = vsel %vm1345_vm12, %v3041_v4, %v3042_v1 }
 0x25c   : > { %5594 = vmatpush3.bf16.msra.mxu1 %v6007_v26  ;;  %v6022_v26 = vld [vmem:[#allocation3 + $0x18] sm:$0xff]  }
 0x25d   : > { %5595 = vmatprep.subr.bf16.mxu1 %v6248_v23  ;;  %v3044_v57 = vrot.slane %v6022_v26, 3 }
 0x25e   : > { %3734 = vmatmul.mubr.bf16.gmra.mrb[68].mxu1 %v2751_v15 }
 0x25f   : > { %3807 = vmatmul.mubr.bf16.gmra.mrb[88].mxu0 %v2885_v27  ;;  %3741 = vmatprep.mubr.bf16.mxu1 %v2827_v60  ;;  %v3045_v7 = vsel %vm1345_vm12, %v3042_v1, %v3044_v57  ;;  %v3047_v10 = vsel %vm1345_vm12, %v3044_v57, %v3046_v3 }
 0x260   : > { %3814 = vmatprep.mubr.bf16.mxu0 %v2982_v34  ;;  %5596 = vmatpush3.bf16.msra.mxu1 %v6010_v19  ;;  %v6025_v19 = vld [vmem:[#allocation3 + $0x30] ss:$0 sps:$4 sm:$0x77]  }
 0x261   : > { %5597 = vmatprep.subr.bf16.mxu1 %v6248_v23  ;;  %v3050_v15 = vrot.slane %v6025_v19, 3 }
 0x263   : > { %v3051_v20 = vsel %vm1345_vm12, %v3048_v13, %v3050_v15 }
 0x264   : > { %5598 = vmatpush3.bf16.msra.mxu1 %v6015_v38 }
 0x265   : > { %5599 = vmatprep.subr.bf16.mxu1 %v6248_v23 }
 0x266   : > { %3742 = vmatmul.mubr.bf16.gmra.mrb[72].mxu1 %v2760_v42 }
 0x267   : > { %3815 = vmatmul.mubr.bf16.gmra.mrb[92].mxu0 %v2887_v54  ;;  %3749 = vmatprep.mubr.bf16.mxu1 %v2829_v33 }
 0x268   : > { %3822 = vmatprep.mubr.bf16.mxu0 %v2991_v59  ;;  %5600 = vmatpush3.bf16.msra.mxu1 %v6016_v28 }
 0x269   : > { %5601 = vmatprep.subr.bf16.mxu1 %v6248_v23 }
 0x26c   : > { %5602 = vmatpush3.bf16.msra.mxu1 %v6019_v58 }
 0x26e   : > { %3750 = vmatmul.mubr.bf16.gmra.mrb[76].mxu1 %v2769_v29 }
 0x26f   : > { %3823 = vmatmul.mubr.bf16.gmra.mrb[96].mxu0 %v2889_v24  ;;  %5603 = vmatprep.mubr.msk.bf16.mxu1 %vm6249_vm11, %v6248_v23 }
 0x276   : > { %5604 = vmatmul.mubr.bf16.vlgmr.msra.gmra.mrb[80].mxu1 %v3043_v6 }
 0x277   : > { %5607 = vmatprep.mubr.msk.bf16.mxu1 %vm6249_vm11, %v6248_v23 }
 0x27e   : > { %5608 = vmatmul.mubr.bf16.gmra.mrb[84].mxu1 %v3045_v7 }
 0x27f   : > { %5611 = vmatprep.mubr.msk.bf16.mxu1 %vm6249_vm11, %v6248_v23 }
 0x286   : > { %5612 = vmatmul.mubr.bf16.gmra.mrb[88].mxu1 %v3047_v10 }
 0x287   : > { %5615 = vmatprep.mubr.msk.bf16.mxu1 %vm6249_vm11, %v6248_v23 }
 0x28e   : > { %5616 = vmatmul.mubr.bf16.gmra.mrb[92].mxu1 %v3049_v47 }
 0x28f   : > { %5619 = vmatprep.mubr.msk.bf16.mxu1 %vm6249_vm11, %v6248_v23 }
 0x296   : > { %5620 = vmatmul.mubr.bf16.gmra.mrb[96].mxu1 %v3051_v20 }
 0x2f9   : > { %v5357_v8 = vpop.f32.mrb[40].mxu1 }
 0x2fa   : > { %v5403_v9 = vpop.f32.mrb[60].mxu0  ;;  %v5358_v27 = vpop.f32.mrb[41].mxu1 }
 0x2fb   : > { %v5404_v60 = vpop.f32.mrb[61].mxu0  ;;  %v5359_v48 = vadd.f32 %v5358_v27, %v5357_v8  ;;  %v5360_v34 = vpop.f32.mrb[42].mxu1 }
 0x2fc   : > { %v5405_v62 = vadd.f32 %v5404_v60, %v5403_v9  ;;  %v5406_v36 = vpop.f32.mrb[62].mxu0  ;;  %v5361_v37 = vpop.f32.mrb[43].mxu1 }
 0x2fd   : > { %v5407_v38 = vpop.f32.mrb[63].mxu0  ;;  %v5362_v40 = vadd.f32 %v5361_v37, %v5360_v34 }
 0x2fe   : > { %v7062_v16 = vadd.f32 %v5405_v62, %v5359_v48  ;;  %v5408_v46 = vadd.f32 %v5407_v38, %v5406_v36 }
 0x300   : > { %v7064_v49 = vadd.f32 %v5408_v46, %v5362_v40 }
 0x301   : > { %v5363_v23 = vpop.f32.mrb[44].mxu1 }
 0x302   : > { %v5409_v0 = vpop.f32.mrb[64].mxu0  ;;  %v5364_v14 = vpop.f32.mrb[45].mxu1 }
 0x303   : > { %v5365_v28 = vadd.f32 %v5364_v14, %v5363_v23  ;;  %v5410_v42 = vpop.f32.mrb[65].mxu0  ;;  %v5366_v51 = vpop.f32.mrb[46].mxu1 }
 0x304   : > { %v5411_v53 = vadd.f32 %v5410_v42, %v5409_v0  ;;  %v5412_v54 = vpop.f32.mrb[66].mxu0  ;;  %v5367_v33 = vpop.f32.mrb[47].mxu1 }
 0x305   : > { %v5368_v12 = vadd.f32 %v5367_v33, %v5366_v51  ;;  %v5413_v59 = vpop.f32.mrb[67].mxu0 }
 0x306   : > { %v7066_v58 = vadd.f32 %v5411_v53, %v5365_v28  ;;  %v5414_v45 = vadd.f32 %v5413_v59, %v5412_v54 }
 0x308   : > { %v7068_v61 = vadd.f32 %v5414_v45, %v5368_v12 }
 0x309   : > { %v5369_v29 = vpop.f32.mrb[48].mxu1 }
 0x30a   : > { %v5415_v63 = vpop.f32.mrb[68].mxu0  ;;  %v5370_v24 = vpop.f32.mrb[49].mxu1 }
 0x30b   : > { %v5371_v2 = vadd.f32 %v5370_v24, %v5369_v29  ;;  %v5416_v1 = vpop.f32.mrb[69].mxu0  ;;  %v5372_v4 = vpop.f32.mrb[50].mxu1 }
 0x30c   : > { %v5417_v6 = vadd.f32 %v5416_v1, %v5415_v63  ;;  %v5418_v26 = vpop.f32.mrb[70].mxu0  ;;  %v5373_v57 = vpop.f32.mrb[51].mxu1 }
 0x30d   : > { %v5374_v7 = vadd.f32 %v5373_v57, %v5372_v4  ;;  %v5419_v43 = vpop.f32.mrb[71].mxu0 }
 0x30e   : > { %v7070_v3 = vadd.f32 %v5417_v6, %v5371_v2  ;;  %v5420_v10 = vadd.f32 %v5419_v43, %v5418_v26 }
 0x310   : > { %v7072_v41 = vadd.f32 %v5420_v10, %v5374_v7 }
 0x311   : > { %v5375_v13 = vpop.f32.mrb[52].mxu1 }
 0x312   : > { %v5421_v47 = vpop.f32.mrb[72].mxu0  ;;  %v5376_v19 = vpop.f32.mrb[53].mxu1 }
 0x313   : > { %v5377_v15 = vadd.f32 %v5376_v19, %v5375_v13  ;;  %v5422_v20 = vpop.f32.mrb[73].mxu0  ;;  %v5378_v8 = vpop.f32.mrb[54].mxu1 }
 0x314   : > { %v5423_v9 = vadd.f32 %v5422_v20, %v5421_v47  ;;  %v5424_v27 = vpop.f32.mrb[74].mxu0  ;;  %v5379_v60 = vpop.f32.mrb[55].mxu1 }
 0x315   : > { %v5380_v48 = vadd.f32 %v5379_v60, %v5378_v8  ;;  %v5425_v62 = vpop.f32.mrb[75].mxu0 }
 0x316   : > { %v7074_v34 = vadd.f32 %v5423_v9, %v5377_v15  ;;  %v5426_v36 = vadd.f32 %v5425_v62, %v5424_v27 }
 0x318   : > { %v7076_v37 = vadd.f32 %v5426_v36, %v5380_v48 }
 0x319   : > { %v5381_v38 = vpop.f32.mrb[56].mxu1 }
 0x31a   : > { %v5427_v40 = vpop.f32.mrb[76].mxu0  ;;  %v5382_v46 = vpop.f32.mrb[57].mxu1 }
 0x31b   : > { %v5383_v23 = vadd.f32 %v5382_v46, %v5381_v38  ;;  %v5428_v0 = vpop.f32.mrb[77].mxu0  ;;  %v5384_v14 = vpop.f32.mrb[58].mxu1 }
 0x31c   : > { %v5429_v28 = vadd.f32 %v5428_v0, %v5427_v40  ;;  %v5430_v42 = vpop.f32.mrb[78].mxu0  ;;  %v5385_v51 = vpop.f32.mrb[59].mxu1 }
 0x31d   : > { %v5386_v53 = vadd.f32 %v5385_v51, %v5384_v14  ;;  %v5431_v54 = vpop.f32.mrb[79].mxu0 }
 0x31e   : > { %v7078_v33 = vadd.f32 %v5429_v28, %v5383_v23  ;;  %v5432_v12 = vadd.f32 %v5431_v54, %v5430_v42 }
 0x320   : > { %v7080_v59 = vadd.f32 %v5432_v12, %v5386_v53 }
 0x321   : > { %v5449_v45 = vpop.f32.mrb[60].mxu1 }
 0x322   : > { %v5495_v29 = vpop.f32.mrb[80].mxu0  ;;  %v5450_v63 = vpop.f32.mrb[61].mxu1 }
 0x323   : > { %v5451_v24 = vadd.f32 %v5450_v63, %v5449_v45  ;;  %v5496_v2 = vpop.f32.mrb[81].mxu0  ;;  %v5452_v1 = vpop.f32.mrb[62].mxu1 }
 0x324   : > { %v5497_v4 = vadd.f32 %v5496_v2, %v5495_v29  ;;  %v5498_v6 = vpop.f32.mrb[82].mxu0  ;;  %v5453_v26 = vpop.f32.mrb[63].mxu1 }
 0x325   : > { %v3720_v57 = vadd.f32 %v5451_v24, %v7062_v16  ;;  %v5454_v7 = vadd.f32 %v5453_v26, %v5452_v1  ;;  %v5499_v43 = vpop.f32.mrb[83].mxu0 }
 0x326   : > { %v5500_v10 = vadd.f32 %v5499_v43, %v5498_v6 }
 0x327   : > { %v3723_v13 = vadd.f32 %v5454_v7, %v7064_v49  ;;  %v7084_v47 = vadd.f32 %v5497_v4, %v3720_v57 }
 0x329   : > { %v5455_v19 = vpop.f32.mrb[64].mxu1  ;;  %v7086_v15 = vadd.f32 %v5500_v10, %v3723_v13 }
 0x32a   : > { %v5501_v20 = vpop.f32.mrb[84].mxu0  ;;  %v5456_v8 = vpop.f32.mrb[65].mxu1 }
 0x32b   : > { %v5457_v9 = vadd.f32 %v5456_v8, %v5455_v19  ;;  %v5502_v27 = vpop.f32.mrb[85].mxu0  ;;  %v5458_v60 = vpop.f32.mrb[66].mxu1 }
 0x32c   : > { %v5503_v48 = vadd.f32 %v5502_v27, %v5501_v20  ;;  %v5504_v62 = vpop.f32.mrb[86].mxu0  ;;  %v5459_v36 = vpop.f32.mrb[67].mxu1 }
 0x32d   : > { %v3728_v16 = vadd.f32 %v5457_v9, %v7066_v58  ;;  %v5460_v38 = vadd.f32 %v5459_v36, %v5458_v60  ;;  %v5505_v40 = vpop.f32.mrb[87].mxu0 }
 0x32e   : > { %v5506_v46 = vadd.f32 %v5505_v40, %v5504_v62 }
 0x32f   : > { %v3731_v49 = vadd.f32 %v5460_v38, %v7068_v61  ;;  %v7090_v23 = vadd.f32 %v5503_v48, %v3728_v16 }
 0x331   : > { %v5461_v0 = vpop.f32.mrb[68].mxu1  ;;  %v7092_v14 = vadd.f32 %v5506_v46, %v3731_v49 }
 0x332   : > { %v5507_v28 = vpop.f32.mrb[88].mxu0  ;;  %v5462_v42 = vpop.f32.mrb[69].mxu1 }
 0x333   : > { %v5463_v51 = vadd.f32 %v5462_v42, %v5461_v0  ;;  %v5508_v53 = vpop.f32.mrb[89].mxu0  ;;  %v5464_v54 = vpop.f32.mrb[70].mxu1  ;;  %v3906_v42 = vsub.s32 2, %v6743_v22 }
 0x334   : > { %v5509_v12 = vadd.f32 %v5508_v53, %v5507_v28  ;;  %v5510_v45 = vpop.f32.mrb[90].mxu0  ;;  %v5465_v29 = vpop.f32.mrb[71].mxu1 }
 0x335   : > { %v3736_v58 = vadd.f32 %v5463_v51, %v7070_v3  ;;  %v5466_v63 = vadd.f32 %v5465_v29, %v5464_v54  ;;  %v5511_v24 = vpop.f32.mrb[91].mxu0  ;;  %v6026_v29 = vld [vmem:[%s6749_s25] sm:$0xf] }
 0x336   : > { %v5512_v2 = vadd.f32 %v5511_v24, %v5510_v45 }
 0x337   : > { %v3739_v61 = vadd.f32 %v5466_v63, %v7072_v41  ;;  %v3809_v1 = vadd.f32 %v5509_v12, %v3736_v58  ;;  %v3907_v58 = vrot.slane %v6026_v29, %v3906_v42 }
 0x339   : > { %v5467_v4 = vpop.f32.mrb[72].mxu1  ;;  %v3812_v6 = vadd.f32 %v5512_v2, %v3739_v61 }
 0x33a   : > { %v5513_v26 = vpop.f32.mrb[92].mxu0  ;;  %v5468_v57 = vpop.f32.mrb[73].mxu1 }
 0x33b   : > { %v5469_v7 = vadd.f32 %v5468_v57, %v5467_v4  ;;  %v5514_v43 = vpop.f32.mrb[93].mxu0  ;;  %v5470_v10 = vpop.f32.mrb[74].mxu1 }
 0x33c   : > { %v5515_v13 = vadd.f32 %v5514_v43, %v5513_v26  ;;  %v5516_v19 = vpop.f32.mrb[94].mxu0  ;;  %v5471_v20 = vpop.f32.mrb[75].mxu1 }
 0x33d   : > { %v3744_v8 = vadd.f32 %v5469_v7, %v7074_v34  ;;  %v5472_v9 = vadd.f32 %v5471_v20, %v5470_v10  ;;  %v5517_v3 = vpop.f32.mrb[95].mxu0 }
 0x33e   : > { %v5518_v27 = vadd.f32 %v5517_v3, %v5516_v19 }
 0x33f   : > { %v3747_v60 = vadd.f32 %v5472_v9, %v7076_v37  ;;  %v3817_v48 = vadd.f32 %v5515_v13, %v3744_v8  ;;  %v3920_v37 = vsub.s32 3, %v6743_v22 }
 0x341   : > { %v5473_v41 = vpop.f32.mrb[76].mxu1  ;;  %v3820_v62 = vadd.f32 %v5518_v27, %v3747_v60  ;;  %v3921_v61 = vrot.slane %v6026_v29, %v3920_v37 }
 0x342   : > { %v5519_v36 = vpop.f32.mrb[96].mxu0  ;;  %v5474_v16 = vpop.f32.mrb[77].mxu1 }
 0x343   : > { %v5475_v38 = vadd.f32 %v5474_v16, %v5473_v41  ;;  %v5520_v40 = vpop.f32.mrb[97].mxu0  ;;  %v5476_v46 = vpop.f32.mrb[78].mxu1 }
 0x344   : > { %v5521_v49 = vadd.f32 %v5520_v40, %v5519_v36  ;;  %v5522_v0 = vpop.f32.mrb[98].mxu0  ;;  %v5477_v28 = vpop.f32.mrb[79].mxu1 }
 0x345   : > { %v3752_v34 = vadd.f32 %v5475_v38, %v7078_v33  ;;  %v5478_v51 = vadd.f32 %v5477_v28, %v5476_v46  ;;  %v5523_v53 = vpop.f32.mrb[99].mxu0 }
 0x346   : > { %v5524_v54 = vadd.f32 %v5523_v53, %v5522_v0 }
 0x347   : > { %v3755_v12 = vadd.f32 %v5478_v51, %v7080_v59  ;;  %v3825_v45 = vadd.f32 %v5521_v49, %v3752_v34 }
 0x349   : > { %v3865_v63 = vpop.f32.mrb[80].mxu1  ;;  %v3828_v24 = vadd.f32 %v5524_v54, %v3755_v12 }
 0x34a   : > { %v3866_v2 = vadd.f32 %v3865_v63, %v7084_v47  ;;  %v5605_v4 = vpop.f32.mrb[81].mxu1 }
 0x34b   : > { %v3868_v26 = vpop.f32.mrb[82].mxu1 }
 0x34c   : > { %v3908_v57 = vmul.f32 %v3907_v58, %v3866_v2  ;;  %v3869_v33 = vadd.f32 %v3868_v26, %v7086_v15  ;;  %v5606_v7 = vpop.f32.mrb[83].mxu1 }
 0x34e   : > { %v7105_v43 = vadd.f32 %v3921_v61, %v3908_v57  ;;  %v3909_v10 = vmul.f32 %v3907_v58, %v3869_v33 }
 0x350   : > { %v7107_v13 = vadd.f32 %v3921_v61, %v3909_v10 }
 0x351   : > { %v3873_v59 = vpop.f32.mrb[84].mxu1 }
 0x352   : > { %v3874_v19 = vadd.f32 %v3873_v59, %v7090_v23  ;;  %v5609_v20 = vpop.f32.mrb[85].mxu1  ;;  %v3936_v59 = vmax.f32 (!%p4746_p10), %v7107_v13, 0.0 }
 0x353   : > { %v3876_v8 = vpop.f32.mrb[86].mxu1 }
 0x354   : > { %v3910_v9 = vmul.f32 %v3907_v58, %v3874_v19  ;;  %v3877_v47 = vadd.f32 %v3876_v8, %v7092_v14  ;;  %v5610_v3 = vpop.f32.mrb[87].mxu1 }
 0x356   : > { %v7111_v27 = vadd.f32 %v3921_v61, %v3910_v9  ;;  %v3911_v60 = vmul.f32 %v3907_v58, %v3877_v47  ;;  %v3946_v9 = vmul.f32 (!%p4746_p10), %v3936_v59, %v6780_v25 }
 0x358   : > { %v7113_v41 = vadd.f32 %v3921_v61, %v3911_v60  ;;  %v3937_v19 = vmax.f32 (!%p4746_p10), %v7111_v27, 0.0 }
 0x359   : > { %v3881_v15 = vpop.f32.mrb[88].mxu1 }
 0x35a   : > { %v3882_v36 = vadd.f32 %v3881_v15, %v3809_v1  ;;  %v5613_v16 = vpop.f32.mrb[89].mxu1  ;;  %v3947_v47 = vmul.f32 (!%p4746_p10), %v3937_v19, %v6792_v50 }
 0x35b   : > { %v3884_v38 = vpop.f32.mrb[90].mxu1 }
 0x35c   : > { %v3912_v40 = vmul.f32 %v3907_v58, %v3882_v36  ;;  %v3885_v46 = vadd.f32 %v3884_v38, %v3812_v6  ;;  %v5614_v49 = vpop.f32.mrb[91].mxu1 }
 0x35e   : > { %v7115_v0 = vadd.f32 %v3921_v61, %v3912_v40  ;;  %v3913_v23 = vmul.f32 %v3907_v58, %v3885_v46  ;;  %v5066_v40 = vpack.c.bf16 (!%p4746_p10), %v3946_v9, %v3946_v9  ;;  %v5067_v46 = vpack.c.bf16 (!%p4746_p10), %v3947_v47, %v3947_v47 }
 0x360   : > { %v7117_v28 = vadd.f32 %v3921_v61, %v3913_v23  ;;  %v3939_v20 = vmax.f32 (!%p4746_p10), %v7115_v0, 0.0 }
 0x361   : > { %v3889_v42 = vpop.f32.mrb[92].mxu1 }
 0x362   : > { %v3890_v14 = vadd.f32 %v3889_v42, %v3817_v48  ;;  %v5617_v34 = vpop.f32.mrb[93].mxu1  ;;  %v3949_v60 = vmul.f32 (!%p4746_p10), %v3939_v20, %v6823_v56 }
 0x363   : > { %v3892_v51 = vpop.f32.mrb[94].mxu1 }
 0x364   : > { %v3914_v53 = vmul.f32 %v3907_v58, %v3890_v14  ;;  %v3893_v54 = vadd.f32 %v3892_v51, %v3820_v62  ;;  %v5618_v37 = vpop.f32.mrb[95].mxu1  ;;  %v3935_v62 = vmax.f32 (!%p4746_p10), %v7105_v43, 0.0  ;;  %v5069_v23 = vpack.c.bf16 (!%p4746_p10), %v3949_v60, %v3949_v60 }
 0x365   : > { %v3998_v37 = vshll.u32 (!%p4746_p10), %v5066_v40, 16 }
 0x366   : > { %v7119_v12 = vadd.f32 %v3921_v61, %v3914_v53  ;;  %v3915_v1 = vmul.f32 %v3907_v58, %v3893_v54  ;;  %v3995_v54 = vshrl.u32 (!%p4746_p10), %v5066_v40, 16 }
 0x368   : > { %v7121_v29 = vadd.f32 %v3921_v61, %v3915_v1  ;;  %v3941_v8 = vmax.f32 (!%p4746_p10), %v7119_v12, 0.0  ;;  %v4005_v1 = vshrl.u32 (!%p4746_p10), %v5067_v46, 16 }
 0x369   : > { %v3897_v63 = vpop.f32.mrb[96].mxu1 }
 0x36a   : > { %v3898_v6 = vadd.f32 %v3897_v63, %v3825_v45  ;;  %v5621_v2 = vpop.f32.mrb[97].mxu1  ;;  %3934 = sbr.rel (%p4746_p10) target bundleno = 907 (0x38b), region = 76  ;;  %v3938_v45 = vmax.f32 (!%p4746_p10), %v7113_v41, 0.0  ;;  %v3951_v36 = vmul.f32 (!%p4746_p10), %v3941_v8, %v6845_v21  ;;  %v4008_v63 = vshll.u32 (!%p4746_p10), %v5067_v46, 16 }
 0x36b   : > { %v3900_v4 = vpop.f32.mrb[98].mxu1  ;;  %v4025_v8 = vshrl.u32 (!%p4746_p10), %v5069_v23, 16 }
 0x36c   : > { %v3916_v26 = vmul.f32 %v3907_v58, %v3898_v6  ;;  %v3901_v57 = vadd.f32 %v3900_v4, %v3828_v24  ;;  %v5622_v33 = vpop.f32.mrb[99].mxu1  ;;  %v3940_v24 = vmax.f32 (!%p4746_p10), %v7117_v28, 0.0  ;;  %v3948_v3 = vmul.f32 (!%p4746_p10), %v3938_v45, %v6802_v30 }
 0x36d   : > { %v5071_v14 = vpack.c.bf16 (!%p4746_p10), %v3951_v36, %v3951_v36  ;;  %v4000_v33 = vrot.slane (!%p4746_p10), %v3998_v37, 7  ;;  %v4010_v59 = vrot.slane (!%p4746_p10), %v4008_v63, 7 }
 0x36e   : > { %v7123_v7 = vadd.f32 %v3921_v61, %v3916_v26  ;;  %v3917_v48 = vmul.f32 %v3907_v58, %v3901_v57  ;;  %v3942_v58 = vmax.f32 (!%p4746_p10), %v7121_v29, 0.0  ;;  %v3950_v15 = vmul.f32 (!%p4746_p10), %v3940_v24, %v6832_v11 }
 0x36f   : > { %v5068_v49 = vpack.c.bf16 (!%p4746_p10), %v3948_v3, %v3948_v3  ;;  %v3997_v57 = vrot.slane (!%p4746_p10), %v3995_v54, 6  ;;  %v4045_v54 = vshrl.u32 (!%p4746_p10), %v5071_v14, 16 }
 0x370   : > { %v7125_v10 = vadd.f32 %v3921_v61, %v3917_v48  ;;  %v3945_v61 = vmul.f32 (!%p4746_p10), %v3935_v62, %v6774_v55  ;;  %v3952_v16 = vmul.f32 (!%p4746_p10), %v3942_v58, %v6857_v32  ;;  %v5070_v42 = vpack.c.bf16 (!%p4746_p10), %v3950_v15, %v3950_v15  ;;  %v4095_v48 = vld [vmem:[#allocation2 + $0x4] sm:$0xe] (!%p4746_p10) }
 0x371   : > { %v4015_v6 = vshrl.u32 %v5068_v49, 16  ;;  %v4018_v2 = vshll.u32 %v5068_v49, 16  ;;  %v4007_v62 = vrot.slane %v4005_v1, 6  ;;  %v4001_v24 = vor.u32 %v4000_v33, %v3997_v57 }
 0x372   : > { %v5065_v38 = vpack.c.bf16 %v3945_v61, %v3945_v61  ;;  %v5072_v34 = vpack.c.bf16 %v3952_v16, %v3952_v16  ;;  %v4028_v58 = vshll.u32 %v5069_v23, 16  ;;  %v4035_v47 = vshrl.u32 %v5070_v42, 16 }
 0x373   : > { %v4017_v19 = vrot.slane %v4015_v6, 6  ;;  %v4020_v45 = vrot.slane %v4018_v2, 7  ;;  %v4011_v61 = vor.u32 %v4010_v59, %v4007_v62  ;;  %v4038_v3 = vshll.u32 %v5070_v42, 16 }
 0x374   : > { %v3986_v51 = vshrl.u32 %v5065_v38, 16  ;;  %v3989_v53 = vshll.u32 %v5065_v38, 16  ;;  %v4003_v36 = vrot.slane %v4001_v24, 4  ;;  %v4027_v16 = vrot.slane %v4025_v8, 6 }
 0x375   : > { %v4021_v9 = vor.u32 %v4020_v45, %v4017_v19  ;;  %v4013_v38 = vrot.slane %v4011_v61, 4  ;;  %v4030_v46 = vrot.slane %v4028_v58, 7  ;;  %v4037_v49 = vrot.slane %v4035_v47, 6 }
 0x376   : > { %v3988_v4 = vrot.slane %v3986_v51, 6  ;;  %v3991_v26 = vrot.slane %v3989_v53, 7  ;;  %v4012_v23 = vsel %vm6807_vm2, %v4003_v36, %v4011_v61  ;;  %v4040_v53 = vrot.slane %v4038_v3, 7 }
 0x377   : > { %v4023_v40 = vrot.slane %v4021_v9, 4  ;;  %4099 = vst [vmem:[#allocation2 + $0xc] sm:$0xf] %v4012_v23  ;;  %v4022_v42 = vsel %vm6807_vm2, %v4013_v38, %v4021_v9  ;;  %v4031_v37 = vor.u32 %v4030_v46, %v4027_v16  ;;  %v4048_v1 = vshll.u32 %v5071_v14, 16 }
 0x378   : > { %v3992_v20 = vor.u32 %v3991_v26, %v3988_v4  ;;  %v4055_v63 = vshrl.u32 %v5072_v34, 16  ;;  %4100 = vst [vmem:[#allocation2 + $0x10] sm:$0xf] %v4022_v42  ;;  %v4041_v6 = vor.u32 %v4040_v53, %v4037_v49  ;;  %v4047_v2 = vrot.slane %v4045_v54, 6 }
 0x379   : > { %v4058_v4 = vshll.u32 %v5072_v34, 16  ;;  %v3943_v26 = vmax.f32 %v7123_v7, 0.0  ;;  %v4032_v57 = vsel %vm6807_vm2, %v4023_v40, %v4031_v37  ;;  %v4033_v33 = vrot.slane %v4031_v37, 4  ;;  %v4107_v37 = vld [vmem:[#allocation2 + $0x2c] sm:$0x3] }
 0x37a   : > { %v4096_v60 = vsel %vm6794_vm1, %v3992_v20, %v4095_v48  ;;  %v3993_v15 = vrot.slane %v3992_v20, 4  ;;  %v4050_v48 = vrot.slane %v4048_v1, 7  ;;  %v4057_v62 = vrot.slane %v4055_v63, 6  ;;  %4101 = vst [vmem:[#allocation2 + $0x14] sm:$0xf] %v4032_v57 }
 0x37b   : > { %4097 = vst [vmem:[#allocation2 + $0x4] sm:$0xe] %v4096_v60  ;;  %v4043_v59 = vrot.slane %v4041_v6, 4  ;;  %v4060_v19 = vrot.slane %v4058_v4, 7  ;;  %v3953_v45 = vmul.f32 %v3943_v26, %v6872_v17  ;;  %v3944_v14 = vmax.f32 %v7125_v10, 0.0 }
 0x37c   : > { %v4002_v51 = vsel %vm6807_vm2, %v3993_v15, %v4001_v24  ;;  %v4042_v20 = vsel %vm6807_vm2, %v4033_v33, %v4041_v6  ;;  %v4051_v24 = vor.u32 %v4050_v48, %v4047_v2 }
 0x37d   : > { %4098 = vst [vmem:[#allocation2 + $0x8] sm:$0xf] %v4002_v51  ;;  %4102 = vst [vmem:[#allocation2 + $0x18] sm:$0xf] %v4042_v20  ;;  %v4061_v34 = vor.u32 %v4060_v19, %v4057_v62  ;;  %v5073_v8 = vpack.c.bf16 %v3953_v45, %v3953_v45  ;;  %v3954_v58 = vmul.f32 %v3944_v14, %v6886_v5 }
 0x37e   : > { %v4052_v61 = vsel %vm6807_vm2, %v4043_v59, %v4051_v24  ;;  %v4053_v9 = vrot.slane %v4051_v24, 4 }
 0x37f   : > { %4103 = vst [vmem:[#allocation2 + $0x1c] sm:$0xf] %v4052_v61  ;;  %v4065_v47 = vshrl.u32 %v5073_v8, 16  ;;  %v4068_v3 = vshll.u32 %v5073_v8, 16  ;;  %v5074_v60 = vpack.c.bf16 %v3954_v58, %v3954_v58  ;;  %v4063_v36 = vrot.slane %v4061_v34, 4 }
 0x380   : > { %v4062_v15 = vsel %vm6807_vm2, %v4053_v9, %v4061_v34 }
 0x381   : > { %4104 = vst [vmem:[#allocation2 + $0x20] sm:$0xf] %v4062_v15  ;;  %v4067_v16 = vrot.slane %v4065_v47, 6  ;;  %v4070_v38 = vrot.slane %v4068_v3, 7  ;;  %v4075_v40 = vshrl.u32 %v5074_v60, 16  ;;  %v4078_v46 = vshll.u32 %v5074_v60, 16 }
 0x383   : > { %v4071_v49 = vor.u32 %v4070_v38, %v4067_v16  ;;  %v4077_v51 = vrot.slane %v4075_v40, 6  ;;  %v4080_v23 = vrot.slane %v4078_v46, 7 }
 0x385   : > { %v4072_v53 = vsel %vm6807_vm2, %v4063_v36, %v4071_v49  ;;  %v4073_v54 = vrot.slane %v4071_v49, 4  ;;  %v4081_v42 = vor.u32 %v4080_v23, %v4077_v51 }
 0x386   : > { %4105 = vst [vmem:[#allocation2 + $0x24] sm:$0xf] %v4072_v53 }
 0x387   : > { %v4082_v1 = vsel %vm6807_vm2, %v4073_v54, %v4081_v42  ;;  %v4083_v63 = vrot.slane %v4081_v42, 4 }
 0x388   : > { %4106 = vst [vmem:[#allocation2 + $0x28] sm:$0xf] %v4082_v1 }
 0x389   : > { %v4108_v6 = vsel %vm6929_vm4, %v4083_v63, %v4107_v37 }
 0x38a   : > { %4109 = vst [vmem:[#allocation2 + $0x2c] sm:$0x3] %v4108_v6 }
 0x38b PF: > { %p5021_p12 = scmp.le.s32.totalorder %s6221_s15, 0 }
 0x38c   : > { %v7172_v2 = vld [vmem:[#allocation2 + $0x4] sm:$0xe] (!%p5021_p12)  ;;  %v5136_v4 = vld [vmem:[#allocation2 + $0x8] sm:$0xff] (!%p5021_p12)   ;;  %v5137_v26 = vld [vmem:[#allocation2 + $0x10] sm:$0xff] (!%p5021_p12)   ;;  %p5032_p13 = scmp.ne.s32.totalorder (!%p5021_p12), %s6221_s15, 13 }
 0x38d   : > { %4113 = sbr.rel (%p5021_p12) target bundleno = 1211 (0x4bb), region = 80  ;;  %v5097_v57 = vunpack.c.l.bf16 (!%p5021_p12), %v5136_v4  ;;  %v4125_v33 = vunpack.c.l.bf16 (!%p5021_p12), %v7172_v2  ;;  %v5098_v48 = vunpack.c.h.bf16 (!%p5021_p12), %v5136_v4  ;;  %v5101_v62 = vunpack.c.l.bf16 (!%p5021_p12), %v5137_v26  ;;  %v5138_v59 = vld [vmem:[#allocation2 + $0x18] sm:$0xff] (!%p5021_p12)   ;;  %v5139_v19 = vld [vmem:[#allocation2 + $0x20] sm:$0xff] (!%p5021_p12)  }
 0x38e   : > { %v5102_v45 = vunpack.c.h.bf16 (!%p5021_p12), %v5137_v26  ;;  %v5105_v14 = vunpack.c.l.bf16 (!%p5021_p12), %v5138_v59  ;;  %v5106_v20 = vunpack.c.h.bf16 (!%p5021_p12), %v5138_v59  ;;  %v5109_v24 = vunpack.c.l.bf16 (!%p5021_p12), %v5139_v19 }
 0x38f   : > { %v4148_v34 = vrot.slane (!%p5021_p12), %v4125_v33, 3  ;;  %v4149_v8 = vrot.slane (!%p5021_p12), %v5097_v57, 3  ;;  %v4151_v58 = vrot.slane (!%p5021_p12), %v5098_v48, 3  ;;  %v4153_v61 = vrot.slane (!%p5021_p12), %v5101_v62, 3 }
 0x390   : > { %v4155_v9 = vrot.slane (!%p5021_p12), %v5102_v45, 3  ;;  %v4157_v47 = vrot.slane (!%p5021_p12), %v5105_v14, 3  ;;  %v4159_v3 = vrot.slane (!%p5021_p12), %v5106_v20, 3  ;;  %v4161_v60 = vrot.slane (!%p5021_p12), %v5109_v24, 3 }
 0x391   : > { %v4150_v15 = vsel (!%p5021_p12), %vm1345_vm12, %v4148_v34, %v4149_v8  ;;  %v4152_v36 = vsel (!%p5021_p12), %vm1345_vm12, %v4149_v8, %v4151_v58  ;;  %v4154_v16 = vsel (!%p5021_p12), %vm1345_vm12, %v4151_v58, %v4153_v61  ;;  %v5110_v38 = vunpack.c.h.bf16 (!%p5021_p12), %v5139_v19 }
 0x392   : > { %v4179_v40 = vadd.f32 (!%p5021_p12), %v4150_v15, %v7105_v43  ;;  %v4180_v46 = vadd.f32 (!%p5021_p12), %v4152_v36, %v7107_v13  ;;  %v4181_v49 = vadd.f32 (!%p5021_p12), %v4154_v16, %v7111_v27  ;;  %v4156_v51 = vsel (!%p5021_p12), %vm1345_vm12, %v4153_v61, %v4155_v9 }
 0x393   : > { %v4182_v23 = vadd.f32 (!%p5021_p12), %v4156_v51, %v7113_v41  ;;  %v4158_v53 = vsel (!%p5021_p12), %vm1345_vm12, %v4155_v9, %v4157_v47  ;;  %v4160_v54 = vsel (!%p5021_p12), %vm1345_vm12, %v4157_v47, %v4159_v3  ;;  %v4162_v42 = vsel (!%p5021_p12), %vm1345_vm12, %v4159_v3, %v4161_v60 }
 0x394   : > { %v4189_v37 = vmax.f32 %v4179_v40, 0.0  ;;  %v4190_v1 = vmax.f32 %v4180_v46, 0.0  ;;  %v4191_v63 = vmax.f32 %v4181_v49, 0.0  ;;  %v4183_v6 = vadd.f32 %v4158_v53, %v7115_v0  ;;  %v6029_v35 = vld [vmem:[#allocation12 + $0x10] sm:$0xff] (!%p5032_p13)   ;;  %v6030_v52 = vld [vmem:[#allocation12 + $0x18] sm:$0xff] (!%p5032_p13)  }
 0x395   : > { %v4192_v43 = vmax.f32 %v4182_v23, 0.0  ;;  %v4184_v13 = vadd.f32 %v4160_v54, %v7117_v28  ;;  %v4185_v27 = vadd.f32 %v4162_v42, %v7119_v12  ;;  %v7189_v4 = vrot.slane %v5110_v38, 3 }
 0x396   : > { %v7192_v41 = vmul.f32 %v4189_v37, %v6774_v55  ;;  %v7195_v26 = vmul.f32 %v4190_v1, %v6780_v25  ;;  %v7198_v57 = vmul.f32 %v4191_v63, %v6792_v50  ;;  %v4193_v33 = vmax.f32 %v4183_v6, 0.0  ;;  %v4123_v6 = vld [vmem:[#allocation2 + $0x28] sm:$0xf] }
 0x397   : > { %v7201_v48 = vmul.f32 %v4192_v43, %v6802_v30  ;;  %v4194_v0 = vmax.f32 %v4184_v13, 0.0  ;;  %v4195_v62 = vmax.f32 %v4185_v27, 0.0  ;;  %v4164_v28 = vsel %vm1345_vm12, %v4161_v60, %v7189_v4 }
 0x398   : > { %v5075_v12 = vpack.c.bf16 %v7192_v41, %v7192_v41  ;;  %v4209_v55 = vpack.c.bf16 %v7195_v26, %v7192_v41  ;;  %v5076_v25 = vpack.c.bf16 %v7195_v26, %v7195_v26  ;;  %v5077_v50 = vpack.c.bf16 %v7198_v57, %v7198_v57  ;;  %v4504_v41 = vld [vmem:[#allocation14] sm:$0x3] (!%p5032_p13) }
 0x399   : > { %v4210_v30 = vpack.c.bf16 %v7201_v48, %v7198_v57  ;;  %v5078_v59 = vpack.c.bf16 %v7201_v48, %v7201_v48  ;;  %v7218_v19 = vmul.f32 %v4193_v33, %v6823_v56  ;;  %v7221_v45 = vmul.f32 %v4194_v0, %v6832_v11  ;;  %v4124_v0 = vld [vmem:[#allocation2 + $0x2c] sm:$0x3] }
 0x39a   : > { %v4240_v14 = vshrl.u32 %v5075_v12, 16  ;;  %v4243_v20 = vshll.u32 %v5075_v12, 16  ;;  %v4249_v24 = vshrl.u32 %v5076_v25, 16  ;;  %v4252_v34 = vshll.u32 %v5076_v25, 16 }
 0x39b   : > { %v4259_v8 = vshrl.u32 %v5077_v50, 16  ;;  %v4262_v58 = vshll.u32 %v5077_v50, 16  ;;  %v4269_v61 = vshrl.u32 %v5078_v59, 16  ;;  %v4272_v9 = vshll.u32 %v5078_v59, 16 }
 0x39c   : > { %v4242_v47 = vrot.slane %v4240_v14, 6  ;;  %v4245_v3 = vrot.slane %v4243_v20, 7  ;;  %v4251_v60 = vrot.slane %v4249_v24, 6  ;;  %v4254_v15 = vrot.slane %v4252_v34, 7 }
 0x39d   : > { %v4261_v36 = vrot.slane %v4259_v8, 6  ;;  %v4264_v16 = vrot.slane %v4262_v58, 7  ;;  %v4271_v38 = vrot.slane %v4269_v61, 6  ;;  %v4274_v56 = vrot.slane %v4272_v9, 7 }
 0x39e   : > { %v4246_v40 = vor.u32 %v4245_v3, %v4242_v47  ;;  %v4255_v46 = vor.u32 %v4254_v15, %v4251_v60  ;;  %v5079_v11 = vpack.c.bf16 %v7218_v19, %v7218_v19  ;;  %v4211_v49 = vpack.c.bf16 %v7221_v45, %v7218_v19 }
 0x39f   : > { %v4265_v51 = vor.u32 %v4264_v16, %v4261_v36  ;;  %v4275_v23 = vor.u32 %v4274_v56, %v4271_v38  ;;  %v5080_v53 = vpack.c.bf16 %v7221_v45, %v7221_v45  ;;  %v7230_v54 = vmul.f32 %v4195_v62, %v6845_v21 }
 0x3a0   : > { %v4349_v42 = vsel %vm6794_vm1, %v4246_v40, %v7172_v2  ;;  %v4247_v37 = vrot.slane %v4246_v40, 4  ;;  %v4257_v1 = vrot.slane %v4255_v46, 4  ;;  %v4279_v63 = vshrl.u32 %v5079_v11, 16 }
 0x3a1   : > { %4350 = vst [vmem:[#allocation2 + $0x4] sm:$0xe] %v4349_v42  ;;  %v4267_v43 = vrot.slane %v4265_v51, 4  ;;  %v4277_v13 = vrot.slane %v4275_v23, 4  ;;  %v4282_v27 = vshll.u32 %v5079_v11, 16  ;;  %v4289_v33 = vshrl.u32 %v5080_v53, 16 }
 0x3a2   : > { %v4256_v12 = vsel %vm6807_vm2, %v4247_v37, %v4255_v46  ;;  %v4266_v21 = vsel %vm6807_vm2, %v4257_v1, %v4265_v51  ;;  %v4281_v62 = vrot.slane %v4279_v63, 6  ;;  %v4292_v25 = vshll.u32 %v5080_v53, 16 }
 0x3a3   : > { %4351 = vst [vmem:[#allocation2 + $0x8] sm:$0xf] %v4256_v12  ;;  %4352 = vst [vmem:[#allocation2 + $0xc] sm:$0xf] %v4266_v21  ;;  %v4276_v18 = vsel %vm6807_vm2, %v4267_v43, %v4275_v23  ;;  %v4284_v2 = vrot.slane %v4282_v27, 7  ;;  %v4291_v50 = vrot.slane %v4289_v33, 6  ;;  %v5081_v59 = vpack.c.bf16 %v7230_v54, %v7230_v54 }
 0x3a4   : > { %4353 = vst [vmem:[#allocation2 + $0x10] sm:$0xf] %v4276_v18  ;;  %v4294_v14 = vrot.slane %v4292_v25, 7  ;;  %v4186_v20 = vadd.f32 %v4164_v28, %v7121_v29  ;;  %v4134_v24 = vunpack.c.l.bf16 %v4123_v6  ;;  %v4135_v34 = vunpack.c.l.bf16 %v4124_v0 }
 0x3a5   : > { %v4285_v8 = vor.u32 %v4284_v2, %v4281_v62  ;;  %v4299_v58 = vshrl.u32 %v5081_v59, 16  ;;  %v4302_v61 = vshll.u32 %v5081_v59, 16  ;;  %vm6251_vm5 = vmmov (!%p5032_p13), 0  }
 0x3a6   : > { %v4295_v9 = vor.u32 %v4294_v14, %v4291_v50  ;;  %v4196_v47 = vmax.f32 %v4186_v20, 0.0  ;;  %v4165_v3 = vrot.slane %v4134_v24, 3  ;;  %v4167_v60 = vrot.slane %v4135_v34, 3  ;;  %v4360_v34 = vld [vmem:[#allocation2 + $0x2c] sm:$0x3] }
 0x3a7   : > { %v4286_v15 = vsel %vm6807_vm2, %v4277_v13, %v4285_v8  ;;  %v4287_v36 = vrot.slane %v4285_v8, 4  ;;  %v4301_v16 = vrot.slane %v4299_v58, 6  ;;  %v4304_v38 = vrot.slane %v4302_v61, 7 }
 0x3a8   : > { %4354 = vst [vmem:[#allocation2 + $0x14] sm:$0xf] %v4286_v15  ;;  %v4297_v56 = vrot.slane %v4295_v9, 4  ;;  %v7247_v40 = vmul.f32 %v4196_v47, %v6857_v32  ;;  %v4166_v29 = vsel %vm1345_vm12, %v7189_v4, %v4165_v3  ;;  %v4168_v28 = vsel %vm1345_vm12, %v4165_v3, %v4167_v60  ;;  %v6027_v3 = vld [vmem:[#allocation12] sm:$0xff] (!%p5032_p13)   ;;  %v6028_v15 = vld [vmem:[#allocation12 + $0x8] sm:$0xff] (!%p5032_p13)  }
 0x3a9   : > { %v4296_v46 = vsel %vm6807_vm2, %v4287_v36, %v4295_v9  ;;  %v4305_v11 = vor.u32 %v4304_v38, %v4301_v16  ;;  %v4187_v51 = vadd.f32 %v4166_v29, %v7123_v7  ;;  %v4188_v23 = vadd.f32 %v4168_v28, %v7125_v10  ;;  %v6031_v36 = vld [vmem:[#allocation12 + $0x20] sm:$0xff] (!%p5032_p13)   ;;  %v6032_v16 = vld [vmem:[#allocation12 + $0x28] sm:$0xff] (!%p5032_p13)   ;;  %v6033_v38 = vld [vmem:[#allocation12 + $0x30] sm:$0xff] (!%p5032_p13)  }
 0x3aa   : > { %4355 = vst [vmem:[#allocation2 + $0x18] sm:$0xf] %v4296_v46  ;;  %v4212_v53 = vpack.c.bf16 %v7247_v40, %v7230_v54  ;;  %v5082_v32 = vpack.c.bf16 %v7247_v40, %v7247_v40  ;;  %v6250_v60 = vmov (!%p5032_p13), 0.0   ;;  %v7305_v26 = vrot.slane (!%p5032_p13), %v4504_v41, %v2211_v31 }
 0x3ab   : > { %v4306_v4 = vsel %vm6807_vm2, %v4297_v56, %v4305_v11  ;;  %v4197_v42 = vmax.f32 %v4187_v51, 0.0  ;;  %v4198_v37 = vmax.f32 %v4188_v23, 0.0  ;;  %v4307_v10 = vrot.slane %v4305_v11, 4  ;;  %5623 = vmatprep.subr.bf16.mxu0 (!%p5032_p13), %v6250_v60  ;;  %5659 = vmatprep.subr.bf16.mxu1 (!%p5032_p13), %v6250_v60  ;;  %v6034_v56 = vld [vmem:[#allocation12 + $0x38] sm:$0xff] (!%p5032_p13)  }
 0x3ac   : > { %4356 = vst [vmem:[#allocation2 + $0x1c] sm:$0xf] %v4306_v4  ;;  %v4309_v1 = vshrl.u32 %v5082_v32, 16  ;;  %v4312_v63 = vshll.u32 %v5082_v32, 16  ;;  %5624 = vmatpush3.bf16.msra.mxu0 (!%p5032_p13), %v6027_v3  ;;  %5667 = vmatpush3.bf16.msra.mxu1 (!%p5032_p13), %v6027_v3  ;;  %v7312_v48 = vand.u32 (!%p5032_p13), 127, %v2209_v44 }
 0x3ad   : > { %v7263_v6 = vmul.f32 %v4197_v42, %v6872_v17  ;;  %v7266_v7 = vmul.f32 %v4198_v37, %v6886_v5  ;;  %5625 = vmatprep.subr.bf16.mxu0 (!%p5032_p13), %v6250_v60  ;;  %5660 = vmatprep.subr.bf16.mxu1 (!%p5032_p13), %v6250_v60 }
 0x3ae   : > { %v4311_v43 = vrot.slane %v4309_v1, 6  ;;  %v4314_v13 = vrot.slane %v4312_v63, 7  ;;  %5639 = vmatprep.mubr.msk.bf16.mxu0 (!%p5032_p13), %vm6251_vm5, %v6250_v60  ;;  %5651 = vmatprep.mubr.msk.bf16.mxu1 (!%p5032_p13), %vm6251_vm5, %v6250_v60  ;;  %vm4535_vm6 = vcmp.eq.s32.totalorder (!%p5032_p13), %v7312_v48, 10 }
 0x3af   : > { %v5083_v27 = vpack.c.bf16 %v7263_v6, %v7263_v6  ;;  %v4213_v33 = vpack.c.bf16 %v7266_v7, %v7263_v6  ;;  %v5084_v0 = vpack.c.bf16 %v7266_v7, %v7266_v7 }
 0x3b0   : > { %v4315_v12 = vor.u32 %v4314_v13, %v4311_v43  ;;  %5626 = vmatpush3.bf16.msra.mxu0 (!%p5032_p13), %v6028_v15  ;;  %5668 = vmatpush3.bf16.msra.mxu1 (!%p5032_p13), %v6028_v15 }
 0x3b1   : > { %v4319_v21 = vshrl.u32 %v5083_v27, 16  ;;  %v4322_v62 = vshll.u32 %v5083_v27, 16  ;;  %v4329_v17 = vshrl.u32 %v5084_v0, 16  ;;  %v4332_v25 = vshll.u32 %v5084_v0, 16  ;;  %5627 = vmatprep.subr.bf16.mxu0 (!%p5032_p13), %v6250_v60  ;;  %5661 = vmatprep.subr.bf16.mxu1 (!%p5032_p13), %v6250_v60 }
 0x3b2   : > { %v4316_v5 = vsel %vm6807_vm2, %v4307_v10, %v4315_v12  ;;  %v4317_v18 = vrot.slane %v4315_v12, 4 }
 0x3b3   : > { %4357 = vst [vmem:[#allocation2 + $0x20] sm:$0xf] %v4316_v5  ;;  %v4321_v2 = vrot.slane %v4319_v21, 6  ;;  %v4324_v50 = vrot.slane %v4322_v62, 7  ;;  %v4331_v59 = vrot.slane %v4329_v17, 6  ;;  %v4334_v14 = vrot.slane %v4332_v25, 7 }
 0x3b4   : > { %4366 = sbr.rel (%p5032_p13) target bundleno = 1211 (0x4bb), region = 84  ;;  %5628 = vmatpush3.bf16.msra.mxu0 (!%p5032_p13), %v6029_v35  ;;  %5669 = vmatpush3.bf16.msra.mxu1 (!%p5032_p13), %v6029_v35 }
 0x3b5   : > { %v4325_v20 = vor.u32 %v4324_v50, %v4321_v2  ;;  %v4335_v24 = vor.u32 %v4334_v14, %v4331_v59  ;;  %5629 = vmatprep.subr.bf16.mxu0 (!%p5032_p13), %v6250_v60  ;;  %5662 = vmatprep.subr.bf16.mxu1 (!%p5032_p13), %v6250_v60 }
 0x3b7   : > { %v4326_v8 = vsel %vm6807_vm2, %v4317_v18, %v4325_v20  ;;  %v4327_v58 = vrot.slane %v4325_v20, 4  ;;  %v4337_v61 = vrot.slane %v4335_v24, 4 }
 0x3b8   : > { %4358 = vst [vmem:[#allocation2 + $0x24] sm:$0xf] %v4326_v8  ;;  %5630 = vmatpush3.bf16.msra.mxu0 (!%p5032_p13), %v6030_v52  ;;  %5670 = vmatpush3.bf16.msra.mxu1 (!%p5032_p13), %v6030_v52 }
 0x3b9   : > { %v4336_v9 = vsel %vm6807_vm2, %v4327_v58, %v4335_v24  ;;  %v4361_v47 = vsel %vm6929_vm4, %v4337_v61, %v4360_v34  ;;  %5631 = vmatprep.subr.bf16.mxu0 (!%p5032_p13), %v6250_v60  ;;  %5663 = vmatprep.subr.bf16.mxu1 (!%p5032_p13), %v6250_v60 }
 0x3ba   : > { %4359 = vst [vmem:[#allocation2 + $0x28] sm:$0xf] %v4336_v9  ;;  %4362 = vst [vmem:[#allocation2 + $0x2c] sm:$0x3] %v4361_v47 }
 0x3bc   : > { %5632 = vmatpush3.bf16.msra.mxu0 %v6031_v36  ;;  %5671 = vmatpush3.bf16.msra.mxu1 %v6031_v36 }
 0x3bd   : > { %5633 = vmatprep.subr.bf16.mxu0 %v6250_v60  ;;  %5664 = vmatprep.subr.bf16.mxu1 %v6250_v60 }
 0x3c0   : > { %5634 = vmatpush3.bf16.msra.mxu0 %v6032_v16  ;;  %5672 = vmatpush3.bf16.msra.mxu1 %v6032_v16 }
 0x3c1   : > { %5635 = vmatprep.subr.bf16.mxu0 %v6250_v60  ;;  %5665 = vmatprep.subr.bf16.mxu1 %v6250_v60 }
 0x3c4   : > { %5636 = vmatpush3.bf16.msra.mxu0 %v6033_v38  ;;  %5673 = vmatpush3.bf16.msra.mxu1 %v6033_v38 }
 0x3c5   : > { %5637 = vmatprep.subr.bf16.mxu0 %v6250_v60  ;;  %5666 = vmatprep.subr.bf16.mxu1 %v6250_v60 }
 0x3c8   : > { %5638 = vmatpush3.bf16.msra.mxu0 %v6034_v56  ;;  %5674 = vmatpush3.bf16.msra.mxu1 %v6034_v56 }
 0x3cb   : > { %5640 = vmatmul.mubr.bf16.vlgmr.msra.gmra.mrb[0].mxu0 %v4209_v55  ;;  %5652 = vmatmul.mubr.bf16.vlgmr.msra.gmra.mrb[0].mxu1 %v4212_v53  ;;  %v7309_v55 = vrot.slane %v4504_v41, %v2225_v39 }
 0x3cc   : > { %5643 = vmatprep.mubr.msk.bf16.mxu0 %vm6251_vm5, %v6250_v60  ;;  %5655 = vmatprep.mubr.msk.bf16.mxu1 %vm6251_vm5, %v6250_v60 }
 0x3d3   : > { %5644 = vmatmul.mubr.bf16.gmra.mrb[4].mxu0 %v4210_v30  ;;  %5656 = vmatmul.mubr.bf16.gmra.mrb[4].mxu1 %v4213_v33 }
 0x3d4   : > { %5647 = vmatprep.mubr.msk.bf16.mxu0 %vm6251_vm5, %v6250_v60 }
 0x3db   : > { %5648 = vmatmul.mubr.bf16.gmra.mrb[8].mxu0 %v4211_v49 }
 0x49e   : > { %v4465_v57 = vpop.f32.mrb[0].mxu0  ;;  %v4489_v30 = vpop.f32.mrb[0].mxu1 }
 0x49f   : > { %v4509_v54 = vmul.f32 %v7305_v26, %v4465_v57  ;;  %v5641_v40 = vpop.f32.mrb[1].mxu0  ;;  %v4515_v19 = vmul.f32 %v7305_v26, %v4489_v30  ;;  %v5653_v45 = vpop.f32.mrb[1].mxu1 }
 0x4a0   : > { %v4468_v49 = vpop.f32.mrb[2].mxu0  ;;  %v4492_v29 = vpop.f32.mrb[2].mxu1 }
 0x4a1   : > { %v4523_v31 = vadd.f32 %v7309_v55, %v4509_v54  ;;  %v4510_v28 = vmul.f32 %v7305_v26, %v4468_v49  ;;  %v5642_v22 = vpop.f32.mrb[3].mxu0  ;;  %v4529_v39 = vadd.f32 %v7309_v55, %v4515_v19  ;;  %v4516_v46 = vmul.f32 %v7305_v26, %v4492_v29  ;;  %v5654_v44 = vpop.f32.mrb[3].mxu1 }
 0x4a3   : > { %v4536_v11 = vmax.f32 %v4523_v31, 0.0  ;;  %v4524_v51 = vadd.f32 %v7309_v55, %v4510_v28  ;;  %v4542_v23 = vmax.f32 %v4529_v39, 0.0  ;;  %v4530_v53 = vadd.f32 %v7309_v55, %v4516_v46 }
 0x4a5   : > { %v4537_v32 = vmax.f32 %v4524_v51, 0.0  ;;  %v4552_v4 = vsel %vm4535_vm6, %v4542_v23, %v4529_v39  ;;  %v4543_v42 = vmax.f32 %v4530_v53, 0.0  ;;  %v4546_v37 = vsel %vm4535_vm6, %v4536_v11, %v4523_v31 }
 0x4a6   : > { %v4473_v1 = vpop.f32.mrb[4].mxu0  ;;  %v4497_v63 = vpop.f32.mrb[4].mxu1 }
 0x4a7   : > { %v4547_v6 = vsel %vm4535_vm6, %v4537_v32, %v4524_v51  ;;  %v4553_v7 = vsel %vm4535_vm6, %v4543_v42, %v4530_v53  ;;  %v4511_v10 = vmul.f32 %v7305_v26, %v4473_v1  ;;  %v5645_v43 = vpop.f32.mrb[5].mxu0  ;;  %v4517_v13 = vmul.f32 %v7305_v26, %v4497_v63  ;;  %v5657_v27 = vpop.f32.mrb[5].mxu1 }
 0x4a8   : > { %v5114_v33 = vpack.c.bf16 %v4547_v6, %v4546_v37  ;;  %v5129_v0 = vpack.c.bf16 %v4553_v7, %v4552_v4  ;;  %v4476_v12 = vpop.f32.mrb[6].mxu0  ;;  %v4500_v21 = vpop.f32.mrb[6].mxu1 }
 0x4a9   : > { %v4525_v62 = vadd.f32 %v7309_v55, %v4511_v10  ;;  %v4512_v17 = vmul.f32 %v7305_v26, %v4476_v12  ;;  %v5646_v25 = vpop.f32.mrb[7].mxu0  ;;  %v4531_v5 = vadd.f32 %v7309_v55, %v4517_v13  ;;  %v4518_v18 = vmul.f32 %v7305_v26, %v4500_v21  ;;  %v5658_v2 = vpop.f32.mrb[7].mxu1 }
 0x4aa   : > { %5115 = vst [vmem:[%s6498_s12] sm:$0xff] %v5114_v33   ;;  %5142 = vst [vmem:[%s6498_s12 + $0x18] sm:$0xff] %v5129_v0  }
 0x4ab   : > { %v4538_v50 = vmax.f32 %v4525_v62, 0.0  ;;  %v4526_v59 = vadd.f32 %v7309_v55, %v4512_v17  ;;  %v4544_v14 = vmax.f32 %v4531_v5, 0.0  ;;  %v4532_v20 = vadd.f32 %v7309_v55, %v4518_v18 }
 0x4ad   : > { %v4539_v24 = vmax.f32 %v4526_v59, 0.0  ;;  %v4554_v34 = vsel %vm4535_vm6, %v4544_v14, %v4531_v5  ;;  %v4545_v8 = vmax.f32 %v4532_v20, 0.0  ;;  %v4548_v61 = vsel %vm4535_vm6, %v4538_v50, %v4525_v62 }
 0x4ae   : > { %v4481_v58 = vpop.f32.mrb[8].mxu0 }
 0x4af   : > { %v4549_v9 = vsel %vm4535_vm6, %v4539_v24, %v4526_v59  ;;  %v4555_v47 = vsel %vm4535_vm6, %v4545_v8, %v4532_v20  ;;  %v4513_v3 = vmul.f32 %v7305_v26, %v4481_v58  ;;  %v5649_v60 = vpop.f32.mrb[9].mxu0 }
 0x4b0   : > { %v5119_v15 = vpack.c.bf16 %v4549_v9, %v4548_v61  ;;  %v5134_v35 = vpack.c.bf16 %v4555_v47, %v4554_v34  ;;  %v4484_v52 = vpop.f32.mrb[10].mxu0 }
 0x4b1   : > { %v4527_v36 = vadd.f32 %v7309_v55, %v4513_v3  ;;  %v4514_v16 = vmul.f32 %v7305_v26, %v4484_v52  ;;  %v5650_v38 = vpop.f32.mrb[11].mxu0 }
 0x4b2   : > { %5140 = vst [vmem:[%s6498_s12 + $0x8] sm:$0xff] %v5119_v15   ;;  %5143 = vst [vmem:[%s6498_s12 + $0x20] sm:$0xff] %v5134_v35  }
 0x4b3   : > { %v4540_v56 = vmax.f32 %v4527_v36, 0.0  ;;  %v4528_v41 = vadd.f32 %v7309_v55, %v4514_v16 }
 0x4b5   : > { %v4541_v57 = vmax.f32 %v4528_v41, 0.0  ;;  %v4550_v30 = vsel %vm4535_vm6, %v4540_v56, %v4527_v36 }
 0x4b7   : > { %v4551_v54 = vsel %vm4535_vm6, %v4541_v57, %v4528_v41 }
 0x4b8   : > { %v5124_v40 = vpack.c.bf16 %v4551_v54, %v4550_v30 }
 0x4ba   : > { %5141 = vst [vmem:[%s6498_s12 + $0x10] sm:$0xff] %v5124_v40  }
 0x4bb PF: > { %s25_s19 = sadd.s32 1, %s6237_s19   ;;  %s7407_s15 = smov %s6229_s17 }
 0x4bc   : > { %p22_p0 = scmp.ge.s32.totalorder %s25_s19, 30   ;;  %s7408_s16 = smov %s6233_s18 }
 0x4bd   : > { %s7409_s17 = smov %s7412_s24  ;;  %s7410_s18 = smov %s7416_s27 }
 0x4be   :  { %24 = sbr.rel (!%p22_p0) target bundleno = 18 (0x12), region = 118 }
 0x4c5   :  { %4627 = vsyncpa [#allocation8], 1 }
 0x4c6   :  { %4629 = vsyncpa [#allocation8 + $0x1], 1 }
 0x4c7   :  { %4630 = vsyncpa [#allocation10], 1 }
 0x4c8   :  { %4631 = vsyncpa [#allocation13], 1 }

// kernel: chessnet_forward.3
= control target key start
LH: loop header
LB: loop body
LE: loop exit
PB: predicated region body
PF: predicated region fallthrough
CT: control target
= control target key end

     0   :  { %s8654_s0 = inlined_call_operand.vmem [shape: bf16[2,640], index: 0, kind: input, shape index: {}]   ;;  %s8655_s1 = inlined_call_operand.vmem [shape: bf16[2,64], index: 1, kind: input, shape index: {}]   ;;  %s8656_s2 = inlined_call_operand.vmem [shape: bf16[640,2048], index: 2, kind: input, shape index: {}]   ;;  %s8657_s3 = inlined_call_operand.vmem [shape: f32[1,2048], index: 3, kind: input, shape index: {}]   ;;  %s8658_s4 = inlined_call_operand.vmem [shape: bf16[64,64], index: 4, kind: input, shape index: {}]   ;;  %s8659_s5 = inlined_call_operand.vmem [shape: f32[1,64], index: 5, kind: input, shape index: {}]   ;;  %s8660_s6 = inlined_call_operand.vmem [shape: bf16[64,1], index: 6, kind: input, shape index: {}]   ;;  %s8661_s7 = inlined_call_operand.<no memory space> [shape: f32[1,1], index: 7, kind: input, shape index: {}]   ;;  %s8662_s8 = inlined_call_operand.hbm [shape: f32[2,2048], index: 8, kind: output, shape index: {0}]   ;;  %s8663_s9 = inlined_call_operand.vmem [shape: f32[2,1], index: 9, kind: output, shape index: {1}]  }
   0x1   :  { %v15_v0 = vstv %s8661_s7 }
   0x2   :  { %16 = vst [vmem:[#allocation2] sm:$0x1] %v15_v0 }
   0x3   :  { %v36_v1 = vld [vmem:[%s8656_s2] sm:$0xff]  ;;  %v37_v3 = vld [vmem:[%s8656_s2 + $0x8] sm:$0xff]  ;;  %v680_v33 = vlaneseq  ;;  %v6308_v34 = vmov 1966171168  }
   0x4   :  { %v44_v2 = vld [vmem:[%s8656_s2 + $0x40] sm:$0xff]  ;;  %v45_v5 = vld [vmem:[%s8656_s2 + $0x48] sm:$0xff]  ;;  %v763_v35 = vunpack.c.l.s4 %v6308_v34 }
   0x5   :  { %v5468_v4 = vcombine.high %v36_v1, %v44_v2  ;;  %v5467_v6 = vcombine.low %v36_v1, %v44_v2  ;;  %v52_v7 = vld [vmem:[%s8656_s2 + $0x80] sm:$0xff]  ;;  %v5470_v9 = vcombine.high %v37_v3, %v45_v5  ;;  %v5469_v10 = vcombine.low %v37_v3, %v45_v5  ;;  %v53_v12 = vld [vmem:[%s8656_s2 + $0x88] sm:$0xff] }
   0x6   :  { %v60_v8 = vld [vmem:[%s8656_s2 + $0xc0] sm:$0xff]  ;;  %v61_v13 = vld [vmem:[%s8656_s2 + $0xc8] sm:$0xff]  ;;  %v6434_v44 = vshrl.u32 %v680_v33, 7  ;;  %v764_v45 = vunpack.c.0.s8 %v763_v35 }
   0x7   :  { %v5484_v11 = vcombine.high %v52_v7, %v60_v8  ;;  %v68_v14 = vld [vmem:[%s8656_s2 + $0x100] sm:$0xff]  ;;  %4005 = vmatprep.subr.bf16.mxu0 %v5468_v4  ;;  %v5486_v15 = vcombine.high %v53_v12, %v61_v13  ;;  %v69_v17 = vld [vmem:[%s8656_s2 + $0x108] sm:$0xff]  ;;  %4128 = vmatprep.subr.bf16.mxu1 %v5470_v9  ;;  %v5483_v19 = vcombine.low %v52_v7, %v60_v8 }
   0x8   :  { %v76_v16 = vld [vmem:[%s8656_s2 + $0x140] sm:$0xff]  ;;  %v77_v18 = vld [vmem:[%s8656_s2 + $0x148] sm:$0xff]  ;;  %4006 = vmatpush1.bf16.msra.mxu0 %v5467_v6  ;;  %4129 = vmatpush1.bf16.msra.mxu1 %v5469_v10  ;;  %v5485_v20 = vcombine.low %v53_v12, %v61_v13  ;;  %v6449_v54 = vsub.s32 %v764_v45, %v6434_v44 }
   0x9   :  { %4007 = vmatprep.subr.bf16.mxu0 %v5484_v11  ;;  %v5500_v21 = vcombine.high %v68_v14, %v76_v16  ;;  %4130 = vmatprep.subr.bf16.mxu1 %v5486_v15  ;;  %v5502_v22 = vcombine.high %v69_v17, %v77_v18  ;;  %v84_v23 = vld [vmem:[%s8656_s2 + $0x180] sm:$0xff]  ;;  %v85_v25 = vld [vmem:[%s8656_s2 + $0x188] sm:$0xff]  ;;  %v5499_v27 = vcombine.low %v68_v14, %v76_v16 }
   0xa   :  { %v92_v24 = vld [vmem:[%s8656_s2 + $0x1c0] sm:$0xff]  ;;  %v93_v26 = vld [vmem:[%s8656_s2 + $0x1c8] sm:$0xff]  ;;  %v5501_v28 = vcombine.low %v69_v17, %v77_v18 }
   0xb   :  { %v5516_v29 = vcombine.high %v84_v23, %v92_v24  ;;  %v5518_v30 = vcombine.high %v85_v25, %v93_v26  ;;  %v100_v31 = vld [vmem:[%s8656_s2 + $0x200] sm:$0xff]  ;;  %v101_v36 = vld [vmem:[%s8656_s2 + $0x208] sm:$0xff]  ;;  %v5515_v38 = vcombine.low %v84_v23, %v92_v24  ;;  %v5517_v39 = vcombine.low %v85_v25, %v93_v26 }
   0xc   :  { %4008 = vmatpush1.bf16.msra.mxu0 %v5483_v19  ;;  %4131 = vmatpush1.bf16.msra.mxu1 %v5485_v20  ;;  %v108_v32 = vld [vmem:[%s8656_s2 + $0x240] sm:$0xff]  ;;  %v109_v37 = vld [vmem:[%s8656_s2 + $0x248] sm:$0xff] }
   0xd   :  { %4009 = vmatprep.subr.bf16.mxu0 %v5500_v21  ;;  %4132 = vmatprep.subr.bf16.mxu1 %v5502_v22  ;;  %v5532_v40 = vcombine.high %v100_v31, %v108_v32  ;;  %v5534_v41 = vcombine.high %v101_v36, %v109_v37  ;;  %v116_v42 = vld [vmem:[%s8656_s2 + $0x280] sm:$0xff]  ;;  %v117_v46 = vld [vmem:[%s8656_s2 + $0x288] sm:$0xff]  ;;  %v5531_v48 = vcombine.low %v100_v31, %v108_v32 }
   0xe   :  { %v124_v43 = vld [vmem:[%s8656_s2 + $0x2c0] sm:$0xff]  ;;  %v125_v47 = vld [vmem:[%s8656_s2 + $0x2c8] sm:$0xff]  ;;  %v5533_v49 = vcombine.low %v101_v36, %v109_v37 }
   0xf   :  { %v5548_v50 = vcombine.high %v116_v42, %v124_v43  ;;  %v5550_v51 = vcombine.high %v117_v46, %v125_v47  ;;  %v132_v52 = vld [vmem:[%s8656_s2 + $0x300] sm:$0xff]  ;;  %v133_v55 = vld [vmem:[%s8656_s2 + $0x308] sm:$0xff]  ;;  %v5547_v57 = vcombine.low %v116_v42, %v124_v43  ;;  %v5549_v58 = vcombine.low %v117_v46, %v125_v47 }
  0x10   :  { %4010 = vmatpush1.bf16.msra.mxu0 %v5499_v27  ;;  %4133 = vmatpush1.bf16.msra.mxu1 %v5501_v28  ;;  %v140_v53 = vld [vmem:[%s8656_s2 + $0x340] sm:$0xff]  ;;  %v141_v56 = vld [vmem:[%s8656_s2 + $0x348] sm:$0xff] }
  0x11   :  { %4011 = vmatprep.subr.bf16.mxu0 %v5516_v29  ;;  %4134 = vmatprep.subr.bf16.mxu1 %v5518_v30  ;;  %v5564_v59 = vcombine.high %v132_v52, %v140_v53  ;;  %v35_v60 = vld [vmem:[%s8654_s0] sm:$0x1f]  ;;  %v5566_v61 = vcombine.high %v133_v55, %v141_v56  ;;  %v149_v1 = vld [vmem:[%s8656_s2 + $0x388] sm:$0xff]  ;;  %v5563_v3 = vcombine.low %v132_v52, %v140_v53 }
  0x12   :  { %v148_v62 = vld [vmem:[%s8656_s2 + $0x380] sm:$0xff]  ;;  %v6467_v0 = vrot.slane %v35_v60, %v6449_v54  ;;  %v157_v2 = vld [vmem:[%s8656_s2 + $0x3c8] sm:$0xff]  ;;  %v5565_v5 = vcombine.low %v133_v55, %v141_v56  ;;  %v761_v22 = vcombine.high %v35_v60, %v35_v60 }
  0x13   :  { %v156_v63 = vld [vmem:[%s8656_s2 + $0x3c0] sm:$0xff]  ;;  %v5582_v7 = vcombine.high %v149_v1, %v157_v2  ;;  %v165_v11 = vld [vmem:[%s8656_s2 + $0x408] sm:$0xff]  ;;  %v5581_v14 = vcombine.low %v149_v1, %v157_v2 }
  0x14   :  { %4012 = vmatpush1.bf16.msra.mxu0 %v5515_v38  ;;  %4135 = vmatpush1.bf16.msra.mxu1 %v5517_v39  ;;  %v776_v4 = vcombine.high %v6467_v0, %v6467_v0  ;;  %v5580_v6 = vcombine.high %v148_v62, %v156_v63  ;;  %v164_v8 = vld [vmem:[%s8656_s2 + $0x400] sm:$0xff]  ;;  %v173_v12 = vld [vmem:[%s8656_s2 + $0x448] sm:$0xff]  ;;  %v5579_v13 = vcombine.low %v148_v62, %v156_v63 }
  0x15   :  { %4013 = vmatprep.subr.bf16.mxu0 %v5532_v40  ;;  %4136 = vmatprep.subr.bf16.mxu1 %v5534_v41  ;;  %v172_v9 = vld [vmem:[%s8656_s2 + $0x440] sm:$0xff]  ;;  %v5598_v16 = vcombine.high %v165_v11, %v173_v12  ;;  %v181_v19 = vld [vmem:[%s8656_s2 + $0x488] sm:$0xff]  ;;  %v5597_v23 = vcombine.low %v165_v11, %v173_v12  ;;  %v775_v28 = vrot.slane %v761_v22, %v6449_v54 }
  0x16   :  { %v6484_v10 = vrot.slane %v776_v4, %v6449_v54  ;;  %v5596_v15 = vcombine.high %v164_v8, %v172_v9  ;;  %v180_v17 = vld [vmem:[%s8656_s2 + $0x480] sm:$0xff]  ;;  %v189_v20 = vld [vmem:[%s8656_s2 + $0x4c8] sm:$0xff]  ;;  %v5595_v21 = vcombine.low %v164_v8, %v172_v9 }
  0x17   :  { %v188_v18 = vld [vmem:[%s8656_s2 + $0x4c0] sm:$0xff]  ;;  %v5614_v25 = vcombine.high %v181_v19, %v189_v20  ;;  %v197_v29 = vld [vmem:[%s8656_s2 + $0x508] sm:$0xff]  ;;  %v6520_v32 = vrot.slane %v775_v28, %v6449_v54  ;;  %v5613_v34 = vcombine.low %v181_v19, %v189_v20 }
  0x18   :  { %4014 = vmatpush1.bf16.msra.mxu0 %v5531_v48  ;;  %4137 = vmatpush1.bf16.msra.mxu1 %v5533_v49  ;;  %v5612_v24 = vcombine.high %v180_v17, %v188_v18  ;;  %v196_v26 = vld [vmem:[%s8656_s2 + $0x500] sm:$0xff]  ;;  %v205_v30 = vld [vmem:[%s8656_s2 + $0x548] sm:$0xff]  ;;  %v5611_v31 = vcombine.low %v180_v17, %v188_v18 }
  0x19   :  { %4015 = vmatprep.subr.bf16.mxu0 %v5548_v50  ;;  %4138 = vmatprep.subr.bf16.mxu1 %v5550_v51  ;;  %v204_v27 = vld [vmem:[%s8656_s2 + $0x540] sm:$0xff]  ;;  %v5630_v36 = vcombine.high %v197_v29, %v205_v30  ;;  %v213_v39 = vld [vmem:[%s8656_s2 + $0x588] sm:$0xff]  ;;  %v5629_v42 = vcombine.low %v197_v29, %v205_v30 }
  0x1a   :  { %4037 = vmatprep.mubr.bf16.mxu0 %v6484_v10  ;;  %4160 = vmatprep.mubr.bf16.mxu1 %v6484_v10  ;;  %v5628_v35 = vcombine.high %v196_v26, %v204_v27  ;;  %v212_v37 = vld [vmem:[%s8656_s2 + $0x580] sm:$0xff]  ;;  %v221_v40 = vld [vmem:[%s8656_s2 + $0x5c8] sm:$0xff]  ;;  %v5627_v41 = vcombine.low %v196_v26, %v204_v27  ;;  %v6602_v27 = vrot.slane %v6467_v0, %v6449_v54 }
  0x1b   :  { %v220_v38 = vld [vmem:[%s8656_s2 + $0x5c0] sm:$0xff]  ;;  %v5646_v45 = vcombine.high %v213_v39, %v221_v40  ;;  %v229_v48 = vld [vmem:[%s8656_s2 + $0x608] sm:$0xff]  ;;  %v5645_v51 = vcombine.low %v213_v39, %v221_v40 }
  0x1c   :  { %4016 = vmatpush1.bf16.msra.mxu0 %v5547_v57  ;;  %4139 = vmatpush1.bf16.msra.mxu1 %v5549_v58  ;;  %v5644_v43 = vcombine.high %v212_v37, %v220_v38  ;;  %v228_v46 = vld [vmem:[%s8656_s2 + $0x600] sm:$0xff]  ;;  %v237_v49 = vld [vmem:[%s8656_s2 + $0x648] sm:$0xff]  ;;  %v5643_v50 = vcombine.low %v212_v37, %v220_v38  ;;  %v6624_v38 = vcombine.high %v6484_v10, %v6484_v10 }
  0x1d   :  { %4017 = vmatprep.subr.bf16.mxu0 %v5564_v59  ;;  %4140 = vmatprep.subr.bf16.mxu1 %v5566_v61  ;;  %v236_v47 = vld [vmem:[%s8656_s2 + $0x640] sm:$0xff]  ;;  %v5662_v53 = vcombine.high %v229_v48, %v237_v49  ;;  %v245_v57 = vld [vmem:[%s8656_s2 + $0x688] sm:$0xff]  ;;  %v5661_v60 = vcombine.low %v229_v48, %v237_v49 }
  0x1e   :  { %v5660_v52 = vcombine.high %v228_v46, %v236_v47  ;;  %v244_v55 = vld [vmem:[%s8656_s2 + $0x680] sm:$0xff]  ;;  %v253_v58 = vld [vmem:[%s8656_s2 + $0x6c8] sm:$0xff]  ;;  %v5659_v59 = vcombine.low %v228_v46, %v236_v47 }
  0x1f   :  { %v252_v56 = vld [vmem:[%s8656_s2 + $0x6c0] sm:$0xff]  ;;  %v5678_v62 = vcombine.high %v245_v57, %v253_v58  ;;  %v261_v2 = vld [vmem:[%s8656_s2 + $0x708] sm:$0xff] }
  0x20   :  { %4018 = vmatpush1.bf16.msra.mxu0 %v5563_v3  ;;  %4141 = vmatpush1.bf16.msra.mxu1 %v5565_v5  ;;  %v5676_v61 = vcombine.high %v244_v55, %v252_v56  ;;  %v260_v63 = vld [vmem:[%s8656_s2 + $0x700] sm:$0xff]  ;;  %v269_v3 = vld [vmem:[%s8656_s2 + $0x748] sm:$0xff]  ;;  %v5675_v4 = vcombine.low %v244_v55, %v252_v56  ;;  %v5677_v5 = vcombine.low %v245_v57, %v253_v58 }
  0x21   :  { %4019 = vmatprep.subr.bf16.mxu0 %v5580_v6  ;;  %4142 = vmatprep.subr.bf16.mxu1 %v5582_v7  ;;  %v268_v1 = vld [vmem:[%s8656_s2 + $0x740] sm:$0xff]  ;;  %v5694_v7 = vcombine.high %v261_v2, %v269_v3  ;;  %v277_v11 = vld [vmem:[%s8656_s2 + $0x788] sm:$0xff] }
  0x22   :  { %v5692_v6 = vcombine.high %v260_v63, %v268_v1  ;;  %v276_v8 = vld [vmem:[%s8656_s2 + $0x780] sm:$0xff]  ;;  %v285_v12 = vld [vmem:[%s8656_s2 + $0x7c8] sm:$0xff] }
  0x23   :  { %v284_v9 = vld [vmem:[%s8656_s2 + $0x7c0] sm:$0xff]  ;;  %v293_v19 = vld [vmem:[%s8656_s2 + $0x808] sm:$0xff]  ;;  %v5709_v22 = vcombine.low %v277_v11, %v285_v12 }
  0x24   :  { %4020 = vmatpush1.bf16.msra.mxu0 %v5579_v13  ;;  %4143 = vmatpush1.bf16.msra.mxu1 %v5581_v14  ;;  %v5691_v13 = vcombine.low %v260_v63, %v268_v1  ;;  %v5693_v14 = vcombine.low %v261_v2, %v269_v3  ;;  %v292_v17 = vld [vmem:[%s8656_s2 + $0x800] sm:$0xff]  ;;  %v301_v20 = vld [vmem:[%s8656_s2 + $0x848] sm:$0xff] }
  0x25   :  { %4021 = vmatprep.subr.bf16.mxu0 %v5596_v15  ;;  %4144 = vmatprep.subr.bf16.mxu1 %v5598_v16  ;;  %v5708_v15 = vcombine.high %v276_v8, %v284_v9  ;;  %v5710_v16 = vcombine.high %v277_v11, %v285_v12  ;;  %v300_v18 = vld [vmem:[%s8656_s2 + $0x840] sm:$0xff]  ;;  %v309_v28 = vld [vmem:[%s8656_s2 + $0x888] sm:$0xff] }
  0x26   :  { %v316_v26 = vld [vmem:[%s8656_s2 + $0x8c0] sm:$0xff]  ;;  %v317_v29 = vld [vmem:[%s8656_s2 + $0x8c8] sm:$0xff]  ;;  %v5723_v30 = vcombine.low %v292_v17, %v300_v18 }
  0x27   :  { %v332_v54 = vld [vmem:[%s8656_s2 + $0x940] sm:$0xff]  ;;  %v325_v0 = vld [vmem:[%s8656_s2 + $0x908] sm:$0xff]  ;;  %v5741_v40 = vcombine.low %v309_v28, %v317_v29 }
  0x28   :  { %4022 = vmatpush1.bf16.msra.mxu0 %v5595_v21  ;;  %4145 = vmatpush1.bf16.msra.mxu1 %v5597_v23  ;;  %v5707_v21 = vcombine.low %v276_v8, %v284_v9  ;;  %v5724_v23 = vcombine.high %v292_v17, %v300_v18  ;;  %v333_v37 = vld [vmem:[%s8656_s2 + $0x948] sm:$0xff] }
  0x29   :  { %4023 = vmatprep.subr.bf16.mxu0 %v5612_v24  ;;  %4146 = vmatprep.subr.bf16.mxu1 %v5614_v25  ;;  %v5726_v24 = vcombine.high %v293_v19, %v301_v20  ;;  %v308_v25 = vld [vmem:[%s8656_s2 + $0x880] sm:$0xff]  ;;  %v5758_v46 = vcombine.high %v325_v0, %v333_v37  ;;  %v349_v47 = vld [vmem:[%s8656_s2 + $0x9c8] sm:$0xff] }
  0x2a   :  { %v5739_v39 = vcombine.low %v308_v25, %v316_v26 }
  0x2c   :  { %4024 = vmatpush1.bf16.msra.mxu0 %v5611_v31  ;;  %4147 = vmatpush1.bf16.msra.mxu1 %v5613_v34  ;;  %v5725_v31 = vcombine.low %v293_v19, %v301_v20  ;;  %v5740_v34 = vcombine.high %v308_v25, %v316_v26 }
  0x2d   :  { %4025 = vmatprep.subr.bf16.mxu0 %v5628_v35  ;;  %4148 = vmatprep.subr.bf16.mxu1 %v5630_v36  ;;  %v324_v35 = vld [vmem:[%s8656_s2 + $0x900] sm:$0xff]  ;;  %v5742_v36 = vcombine.high %v309_v28, %v317_v29 }
  0x2e   :  { %v5755_v48 = vcombine.low %v324_v35, %v332_v54 }
  0x30   :  { %4026 = vmatpush1.bf16.msra.mxu0 %v5627_v41  ;;  %4149 = vmatpush1.bf16.msra.mxu1 %v5629_v42  ;;  %v5756_v41 = vcombine.high %v324_v35, %v332_v54  ;;  %v340_v42 = vld [vmem:[%s8656_s2 + $0x980] sm:$0xff] }
  0x31   :  { %4027 = vmatprep.subr.bf16.mxu0 %v5644_v43  ;;  %4150 = vmatprep.subr.bf16.mxu1 %v5646_v45  ;;  %v348_v43 = vld [vmem:[%s8656_s2 + $0x9c0] sm:$0xff]  ;;  %v341_v45 = vld [vmem:[%s8656_s2 + $0x988] sm:$0xff] }
  0x34   :  { %4028 = vmatpush1.bf16.msra.mxu0 %v5643_v50  ;;  %4151 = vmatpush1.bf16.msra.mxu1 %v5645_v51 }
  0x35   :  { %4029 = vmatprep.subr.bf16.mxu0 %v5660_v52  ;;  %4152 = vmatprep.subr.bf16.mxu1 %v5662_v53 }
  0x38   :  { %4030 = vmatpush1.bf16.msra.mxu0 %v5659_v59  ;;  %4153 = vmatpush1.bf16.msra.mxu1 %v5661_v60 }
  0x39   :  { %4031 = vmatprep.subr.bf16.mxu0 %v5676_v61  ;;  %4154 = vmatprep.subr.bf16.mxu1 %v5678_v62 }
  0x3c   :  { %4032 = vmatpush1.bf16.msra.mxu0 %v5675_v4  ;;  %4155 = vmatpush1.bf16.msra.mxu1 %v5677_v5 }
  0x3d   :  { %4033 = vmatprep.subr.bf16.mxu0 %v5692_v6  ;;  %4156 = vmatprep.subr.bf16.mxu1 %v5694_v7 }
  0x40   :  { %4034 = vmatpush1.bf16.msra.mxu0 %v5691_v13  ;;  %4157 = vmatpush1.bf16.msra.mxu1 %v5693_v14 }
  0x41   :  { %4035 = vmatprep.subr.bf16.mxu0 %v5708_v15  ;;  %4158 = vmatprep.subr.bf16.mxu1 %v5710_v16 }
  0x44   :  { %4036 = vmatpush1.bf16.msra.mxu0 %v5707_v21  ;;  %4159 = vmatpush1.bf16.msra.mxu1 %v5709_v22 }
  0x45   :  { %4046 = vmatprep.subr.bf16.mxu0 %v5724_v23  ;;  %4169 = vmatprep.subr.bf16.mxu1 %v5726_v24 }
  0x47   :  { %4038 = vmatmul.mubr.bf16.vlgmr.msra.gmra.mrb[0].mxu0 %v6602_v27  ;;  %4161 = vmatmul.mubr.bf16.vlgmr.msra.gmra.mrb[0].mxu1 %v6602_v27 }
  0x48   :  { %4047 = vmatpush1.bf16.msra.mxu0 %v5723_v30  ;;  %4170 = vmatpush1.bf16.msra.mxu1 %v5725_v31 }
  0x49   :  { %4048 = vmatprep.subr.bf16.mxu0 %v5740_v34  ;;  %4171 = vmatprep.subr.bf16.mxu1 %v5742_v36 }
  0x4a   :  { %4078 = vmatprep.mubr.bf16.mxu0 %v6624_v38  ;;  %4201 = vmatprep.mubr.bf16.mxu1 %v6624_v38 }
  0x4c   :  { %4049 = vmatpush1.bf16.msra.mxu0 %v5739_v39 }
  0x4d   :  { %17 = vsyncpa [#allocation4], 0  ;;  %4172 = vmatpush1.bf16.msra.mxu1 %v5741_v40  ;;  %4050 = vmatprep.subr.bf16.mxu0 %v5756_v41  ;;  %v5757_v49 = vcombine.low %v325_v0, %v333_v37  ;;  %v5772_v50 = vcombine.high %v340_v42, %v348_v43  ;;  %v5774_v51 = vcombine.high %v341_v45, %v349_v47  ;;  %v356_v52 = vld [vmem:[%s8656_s2 + $0xa00] sm:$0xff]  ;;  %v357_v55 = vld [vmem:[%s8656_s2 + $0xa08] sm:$0xff]  ;;  %vm6311_vm0 = vmmov 0  }
  0x4e   :  { %4173 = vmatprep.subr.bf16.mxu1 %v5758_v46  ;;  %v364_v53 = vld [vmem:[%s8656_s2 + $0xa40] sm:$0xff]  ;;  %v365_v56 = vld [vmem:[%s8656_s2 + $0xa48] sm:$0xff]  ;;  %v5771_v57 = vcombine.low %v340_v42, %v348_v43  ;;  %v5773_v58 = vcombine.low %v341_v45, %v349_v47  ;;  %vm5318_vm1 = vcmask 523264   ;;  %vm5054_vm2 = vcmask 1041408  }
  0x4f   :  { %v5788_v59 = vcombine.high %v356_v52, %v364_v53  ;;  %v5790_v60 = vcombine.high %v357_v55, %v365_v56  ;;  %v372_v61 = vld [vmem:[%s8656_s2 + $0xa80] sm:$0xff]  ;;  %v373_v63 = vld [vmem:[%s8656_s2 + $0xa88] sm:$0xff]  ;;  %v5787_v2 = vcombine.low %v356_v52, %v364_v53  ;;  %v5789_v3 = vcombine.low %v357_v55, %v365_v56 }
  0x50   :  { %4051 = vmatpush1.bf16.msra.mxu0 %v5755_v48  ;;  %v380_v62 = vld [vmem:[%s8656_s2 + $0xac0] sm:$0xff]  ;;  %v381_v1 = vld [vmem:[%s8656_s2 + $0xac8] sm:$0xff]  ;;  %vm5447_vm4 = vcmask 1024  }
  0x51   :  { %4174 = vmatpush1.bf16.msra.mxu1 %v5757_v49  ;;  %4052 = vmatprep.subr.bf16.mxu0 %v5772_v50  ;;  %v5804_v4 = vcombine.high %v372_v61, %v380_v62  ;;  %v5806_v5 = vcombine.high %v373_v63, %v381_v1  ;;  %v388_v6 = vld [vmem:[%s8656_s2 + $0xb00] sm:$0xff]  ;;  %v389_v8 = vld [vmem:[%s8656_s2 + $0xb08] sm:$0xff]  ;;  %v5803_v11 = vcombine.low %v372_v61, %v380_v62 }
  0x52   :  { %4175 = vmatprep.subr.bf16.mxu1 %v5774_v51  ;;  %v396_v7 = vld [vmem:[%s8656_s2 + $0xb40] sm:$0xff]  ;;  %v397_v9 = vld [vmem:[%s8656_s2 + $0xb48] sm:$0xff]  ;;  %v5805_v12 = vcombine.low %v373_v63, %v381_v1 }
  0x53   :  { %v5820_v13 = vcombine.high %v388_v6, %v396_v7  ;;  %v5822_v14 = vcombine.high %v389_v8, %v397_v9  ;;  %v404_v15 = vld [vmem:[%s8656_s2 + $0xb80] sm:$0xff]  ;;  %v405_v17 = vld [vmem:[%s8656_s2 + $0xb88] sm:$0xff]  ;;  %v5819_v19 = vcombine.low %v388_v6, %v396_v7  ;;  %v5821_v20 = vcombine.low %v389_v8, %v397_v9 }
  0x54   :  { %4053 = vmatpush1.bf16.msra.mxu0 %v5771_v57  ;;  %v412_v16 = vld [vmem:[%s8656_s2 + $0xbc0] sm:$0xff]  ;;  %v413_v18 = vld [vmem:[%s8656_s2 + $0xbc8] sm:$0xff] }
  0x55   :  { %4176 = vmatpush1.bf16.msra.mxu1 %v5773_v58  ;;  %4054 = vmatprep.subr.bf16.mxu0 %v5788_v59  ;;  %v5836_v21 = vcombine.high %v404_v15, %v412_v16  ;;  %v5838_v22 = vcombine.high %v405_v17, %v413_v18  ;;  %v420_v23 = vld [vmem:[%s8656_s2 + $0xc00] sm:$0xff]  ;;  %v421_v25 = vld [vmem:[%s8656_s2 + $0xc08] sm:$0xff]  ;;  %v5835_v28 = vcombine.low %v404_v15, %v412_v16 }
  0x56   :  { %4177 = vmatprep.subr.bf16.mxu1 %v5790_v60  ;;  %v428_v24 = vld [vmem:[%s8656_s2 + $0xc40] sm:$0xff]  ;;  %v429_v26 = vld [vmem:[%s8656_s2 + $0xc48] sm:$0xff]  ;;  %v5837_v29 = vcombine.low %v405_v17, %v413_v18 }
  0x57   :  { %v5852_v30 = vcombine.high %v420_v23, %v428_v24  ;;  %v5854_v31 = vcombine.high %v421_v25, %v429_v26  ;;  %v436_v34 = vld [vmem:[%s8656_s2 + $0xc80] sm:$0xff]  ;;  %v437_v54 = vld [vmem:[%s8656_s2 + $0xc88] sm:$0xff]  ;;  %v5851_v36 = vcombine.low %v420_v23, %v428_v24  ;;  %v5853_v37 = vcombine.low %v421_v25, %v429_v26 }
  0x58   :  { %4055 = vmatpush1.bf16.msra.mxu0 %v5787_v2  ;;  %v444_v35 = vld [vmem:[%s8656_s2 + $0xcc0] sm:$0xff]  ;;  %v445_v0 = vld [vmem:[%s8656_s2 + $0xcc8] sm:$0xff] }
  0x59   :  { %4178 = vmatpush1.bf16.msra.mxu1 %v5789_v3  ;;  %4056 = vmatprep.subr.bf16.mxu0 %v5804_v4  ;;  %v5868_v39 = vcombine.high %v436_v34, %v444_v35  ;;  %v5870_v40 = vcombine.high %v437_v54, %v445_v0  ;;  %v452_v41 = vld [vmem:[%s8656_s2 + $0xd00] sm:$0xff]  ;;  %v453_v43 = vld [vmem:[%s8656_s2 + $0xd08] sm:$0xff]  ;;  %v5867_v46 = vcombine.low %v436_v34, %v444_v35 }
  0x5a   :  { %4179 = vmatprep.subr.bf16.mxu1 %v5806_v5  ;;  %v460_v42 = vld [vmem:[%s8656_s2 + $0xd40] sm:$0xff]  ;;  %v461_v45 = vld [vmem:[%s8656_s2 + $0xd48] sm:$0xff]  ;;  %v5869_v47 = vcombine.low %v437_v54, %v445_v0 }
  0x5b   :  { %v5884_v48 = vcombine.high %v452_v41, %v460_v42  ;;  %v5886_v49 = vcombine.high %v453_v43, %v461_v45  ;;  %v468_v50 = vld [vmem:[%s8656_s2 + $0xd80] sm:$0xff]  ;;  %v469_v52 = vld [vmem:[%s8656_s2 + $0xd88] sm:$0xff]  ;;  %v5883_v55 = vcombine.low %v452_v41, %v460_v42  ;;  %v5885_v56 = vcombine.low %v453_v43, %v461_v45 }
  0x5c   :  { %4057 = vmatpush1.bf16.msra.mxu0 %v5803_v11  ;;  %v476_v51 = vld [vmem:[%s8656_s2 + $0xdc0] sm:$0xff]  ;;  %v477_v53 = vld [vmem:[%s8656_s2 + $0xdc8] sm:$0xff]  ;;  %v6806_v41 = vcombine.high %v6602_v27, %v6602_v27 }
  0x5d   :  { %4180 = vmatpush1.bf16.msra.mxu1 %v5805_v12  ;;  %4058 = vmatprep.subr.bf16.mxu0 %v5820_v13  ;;  %v5900_v57 = vcombine.high %v468_v50, %v476_v51  ;;  %v5902_v58 = vcombine.high %v469_v52, %v477_v53  ;;  %v484_v59 = vld [vmem:[%s8656_s2 + $0xe00] sm:$0xff]  ;;  %v485_v61 = vld [vmem:[%s8656_s2 + $0xe08] sm:$0xff]  ;;  %v5899_v63 = vcombine.low %v468_v50, %v476_v51 }
  0x5e   :  { %4181 = vmatprep.subr.bf16.mxu1 %v5822_v14  ;;  %v492_v60 = vld [vmem:[%s8656_s2 + $0xe40] sm:$0xff]  ;;  %v493_v62 = vld [vmem:[%s8656_s2 + $0xe48] sm:$0xff]  ;;  %v5901_v1 = vcombine.low %v469_v52, %v477_v53 }
  0x5f   :  { %v5916_v2 = vcombine.high %v484_v59, %v492_v60  ;;  %v5918_v3 = vcombine.high %v485_v61, %v493_v62  ;;  %v500_v4 = vld [vmem:[%s8656_s2 + $0xe80] sm:$0xff]  ;;  %v501_v6 = vld [vmem:[%s8656_s2 + $0xe88] sm:$0xff]  ;;  %v5915_v8 = vcombine.low %v484_v59, %v492_v60  ;;  %v5917_v9 = vcombine.low %v485_v61, %v493_v62 }
  0x60   :  { %4059 = vmatpush1.bf16.msra.mxu0 %v5819_v19  ;;  %v508_v5 = vld [vmem:[%s8656_s2 + $0xec0] sm:$0xff]  ;;  %v509_v7 = vld [vmem:[%s8656_s2 + $0xec8] sm:$0xff]  ;;  %v6309_v60 = vmov 0  }
  0x61   :  { %4182 = vmatpush1.bf16.msra.mxu1 %v5821_v20  ;;  %4060 = vmatprep.subr.bf16.mxu0 %v5836_v21  ;;  %v5932_v11 = vcombine.high %v500_v4, %v508_v5  ;;  %v5934_v12 = vcombine.high %v501_v6, %v509_v7  ;;  %v516_v13 = vld [vmem:[%s8656_s2 + $0xf00] sm:$0xff]  ;;  %v517_v15 = vld [vmem:[%s8656_s2 + $0xf08] sm:$0xff]  ;;  %v5931_v17 = vcombine.low %v500_v4, %v508_v5 }
  0x62   :  { %4183 = vmatprep.subr.bf16.mxu1 %v5838_v22  ;;  %v524_v14 = vld [vmem:[%s8656_s2 + $0xf40] sm:$0xff]  ;;  %v525_v16 = vld [vmem:[%s8656_s2 + $0xf48] sm:$0xff]  ;;  %v5933_v18 = vcombine.low %v501_v6, %v509_v7 }
  0x63   :  { %v5948_v19 = vcombine.high %v516_v13, %v524_v14  ;;  %v5950_v20 = vcombine.high %v517_v15, %v525_v16  ;;  %v532_v21 = vld [vmem:[%s8656_s2 + $0xf80] sm:$0xff]  ;;  %v533_v23 = vld [vmem:[%s8656_s2 + $0xf88] sm:$0xff]  ;;  %v5947_v25 = vcombine.low %v516_v13, %v524_v14  ;;  %v5949_v26 = vcombine.low %v517_v15, %v525_v16 }
  0x64   :  { %4061 = vmatpush1.bf16.msra.mxu0 %v5835_v28  ;;  %v540_v22 = vld [vmem:[%s8656_s2 + $0xfc0] sm:$0xff]  ;;  %v541_v24 = vld [vmem:[%s8656_s2 + $0xfc8] sm:$0xff] }
  0x65   :  { %4184 = vmatpush1.bf16.msra.mxu1 %v5837_v29  ;;  %4062 = vmatprep.subr.bf16.mxu0 %v5852_v30  ;;  %v5964_v28 = vcombine.high %v532_v21, %v540_v22  ;;  %v5966_v29 = vcombine.high %v533_v23, %v541_v24  ;;  %v548_v30 = vld [vmem:[%s8656_s2 + $0x1000] sm:$0xff]  ;;  %v549_v34 = vld [vmem:[%s8656_s2 + $0x1008] sm:$0xff]  ;;  %v5963_v54 = vcombine.low %v532_v21, %v540_v22 }
  0x66   :  { %4185 = vmatprep.subr.bf16.mxu1 %v5854_v31  ;;  %v556_v31 = vld [vmem:[%s8656_s2 + $0x1040] sm:$0xff]  ;;  %v557_v35 = vld [vmem:[%s8656_s2 + $0x1048] sm:$0xff]  ;;  %v5965_v0 = vcombine.low %v533_v23, %v541_v24 }
  0x67   :  { %v565_v42 = vld [vmem:[%s8656_s2 + $0x1088] sm:$0xff]  ;;  %v5979_v45 = vcombine.low %v548_v30, %v556_v31  ;;  %v588_v50 = vld [vmem:[%s8656_s2 + $0x1140] sm:$0xff] }
  0x68   :  { %4063 = vmatpush1.bf16.msra.mxu0 %v5851_v36  ;;  %v5980_v36 = vcombine.high %v548_v30, %v556_v31  ;;  %v573_v43 = vld [vmem:[%s8656_s2 + $0x10c8] sm:$0xff]  ;;  %v604_v59 = vld [vmem:[%s8656_s2 + $0x11c0] sm:$0xff] }
  0x69   :  { %4186 = vmatpush1.bf16.msra.mxu1 %v5853_v37  ;;  %4064 = vmatprep.subr.bf16.mxu0 %v5868_v39  ;;  %v5982_v37 = vcombine.high %v549_v34, %v557_v35  ;;  %v564_v39 = vld [vmem:[%s8656_s2 + $0x1080] sm:$0xff]  ;;  %v581_v51 = vld [vmem:[%s8656_s2 + $0x1108] sm:$0xff] }
  0x6a   :  { %4187 = vmatprep.subr.bf16.mxu1 %v5870_v40  ;;  %v572_v40 = vld [vmem:[%s8656_s2 + $0x10c0] sm:$0xff]  ;;  %v589_v52 = vld [vmem:[%s8656_s2 + $0x1148] sm:$0xff] }
  0x6b   :  { %v5995_v53 = vcombine.low %v564_v39, %v572_v40  ;;  %v597_v61 = vld [vmem:[%s8656_s2 + $0x1188] sm:$0xff]  ;;  %v612_v4 = vld [vmem:[%s8656_s2 + $0x1200] sm:$0xff] }
  0x6c   :  { %4065 = vmatpush1.bf16.msra.mxu0 %v5867_v46  ;;  %v5981_v46 = vcombine.low %v549_v34, %v557_v35  ;;  %v605_v62 = vld [vmem:[%s8656_s2 + $0x11c8] sm:$0xff]  ;;  %v620_v5 = vld [vmem:[%s8656_s2 + $0x1240] sm:$0xff] }
  0x6d   :  { %4188 = vmatpush1.bf16.msra.mxu1 %v5869_v47  ;;  %4066 = vmatprep.subr.bf16.mxu0 %v5884_v48  ;;  %v5996_v47 = vcombine.high %v564_v39, %v572_v40  ;;  %v5998_v48 = vcombine.high %v565_v42, %v573_v43  ;;  %v613_v6 = vld [vmem:[%s8656_s2 + $0x1208] sm:$0xff]  ;;  %v628_v13 = vld [vmem:[%s8656_s2 + $0x1280] sm:$0xff]  ;;  %v38_v39 = vld [vmem:[%s8656_s2 + $0x10] sm:$0xff] }
  0x6e   :  { %4189 = vmatprep.subr.bf16.mxu1 %v5886_v49  ;;  %v580_v49 = vld [vmem:[%s8656_s2 + $0x1100] sm:$0xff]  ;;  %v621_v7 = vld [vmem:[%s8656_s2 + $0x1248] sm:$0xff]  ;;  %v46_v40 = vld [vmem:[%s8656_s2 + $0x50] sm:$0xff] }
  0x6f   :  { %v636_v14 = vld [vmem:[%s8656_s2 + $0x12c0] sm:$0xff]  ;;  %v629_v15 = vld [vmem:[%s8656_s2 + $0x1288] sm:$0xff] }
  0x70   :  { %4067 = vmatpush1.bf16.msra.mxu0 %v5883_v55  ;;  %v5997_v55 = vcombine.low %v565_v42, %v573_v43  ;;  %v637_v16 = vld [vmem:[%s8656_s2 + $0x12c8] sm:$0xff]  ;;  %v644_v21 = vld [vmem:[%s8656_s2 + $0x1300] sm:$0xff]  ;;  %v39_v42 = vld [vmem:[%s8656_s2 + $0x18] sm:$0xff] }
  0x71   :  { %4190 = vmatpush1.bf16.msra.mxu1 %v5885_v56  ;;  %4068 = vmatprep.subr.bf16.mxu0 %v5900_v57  ;;  %v6012_v56 = vcombine.high %v580_v49, %v588_v50  ;;  %v6014_v57 = vcombine.high %v581_v51, %v589_v52  ;;  %v652_v22 = vld [vmem:[%s8656_s2 + $0x1340] sm:$0xff]  ;;  %v645_v23 = vld [vmem:[%s8656_s2 + $0x1308] sm:$0xff]  ;;  %v47_v43 = vld [vmem:[%s8656_s2 + $0x58] sm:$0xff] }
  0x72   :  { %4191 = vmatprep.subr.bf16.mxu1 %v5902_v58  ;;  %v596_v58 = vld [vmem:[%s8656_s2 + $0x1180] sm:$0xff]  ;;  %v653_v24 = vld [vmem:[%s8656_s2 + $0x1348] sm:$0xff] }
  0x73   :  { %v660_v30 = vld [vmem:[%s8656_s2 + $0x1380] sm:$0xff]  ;;  %v661_v34 = vld [vmem:[%s8656_s2 + $0x1388] sm:$0xff] }
  0x74   :  { %4069 = vmatpush1.bf16.msra.mxu0 %v5899_v63  ;;  %v6011_v63 = vcombine.low %v580_v49, %v588_v50  ;;  %v668_v31 = vld [vmem:[%s8656_s2 + $0x13c0] sm:$0xff]  ;;  %v669_v35 = vld [vmem:[%s8656_s2 + $0x13c8] sm:$0xff]  ;;  %v54_v49 = vld [vmem:[%s8656_s2 + $0x90] sm:$0xff] }
  0x75   :  { %4192 = vmatpush1.bf16.msra.mxu1 %v5901_v1  ;;  %4070 = vmatprep.subr.bf16.mxu0 %v5916_v2  ;;  %v6013_v1 = vcombine.low %v581_v51, %v589_v52  ;;  %v6028_v2 = vcombine.high %v596_v58, %v604_v59  ;;  %v62_v50 = vld [vmem:[%s8656_s2 + $0xd0] sm:$0xff]  ;;  %v55_v51 = vld [vmem:[%s8656_s2 + $0x98] sm:$0xff] }
  0x76   :  { %4193 = vmatprep.subr.bf16.mxu1 %v5918_v3  ;;  %v6030_v3 = vcombine.high %v597_v61, %v605_v62  ;;  %v63_v52 = vld [vmem:[%s8656_s2 + $0xd8] sm:$0xff] }
  0x78   :  { %4071 = vmatpush1.bf16.msra.mxu0 %v5915_v8  ;;  %v6027_v8 = vcombine.low %v596_v58, %v604_v59  ;;  %v70_v58 = vld [vmem:[%s8656_s2 + $0x110] sm:$0xff] }
  0x79   :  { %4194 = vmatpush1.bf16.msra.mxu1 %v5917_v9  ;;  %4072 = vmatprep.subr.bf16.mxu0 %v5932_v11  ;;  %v6029_v9 = vcombine.low %v597_v61, %v605_v62  ;;  %v6044_v11 = vcombine.high %v612_v4, %v620_v5  ;;  %v78_v59 = vld [vmem:[%s8656_s2 + $0x150] sm:$0xff]  ;;  %v71_v61 = vld [vmem:[%s8656_s2 + $0x118] sm:$0xff] }
  0x7a   :  { %4195 = vmatprep.subr.bf16.mxu1 %v5934_v12  ;;  %v6046_v12 = vcombine.high %v613_v6, %v621_v7  ;;  %v79_v62 = vld [vmem:[%s8656_s2 + $0x158] sm:$0xff] }
  0x7c   :  { %4073 = vmatpush1.bf16.msra.mxu0 %v5931_v17  ;;  %v6043_v17 = vcombine.low %v612_v4, %v620_v5  ;;  %v86_v4 = vld [vmem:[%s8656_s2 + $0x190] sm:$0xff] }
  0x7d   :  { %4196 = vmatpush1.bf16.msra.mxu1 %v5933_v18  ;;  %4074 = vmatprep.subr.bf16.mxu0 %v5948_v19  ;;  %v6045_v18 = vcombine.low %v613_v6, %v621_v7  ;;  %v6060_v19 = vcombine.high %v628_v13, %v636_v14  ;;  %v94_v5 = vld [vmem:[%s8656_s2 + $0x1d0] sm:$0xff]  ;;  %v87_v6 = vld [vmem:[%s8656_s2 + $0x198] sm:$0xff] }
  0x7e   :  { %4197 = vmatprep.subr.bf16.mxu1 %v5950_v20  ;;  %v6062_v20 = vcombine.high %v629_v15, %v637_v16  ;;  %v95_v7 = vld [vmem:[%s8656_s2 + $0x1d8] sm:$0xff] }
  0x80   :  { %4075 = vmatpush1.bf16.msra.mxu0 %v5947_v25  ;;  %v6059_v25 = vcombine.low %v628_v13, %v636_v14  ;;  %v102_v13 = vld [vmem:[%s8656_s2 + $0x210] sm:$0xff] }
  0x81   :  { %4198 = vmatpush1.bf16.msra.mxu1 %v5949_v26  ;;  %4076 = vmatprep.subr.bf16.mxu0 %v5964_v28  ;;  %v6061_v26 = vcombine.low %v629_v15, %v637_v16  ;;  %v6076_v28 = vcombine.high %v644_v21, %v652_v22  ;;  %v110_v14 = vld [vmem:[%s8656_s2 + $0x250] sm:$0xff]  ;;  %v103_v15 = vld [vmem:[%s8656_s2 + $0x218] sm:$0xff] }
  0x82   :  { %4199 = vmatprep.subr.bf16.mxu1 %v5966_v29  ;;  %v6078_v29 = vcombine.high %v645_v23, %v653_v24  ;;  %v111_v16 = vld [vmem:[%s8656_s2 + $0x258] sm:$0xff] }
  0x84   :  { %4077 = vmatpush1.bf16.msra.mxu0 %v5963_v54  ;;  %v6075_v54 = vcombine.low %v644_v21, %v652_v22  ;;  %v118_v21 = vld [vmem:[%s8656_s2 + $0x290] sm:$0xff] }
  0x85   :  { %4200 = vmatpush1.bf16.msra.mxu1 %v5965_v0  ;;  %4087 = vmatprep.subr.bf16.mxu0 %v5980_v36  ;;  %v6077_v0 = vcombine.low %v645_v23, %v653_v24  ;;  %v6092_v36 = vcombine.high %v660_v30, %v668_v31  ;;  %v126_v22 = vld [vmem:[%s8656_s2 + $0x2d0] sm:$0xff]  ;;  %v119_v23 = vld [vmem:[%s8656_s2 + $0x298] sm:$0xff] }
  0x86   :  { %4210 = vmatprep.subr.bf16.mxu1 %v5982_v37  ;;  %v6094_v37 = vcombine.high %v661_v34, %v669_v35  ;;  %v127_v24 = vld [vmem:[%s8656_s2 + $0x2d8] sm:$0xff] }
  0x87   :  { %4079 = vmatmul.mubr.bf16.vlgmr.msra.gmra.mrb[0].mxu0 %v6806_v41 }
  0x88   :  { %4088 = vmatpush1.bf16.msra.mxu0 %v5979_v45  ;;  %4202 = vmatmul.mubr.bf16.vlgmr.msra.gmra.mrb[0].mxu1 %v6806_v41  ;;  %v6091_v45 = vcombine.low %v660_v30, %v668_v31  ;;  %v134_v30 = vld [vmem:[%s8656_s2 + $0x310] sm:$0xff] }
  0x89   :  { %4211 = vmatpush1.bf16.msra.mxu1 %v5981_v46  ;;  %4089 = vmatprep.subr.bf16.mxu0 %v5996_v47  ;;  %v6093_v46 = vcombine.low %v661_v34, %v669_v35  ;;  %v5472_v47 = vcombine.high %v38_v39, %v46_v40  ;;  %v142_v31 = vld [vmem:[%s8656_s2 + $0x350] sm:$0xff]  ;;  %v135_v34 = vld [vmem:[%s8656_s2 + $0x318] sm:$0xff] }
  0x8a   :  { %4212 = vmatprep.subr.bf16.mxu1 %v5998_v48  ;;  %4119 = vmatprep.mubr.bf16.mxu0 %v6309_v60  ;;  %v5474_v48 = vcombine.high %v39_v42, %v47_v43  ;;  %v143_v35 = vld [vmem:[%s8656_s2 + $0x358] sm:$0xff] }
  0x8b   :  { %4242 = vmatprep.mubr.bf16.mxu1 %v6309_v60 }
  0x8c   :  { %4090 = vmatpush1.bf16.msra.mxu0 %v5995_v53  ;;  %v5471_v53 = vcombine.low %v38_v39, %v46_v40  ;;  %v150_v39 = vld [vmem:[%s8656_s2 + $0x390] sm:$0xff] }
  0x8d   :  { %4213 = vmatpush1.bf16.msra.mxu1 %v5997_v55  ;;  %4091 = vmatprep.subr.bf16.mxu0 %v6012_v56  ;;  %v5473_v55 = vcombine.low %v39_v42, %v47_v43  ;;  %v5488_v56 = vcombine.high %v54_v49, %v62_v50  ;;  %v158_v40 = vld [vmem:[%s8656_s2 + $0x3d0] sm:$0xff]  ;;  %v151_v42 = vld [vmem:[%s8656_s2 + $0x398] sm:$0xff] }
  0x8e   :  { %4214 = vmatprep.subr.bf16.mxu1 %v6014_v57  ;;  %v5490_v57 = vcombine.high %v55_v51, %v63_v52  ;;  %v159_v43 = vld [vmem:[%s8656_s2 + $0x3d8] sm:$0xff] }
  0x90   :  { %4092 = vmatpush1.bf16.msra.mxu0 %v6011_v63  ;;  %v5487_v63 = vcombine.low %v54_v49, %v62_v50  ;;  %v166_v49 = vld [vmem:[%s8656_s2 + $0x410] sm:$0xff] }
  0x91   :  { %4215 = vmatpush1.bf16.msra.mxu1 %v6013_v1  ;;  %4093 = vmatprep.subr.bf16.mxu0 %v6028_v2  ;;  %v5489_v1 = vcombine.low %v55_v51, %v63_v52  ;;  %v5504_v2 = vcombine.high %v70_v58, %v78_v59  ;;  %v174_v50 = vld [vmem:[%s8656_s2 + $0x450] sm:$0xff]  ;;  %v167_v51 = vld [vmem:[%s8656_s2 + $0x418] sm:$0xff] }
  0x92   :  { %4216 = vmatprep.subr.bf16.mxu1 %v6030_v3  ;;  %v5506_v3 = vcombine.high %v71_v61, %v79_v62  ;;  %v175_v52 = vld [vmem:[%s8656_s2 + $0x458] sm:$0xff] }
  0x94   :  { %4094 = vmatpush1.bf16.msra.mxu0 %v6027_v8  ;;  %v5503_v8 = vcombine.low %v70_v58, %v78_v59  ;;  %v182_v58 = vld [vmem:[%s8656_s2 + $0x490] sm:$0xff] }
  0x95   :  { %4217 = vmatpush1.bf16.msra.mxu1 %v6029_v9  ;;  %4095 = vmatprep.subr.bf16.mxu0 %v6044_v11  ;;  %v5505_v9 = vcombine.low %v71_v61, %v79_v62  ;;  %v5520_v11 = vcombine.high %v86_v4, %v94_v5  ;;  %v190_v59 = vld [vmem:[%s8656_s2 + $0x4d0] sm:$0xff]  ;;  %v183_v61 = vld [vmem:[%s8656_s2 + $0x498] sm:$0xff] }
  0x96   :  { %4218 = vmatprep.subr.bf16.mxu1 %v6046_v12  ;;  %v5522_v12 = vcombine.high %v87_v6, %v95_v7  ;;  %v191_v62 = vld [vmem:[%s8656_s2 + $0x4d8] sm:$0xff] }
  0x98   :  { %4096 = vmatpush1.bf16.msra.mxu0 %v6043_v17  ;;  %v5519_v17 = vcombine.low %v86_v4, %v94_v5  ;;  %v198_v4 = vld [vmem:[%s8656_s2 + $0x510] sm:$0xff] }
  0x99   :  { %4219 = vmatpush1.bf16.msra.mxu1 %v6045_v18  ;;  %4097 = vmatprep.subr.bf16.mxu0 %v6060_v19  ;;  %v5521_v18 = vcombine.low %v87_v6, %v95_v7  ;;  %v5536_v19 = vcombine.high %v102_v13, %v110_v14  ;;  %v206_v5 = vld [vmem:[%s8656_s2 + $0x550] sm:$0xff]  ;;  %v199_v6 = vld [vmem:[%s8656_s2 + $0x518] sm:$0xff] }
  0x9a   :  { %4220 = vmatprep.subr.bf16.mxu1 %v6062_v20  ;;  %v5538_v20 = vcombine.high %v103_v15, %v111_v16  ;;  %v207_v7 = vld [vmem:[%s8656_s2 + $0x558] sm:$0xff] }
  0x9c   :  { %4098 = vmatpush1.bf16.msra.mxu0 %v6059_v25  ;;  %v5535_v25 = vcombine.low %v102_v13, %v110_v14  ;;  %v214_v13 = vld [vmem:[%s8656_s2 + $0x590] sm:$0xff] }
  0x9d   :  { %4221 = vmatpush1.bf16.msra.mxu1 %v6061_v26  ;;  %4099 = vmatprep.subr.bf16.mxu0 %v6076_v28  ;;  %v5537_v26 = vcombine.low %v103_v15, %v111_v16  ;;  %v5552_v28 = vcombine.high %v118_v21, %v126_v22  ;;  %v222_v14 = vld [vmem:[%s8656_s2 + $0x5d0] sm:$0xff]  ;;  %v215_v15 = vld [vmem:[%s8656_s2 + $0x598] sm:$0xff] }
  0x9e   :  { %4222 = vmatprep.subr.bf16.mxu1 %v6078_v29  ;;  %v5554_v29 = vcombine.high %v119_v23, %v127_v24  ;;  %v223_v16 = vld [vmem:[%s8656_s2 + $0x5d8] sm:$0xff] }
  0xa0   :  { %4100 = vmatpush1.bf16.msra.mxu0 %v6075_v54  ;;  %v5551_v54 = vcombine.low %v118_v21, %v126_v22  ;;  %v230_v21 = vld [vmem:[%s8656_s2 + $0x610] sm:$0xff] }
  0xa1   :  { %4223 = vmatpush1.bf16.msra.mxu1 %v6077_v0  ;;  %4101 = vmatprep.subr.bf16.mxu0 %v6092_v36  ;;  %v5553_v0 = vcombine.low %v119_v23, %v127_v24  ;;  %v5568_v36 = vcombine.high %v134_v30, %v142_v31  ;;  %v238_v22 = vld [vmem:[%s8656_s2 + $0x650] sm:$0xff]  ;;  %v231_v23 = vld [vmem:[%s8656_s2 + $0x618] sm:$0xff] }
  0xa2   :  { %4224 = vmatprep.subr.bf16.mxu1 %v6094_v37  ;;  %v5570_v37 = vcombine.high %v135_v34, %v143_v35  ;;  %v239_v24 = vld [vmem:[%s8656_s2 + $0x658] sm:$0xff] }
  0xa4   :  { %4102 = vmatpush1.bf16.msra.mxu0 %v6091_v45  ;;  %v5567_v45 = vcombine.low %v134_v30, %v142_v31  ;;  %v246_v30 = vld [vmem:[%s8656_s2 + $0x690] sm:$0xff] }
  0xa5   :  { %4225 = vmatpush1.bf16.msra.mxu1 %v6093_v46  ;;  %4251 = vmatprep.subr.bf16.mxu0 %v5472_v47  ;;  %v5569_v46 = vcombine.low %v135_v34, %v143_v35  ;;  %v5584_v47 = vcombine.high %v150_v39, %v158_v40  ;;  %v254_v31 = vld [vmem:[%s8656_s2 + $0x6d0] sm:$0xff]  ;;  %v247_v34 = vld [vmem:[%s8656_s2 + $0x698] sm:$0xff] }
  0xa6   :  { %4374 = vmatprep.subr.bf16.mxu1 %v5474_v48  ;;  %v5586_v48 = vcombine.high %v151_v42, %v159_v43  ;;  %v255_v35 = vld [vmem:[%s8656_s2 + $0x6d8] sm:$0xff] }
  0xa7   :  { %4120 = vmatmul.mubr.bf16.vlgmr.msra.gmra.mrb[0].mxu0 %v6520_v32 }
  0xa8   :  { %4243 = vmatmul.mubr.bf16.vlgmr.msra.gmra.mrb[0].mxu1 %v6520_v32  ;;  %4252 = vmatpush1.bf16.msra.mxu0 %v5471_v53  ;;  %v5583_v53 = vcombine.low %v150_v39, %v158_v40  ;;  %v262_v39 = vld [vmem:[%s8656_s2 + $0x710] sm:$0xff] }
  0xa9   :  { %4375 = vmatpush1.bf16.msra.mxu1 %v5473_v55  ;;  %4253 = vmatprep.subr.bf16.mxu0 %v5488_v56  ;;  %v5585_v55 = vcombine.low %v151_v42, %v159_v43  ;;  %v5600_v56 = vcombine.high %v166_v49, %v174_v50  ;;  %v270_v40 = vld [vmem:[%s8656_s2 + $0x750] sm:$0xff]  ;;  %v263_v42 = vld [vmem:[%s8656_s2 + $0x718] sm:$0xff] }
  0xaa   :  { %4376 = vmatprep.subr.bf16.mxu1 %v5490_v57  ;;  %4283 = vmatprep.mubr.bf16.mxu0 %v6484_v10  ;;  %v5602_v57 = vcombine.high %v167_v51, %v175_v52  ;;  %v271_v43 = vld [vmem:[%s8656_s2 + $0x758] sm:$0xff] }
  0xab   :  { %4406 = vmatprep.mubr.bf16.mxu1 %v6484_v10 }
  0xac   :  { %4254 = vmatpush1.bf16.msra.mxu0 %v5487_v63  ;;  %v5599_v63 = vcombine.low %v166_v49, %v174_v50  ;;  %v278_v49 = vld [vmem:[%s8656_s2 + $0x790] sm:$0xff] }
  0xad   :  { %4377 = vmatpush1.bf16.msra.mxu1 %v5489_v1  ;;  %4255 = vmatprep.subr.bf16.mxu0 %v5504_v2  ;;  %v5601_v1 = vcombine.low %v167_v51, %v175_v52  ;;  %v5616_v2 = vcombine.high %v182_v58, %v190_v59  ;;  %v286_v50 = vld [vmem:[%s8656_s2 + $0x7d0] sm:$0xff]  ;;  %v279_v51 = vld [vmem:[%s8656_s2 + $0x798] sm:$0xff] }
  0xae   :  { %4378 = vmatprep.subr.bf16.mxu1 %v5506_v3  ;;  %v5618_v3 = vcombine.high %v183_v61, %v191_v62  ;;  %v287_v52 = vld [vmem:[%s8656_s2 + $0x7d8] sm:$0xff] }
  0xb0   :  { %4256 = vmatpush1.bf16.msra.mxu0 %v5503_v8  ;;  %v5615_v8 = vcombine.low %v182_v58, %v190_v59  ;;  %v294_v58 = vld [vmem:[%s8656_s2 + $0x810] sm:$0xff] }
  0xb1   :  { %4379 = vmatpush1.bf16.msra.mxu1 %v5505_v9  ;;  %4257 = vmatprep.subr.bf16.mxu0 %v5520_v11  ;;  %v5617_v9 = vcombine.low %v183_v61, %v191_v62  ;;  %v5632_v11 = vcombine.high %v198_v4, %v206_v5  ;;  %v302_v59 = vld [vmem:[%s8656_s2 + $0x850] sm:$0xff]  ;;  %v295_v61 = vld [vmem:[%s8656_s2 + $0x818] sm:$0xff] }
  0xb2   :  { %4380 = vmatprep.subr.bf16.mxu1 %v5522_v12  ;;  %v5634_v12 = vcombine.high %v199_v6, %v207_v7  ;;  %v303_v62 = vld [vmem:[%s8656_s2 + $0x858] sm:$0xff] }
  0xb4   :  { %4258 = vmatpush1.bf16.msra.mxu0 %v5519_v17  ;;  %v5631_v17 = vcombine.low %v198_v4, %v206_v5  ;;  %v310_v4 = vld [vmem:[%s8656_s2 + $0x890] sm:$0xff] }
  0xb5   :  { %4381 = vmatpush1.bf16.msra.mxu1 %v5521_v18  ;;  %4259 = vmatprep.subr.bf16.mxu0 %v5536_v19  ;;  %v5633_v18 = vcombine.low %v199_v6, %v207_v7  ;;  %v5648_v19 = vcombine.high %v214_v13, %v222_v14  ;;  %v318_v5 = vld [vmem:[%s8656_s2 + $0x8d0] sm:$0xff]  ;;  %v311_v6 = vld [vmem:[%s8656_s2 + $0x898] sm:$0xff] }
  0xb6   :  { %4382 = vmatprep.subr.bf16.mxu1 %v5538_v20  ;;  %v5650_v20 = vcombine.high %v215_v15, %v223_v16  ;;  %v319_v7 = vld [vmem:[%s8656_s2 + $0x8d8] sm:$0xff] }
  0xb8   :  { %4260 = vmatpush1.bf16.msra.mxu0 %v5535_v25  ;;  %v5647_v25 = vcombine.low %v214_v13, %v222_v14  ;;  %v326_v13 = vld [vmem:[%s8656_s2 + $0x910] sm:$0xff] }
  0xb9   :  { %4383 = vmatpush1.bf16.msra.mxu1 %v5537_v26  ;;  %4261 = vmatprep.subr.bf16.mxu0 %v5552_v28  ;;  %v5649_v26 = vcombine.low %v215_v15, %v223_v16  ;;  %v5664_v28 = vcombine.high %v230_v21, %v238_v22  ;;  %v334_v14 = vld [vmem:[%s8656_s2 + $0x950] sm:$0xff]  ;;  %v327_v15 = vld [vmem:[%s8656_s2 + $0x918] sm:$0xff] }
  0xba   :  { %4384 = vmatprep.subr.bf16.mxu1 %v5554_v29  ;;  %v5666_v29 = vcombine.high %v231_v23, %v239_v24  ;;  %v335_v16 = vld [vmem:[%s8656_s2 + $0x958] sm:$0xff] }
  0xbc   :  { %4262 = vmatpush1.bf16.msra.mxu0 %v5551_v54  ;;  %v5663_v54 = vcombine.low %v230_v21, %v238_v22  ;;  %v342_v21 = vld [vmem:[%s8656_s2 + $0x990] sm:$0xff] }
  0xbd   :  { %4385 = vmatpush1.bf16.msra.mxu1 %v5553_v0  ;;  %4263 = vmatprep.subr.bf16.mxu0 %v5568_v36  ;;  %v5665_v0 = vcombine.low %v231_v23, %v239_v24  ;;  %v5680_v36 = vcombine.high %v246_v30, %v254_v31  ;;  %v350_v22 = vld [vmem:[%s8656_s2 + $0x9d0] sm:$0xff]  ;;  %v343_v23 = vld [vmem:[%s8656_s2 + $0x998] sm:$0xff] }
  0xbe   :  { %4386 = vmatprep.subr.bf16.mxu1 %v5570_v37  ;;  %v5682_v37 = vcombine.high %v247_v34, %v255_v35  ;;  %v351_v24 = vld [vmem:[%s8656_s2 + $0x9d8] sm:$0xff] }
  0xc0   :  { %4264 = vmatpush1.bf16.msra.mxu0 %v5567_v45  ;;  %v5679_v45 = vcombine.low %v246_v30, %v254_v31  ;;  %v358_v30 = vld [vmem:[%s8656_s2 + $0xa10] sm:$0xff] }
  0xc1   :  { %4387 = vmatpush1.bf16.msra.mxu1 %v5569_v46  ;;  %4265 = vmatprep.subr.bf16.mxu0 %v5584_v47  ;;  %v5681_v46 = vcombine.low %v247_v34, %v255_v35  ;;  %v5696_v47 = vcombine.high %v262_v39, %v270_v40  ;;  %v366_v31 = vld [vmem:[%s8656_s2 + $0xa50] sm:$0xff]  ;;  %v359_v34 = vld [vmem:[%s8656_s2 + $0xa18] sm:$0xff] }
  0xc2   :  { %4388 = vmatprep.subr.bf16.mxu1 %v5586_v48  ;;  %v5698_v48 = vcombine.high %v263_v42, %v271_v43  ;;  %v367_v35 = vld [vmem:[%s8656_s2 + $0xa58] sm:$0xff] }
  0xc4   :  { %4266 = vmatpush1.bf16.msra.mxu0 %v5583_v53  ;;  %v5695_v53 = vcombine.low %v262_v39, %v270_v40  ;;  %v374_v39 = vld [vmem:[%s8656_s2 + $0xa90] sm:$0xff] }
  0xc5   :  { %4389 = vmatpush1.bf16.msra.mxu1 %v5585_v55  ;;  %4267 = vmatprep.subr.bf16.mxu0 %v5600_v56  ;;  %v5697_v55 = vcombine.low %v263_v42, %v271_v43  ;;  %v5712_v56 = vcombine.high %v278_v49, %v286_v50  ;;  %v382_v40 = vld [vmem:[%s8656_s2 + $0xad0] sm:$0xff]  ;;  %v375_v42 = vld [vmem:[%s8656_s2 + $0xa98] sm:$0xff] }
  0xc6   :  { %4390 = vmatprep.subr.bf16.mxu1 %v5602_v57  ;;  %v5714_v57 = vcombine.high %v279_v51, %v287_v52  ;;  %v383_v43 = vld [vmem:[%s8656_s2 + $0xad8] sm:$0xff] }
  0xc8   :  { %4268 = vmatpush1.bf16.msra.mxu0 %v5599_v63  ;;  %v5711_v63 = vcombine.low %v278_v49, %v286_v50  ;;  %v390_v49 = vld [vmem:[%s8656_s2 + $0xb10] sm:$0xff] }
  0xc9   :  { %4391 = vmatpush1.bf16.msra.mxu1 %v5601_v1  ;;  %4269 = vmatprep.subr.bf16.mxu0 %v5616_v2  ;;  %v5713_v1 = vcombine.low %v279_v51, %v287_v52  ;;  %v5728_v2 = vcombine.high %v294_v58, %v302_v59  ;;  %v398_v50 = vld [vmem:[%s8656_s2 + $0xb50] sm:$0xff]  ;;  %v391_v51 = vld [vmem:[%s8656_s2 + $0xb18] sm:$0xff] }
  0xca   :  { %4392 = vmatprep.subr.bf16.mxu1 %v5618_v3  ;;  %v5730_v3 = vcombine.high %v295_v61, %v303_v62  ;;  %v399_v52 = vld [vmem:[%s8656_s2 + $0xb58] sm:$0xff] }
  0xcc   :  { %4270 = vmatpush1.bf16.msra.mxu0 %v5615_v8  ;;  %v5727_v8 = vcombine.low %v294_v58, %v302_v59  ;;  %v406_v58 = vld [vmem:[%s8656_s2 + $0xb90] sm:$0xff] }
  0xcd   :  { %4393 = vmatpush1.bf16.msra.mxu1 %v5617_v9  ;;  %4271 = vmatprep.subr.bf16.mxu0 %v5632_v11  ;;  %v5729_v9 = vcombine.low %v295_v61, %v303_v62  ;;  %v5744_v11 = vcombine.high %v310_v4, %v318_v5  ;;  %v414_v59 = vld [vmem:[%s8656_s2 + $0xbd0] sm:$0xff]  ;;  %v407_v61 = vld [vmem:[%s8656_s2 + $0xb98] sm:$0xff] }
  0xce   :  { %4394 = vmatprep.subr.bf16.mxu1 %v5634_v12  ;;  %v5746_v12 = vcombine.high %v311_v6, %v319_v7  ;;  %v415_v62 = vld [vmem:[%s8656_s2 + $0xbd8] sm:$0xff] }
  0xd0   :  { %4272 = vmatpush1.bf16.msra.mxu0 %v5631_v17  ;;  %v5743_v17 = vcombine.low %v310_v4, %v318_v5  ;;  %v422_v4 = vld [vmem:[%s8656_s2 + $0xc10] sm:$0xff] }
  0xd1   :  { %4395 = vmatpush1.bf16.msra.mxu1 %v5633_v18  ;;  %4273 = vmatprep.subr.bf16.mxu0 %v5648_v19  ;;  %v5745_v18 = vcombine.low %v311_v6, %v319_v7  ;;  %v5760_v19 = vcombine.high %v326_v13, %v334_v14  ;;  %v430_v5 = vld [vmem:[%s8656_s2 + $0xc50] sm:$0xff]  ;;  %v423_v6 = vld [vmem:[%s8656_s2 + $0xc18] sm:$0xff] }
  0xd2   :  { %4396 = vmatprep.subr.bf16.mxu1 %v5650_v20  ;;  %v5762_v20 = vcombine.high %v327_v15, %v335_v16  ;;  %v431_v7 = vld [vmem:[%s8656_s2 + $0xc58] sm:$0xff] }
  0xd4   :  { %4274 = vmatpush1.bf16.msra.mxu0 %v5647_v25  ;;  %v5759_v25 = vcombine.low %v326_v13, %v334_v14  ;;  %v438_v13 = vld [vmem:[%s8656_s2 + $0xc90] sm:$0xff] }
  0xd5   :  { %4397 = vmatpush1.bf16.msra.mxu1 %v5649_v26  ;;  %4275 = vmatprep.subr.bf16.mxu0 %v5664_v28  ;;  %v5761_v26 = vcombine.low %v327_v15, %v335_v16  ;;  %v5776_v28 = vcombine.high %v342_v21, %v350_v22  ;;  %v446_v14 = vld [vmem:[%s8656_s2 + $0xcd0] sm:$0xff]  ;;  %v439_v15 = vld [vmem:[%s8656_s2 + $0xc98] sm:$0xff] }
  0xd6   :  { %4398 = vmatprep.subr.bf16.mxu1 %v5666_v29  ;;  %v5778_v29 = vcombine.high %v343_v23, %v351_v24  ;;  %v447_v16 = vld [vmem:[%s8656_s2 + $0xcd8] sm:$0xff] }
  0xd8   :  { %4276 = vmatpush1.bf16.msra.mxu0 %v5663_v54  ;;  %v5775_v54 = vcombine.low %v342_v21, %v350_v22  ;;  %v454_v21 = vld [vmem:[%s8656_s2 + $0xd10] sm:$0xff] }
  0xd9   :  { %4399 = vmatpush1.bf16.msra.mxu1 %v5665_v0  ;;  %4277 = vmatprep.subr.bf16.mxu0 %v5680_v36  ;;  %v5777_v0 = vcombine.low %v343_v23, %v351_v24  ;;  %v5792_v36 = vcombine.high %v358_v30, %v366_v31  ;;  %v462_v22 = vld [vmem:[%s8656_s2 + $0xd50] sm:$0xff]  ;;  %v455_v23 = vld [vmem:[%s8656_s2 + $0xd18] sm:$0xff] }
  0xda   :  { %4400 = vmatprep.subr.bf16.mxu1 %v5682_v37  ;;  %v5794_v37 = vcombine.high %v359_v34, %v367_v35  ;;  %v463_v24 = vld [vmem:[%s8656_s2 + $0xd58] sm:$0xff] }
  0xdc   :  { %4278 = vmatpush1.bf16.msra.mxu0 %v5679_v45  ;;  %v5791_v45 = vcombine.low %v358_v30, %v366_v31  ;;  %v470_v30 = vld [vmem:[%s8656_s2 + $0xd90] sm:$0xff] }
  0xdd   :  { %4401 = vmatpush1.bf16.msra.mxu1 %v5681_v46  ;;  %4279 = vmatprep.subr.bf16.mxu0 %v5696_v47  ;;  %v5793_v46 = vcombine.low %v359_v34, %v367_v35  ;;  %v5808_v47 = vcombine.high %v374_v39, %v382_v40  ;;  %v478_v31 = vld [vmem:[%s8656_s2 + $0xdd0] sm:$0xff]  ;;  %v471_v34 = vld [vmem:[%s8656_s2 + $0xd98] sm:$0xff] }
  0xde   :  { %4402 = vmatprep.subr.bf16.mxu1 %v5698_v48  ;;  %v5810_v48 = vcombine.high %v375_v42, %v383_v43  ;;  %v479_v35 = vld [vmem:[%s8656_s2 + $0xdd8] sm:$0xff] }
  0xe0   :  { %4280 = vmatpush1.bf16.msra.mxu0 %v5695_v53  ;;  %v5807_v53 = vcombine.low %v374_v39, %v382_v40  ;;  %v486_v39 = vld [vmem:[%s8656_s2 + $0xe10] sm:$0xff] }
  0xe1   :  { %4403 = vmatpush1.bf16.msra.mxu1 %v5697_v55  ;;  %4281 = vmatprep.subr.bf16.mxu0 %v5712_v56  ;;  %v5809_v55 = vcombine.low %v375_v42, %v383_v43  ;;  %v5824_v56 = vcombine.high %v390_v49, %v398_v50  ;;  %v494_v40 = vld [vmem:[%s8656_s2 + $0xe50] sm:$0xff]  ;;  %v487_v42 = vld [vmem:[%s8656_s2 + $0xe18] sm:$0xff] }
  0xe2   :  { %4404 = vmatprep.subr.bf16.mxu1 %v5714_v57  ;;  %v5826_v57 = vcombine.high %v391_v51, %v399_v52  ;;  %v495_v43 = vld [vmem:[%s8656_s2 + $0xe58] sm:$0xff] }
  0xe4   :  { %4282 = vmatpush1.bf16.msra.mxu0 %v5711_v63  ;;  %v5823_v63 = vcombine.low %v390_v49, %v398_v50  ;;  %v502_v49 = vld [vmem:[%s8656_s2 + $0xe90] sm:$0xff] }
  0xe5   :  { %4405 = vmatpush1.bf16.msra.mxu1 %v5713_v1  ;;  %4292 = vmatprep.subr.bf16.mxu0 %v5728_v2  ;;  %v5825_v1 = vcombine.low %v391_v51, %v399_v52  ;;  %v5840_v2 = vcombine.high %v406_v58, %v414_v59  ;;  %v510_v50 = vld [vmem:[%s8656_s2 + $0xed0] sm:$0xff]  ;;  %v503_v51 = vld [vmem:[%s8656_s2 + $0xe98] sm:$0xff] }
  0xe6   :  { %4415 = vmatprep.subr.bf16.mxu1 %v5730_v3  ;;  %v5842_v3 = vcombine.high %v407_v61, %v415_v62  ;;  %v511_v52 = vld [vmem:[%s8656_s2 + $0xed8] sm:$0xff] }
  0xe7   :  { %4284 = vmatmul.mubr.bf16.vlgmr.msra.gmra.mrb[4].mxu0 %v6602_v27 }
  0xe8   :  { %4293 = vmatpush1.bf16.msra.mxu0 %v5727_v8  ;;  %4407 = vmatmul.mubr.bf16.vlgmr.msra.gmra.mrb[4].mxu1 %v6602_v27  ;;  %v5839_v8 = vcombine.low %v406_v58, %v414_v59  ;;  %v518_v58 = vld [vmem:[%s8656_s2 + $0xf10] sm:$0xff] }
  0xe9   :  { %4416 = vmatpush1.bf16.msra.mxu1 %v5729_v9  ;;  %4294 = vmatprep.subr.bf16.mxu0 %v5744_v11  ;;  %v5841_v9 = vcombine.low %v407_v61, %v415_v62  ;;  %v5856_v11 = vcombine.high %v422_v4, %v430_v5  ;;  %v526_v59 = vld [vmem:[%s8656_s2 + $0xf50] sm:$0xff]  ;;  %v519_v61 = vld [vmem:[%s8656_s2 + $0xf18] sm:$0xff] }
  0xea   :  { %4417 = vmatprep.subr.bf16.mxu1 %v5746_v12  ;;  %4324 = vmatprep.mubr.bf16.mxu0 %v6624_v38  ;;  %v5858_v12 = vcombine.high %v423_v6, %v431_v7  ;;  %v527_v62 = vld [vmem:[%s8656_s2 + $0xf58] sm:$0xff] }
  0xeb   :  { %4447 = vmatprep.mubr.bf16.mxu1 %v6624_v38 }
  0xec   :  { %4295 = vmatpush1.bf16.msra.mxu0 %v5743_v17  ;;  %v5855_v17 = vcombine.low %v422_v4, %v430_v5  ;;  %v534_v4 = vld [vmem:[%s8656_s2 + $0xf90] sm:$0xff] }
  0xed   :  { %4418 = vmatpush1.bf16.msra.mxu1 %v5745_v18  ;;  %4296 = vmatprep.subr.bf16.mxu0 %v5760_v19  ;;  %v5857_v18 = vcombine.low %v423_v6, %v431_v7  ;;  %v5872_v19 = vcombine.high %v438_v13, %v446_v14  ;;  %v542_v5 = vld [vmem:[%s8656_s2 + $0xfd0] sm:$0xff]  ;;  %v535_v6 = vld [vmem:[%s8656_s2 + $0xf98] sm:$0xff] }
  0xee   :  { %4419 = vmatprep.subr.bf16.mxu1 %v5762_v20  ;;  %v5874_v20 = vcombine.high %v439_v15, %v447_v16  ;;  %v543_v7 = vld [vmem:[%s8656_s2 + $0xfd8] sm:$0xff] }
  0xf0   :  { %4297 = vmatpush1.bf16.msra.mxu0 %v5759_v25  ;;  %v5871_v25 = vcombine.low %v438_v13, %v446_v14  ;;  %v550_v13 = vld [vmem:[%s8656_s2 + $0x1010] sm:$0xff] }
  0xf1   :  { %4420 = vmatpush1.bf16.msra.mxu1 %v5761_v26  ;;  %4298 = vmatprep.subr.bf16.mxu0 %v5776_v28  ;;  %v5873_v26 = vcombine.low %v439_v15, %v447_v16  ;;  %v5888_v28 = vcombine.high %v454_v21, %v462_v22  ;;  %v558_v14 = vld [vmem:[%s8656_s2 + $0x1050] sm:$0xff]  ;;  %v551_v15 = vld [vmem:[%s8656_s2 + $0x1018] sm:$0xff] }
  0xf2   :  { %4421 = vmatprep.subr.bf16.mxu1 %v5778_v29  ;;  %v5890_v29 = vcombine.high %v455_v23, %v463_v24  ;;  %v559_v16 = vld [vmem:[%s8656_s2 + $0x1058] sm:$0xff] }
  0xf4   :  { %4299 = vmatpush1.bf16.msra.mxu0 %v5775_v54  ;;  %v5887_v54 = vcombine.low %v454_v21, %v462_v22  ;;  %v566_v21 = vld [vmem:[%s8656_s2 + $0x1090] sm:$0xff] }
  0xf5   :  { %4422 = vmatpush1.bf16.msra.mxu1 %v5777_v0  ;;  %4300 = vmatprep.subr.bf16.mxu0 %v5792_v36  ;;  %v5889_v0 = vcombine.low %v455_v23, %v463_v24  ;;  %v5904_v36 = vcombine.high %v470_v30, %v478_v31  ;;  %v574_v22 = vld [vmem:[%s8656_s2 + $0x10d0] sm:$0xff]  ;;  %v567_v23 = vld [vmem:[%s8656_s2 + $0x1098] sm:$0xff] }
  0xf6   :  { %4423 = vmatprep.subr.bf16.mxu1 %v5794_v37  ;;  %v5906_v37 = vcombine.high %v471_v34, %v479_v35  ;;  %v575_v24 = vld [vmem:[%s8656_s2 + $0x10d8] sm:$0xff] }
  0xf8   :  { %4301 = vmatpush1.bf16.msra.mxu0 %v5791_v45  ;;  %v5903_v45 = vcombine.low %v470_v30, %v478_v31  ;;  %v582_v30 = vld [vmem:[%s8656_s2 + $0x1110] sm:$0xff] }
  0xf9   :  { %4424 = vmatpush1.bf16.msra.mxu1 %v5793_v46  ;;  %4302 = vmatprep.subr.bf16.mxu0 %v5808_v47  ;;  %v5905_v46 = vcombine.low %v471_v34, %v479_v35  ;;  %v5920_v47 = vcombine.high %v486_v39, %v494_v40  ;;  %v590_v31 = vld [vmem:[%s8656_s2 + $0x1150] sm:$0xff]  ;;  %v583_v34 = vld [vmem:[%s8656_s2 + $0x1118] sm:$0xff] }
  0xfa   :  { %4425 = vmatprep.subr.bf16.mxu1 %v5810_v48  ;;  %v5922_v48 = vcombine.high %v487_v42, %v495_v43  ;;  %v591_v35 = vld [vmem:[%s8656_s2 + $0x1158] sm:$0xff] }
  0xfc   :  { %4303 = vmatpush1.bf16.msra.mxu0 %v5807_v53  ;;  %v5919_v53 = vcombine.low %v486_v39, %v494_v40  ;;  %v598_v39 = vld [vmem:[%s8656_s2 + $0x1190] sm:$0xff] }
  0xfd   :  { %4426 = vmatpush1.bf16.msra.mxu1 %v5809_v55  ;;  %4304 = vmatprep.subr.bf16.mxu0 %v5824_v56  ;;  %v5921_v55 = vcombine.low %v487_v42, %v495_v43  ;;  %v5936_v56 = vcombine.high %v502_v49, %v510_v50  ;;  %v606_v40 = vld [vmem:[%s8656_s2 + $0x11d0] sm:$0xff]  ;;  %v599_v42 = vld [vmem:[%s8656_s2 + $0x1198] sm:$0xff] }
  0xfe   :  { %4427 = vmatprep.subr.bf16.mxu1 %v5826_v57  ;;  %v5938_v57 = vcombine.high %v503_v51, %v511_v52  ;;  %v607_v43 = vld [vmem:[%s8656_s2 + $0x11d8] sm:$0xff] }
 0x100   :  { %4305 = vmatpush1.bf16.msra.mxu0 %v5823_v63  ;;  %v5935_v63 = vcombine.low %v502_v49, %v510_v50  ;;  %v614_v49 = vld [vmem:[%s8656_s2 + $0x1210] sm:$0xff] }
 0x101   :  { %4428 = vmatpush1.bf16.msra.mxu1 %v5825_v1  ;;  %4306 = vmatprep.subr.bf16.mxu0 %v5840_v2  ;;  %v5937_v1 = vcombine.low %v503_v51, %v511_v52  ;;  %v5952_v2 = vcombine.high %v518_v58, %v526_v59  ;;  %v622_v50 = vld [vmem:[%s8656_s2 + $0x1250] sm:$0xff]  ;;  %v615_v51 = vld [vmem:[%s8656_s2 + $0x1218] sm:$0xff] }
 0x102   :  { %4429 = vmatprep.subr.bf16.mxu1 %v5842_v3  ;;  %v5954_v3 = vcombine.high %v519_v61, %v527_v62  ;;  %v623_v52 = vld [vmem:[%s8656_s2 + $0x1258] sm:$0xff] }
 0x104   :  { %4307 = vmatpush1.bf16.msra.mxu0 %v5839_v8  ;;  %v5951_v8 = vcombine.low %v518_v58, %v526_v59  ;;  %v630_v58 = vld [vmem:[%s8656_s2 + $0x1290] sm:$0xff] }
 0x105   :  { %4430 = vmatpush1.bf16.msra.mxu1 %v5841_v9  ;;  %4308 = vmatprep.subr.bf16.mxu0 %v5856_v11  ;;  %v5953_v9 = vcombine.low %v519_v61, %v527_v62  ;;  %v5968_v11 = vcombine.high %v534_v4, %v542_v5  ;;  %v638_v59 = vld [vmem:[%s8656_s2 + $0x12d0] sm:$0xff]  ;;  %v631_v61 = vld [vmem:[%s8656_s2 + $0x1298] sm:$0xff] }
 0x106   :  { %4431 = vmatprep.subr.bf16.mxu1 %v5858_v12  ;;  %v5970_v12 = vcombine.high %v535_v6, %v543_v7  ;;  %v639_v62 = vld [vmem:[%s8656_s2 + $0x12d8] sm:$0xff] }
 0x108   :  { %4309 = vmatpush1.bf16.msra.mxu0 %v5855_v17  ;;  %v5967_v17 = vcombine.low %v534_v4, %v542_v5  ;;  %v646_v4 = vld [vmem:[%s8656_s2 + $0x1310] sm:$0xff] }
 0x109   :  { %4432 = vmatpush1.bf16.msra.mxu1 %v5857_v18  ;;  %4310 = vmatprep.subr.bf16.mxu0 %v5872_v19  ;;  %v5969_v18 = vcombine.low %v535_v6, %v543_v7  ;;  %v5984_v19 = vcombine.high %v550_v13, %v558_v14  ;;  %v654_v5 = vld [vmem:[%s8656_s2 + $0x1350] sm:$0xff]  ;;  %v647_v6 = vld [vmem:[%s8656_s2 + $0x1318] sm:$0xff] }
 0x10a   :  { %4433 = vmatprep.subr.bf16.mxu1 %v5874_v20  ;;  %v5986_v20 = vcombine.high %v551_v15, %v559_v16  ;;  %v655_v7 = vld [vmem:[%s8656_s2 + $0x1358] sm:$0xff] }
 0x10c   :  { %4311 = vmatpush1.bf16.msra.mxu0 %v5871_v25  ;;  %v5983_v25 = vcombine.low %v550_v13, %v558_v14  ;;  %v662_v13 = vld [vmem:[%s8656_s2 + $0x1390] sm:$0xff] }
 0x10d   :  { %4434 = vmatpush1.bf16.msra.mxu1 %v5873_v26  ;;  %4312 = vmatprep.subr.bf16.mxu0 %v5888_v28  ;;  %v5985_v26 = vcombine.low %v551_v15, %v559_v16  ;;  %v6000_v28 = vcombine.high %v566_v21, %v574_v22  ;;  %v670_v14 = vld [vmem:[%s8656_s2 + $0x13d0] sm:$0xff]  ;;  %v663_v15 = vld [vmem:[%s8656_s2 + $0x1398] sm:$0xff] }
 0x10e   :  { %4435 = vmatprep.subr.bf16.mxu1 %v5890_v29  ;;  %v6002_v29 = vcombine.high %v567_v23, %v575_v24  ;;  %v671_v16 = vld [vmem:[%s8656_s2 + $0x13d8] sm:$0xff] }
 0x110   :  { %4313 = vmatpush1.bf16.msra.mxu0 %v5887_v54  ;;  %v5999_v54 = vcombine.low %v566_v21, %v574_v22  ;;  %v40_v21 = vld [vmem:[%s8656_s2 + $0x20] sm:$0xff] }
 0x111   :  { %4436 = vmatpush1.bf16.msra.mxu1 %v5889_v0  ;;  %4314 = vmatprep.subr.bf16.mxu0 %v5904_v36  ;;  %v6001_v0 = vcombine.low %v567_v23, %v575_v24  ;;  %v6016_v36 = vcombine.high %v582_v30, %v590_v31  ;;  %v48_v22 = vld [vmem:[%s8656_s2 + $0x60] sm:$0xff]  ;;  %v41_v23 = vld [vmem:[%s8656_s2 + $0x28] sm:$0xff] }
 0x112   :  { %4437 = vmatprep.subr.bf16.mxu1 %v5906_v37  ;;  %v6018_v37 = vcombine.high %v583_v34, %v591_v35  ;;  %v49_v24 = vld [vmem:[%s8656_s2 + $0x68] sm:$0xff] }
 0x114   :  { %4315 = vmatpush1.bf16.msra.mxu0 %v5903_v45  ;;  %v6015_v45 = vcombine.low %v582_v30, %v590_v31  ;;  %v56_v30 = vld [vmem:[%s8656_s2 + $0xa0] sm:$0xff] }
 0x115   :  { %4438 = vmatpush1.bf16.msra.mxu1 %v5905_v46  ;;  %4316 = vmatprep.subr.bf16.mxu0 %v5920_v47  ;;  %v6017_v46 = vcombine.low %v583_v34, %v591_v35  ;;  %v6032_v47 = vcombine.high %v598_v39, %v606_v40  ;;  %v64_v31 = vld [vmem:[%s8656_s2 + $0xe0] sm:$0xff]  ;;  %v57_v34 = vld [vmem:[%s8656_s2 + $0xa8] sm:$0xff] }
 0x116   :  { %4439 = vmatprep.subr.bf16.mxu1 %v5922_v48  ;;  %v6034_v48 = vcombine.high %v599_v42, %v607_v43  ;;  %v65_v35 = vld [vmem:[%s8656_s2 + $0xe8] sm:$0xff] }
 0x118   :  { %4317 = vmatpush1.bf16.msra.mxu0 %v5919_v53  ;;  %v6031_v53 = vcombine.low %v598_v39, %v606_v40  ;;  %v72_v39 = vld [vmem:[%s8656_s2 + $0x120] sm:$0xff] }
 0x119   :  { %4440 = vmatpush1.bf16.msra.mxu1 %v5921_v55  ;;  %4318 = vmatprep.subr.bf16.mxu0 %v5936_v56  ;;  %v6033_v55 = vcombine.low %v599_v42, %v607_v43  ;;  %v6048_v56 = vcombine.high %v614_v49, %v622_v50  ;;  %v80_v40 = vld [vmem:[%s8656_s2 + $0x160] sm:$0xff]  ;;  %v73_v42 = vld [vmem:[%s8656_s2 + $0x128] sm:$0xff] }
 0x11a   :  { %4441 = vmatprep.subr.bf16.mxu1 %v5938_v57  ;;  %v6050_v57 = vcombine.high %v615_v51, %v623_v52  ;;  %v81_v43 = vld [vmem:[%s8656_s2 + $0x168] sm:$0xff] }
 0x11c   :  { %4319 = vmatpush1.bf16.msra.mxu0 %v5935_v63  ;;  %v6047_v63 = vcombine.low %v614_v49, %v622_v50  ;;  %v88_v49 = vld [vmem:[%s8656_s2 + $0x1a0] sm:$0xff] }
 0x11d   :  { %4442 = vmatpush1.bf16.msra.mxu1 %v5937_v1  ;;  %4320 = vmatprep.subr.bf16.mxu0 %v5952_v2  ;;  %v6049_v1 = vcombine.low %v615_v51, %v623_v52  ;;  %v6064_v2 = vcombine.high %v630_v58, %v638_v59  ;;  %v96_v50 = vld [vmem:[%s8656_s2 + $0x1e0] sm:$0xff]  ;;  %v89_v51 = vld [vmem:[%s8656_s2 + $0x1a8] sm:$0xff] }
 0x11e   :  { %4443 = vmatprep.subr.bf16.mxu1 %v5954_v3  ;;  %v6066_v3 = vcombine.high %v631_v61, %v639_v62  ;;  %v97_v52 = vld [vmem:[%s8656_s2 + $0x1e8] sm:$0xff] }
 0x120   :  { %4321 = vmatpush1.bf16.msra.mxu0 %v5951_v8  ;;  %v6063_v8 = vcombine.low %v630_v58, %v638_v59  ;;  %v104_v58 = vld [vmem:[%s8656_s2 + $0x220] sm:$0xff] }
 0x121   :  { %4444 = vmatpush1.bf16.msra.mxu1 %v5953_v9  ;;  %4322 = vmatprep.subr.bf16.mxu0 %v5968_v11  ;;  %v6065_v9 = vcombine.low %v631_v61, %v639_v62  ;;  %v6080_v11 = vcombine.high %v646_v4, %v654_v5  ;;  %v112_v59 = vld [vmem:[%s8656_s2 + $0x260] sm:$0xff]  ;;  %v105_v61 = vld [vmem:[%s8656_s2 + $0x228] sm:$0xff] }
 0x122   :  { %4445 = vmatprep.subr.bf16.mxu1 %v5970_v12  ;;  %v6082_v12 = vcombine.high %v647_v6, %v655_v7  ;;  %v113_v62 = vld [vmem:[%s8656_s2 + $0x268] sm:$0xff] }
 0x124   :  { %4323 = vmatpush1.bf16.msra.mxu0 %v5967_v17  ;;  %v6079_v17 = vcombine.low %v646_v4, %v654_v5  ;;  %v120_v4 = vld [vmem:[%s8656_s2 + $0x2a0] sm:$0xff] }
 0x125   :  { %4446 = vmatpush1.bf16.msra.mxu1 %v5969_v18  ;;  %4333 = vmatprep.subr.bf16.mxu0 %v5984_v19  ;;  %v6081_v18 = vcombine.low %v647_v6, %v655_v7  ;;  %v6096_v19 = vcombine.high %v662_v13, %v670_v14  ;;  %v128_v5 = vld [vmem:[%s8656_s2 + $0x2e0] sm:$0xff]  ;;  %v121_v6 = vld [vmem:[%s8656_s2 + $0x2a8] sm:$0xff] }
 0x126   :  { %4456 = vmatprep.subr.bf16.mxu1 %v5986_v20  ;;  %v6098_v20 = vcombine.high %v663_v15, %v671_v16  ;;  %v129_v7 = vld [vmem:[%s8656_s2 + $0x2e8] sm:$0xff] }
 0x127   :  { %4325 = vmatmul.mubr.bf16.vlgmr.msra.gmra.mrb[4].mxu0 %v6806_v41 }
 0x128   :  { %4334 = vmatpush1.bf16.msra.mxu0 %v5983_v25  ;;  %4448 = vmatmul.mubr.bf16.vlgmr.msra.gmra.mrb[4].mxu1 %v6806_v41  ;;  %v6095_v25 = vcombine.low %v662_v13, %v670_v14  ;;  %v136_v13 = vld [vmem:[%s8656_s2 + $0x320] sm:$0xff] }
 0x129   :  { %4457 = vmatpush1.bf16.msra.mxu1 %v5985_v26  ;;  %4335 = vmatprep.subr.bf16.mxu0 %v6000_v28  ;;  %v6097_v26 = vcombine.low %v663_v15, %v671_v16  ;;  %v5476_v28 = vcombine.high %v40_v21, %v48_v22  ;;  %v144_v14 = vld [vmem:[%s8656_s2 + $0x360] sm:$0xff]  ;;  %v137_v15 = vld [vmem:[%s8656_s2 + $0x328] sm:$0xff] }
 0x12a   :  { %4458 = vmatprep.subr.bf16.mxu1 %v6002_v29  ;;  %4365 = vmatprep.mubr.bf16.mxu0 %v6309_v60  ;;  %v5478_v29 = vcombine.high %v41_v23, %v49_v24  ;;  %v145_v16 = vld [vmem:[%s8656_s2 + $0x368] sm:$0xff] }
 0x12b   :  { %4488 = vmatprep.mubr.bf16.mxu1 %v6309_v60 }
 0x12c   :  { %4336 = vmatpush1.bf16.msra.mxu0 %v5999_v54  ;;  %v5475_v54 = vcombine.low %v40_v21, %v48_v22  ;;  %v152_v21 = vld [vmem:[%s8656_s2 + $0x3a0] sm:$0xff] }
 0x12d   :  { %4459 = vmatpush1.bf16.msra.mxu1 %v6001_v0  ;;  %4337 = vmatprep.subr.bf16.mxu0 %v6016_v36  ;;  %v5477_v0 = vcombine.low %v41_v23, %v49_v24  ;;  %v5492_v36 = vcombine.high %v56_v30, %v64_v31  ;;  %v160_v22 = vld [vmem:[%s8656_s2 + $0x3e0] sm:$0xff]  ;;  %v153_v23 = vld [vmem:[%s8656_s2 + $0x3a8] sm:$0xff] }
 0x12e   :  { %4460 = vmatprep.subr.bf16.mxu1 %v6018_v37  ;;  %v5494_v37 = vcombine.high %v57_v34, %v65_v35  ;;  %v161_v24 = vld [vmem:[%s8656_s2 + $0x3e8] sm:$0xff] }
 0x130   :  { %4338 = vmatpush1.bf16.msra.mxu0 %v6015_v45  ;;  %v5491_v45 = vcombine.low %v56_v30, %v64_v31  ;;  %v168_v30 = vld [vmem:[%s8656_s2 + $0x420] sm:$0xff] }
 0x131   :  { %4461 = vmatpush1.bf16.msra.mxu1 %v6017_v46  ;;  %4339 = vmatprep.subr.bf16.mxu0 %v6032_v47  ;;  %v5493_v46 = vcombine.low %v57_v34, %v65_v35  ;;  %v5508_v47 = vcombine.high %v72_v39, %v80_v40  ;;  %v176_v31 = vld [vmem:[%s8656_s2 + $0x460] sm:$0xff]  ;;  %v169_v34 = vld [vmem:[%s8656_s2 + $0x428] sm:$0xff] }
 0x132   :  { %4462 = vmatprep.subr.bf16.mxu1 %v6034_v48  ;;  %v5510_v48 = vcombine.high %v73_v42, %v81_v43  ;;  %v177_v35 = vld [vmem:[%s8656_s2 + $0x468] sm:$0xff] }
 0x134   :  { %4340 = vmatpush1.bf16.msra.mxu0 %v6031_v53  ;;  %v5507_v53 = vcombine.low %v72_v39, %v80_v40  ;;  %v184_v39 = vld [vmem:[%s8656_s2 + $0x4a0] sm:$0xff] }
 0x135   :  { %4463 = vmatpush1.bf16.msra.mxu1 %v6033_v55  ;;  %4341 = vmatprep.subr.bf16.mxu0 %v6048_v56  ;;  %v5509_v55 = vcombine.low %v73_v42, %v81_v43  ;;  %v5524_v56 = vcombine.high %v88_v49, %v96_v50  ;;  %v192_v40 = vld [vmem:[%s8656_s2 + $0x4e0] sm:$0xff]  ;;  %v185_v42 = vld [vmem:[%s8656_s2 + $0x4a8] sm:$0xff] }
 0x136   :  { %4464 = vmatprep.subr.bf16.mxu1 %v6050_v57  ;;  %v5526_v57 = vcombine.high %v89_v51, %v97_v52  ;;  %v193_v43 = vld [vmem:[%s8656_s2 + $0x4e8] sm:$0xff] }
 0x138   :  { %4342 = vmatpush1.bf16.msra.mxu0 %v6047_v63  ;;  %v5523_v63 = vcombine.low %v88_v49, %v96_v50  ;;  %v200_v49 = vld [vmem:[%s8656_s2 + $0x520] sm:$0xff] }
 0x139   :  { %4465 = vmatpush1.bf16.msra.mxu1 %v6049_v1  ;;  %4343 = vmatprep.subr.bf16.mxu0 %v6064_v2  ;;  %v5525_v1 = vcombine.low %v89_v51, %v97_v52  ;;  %v5540_v2 = vcombine.high %v104_v58, %v112_v59  ;;  %v208_v50 = vld [vmem:[%s8656_s2 + $0x560] sm:$0xff]  ;;  %v201_v51 = vld [vmem:[%s8656_s2 + $0x528] sm:$0xff] }
 0x13a   :  { %4466 = vmatprep.subr.bf16.mxu1 %v6066_v3  ;;  %v5542_v3 = vcombine.high %v105_v61, %v113_v62  ;;  %v209_v52 = vld [vmem:[%s8656_s2 + $0x568] sm:$0xff] }
 0x13c   :  { %4344 = vmatpush1.bf16.msra.mxu0 %v6063_v8  ;;  %v5539_v8 = vcombine.low %v104_v58, %v112_v59  ;;  %v216_v58 = vld [vmem:[%s8656_s2 + $0x5a0] sm:$0xff] }
 0x13d   :  { %4467 = vmatpush1.bf16.msra.mxu1 %v6065_v9  ;;  %4345 = vmatprep.subr.bf16.mxu0 %v6080_v11  ;;  %v5541_v9 = vcombine.low %v105_v61, %v113_v62  ;;  %v5556_v11 = vcombine.high %v120_v4, %v128_v5  ;;  %v224_v59 = vld [vmem:[%s8656_s2 + $0x5e0] sm:$0xff]  ;;  %v217_v61 = vld [vmem:[%s8656_s2 + $0x5a8] sm:$0xff] }
 0x13e   :  { %4468 = vmatprep.subr.bf16.mxu1 %v6082_v12  ;;  %v5558_v12 = vcombine.high %v121_v6, %v129_v7  ;;  %v225_v62 = vld [vmem:[%s8656_s2 + $0x5e8] sm:$0xff] }
 0x140   :  { %4346 = vmatpush1.bf16.msra.mxu0 %v6079_v17  ;;  %v5555_v17 = vcombine.low %v120_v4, %v128_v5  ;;  %v232_v4 = vld [vmem:[%s8656_s2 + $0x620] sm:$0xff] }
 0x141   :  { %4469 = vmatpush1.bf16.msra.mxu1 %v6081_v18  ;;  %4347 = vmatprep.subr.bf16.mxu0 %v6096_v19  ;;  %v5557_v18 = vcombine.low %v121_v6, %v129_v7  ;;  %v5572_v19 = vcombine.high %v136_v13, %v144_v14  ;;  %v240_v5 = vld [vmem:[%s8656_s2 + $0x660] sm:$0xff]  ;;  %v233_v6 = vld [vmem:[%s8656_s2 + $0x628] sm:$0xff] }
 0x142   :  { %4470 = vmatprep.subr.bf16.mxu1 %v6098_v20  ;;  %v5574_v20 = vcombine.high %v137_v15, %v145_v16  ;;  %v241_v7 = vld [vmem:[%s8656_s2 + $0x668] sm:$0xff] }
 0x144   :  { %4348 = vmatpush1.bf16.msra.mxu0 %v6095_v25  ;;  %v5571_v25 = vcombine.low %v136_v13, %v144_v14  ;;  %v248_v13 = vld [vmem:[%s8656_s2 + $0x6a0] sm:$0xff] }
 0x145   :  { %4471 = vmatpush1.bf16.msra.mxu1 %v6097_v26  ;;  %4497 = vmatprep.subr.bf16.mxu0 %v5476_v28  ;;  %v5573_v26 = vcombine.low %v137_v15, %v145_v16  ;;  %v5588_v28 = vcombine.high %v152_v21, %v160_v22  ;;  %v256_v14 = vld [vmem:[%s8656_s2 + $0x6e0] sm:$0xff]  ;;  %v249_v15 = vld [vmem:[%s8656_s2 + $0x6a8] sm:$0xff] }
 0x146   :  { %4620 = vmatprep.subr.bf16.mxu1 %v5478_v29  ;;  %v5590_v29 = vcombine.high %v153_v23, %v161_v24  ;;  %v257_v16 = vld [vmem:[%s8656_s2 + $0x6e8] sm:$0xff] }
 0x147   :  { %4366 = vmatmul.mubr.bf16.vlgmr.msra.gmra.mrb[4].mxu0 %v6520_v32 }
 0x148   :  { %4489 = vmatmul.mubr.bf16.vlgmr.msra.gmra.mrb[4].mxu1 %v6520_v32  ;;  %4498 = vmatpush1.bf16.msra.mxu0 %v5475_v54  ;;  %v5587_v54 = vcombine.low %v152_v21, %v160_v22  ;;  %v264_v21 = vld [vmem:[%s8656_s2 + $0x720] sm:$0xff] }
 0x149   :  { %4621 = vmatpush1.bf16.msra.mxu1 %v5477_v0  ;;  %4499 = vmatprep.subr.bf16.mxu0 %v5492_v36  ;;  %v5589_v0 = vcombine.low %v153_v23, %v161_v24  ;;  %v5604_v36 = vcombine.high %v168_v30, %v176_v31  ;;  %v272_v22 = vld [vmem:[%s8656_s2 + $0x760] sm:$0xff]  ;;  %v265_v23 = vld [vmem:[%s8656_s2 + $0x728] sm:$0xff] }
 0x14a   :  { %4622 = vmatprep.subr.bf16.mxu1 %v5494_v37  ;;  %4529 = vmatprep.mubr.bf16.mxu0 %v6484_v10  ;;  %v5606_v37 = vcombine.high %v169_v34, %v177_v35  ;;  %v273_v24 = vld [vmem:[%s8656_s2 + $0x768] sm:$0xff] }
 0x14b   :  { %4652 = vmatprep.mubr.bf16.mxu1 %v6484_v10 }
 0x14c   :  { %4500 = vmatpush1.bf16.msra.mxu0 %v5491_v45  ;;  %v5603_v45 = vcombine.low %v168_v30, %v176_v31  ;;  %v5702_v30 = vcombine.high %v265_v23, %v273_v24  ;;  %v280_v31 = vld [vmem:[%s8656_s2 + $0x7a0] sm:$0xff] }
 0x14d   :  { %4623 = vmatpush1.bf16.msra.mxu1 %v5493_v46  ;;  %4501 = vmatprep.subr.bf16.mxu0 %v5508_v47  ;;  %v5605_v46 = vcombine.low %v169_v34, %v177_v35  ;;  %v5620_v47 = vcombine.high %v184_v39, %v192_v40  ;;  %v288_v34 = vld [vmem:[%s8656_s2 + $0x7e0] sm:$0xff] }
 0x14e   :  { %4624 = vmatprep.subr.bf16.mxu1 %v5510_v48  ;;  %v5622_v48 = vcombine.high %v185_v42, %v193_v43 }
 0x150   :  { %4502 = vmatpush1.bf16.msra.mxu0 %v5507_v53  ;;  %v5619_v53 = vcombine.low %v184_v39, %v192_v40  ;;  %v5699_v40 = vcombine.low %v264_v21, %v272_v22 }
 0x151   :  { %4625 = vmatpush1.bf16.msra.mxu1 %v5509_v55  ;;  %4503 = vmatprep.subr.bf16.mxu0 %v5524_v56  ;;  %v5621_v55 = vcombine.low %v185_v42, %v193_v43  ;;  %v5636_v56 = vcombine.high %v200_v49, %v208_v50 }
 0x152   :  { %4626 = vmatprep.subr.bf16.mxu1 %v5526_v57  ;;  %v5638_v57 = vcombine.high %v201_v51, %v209_v52 }
 0x154   :  { %4504 = vmatpush1.bf16.msra.mxu0 %v5523_v63  ;;  %v5635_v63 = vcombine.low %v200_v49, %v208_v50  ;;  %v296_v49 = vld [vmem:[%s8656_s2 + $0x820] sm:$0xff] }
 0x155   :  { %4627 = vmatpush1.bf16.msra.mxu1 %v5525_v1  ;;  %4505 = vmatprep.subr.bf16.mxu0 %v5540_v2  ;;  %v5637_v1 = vcombine.low %v201_v51, %v209_v52  ;;  %v5652_v2 = vcombine.high %v216_v58, %v224_v59  ;;  %v304_v50 = vld [vmem:[%s8656_s2 + $0x860] sm:$0xff]  ;;  %v297_v51 = vld [vmem:[%s8656_s2 + $0x828] sm:$0xff] }
 0x156   :  { %4628 = vmatprep.subr.bf16.mxu1 %v5542_v3  ;;  %v5654_v3 = vcombine.high %v217_v61, %v225_v62  ;;  %v305_v52 = vld [vmem:[%s8656_s2 + $0x868] sm:$0xff] }
 0x158   :  { %4506 = vmatpush1.bf16.msra.mxu0 %v5539_v8  ;;  %v5651_v8 = vcombine.low %v216_v58, %v224_v59  ;;  %v312_v58 = vld [vmem:[%s8656_s2 + $0x8a0] sm:$0xff] }
 0x159   :  { %4629 = vmatpush1.bf16.msra.mxu1 %v5541_v9  ;;  %4507 = vmatprep.subr.bf16.mxu0 %v5556_v11  ;;  %v5653_v9 = vcombine.low %v217_v61, %v225_v62  ;;  %v5668_v11 = vcombine.high %v232_v4, %v240_v5  ;;  %v320_v59 = vld [vmem:[%s8656_s2 + $0x8e0] sm:$0xff]  ;;  %v313_v61 = vld [vmem:[%s8656_s2 + $0x8a8] sm:$0xff] }
 0x15a   :  { %4630 = vmatprep.subr.bf16.mxu1 %v5558_v12  ;;  %v5670_v12 = vcombine.high %v233_v6, %v241_v7  ;;  %v321_v62 = vld [vmem:[%s8656_s2 + $0x8e8] sm:$0xff] }
 0x15c   :  { %4508 = vmatpush1.bf16.msra.mxu0 %v5555_v17  ;;  %v5667_v17 = vcombine.low %v232_v4, %v240_v5  ;;  %v328_v4 = vld [vmem:[%s8656_s2 + $0x920] sm:$0xff] }
 0x15d   :  { %4631 = vmatpush1.bf16.msra.mxu1 %v5557_v18  ;;  %4509 = vmatprep.subr.bf16.mxu0 %v5572_v19  ;;  %v5669_v18 = vcombine.low %v233_v6, %v241_v7  ;;  %v5684_v19 = vcombine.high %v248_v13, %v256_v14  ;;  %v336_v5 = vld [vmem:[%s8656_s2 + $0x960] sm:$0xff]  ;;  %v329_v6 = vld [vmem:[%s8656_s2 + $0x928] sm:$0xff] }
 0x15e   :  { %4632 = vmatprep.subr.bf16.mxu1 %v5574_v20  ;;  %v5686_v20 = vcombine.high %v249_v15, %v257_v16  ;;  %v337_v7 = vld [vmem:[%s8656_s2 + $0x968] sm:$0xff] }
 0x160   :  { %4510 = vmatpush1.bf16.msra.mxu0 %v5571_v25  ;;  %v5683_v25 = vcombine.low %v248_v13, %v256_v14  ;;  %v344_v13 = vld [vmem:[%s8656_s2 + $0x9a0] sm:$0xff] }
 0x161   :  { %4633 = vmatpush1.bf16.msra.mxu1 %v5573_v26  ;;  %4511 = vmatprep.subr.bf16.mxu0 %v5588_v28  ;;  %v5685_v26 = vcombine.low %v249_v15, %v257_v16  ;;  %v5700_v28 = vcombine.high %v264_v21, %v272_v22  ;;  %v352_v14 = vld [vmem:[%s8656_s2 + $0x9e0] sm:$0xff]  ;;  %v345_v15 = vld [vmem:[%s8656_s2 + $0x9a8] sm:$0xff] }
 0x162   :  { %4634 = vmatprep.subr.bf16.mxu1 %v5590_v29  ;;  %v353_v16 = vld [vmem:[%s8656_s2 + $0x9e8] sm:$0xff]  ;;  %v360_v21 = vld [vmem:[%s8656_s2 + $0xa20] sm:$0xff] }
 0x163   :  { %v368_v22 = vld [vmem:[%s8656_s2 + $0xa60] sm:$0xff] }
 0x164   :  { %4512 = vmatpush1.bf16.msra.mxu0 %v5587_v54 }
 0x165   :  { %4635 = vmatpush1.bf16.msra.mxu1 %v5589_v0  ;;  %4513 = vmatprep.subr.bf16.mxu0 %v5604_v36  ;;  %v281_v0 = vld [vmem:[%s8656_s2 + $0x7a8] sm:$0xff] }
 0x166   :  { %4636 = vmatprep.subr.bf16.mxu1 %v5606_v37  ;;  %v289_v36 = vld [vmem:[%s8656_s2 + $0x7e8] sm:$0xff] }
 0x168   :  { %4514 = vmatpush1.bf16.msra.mxu0 %v5603_v45  ;;  %v5701_v45 = vcombine.low %v265_v23, %v273_v24  ;;  %v361_v23 = vld [vmem:[%s8656_s2 + $0xa28] sm:$0xff] }
 0x169   :  { %4637 = vmatpush1.bf16.msra.mxu1 %v5605_v46  ;;  %4515 = vmatprep.subr.bf16.mxu0 %v5620_v47  ;;  %v5716_v46 = vcombine.high %v280_v31, %v288_v34  ;;  %v369_v24 = vld [vmem:[%s8656_s2 + $0xa68] sm:$0xff] }
 0x16a   :  { %4638 = vmatprep.subr.bf16.mxu1 %v5622_v48  ;;  %v5718_v48 = vcombine.high %v281_v0, %v289_v36 }
 0x16c   :  { %4516 = vmatpush1.bf16.msra.mxu0 %v5619_v53  ;;  %v5715_v53 = vcombine.low %v280_v31, %v288_v34  ;;  %v376_v31 = vld [vmem:[%s8656_s2 + $0xaa0] sm:$0xff] }
 0x16d   :  { %4639 = vmatpush1.bf16.msra.mxu1 %v5621_v55  ;;  %4517 = vmatprep.subr.bf16.mxu0 %v5636_v56  ;;  %v5717_v55 = vcombine.low %v281_v0, %v289_v36  ;;  %v5732_v56 = vcombine.high %v296_v49, %v304_v50  ;;  %v384_v34 = vld [vmem:[%s8656_s2 + $0xae0] sm:$0xff]  ;;  %v377_v0 = vld [vmem:[%s8656_s2 + $0xaa8] sm:$0xff] }
 0x16e   :  { %4640 = vmatprep.subr.bf16.mxu1 %v5638_v57  ;;  %v5734_v57 = vcombine.high %v297_v51, %v305_v52  ;;  %v385_v36 = vld [vmem:[%s8656_s2 + $0xae8] sm:$0xff] }
 0x170   :  { %4518 = vmatpush1.bf16.msra.mxu0 %v5635_v63  ;;  %v5731_v63 = vcombine.low %v296_v49, %v304_v50  ;;  %v5811_v49 = vcombine.low %v376_v31, %v384_v34  ;;  %v5813_v50 = vcombine.low %v377_v0, %v385_v36 }
 0x171   :  { %4641 = vmatpush1.bf16.msra.mxu1 %v5637_v1  ;;  %4519 = vmatprep.subr.bf16.mxu0 %v5652_v2  ;;  %v5733_v1 = vcombine.low %v297_v51, %v305_v52  ;;  %v5748_v2 = vcombine.high %v312_v58, %v320_v59 }
 0x172   :  { %4642 = vmatprep.subr.bf16.mxu1 %v5654_v3  ;;  %v5750_v3 = vcombine.high %v313_v61, %v321_v62 }
 0x174   :  { %4520 = vmatpush1.bf16.msra.mxu0 %v5651_v8  ;;  %v5747_v8 = vcombine.low %v312_v58, %v320_v59 }
 0x175   :  { %4643 = vmatpush1.bf16.msra.mxu1 %v5653_v9  ;;  %4521 = vmatprep.subr.bf16.mxu0 %v5668_v11  ;;  %v5749_v9 = vcombine.low %v313_v61, %v321_v62  ;;  %v5764_v11 = vcombine.high %v328_v4, %v336_v5 }
 0x176   :  { %4644 = vmatprep.subr.bf16.mxu1 %v5670_v12  ;;  %v5766_v12 = vcombine.high %v329_v6, %v337_v7 }
 0x178   :  { %4522 = vmatpush1.bf16.msra.mxu0 %v5667_v17  ;;  %v5763_v17 = vcombine.low %v328_v4, %v336_v5 }
 0x179   :  { %4645 = vmatpush1.bf16.msra.mxu1 %v5669_v18  ;;  %4523 = vmatprep.subr.bf16.mxu0 %v5684_v19  ;;  %v5765_v18 = vcombine.low %v329_v6, %v337_v7  ;;  %v5780_v19 = vcombine.high %v344_v13, %v352_v14 }
 0x17a   :  { %v7566_v29 = vpop.f32.mrb[0].mxu0  ;;  %4646 = vmatprep.subr.bf16.mxu1 %v5686_v20  ;;  %v5782_v20 = vcombine.high %v345_v15, %v353_v16 }
 0x17b   :  { %v7574_v35 = vpop.f32.mrb[0].mxu1  ;;  %v7576_v54 = vpop.f32.mrb[1].mxu0 }
 0x17c   :  { %v7584_v37 = vpop.f32.mrb[1].mxu1  ;;  %v4125_v39 = vpop.f32.mrb[2].mxu0  ;;  %4524 = vmatpush1.bf16.msra.mxu0 %v5683_v25  ;;  %v5779_v25 = vcombine.low %v344_v13, %v352_v14 }
 0x17d   :  { %v4248_v42 = vpop.f32.mrb[2].mxu1  ;;  %4647 = vmatpush1.bf16.msra.mxu1 %v5685_v26  ;;  %v4126_v43 = vpop.f32.mrb[3].mxu0  ;;  %4525 = vmatprep.subr.bf16.mxu0 %v5700_v28  ;;  %v5781_v26 = vcombine.low %v345_v15, %v353_v16  ;;  %v5796_v28 = vcombine.high %v360_v21, %v368_v22  ;;  %v5795_v39 = vcombine.low %v360_v21, %v368_v22 }
 0x17e   :  { %v4249_v47 = vpop.f32.mrb[3].mxu1  ;;  %4648 = vmatprep.subr.bf16.mxu1 %v5702_v30  ;;  %v5798_v30 = vcombine.high %v361_v23, %v369_v24  ;;  %v5812_v42 = vcombine.high %v376_v31, %v384_v34  ;;  %v5814_v43 = vcombine.high %v377_v0, %v385_v36 }
 0x17f   :  { %v393_v47 = vld [vmem:[%s8656_s2 + $0xb28] sm:$0xff] }
 0x180   :  { %4526 = vmatpush1.bf16.msra.mxu0 %v5699_v40  ;;  %v5797_v40 = vcombine.low %v361_v23, %v369_v24 }
 0x181   :  { %4649 = vmatpush1.bf16.msra.mxu1 %v5701_v45  ;;  %4527 = vmatprep.subr.bf16.mxu0 %v5716_v46  ;;  %v392_v45 = vld [vmem:[%s8656_s2 + $0xb20] sm:$0xff] }
 0x182   :  { %4650 = vmatprep.subr.bf16.mxu1 %v5718_v48  ;;  %v400_v46 = vld [vmem:[%s8656_s2 + $0xb60] sm:$0xff]  ;;  %v401_v48 = vld [vmem:[%s8656_s2 + $0xb68] sm:$0xff] }
 0x183   :  { %v5828_v51 = vcombine.high %v392_v45, %v400_v46  ;;  %v5830_v52 = vcombine.high %v393_v47, %v401_v48  ;;  %v5827_v58 = vcombine.low %v392_v45, %v400_v46  ;;  %v5829_v59 = vcombine.low %v393_v47, %v401_v48 }
 0x184   :  { %4528 = vmatpush1.bf16.msra.mxu0 %v5715_v53  ;;  %v408_v53 = vld [vmem:[%s8656_s2 + $0xba0] sm:$0xff] }
 0x185   :  { %4651 = vmatpush1.bf16.msra.mxu1 %v5717_v55  ;;  %4538 = vmatprep.subr.bf16.mxu0 %v5732_v56  ;;  %v416_v55 = vld [vmem:[%s8656_s2 + $0xbe0] sm:$0xff]  ;;  %v409_v56 = vld [vmem:[%s8656_s2 + $0xba8] sm:$0xff] }
 0x186   :  { %4661 = vmatprep.subr.bf16.mxu1 %v5734_v57  ;;  %v417_v57 = vld [vmem:[%s8656_s2 + $0xbe8] sm:$0xff]  ;;  %v5844_v61 = vcombine.high %v408_v53, %v416_v55  ;;  %v5843_v4 = vcombine.low %v408_v53, %v416_v55 }
 0x187   :  { %4530 = vmatmul.mubr.bf16.vlgmr.msra.gmra.mrb[8].mxu0 %v6602_v27  ;;  %v5846_v62 = vcombine.high %v409_v56, %v417_v57  ;;  %v5845_v5 = vcombine.low %v409_v56, %v417_v57 }
 0x188   :  { %4539 = vmatpush1.bf16.msra.mxu0 %v5731_v63  ;;  %4653 = vmatmul.mubr.bf16.vlgmr.msra.gmra.mrb[8].mxu1 %v6602_v27  ;;  %v424_v63 = vld [vmem:[%s8656_s2 + $0xc20] sm:$0xff] }
 0x189   :  { %4662 = vmatpush1.bf16.msra.mxu1 %v5733_v1  ;;  %4540 = vmatprep.subr.bf16.mxu0 %v5748_v2  ;;  %v432_v1 = vld [vmem:[%s8656_s2 + $0xc60] sm:$0xff]  ;;  %v425_v2 = vld [vmem:[%s8656_s2 + $0xc28] sm:$0xff] }
 0x18a   :  { %4663 = vmatprep.subr.bf16.mxu1 %v5750_v3  ;;  %4570 = vmatprep.mubr.bf16.mxu0 %v6624_v38  ;;  %v433_v3 = vld [vmem:[%s8656_s2 + $0xc68] sm:$0xff]  ;;  %v5860_v6 = vcombine.high %v424_v63, %v432_v1  ;;  %v5859_v13 = vcombine.low %v424_v63, %v432_v1 }
 0x18b   :  { %4693 = vmatprep.mubr.bf16.mxu1 %v6624_v38  ;;  %v5862_v7 = vcombine.high %v425_v2, %v433_v3  ;;  %v5861_v14 = vcombine.low %v425_v2, %v433_v3 }
 0x18c   :  { %4541 = vmatpush1.bf16.msra.mxu0 %v5747_v8  ;;  %v440_v8 = vld [vmem:[%s8656_s2 + $0xca0] sm:$0xff] }
 0x18d   :  { %4664 = vmatpush1.bf16.msra.mxu1 %v5749_v9  ;;  %4542 = vmatprep.subr.bf16.mxu0 %v5764_v11  ;;  %v448_v9 = vld [vmem:[%s8656_s2 + $0xce0] sm:$0xff]  ;;  %v441_v11 = vld [vmem:[%s8656_s2 + $0xca8] sm:$0xff] }
 0x18e   :  { %4665 = vmatprep.subr.bf16.mxu1 %v5766_v12  ;;  %v449_v12 = vld [vmem:[%s8656_s2 + $0xce8] sm:$0xff]  ;;  %v5876_v15 = vcombine.high %v440_v8, %v448_v9  ;;  %v5875_v21 = vcombine.low %v440_v8, %v448_v9 }
 0x18f   :  { %v5878_v16 = vcombine.high %v441_v11, %v449_v12  ;;  %v5877_v22 = vcombine.low %v441_v11, %v449_v12 }
 0x190   :  { %4543 = vmatpush1.bf16.msra.mxu0 %v5763_v17  ;;  %v456_v17 = vld [vmem:[%s8656_s2 + $0xd20] sm:$0xff] }
 0x191   :  { %4666 = vmatpush1.bf16.msra.mxu1 %v5765_v18  ;;  %4544 = vmatprep.subr.bf16.mxu0 %v5780_v19  ;;  %v464_v18 = vld [vmem:[%s8656_s2 + $0xd60] sm:$0xff]  ;;  %v457_v19 = vld [vmem:[%s8656_s2 + $0xd28] sm:$0xff] }
 0x192   :  { %4667 = vmatprep.subr.bf16.mxu1 %v5782_v20  ;;  %v465_v20 = vld [vmem:[%s8656_s2 + $0xd68] sm:$0xff]  ;;  %v5892_v23 = vcombine.high %v456_v17, %v464_v18  ;;  %v5891_v31 = vcombine.low %v456_v17, %v464_v18 }
 0x193   :  { %v5894_v24 = vcombine.high %v457_v19, %v465_v20  ;;  %v5893_v34 = vcombine.low %v457_v19, %v465_v20 }
 0x194   :  { %4545 = vmatpush1.bf16.msra.mxu0 %v5779_v25  ;;  %v472_v25 = vld [vmem:[%s8656_s2 + $0xda0] sm:$0xff] }
 0x195   :  { %4668 = vmatpush1.bf16.msra.mxu1 %v5781_v26  ;;  %4546 = vmatprep.subr.bf16.mxu0 %v5796_v28  ;;  %v480_v26 = vld [vmem:[%s8656_s2 + $0xde0] sm:$0xff]  ;;  %v473_v28 = vld [vmem:[%s8656_s2 + $0xda8] sm:$0xff] }
 0x196   :  { %4669 = vmatprep.subr.bf16.mxu1 %v5798_v30  ;;  %v481_v30 = vld [vmem:[%s8656_s2 + $0xde8] sm:$0xff]  ;;  %v5908_v0 = vcombine.high %v472_v25, %v480_v26  ;;  %v5907_v45 = vcombine.low %v472_v25, %v480_v26 }
 0x197   :  { %v5910_v36 = vcombine.high %v473_v28, %v481_v30  ;;  %v5909_v46 = vcombine.low %v473_v28, %v481_v30 }
 0x198   :  { %4547 = vmatpush1.bf16.msra.mxu0 %v5795_v39  ;;  %v488_v39 = vld [vmem:[%s8656_s2 + $0xe20] sm:$0xff] }
 0x199   :  { %4670 = vmatpush1.bf16.msra.mxu1 %v5797_v40  ;;  %4548 = vmatprep.subr.bf16.mxu0 %v5812_v42  ;;  %v496_v40 = vld [vmem:[%s8656_s2 + $0xe60] sm:$0xff]  ;;  %v489_v42 = vld [vmem:[%s8656_s2 + $0xe28] sm:$0xff] }
 0x19a   :  { %4671 = vmatprep.subr.bf16.mxu1 %v5814_v43  ;;  %v497_v43 = vld [vmem:[%s8656_s2 + $0xe68] sm:$0xff]  ;;  %v5924_v47 = vcombine.high %v488_v39, %v496_v40  ;;  %v5923_v53 = vcombine.low %v488_v39, %v496_v40 }
 0x19b   :  { %v5926_v48 = vcombine.high %v489_v42, %v497_v43  ;;  %v5925_v55 = vcombine.low %v489_v42, %v497_v43 }
 0x19c   :  { %4549 = vmatpush1.bf16.msra.mxu0 %v5811_v49  ;;  %v504_v49 = vld [vmem:[%s8656_s2 + $0xea0] sm:$0xff] }
 0x19d   :  { %4672 = vmatpush1.bf16.msra.mxu1 %v5813_v50  ;;  %4550 = vmatprep.subr.bf16.mxu0 %v5828_v51  ;;  %v512_v50 = vld [vmem:[%s8656_s2 + $0xee0] sm:$0xff]  ;;  %v505_v51 = vld [vmem:[%s8656_s2 + $0xea8] sm:$0xff] }
 0x19e   :  { %4673 = vmatprep.subr.bf16.mxu1 %v5830_v52  ;;  %v513_v52 = vld [vmem:[%s8656_s2 + $0xee8] sm:$0xff]  ;;  %v5940_v56 = vcombine.high %v504_v49, %v512_v50  ;;  %v5939_v63 = vcombine.low %v504_v49, %v512_v50 }
 0x19f   :  { %v5942_v57 = vcombine.high %v505_v51, %v513_v52  ;;  %v5941_v1 = vcombine.low %v505_v51, %v513_v52 }
 0x1a0   :  { %4551 = vmatpush1.bf16.msra.mxu0 %v5827_v58  ;;  %v520_v58 = vld [vmem:[%s8656_s2 + $0xf20] sm:$0xff] }
 0x1a1   :  { %4674 = vmatpush1.bf16.msra.mxu1 %v5829_v59  ;;  %4552 = vmatprep.subr.bf16.mxu0 %v5844_v61  ;;  %v528_v59 = vld [vmem:[%s8656_s2 + $0xf60] sm:$0xff]  ;;  %v521_v61 = vld [vmem:[%s8656_s2 + $0xf28] sm:$0xff] }
 0x1a2   :  { %4675 = vmatprep.subr.bf16.mxu1 %v5846_v62  ;;  %v529_v62 = vld [vmem:[%s8656_s2 + $0xf68] sm:$0xff]  ;;  %v5956_v2 = vcombine.high %v520_v58, %v528_v59  ;;  %v5955_v8 = vcombine.low %v520_v58, %v528_v59 }
 0x1a3   :  { %v5958_v3 = vcombine.high %v521_v61, %v529_v62  ;;  %v5957_v9 = vcombine.low %v521_v61, %v529_v62 }
 0x1a4   :  { %4553 = vmatpush1.bf16.msra.mxu0 %v5843_v4  ;;  %v536_v4 = vld [vmem:[%s8656_s2 + $0xfa0] sm:$0xff] }
 0x1a5   :  { %4676 = vmatpush1.bf16.msra.mxu1 %v5845_v5  ;;  %4554 = vmatprep.subr.bf16.mxu0 %v5860_v6  ;;  %v544_v5 = vld [vmem:[%s8656_s2 + $0xfe0] sm:$0xff]  ;;  %v537_v6 = vld [vmem:[%s8656_s2 + $0xfa8] sm:$0xff] }
 0x1a6   :  { %4677 = vmatprep.subr.bf16.mxu1 %v5862_v7  ;;  %v545_v7 = vld [vmem:[%s8656_s2 + $0xfe8] sm:$0xff]  ;;  %v5972_v11 = vcombine.high %v536_v4, %v544_v5  ;;  %v5971_v17 = vcombine.low %v536_v4, %v544_v5 }
 0x1a7   :  { %v5974_v12 = vcombine.high %v537_v6, %v545_v7  ;;  %v5973_v18 = vcombine.low %v537_v6, %v545_v7 }
 0x1a8   :  { %4555 = vmatpush1.bf16.msra.mxu0 %v5859_v13  ;;  %v552_v13 = vld [vmem:[%s8656_s2 + $0x1020] sm:$0xff] }
 0x1a9   :  { %4678 = vmatpush1.bf16.msra.mxu1 %v5861_v14  ;;  %4556 = vmatprep.subr.bf16.mxu0 %v5876_v15  ;;  %v560_v14 = vld [vmem:[%s8656_s2 + $0x1060] sm:$0xff]  ;;  %v553_v15 = vld [vmem:[%s8656_s2 + $0x1028] sm:$0xff] }
 0x1aa   :  { %4679 = vmatprep.subr.bf16.mxu1 %v5878_v16  ;;  %v561_v16 = vld [vmem:[%s8656_s2 + $0x1068] sm:$0xff]  ;;  %v5988_v19 = vcombine.high %v552_v13, %v560_v14  ;;  %v5987_v25 = vcombine.low %v552_v13, %v560_v14 }
 0x1ab   :  { %v5990_v20 = vcombine.high %v553_v15, %v561_v16  ;;  %v5989_v26 = vcombine.low %v553_v15, %v561_v16 }
 0x1ac   :  { %4557 = vmatpush1.bf16.msra.mxu0 %v5875_v21  ;;  %v568_v21 = vld [vmem:[%s8656_s2 + $0x10a0] sm:$0xff] }
 0x1ad   :  { %4680 = vmatpush1.bf16.msra.mxu1 %v5877_v22  ;;  %4558 = vmatprep.subr.bf16.mxu0 %v5892_v23  ;;  %v576_v22 = vld [vmem:[%s8656_s2 + $0x10e0] sm:$0xff]  ;;  %v569_v23 = vld [vmem:[%s8656_s2 + $0x10a8] sm:$0xff] }
 0x1ae   :  { %4681 = vmatprep.subr.bf16.mxu1 %v5894_v24  ;;  %v577_v24 = vld [vmem:[%s8656_s2 + $0x10e8] sm:$0xff]  ;;  %v6004_v28 = vcombine.high %v568_v21, %v576_v22  ;;  %v6003_v39 = vcombine.low %v568_v21, %v576_v22 }
 0x1af   :  { %v6006_v30 = vcombine.high %v569_v23, %v577_v24  ;;  %v6005_v40 = vcombine.low %v569_v23, %v577_v24 }
 0x1b0   :  { %4559 = vmatpush1.bf16.msra.mxu0 %v5891_v31  ;;  %v584_v31 = vld [vmem:[%s8656_s2 + $0x1120] sm:$0xff] }
 0x1b1   :  { %4682 = vmatpush1.bf16.msra.mxu1 %v5893_v34  ;;  %4560 = vmatprep.subr.bf16.mxu0 %v5908_v0  ;;  %v592_v34 = vld [vmem:[%s8656_s2 + $0x1160] sm:$0xff]  ;;  %v585_v0 = vld [vmem:[%s8656_s2 + $0x1128] sm:$0xff] }
 0x1b2   :  { %4683 = vmatprep.subr.bf16.mxu1 %v5910_v36  ;;  %v593_v36 = vld [vmem:[%s8656_s2 + $0x1168] sm:$0xff]  ;;  %v6020_v42 = vcombine.high %v584_v31, %v592_v34  ;;  %v6019_v49 = vcombine.low %v584_v31, %v592_v34 }
 0x1b3   :  { %v6022_v43 = vcombine.high %v585_v0, %v593_v36  ;;  %v6021_v50 = vcombine.low %v585_v0, %v593_v36 }
 0x1b4   :  { %4561 = vmatpush1.bf16.msra.mxu0 %v5907_v45  ;;  %v600_v45 = vld [vmem:[%s8656_s2 + $0x11a0] sm:$0xff] }
 0x1b5   :  { %4684 = vmatpush1.bf16.msra.mxu1 %v5909_v46  ;;  %4562 = vmatprep.subr.bf16.mxu0 %v5924_v47  ;;  %v608_v46 = vld [vmem:[%s8656_s2 + $0x11e0] sm:$0xff]  ;;  %v601_v47 = vld [vmem:[%s8656_s2 + $0x11a8] sm:$0xff] }
 0x1b6   :  { %4685 = vmatprep.subr.bf16.mxu1 %v5926_v48  ;;  %v609_v48 = vld [vmem:[%s8656_s2 + $0x11e8] sm:$0xff]  ;;  %v6036_v51 = vcombine.high %v600_v45, %v608_v46  ;;  %v6035_v58 = vcombine.low %v600_v45, %v608_v46 }
 0x1b7   :  { %v6038_v52 = vcombine.high %v601_v47, %v609_v48  ;;  %v6037_v59 = vcombine.low %v601_v47, %v609_v48 }
 0x1b8   :  { %4563 = vmatpush1.bf16.msra.mxu0 %v5923_v53  ;;  %v616_v53 = vld [vmem:[%s8656_s2 + $0x1220] sm:$0xff] }
 0x1b9   :  { %4686 = vmatpush1.bf16.msra.mxu1 %v5925_v55  ;;  %4564 = vmatprep.subr.bf16.mxu0 %v5940_v56  ;;  %v624_v55 = vld [vmem:[%s8656_s2 + $0x1260] sm:$0xff]  ;;  %v617_v56 = vld [vmem:[%s8656_s2 + $0x1228] sm:$0xff] }
 0x1ba   :  { %4687 = vmatprep.subr.bf16.mxu1 %v5942_v57  ;;  %v625_v57 = vld [vmem:[%s8656_s2 + $0x1268] sm:$0xff]  ;;  %v6052_v61 = vcombine.high %v616_v53, %v624_v55  ;;  %v6051_v4 = vcombine.low %v616_v53, %v624_v55 }
 0x1bb   :  { %v6054_v62 = vcombine.high %v617_v56, %v625_v57  ;;  %v6053_v5 = vcombine.low %v617_v56, %v625_v57 }
 0x1bc   :  { %4565 = vmatpush1.bf16.msra.mxu0 %v5939_v63  ;;  %v632_v63 = vld [vmem:[%s8656_s2 + $0x12a0] sm:$0xff] }
 0x1bd   :  { %4688 = vmatpush1.bf16.msra.mxu1 %v5941_v1  ;;  %4566 = vmatprep.subr.bf16.mxu0 %v5956_v2  ;;  %v640_v1 = vld [vmem:[%s8656_s2 + $0x12e0] sm:$0xff]  ;;  %v633_v2 = vld [vmem:[%s8656_s2 + $0x12a8] sm:$0xff] }
 0x1be   :  { %4689 = vmatprep.subr.bf16.mxu1 %v5958_v3  ;;  %v641_v3 = vld [vmem:[%s8656_s2 + $0x12e8] sm:$0xff]  ;;  %v6068_v6 = vcombine.high %v632_v63, %v640_v1  ;;  %v6067_v13 = vcombine.low %v632_v63, %v640_v1 }
 0x1bf   :  { %v6070_v7 = vcombine.high %v633_v2, %v641_v3  ;;  %v6069_v14 = vcombine.low %v633_v2, %v641_v3 }
 0x1c0   :  { %4567 = vmatpush1.bf16.msra.mxu0 %v5955_v8  ;;  %v648_v8 = vld [vmem:[%s8656_s2 + $0x1320] sm:$0xff] }
 0x1c1   :  { %4690 = vmatpush1.bf16.msra.mxu1 %v5957_v9  ;;  %4568 = vmatprep.subr.bf16.mxu0 %v5972_v11  ;;  %v656_v9 = vld [vmem:[%s8656_s2 + $0x1360] sm:$0xff]  ;;  %v649_v11 = vld [vmem:[%s8656_s2 + $0x1328] sm:$0xff] }
 0x1c2   :  { %4691 = vmatprep.subr.bf16.mxu1 %v5974_v12  ;;  %v657_v12 = vld [vmem:[%s8656_s2 + $0x1368] sm:$0xff]  ;;  %v6084_v15 = vcombine.high %v648_v8, %v656_v9  ;;  %v6083_v21 = vcombine.low %v648_v8, %v656_v9 }
 0x1c3   :  { %v6086_v16 = vcombine.high %v649_v11, %v657_v12  ;;  %v6085_v22 = vcombine.low %v649_v11, %v657_v12  ;;  %v122_v12 = vld [vmem:[%s8656_s2 + $0x2b0] sm:$0xff] }
 0x1c4   :  { %4569 = vmatpush1.bf16.msra.mxu0 %v5971_v17  ;;  %v664_v17 = vld [vmem:[%s8656_s2 + $0x13a0] sm:$0xff] }
 0x1c5   :  { %4692 = vmatpush1.bf16.msra.mxu1 %v5973_v18  ;;  %4579 = vmatprep.subr.bf16.mxu0 %v5988_v19  ;;  %v672_v18 = vld [vmem:[%s8656_s2 + $0x13e0] sm:$0xff]  ;;  %v665_v19 = vld [vmem:[%s8656_s2 + $0x13a8] sm:$0xff] }
 0x1c6   :  { %4702 = vmatprep.subr.bf16.mxu1 %v5990_v20  ;;  %v673_v20 = vld [vmem:[%s8656_s2 + $0x13e8] sm:$0xff]  ;;  %v6100_v23 = vcombine.high %v664_v17, %v672_v18  ;;  %v6099_v31 = vcombine.low %v664_v17, %v672_v18 }
 0x1c7   :  { %4571 = vmatmul.mubr.bf16.vlgmr.msra.gmra.mrb[8].mxu0 %v6806_v41  ;;  %v6102_v24 = vcombine.high %v665_v19, %v673_v20  ;;  %v6101_v34 = vcombine.low %v665_v19, %v673_v20  ;;  %v138_v20 = vld [vmem:[%s8656_s2 + $0x330] sm:$0xff] }
 0x1c8   :  { %4580 = vmatpush1.bf16.msra.mxu0 %v5987_v25  ;;  %4694 = vmatmul.mubr.bf16.vlgmr.msra.gmra.mrb[8].mxu1 %v6806_v41  ;;  %v42_v25 = vld [vmem:[%s8656_s2 + $0x30] sm:$0xff] }
 0x1c9   :  { %4703 = vmatpush1.bf16.msra.mxu1 %v5989_v26  ;;  %4581 = vmatprep.subr.bf16.mxu0 %v6004_v28  ;;  %v50_v26 = vld [vmem:[%s8656_s2 + $0x70] sm:$0xff]  ;;  %v43_v28 = vld [vmem:[%s8656_s2 + $0x38] sm:$0xff] }
 0x1ca   :  { %4704 = vmatprep.subr.bf16.mxu1 %v6006_v30  ;;  %4611 = vmatprep.mubr.bf16.mxu0 %v6309_v60  ;;  %v51_v30 = vld [vmem:[%s8656_s2 + $0x78] sm:$0xff]  ;;  %v5480_v0 = vcombine.high %v42_v25, %v50_v26  ;;  %v5479_v45 = vcombine.low %v42_v25, %v50_v26 }
 0x1cb   :  { %4734 = vmatprep.mubr.bf16.mxu1 %v6309_v60  ;;  %v5482_v36 = vcombine.high %v43_v28, %v51_v30  ;;  %v5481_v46 = vcombine.low %v43_v28, %v51_v30  ;;  %v154_v30 = vld [vmem:[%s8656_s2 + $0x3b0] sm:$0xff] }
 0x1cc   :  { %4582 = vmatpush1.bf16.msra.mxu0 %v6003_v39  ;;  %v58_v39 = vld [vmem:[%s8656_s2 + $0xb0] sm:$0xff] }
 0x1cd   :  { %4705 = vmatpush1.bf16.msra.mxu1 %v6005_v40  ;;  %4583 = vmatprep.subr.bf16.mxu0 %v6020_v42  ;;  %v66_v40 = vld [vmem:[%s8656_s2 + $0xf0] sm:$0xff]  ;;  %v59_v42 = vld [vmem:[%s8656_s2 + $0xb8] sm:$0xff] }
 0x1ce   :  { %4706 = vmatprep.subr.bf16.mxu1 %v6022_v43  ;;  %v67_v43 = vld [vmem:[%s8656_s2 + $0xf8] sm:$0xff]  ;;  %v5496_v47 = vcombine.high %v58_v39, %v66_v40  ;;  %v5495_v53 = vcombine.low %v58_v39, %v66_v40 }
 0x1cf   :  { %v5498_v48 = vcombine.high %v59_v42, %v67_v43  ;;  %v5497_v55 = vcombine.low %v59_v42, %v67_v43  ;;  %v170_v43 = vld [vmem:[%s8656_s2 + $0x430] sm:$0xff] }
 0x1d0   :  { %4584 = vmatpush1.bf16.msra.mxu0 %v6019_v49  ;;  %v74_v49 = vld [vmem:[%s8656_s2 + $0x130] sm:$0xff] }
 0x1d1   :  { %4707 = vmatpush1.bf16.msra.mxu1 %v6021_v50  ;;  %4585 = vmatprep.subr.bf16.mxu0 %v6036_v51  ;;  %v82_v50 = vld [vmem:[%s8656_s2 + $0x170] sm:$0xff]  ;;  %v75_v51 = vld [vmem:[%s8656_s2 + $0x138] sm:$0xff] }
 0x1d2   :  { %4708 = vmatprep.subr.bf16.mxu1 %v6038_v52  ;;  %v83_v52 = vld [vmem:[%s8656_s2 + $0x178] sm:$0xff]  ;;  %v5512_v56 = vcombine.high %v74_v49, %v82_v50  ;;  %v5511_v63 = vcombine.low %v74_v49, %v82_v50 }
 0x1d3   :  { %v5514_v57 = vcombine.high %v75_v51, %v83_v52  ;;  %v5513_v1 = vcombine.low %v75_v51, %v83_v52  ;;  %v186_v52 = vld [vmem:[%s8656_s2 + $0x4b0] sm:$0xff] }
 0x1d4   :  { %4586 = vmatpush1.bf16.msra.mxu0 %v6035_v58  ;;  %v90_v58 = vld [vmem:[%s8656_s2 + $0x1b0] sm:$0xff] }
 0x1d5   :  { %4709 = vmatpush1.bf16.msra.mxu1 %v6037_v59  ;;  %4587 = vmatprep.subr.bf16.mxu0 %v6052_v61  ;;  %v98_v59 = vld [vmem:[%s8656_s2 + $0x1f0] sm:$0xff]  ;;  %v91_v61 = vld [vmem:[%s8656_s2 + $0x1b8] sm:$0xff] }
 0x1d6   :  { %4710 = vmatprep.subr.bf16.mxu1 %v6054_v62  ;;  %v99_v62 = vld [vmem:[%s8656_s2 + $0x1f8] sm:$0xff]  ;;  %v5528_v2 = vcombine.high %v90_v58, %v98_v59 }
 0x1d7   :  { %v5530_v3 = vcombine.high %v91_v61, %v99_v62  ;;  %v5529_v8 = vcombine.low %v91_v61, %v99_v62  ;;  %v202_v62 = vld [vmem:[%s8656_s2 + $0x530] sm:$0xff] }
 0x1d8   :  { %4588 = vmatpush1.bf16.msra.mxu0 %v6051_v4  ;;  %v106_v4 = vld [vmem:[%s8656_s2 + $0x230] sm:$0xff] }
 0x1d9   :  { %4711 = vmatpush1.bf16.msra.mxu1 %v6053_v5  ;;  %4589 = vmatprep.subr.bf16.mxu0 %v6068_v6  ;;  %v114_v5 = vld [vmem:[%s8656_s2 + $0x270] sm:$0xff]  ;;  %v115_v6 = vld [vmem:[%s8656_s2 + $0x278] sm:$0xff] }
 0x1da   :  { %4712 = vmatprep.subr.bf16.mxu1 %v6070_v7  ;;  %v5527_v7 = vcombine.low %v90_v58, %v98_v59  ;;  %v5544_v9 = vcombine.high %v106_v4, %v114_v5 }
 0x1dc   :  { %4590 = vmatpush1.bf16.msra.mxu0 %v6067_v13  ;;  %v130_v13 = vld [vmem:[%s8656_s2 + $0x2f0] sm:$0xff] }
 0x1dd   :  { %4713 = vmatpush1.bf16.msra.mxu1 %v6069_v14  ;;  %4591 = vmatprep.subr.bf16.mxu0 %v6084_v15  ;;  %v123_v14 = vld [vmem:[%s8656_s2 + $0x2b8] sm:$0xff]  ;;  %v5560_v18 = vcombine.high %v122_v12, %v130_v13 }
 0x1de   :  { %4714 = vmatprep.subr.bf16.mxu1 %v6086_v16  ;;  %v131_v15 = vld [vmem:[%s8656_s2 + $0x2f8] sm:$0xff]  ;;  %v5543_v16 = vcombine.low %v106_v4, %v114_v5 }
 0x1df   :  { %v5562_v19 = vcombine.high %v123_v14, %v131_v15  ;;  %v5561_v25 = vcombine.low %v123_v14, %v131_v15  ;;  %v234_v15 = vld [vmem:[%s8656_s2 + $0x630] sm:$0xff] }
 0x1e0   :  { %4592 = vmatpush1.bf16.msra.mxu0 %v6083_v21  ;;  %v146_v21 = vld [vmem:[%s8656_s2 + $0x370] sm:$0xff] }
 0x1e1   :  { %4715 = vmatpush1.bf16.msra.mxu1 %v6085_v22  ;;  %4593 = vmatprep.subr.bf16.mxu0 %v6100_v23  ;;  %v139_v22 = vld [vmem:[%s8656_s2 + $0x338] sm:$0xff]  ;;  %v5576_v26 = vcombine.high %v138_v20, %v146_v21 }
 0x1e2   :  { %4716 = vmatprep.subr.bf16.mxu1 %v6102_v24  ;;  %v147_v23 = vld [vmem:[%s8656_s2 + $0x378] sm:$0xff]  ;;  %v5559_v24 = vcombine.low %v122_v12, %v130_v13 }
 0x1e3   :  { %v5578_v28 = vcombine.high %v139_v22, %v147_v23  ;;  %v5577_v39 = vcombine.low %v139_v22, %v147_v23  ;;  %v250_v23 = vld [vmem:[%s8656_s2 + $0x6b0] sm:$0xff] }
 0x1e4   :  { %4594 = vmatpush1.bf16.msra.mxu0 %v6099_v31  ;;  %v162_v31 = vld [vmem:[%s8656_s2 + $0x3f0] sm:$0xff] }
 0x1e5   :  { %4717 = vmatpush1.bf16.msra.mxu1 %v6101_v34  ;;  %4743 = vmatprep.subr.bf16.mxu0 %v5480_v0  ;;  %v155_v34 = vld [vmem:[%s8656_s2 + $0x3b8] sm:$0xff]  ;;  %v5592_v40 = vcombine.high %v154_v30, %v162_v31 }
 0x1e6   :  { %4866 = vmatprep.subr.bf16.mxu1 %v5482_v36  ;;  %v163_v0 = vld [vmem:[%s8656_s2 + $0x3f8] sm:$0xff]  ;;  %v5575_v36 = vcombine.low %v138_v20, %v146_v21 }
 0x1e7   :  { %4612 = vmatmul.mubr.bf16.vlgmr.msra.gmra.mrb[8].mxu0 %v6520_v32  ;;  %v5594_v42 = vcombine.high %v155_v34, %v163_v0  ;;  %v5593_v49 = vcombine.low %v155_v34, %v163_v0  ;;  %v266_v0 = vld [vmem:[%s8656_s2 + $0x730] sm:$0xff] }
 0x1e8   :  { %4735 = vmatmul.mubr.bf16.vlgmr.msra.gmra.mrb[8].mxu1 %v6520_v32  ;;  %4744 = vmatpush1.bf16.msra.mxu0 %v5479_v45  ;;  %v178_v45 = vld [vmem:[%s8656_s2 + $0x470] sm:$0xff] }
 0x1e9   :  { %4867 = vmatpush1.bf16.msra.mxu1 %v5481_v46  ;;  %4745 = vmatprep.subr.bf16.mxu0 %v5496_v47  ;;  %v171_v46 = vld [vmem:[%s8656_s2 + $0x438] sm:$0xff]  ;;  %v5608_v50 = vcombine.high %v170_v43, %v178_v45 }
 0x1ea   :  { %4868 = vmatprep.subr.bf16.mxu1 %v5498_v48  ;;  %4775 = vmatprep.mubr.bf16.mxu0 %v6484_v10  ;;  %v179_v47 = vld [vmem:[%s8656_s2 + $0x478] sm:$0xff]  ;;  %v5591_v48 = vcombine.low %v154_v30, %v162_v31 }
 0x1eb   :  { %4898 = vmatprep.mubr.bf16.mxu1 %v6484_v10  ;;  %v107_v10 = vld [vmem:[%s8656_s2 + $0x238] sm:$0xff]  ;;  %v5610_v51 = vcombine.high %v171_v46, %v179_v47  ;;  %v5609_v58 = vcombine.low %v171_v46, %v179_v47 }
 0x1ec   :  { %4746 = vmatpush1.bf16.msra.mxu0 %v5495_v53  ;;  %v5546_v11 = vcombine.high %v107_v10, %v115_v6  ;;  %v5545_v17 = vcombine.low %v107_v10, %v115_v6  ;;  %v194_v53 = vld [vmem:[%s8656_s2 + $0x4f0] sm:$0xff] }
 0x1ed   :  { %4869 = vmatpush1.bf16.msra.mxu1 %v5497_v55  ;;  %4747 = vmatprep.subr.bf16.mxu0 %v5512_v56  ;;  %v187_v55 = vld [vmem:[%s8656_s2 + $0x4b8] sm:$0xff]  ;;  %v5624_v59 = vcombine.high %v186_v52, %v194_v53  ;;  %v218_v6 = vld [vmem:[%s8656_s2 + $0x5b0] sm:$0xff] }
 0x1ee   :  { %4870 = vmatprep.subr.bf16.mxu1 %v5514_v57  ;;  %v195_v56 = vld [vmem:[%s8656_s2 + $0x4f8] sm:$0xff]  ;;  %v5607_v57 = vcombine.low %v170_v43, %v178_v45 }
 0x1ef   :  { %v5626_v61 = vcombine.high %v187_v55, %v195_v56  ;;  %v5625_v4 = vcombine.low %v187_v55, %v195_v56 }
 0x1f0   :  { %4748 = vmatpush1.bf16.msra.mxu0 %v5511_v63  ;;  %v210_v63 = vld [vmem:[%s8656_s2 + $0x570] sm:$0xff] }
 0x1f1   :  { %4871 = vmatpush1.bf16.msra.mxu1 %v5513_v1  ;;  %4749 = vmatprep.subr.bf16.mxu0 %v5528_v2  ;;  %v203_v1 = vld [vmem:[%s8656_s2 + $0x538] sm:$0xff]  ;;  %v5640_v5 = vcombine.high %v202_v62, %v210_v63 }
 0x1f2   :  { %4872 = vmatprep.subr.bf16.mxu1 %v5530_v3  ;;  %v211_v2 = vld [vmem:[%s8656_s2 + $0x578] sm:$0xff]  ;;  %v5623_v3 = vcombine.low %v186_v52, %v194_v53 }
 0x1f3   :  { %v5642_v10 = vcombine.high %v203_v1, %v211_v2  ;;  %v5641_v12 = vcombine.low %v203_v1, %v211_v2  ;;  %v283_v52 = vld [vmem:[%s8656_s2 + $0x7b8] sm:$0xff]  ;;  %v298_v2 = vld [vmem:[%s8656_s2 + $0x830] sm:$0xff] }
 0x1f4   :  { %4750 = vmatpush1.bf16.msra.mxu0 %v5527_v7  ;;  %v226_v7 = vld [vmem:[%s8656_s2 + $0x5f0] sm:$0xff]  ;;  %v291_v53 = vld [vmem:[%s8656_s2 + $0x7f8] sm:$0xff] }
 0x1f5   :  { %4873 = vmatpush1.bf16.msra.mxu1 %v5529_v8  ;;  %4751 = vmatprep.subr.bf16.mxu0 %v5544_v9  ;;  %v219_v8 = vld [vmem:[%s8656_s2 + $0x5b8] sm:$0xff]  ;;  %v5656_v13 = vcombine.high %v218_v6, %v226_v7  ;;  %v5722_v1 = vcombine.high %v283_v52, %v291_v53 }
 0x1f6   :  { %4874 = vmatprep.subr.bf16.mxu1 %v5546_v11  ;;  %v227_v9 = vld [vmem:[%s8656_s2 + $0x5f8] sm:$0xff]  ;;  %v5639_v11 = vcombine.low %v202_v62, %v210_v63 }
 0x1f7   :  { %v5658_v14 = vcombine.high %v219_v8, %v227_v9  ;;  %v5657_v20 = vcombine.low %v219_v8, %v227_v9  ;;  %v314_v9 = vld [vmem:[%s8656_s2 + $0x8b0] sm:$0xff] }
 0x1f8   :  { %4752 = vmatpush1.bf16.msra.mxu0 %v5543_v16  ;;  %v242_v16 = vld [vmem:[%s8656_s2 + $0x670] sm:$0xff] }
 0x1f9   :  { %4875 = vmatpush1.bf16.msra.mxu1 %v5545_v17  ;;  %4753 = vmatprep.subr.bf16.mxu0 %v5560_v18  ;;  %v235_v17 = vld [vmem:[%s8656_s2 + $0x638] sm:$0xff]  ;;  %v5672_v21 = vcombine.high %v234_v15, %v242_v16 }
 0x1fa   :  { %4876 = vmatprep.subr.bf16.mxu1 %v5562_v19  ;;  %v243_v18 = vld [vmem:[%s8656_s2 + $0x678] sm:$0xff]  ;;  %v5655_v19 = vcombine.low %v218_v6, %v226_v7  ;;  %v5721_v6 = vcombine.low %v283_v52, %v291_v53  ;;  %v386_v52 = vld [vmem:[%s8656_s2 + $0xaf0] sm:$0xff] }
 0x1fb   :  { %v5674_v22 = vcombine.high %v235_v17, %v243_v18  ;;  %v5673_v30 = vcombine.low %v235_v17, %v243_v18  ;;  %v330_v18 = vld [vmem:[%s8656_s2 + $0x930] sm:$0xff]  ;;  %v379_v53 = vld [vmem:[%s8656_s2 + $0xab8] sm:$0xff] }
 0x1fc   :  { %4754 = vmatpush1.bf16.msra.mxu0 %v5559_v24  ;;  %v258_v24 = vld [vmem:[%s8656_s2 + $0x6f0] sm:$0xff] }
 0x1fd   :  { %4877 = vmatpush1.bf16.msra.mxu1 %v5561_v25  ;;  %4755 = vmatprep.subr.bf16.mxu0 %v5576_v26  ;;  %v251_v25 = vld [vmem:[%s8656_s2 + $0x6b8] sm:$0xff]  ;;  %v5688_v31 = vcombine.high %v250_v23, %v258_v24 }
 0x1fe   :  { %4878 = vmatprep.subr.bf16.mxu1 %v5578_v28  ;;  %v259_v26 = vld [vmem:[%s8656_s2 + $0x6f8] sm:$0xff]  ;;  %v5671_v28 = vcombine.low %v234_v15, %v242_v16 }
 0x1ff   :  { %v5690_v34 = vcombine.high %v251_v25, %v259_v26  ;;  %v5689_v43 = vcombine.low %v251_v25, %v259_v26  ;;  %v346_v26 = vld [vmem:[%s8656_s2 + $0x9b0] sm:$0xff] }
 0x200   :  { %4756 = vmatpush1.bf16.msra.mxu0 %v5575_v36  ;;  %v274_v36 = vld [vmem:[%s8656_s2 + $0x770] sm:$0xff] }
 0x201   :  { %4879 = vmatpush1.bf16.msra.mxu1 %v5577_v39  ;;  %4757 = vmatprep.subr.bf16.mxu0 %v5592_v40  ;;  %v267_v39 = vld [vmem:[%s8656_s2 + $0x738] sm:$0xff]  ;;  %v5704_v45 = vcombine.high %v266_v0, %v274_v36 }
 0x202   :  { %4880 = vmatprep.subr.bf16.mxu1 %v5594_v42  ;;  %v275_v40 = vld [vmem:[%s8656_s2 + $0x778] sm:$0xff]  ;;  %v5687_v42 = vcombine.low %v250_v23, %v258_v24 }
 0x203   :  { %v5706_v47 = vcombine.high %v267_v39, %v275_v40 }
 0x204   :  { %4758 = vmatpush1.bf16.msra.mxu0 %v5591_v48  ;;  %v282_v48 = vld [vmem:[%s8656_s2 + $0x7b0] sm:$0xff] }
 0x205   :  { %4881 = vmatpush1.bf16.msra.mxu1 %v5593_v49  ;;  %4759 = vmatprep.subr.bf16.mxu0 %v5608_v50  ;;  %v290_v49 = vld [vmem:[%s8656_s2 + $0x7f0] sm:$0xff] }
 0x206   :  { %4882 = vmatprep.subr.bf16.mxu1 %v5610_v51  ;;  %v5720_v62 = vcombine.high %v282_v48, %v290_v49 }
 0x208   :  { %4760 = vmatpush1.bf16.msra.mxu0 %v5607_v57  ;;  %v5703_v57 = vcombine.low %v266_v0, %v274_v36 }
 0x209   :  { %4883 = vmatpush1.bf16.msra.mxu1 %v5609_v58  ;;  %4761 = vmatprep.subr.bf16.mxu0 %v5624_v59 }
 0x20a   :  { %4884 = vmatprep.subr.bf16.mxu1 %v5626_v61  ;;  %v5705_v61 = vcombine.low %v267_v39, %v275_v40  ;;  %v362_v39 = vld [vmem:[%s8656_s2 + $0xa30] sm:$0xff] }
 0x20b   :  { %v370_v40 = vld [vmem:[%s8656_s2 + $0xa70] sm:$0xff] }
 0x20c   :  { %4762 = vmatpush1.bf16.msra.mxu0 %v5623_v3  ;;  %v306_v3 = vld [vmem:[%s8656_s2 + $0x870] sm:$0xff] }
 0x20d   :  { %4885 = vmatpush1.bf16.msra.mxu1 %v5625_v4  ;;  %4763 = vmatprep.subr.bf16.mxu0 %v5640_v5  ;;  %v299_v4 = vld [vmem:[%s8656_s2 + $0x838] sm:$0xff]  ;;  %v5736_v7 = vcombine.high %v298_v2, %v306_v3 }
 0x20e   :  { %4886 = vmatprep.subr.bf16.mxu1 %v5642_v10  ;;  %v307_v5 = vld [vmem:[%s8656_s2 + $0x878] sm:$0xff]  ;;  %v5719_v10 = vcombine.low %v282_v48, %v290_v49  ;;  %v378_v49 = vld [vmem:[%s8656_s2 + $0xab0] sm:$0xff] }
 0x20f   :  { %v5738_v8 = vcombine.high %v299_v4, %v307_v5  ;;  %v5737_v15 = vcombine.low %v299_v4, %v307_v5 }
 0x210   :  { %4764 = vmatpush1.bf16.msra.mxu0 %v5639_v11  ;;  %v322_v11 = vld [vmem:[%s8656_s2 + $0x8f0] sm:$0xff] }
 0x211   :  { %4887 = vmatpush1.bf16.msra.mxu1 %v5641_v12  ;;  %4765 = vmatprep.subr.bf16.mxu0 %v5656_v13  ;;  %v315_v12 = vld [vmem:[%s8656_s2 + $0x8b8] sm:$0xff]  ;;  %v5752_v16 = vcombine.high %v314_v9, %v322_v11 }
 0x212   :  { %4888 = vmatprep.subr.bf16.mxu1 %v5658_v14  ;;  %v323_v13 = vld [vmem:[%s8656_s2 + $0x8f8] sm:$0xff]  ;;  %v5735_v14 = vcombine.low %v298_v2, %v306_v3  ;;  %v5815_v3 = vcombine.low %v378_v49, %v386_v52 }
 0x213   :  { %v5754_v17 = vcombine.high %v315_v12, %v323_v13  ;;  %v5753_v23 = vcombine.low %v315_v12, %v323_v13  ;;  %v403_v2 = vld [vmem:[%s8656_s2 + $0xb78] sm:$0xff] }
 0x214   :  { %4766 = vmatpush1.bf16.msra.mxu0 %v5655_v19  ;;  %v338_v19 = vld [vmem:[%s8656_s2 + $0x970] sm:$0xff] }
 0x215   :  { %4889 = vmatpush1.bf16.msra.mxu1 %v5657_v20  ;;  %4767 = vmatprep.subr.bf16.mxu0 %v5672_v21  ;;  %v331_v20 = vld [vmem:[%s8656_s2 + $0x938] sm:$0xff]  ;;  %v5768_v24 = vcombine.high %v330_v18, %v338_v19 }
 0x216   :  { %4890 = vmatprep.subr.bf16.mxu1 %v5674_v22  ;;  %v339_v21 = vld [vmem:[%s8656_s2 + $0x978] sm:$0xff]  ;;  %v5751_v22 = vcombine.low %v314_v9, %v322_v11 }
 0x217   :  { %v5770_v25 = vcombine.high %v331_v20, %v339_v21  ;;  %v419_v9 = vld [vmem:[%s8656_s2 + $0xbf8] sm:$0xff] }
 0x218   :  { %4768 = vmatpush1.bf16.msra.mxu0 %v5671_v28  ;;  %v354_v28 = vld [vmem:[%s8656_s2 + $0x9f0] sm:$0xff] }
 0x219   :  { %4891 = vmatpush1.bf16.msra.mxu1 %v5673_v30  ;;  %4769 = vmatprep.subr.bf16.mxu0 %v5688_v31  ;;  %v355_v30 = vld [vmem:[%s8656_s2 + $0x9f8] sm:$0xff]  ;;  %v5767_v31 = vcombine.low %v330_v18, %v338_v19  ;;  %v5784_v0 = vcombine.high %v346_v26, %v354_v28 }
 0x21a   :  { %v8066_v46 = vpop.f32.mrb[4].mxu0  ;;  %4892 = vmatprep.subr.bf16.mxu1 %v5690_v34  ;;  %v5769_v34 = vcombine.low %v331_v20, %v339_v21  ;;  %v435_v18 = vld [vmem:[%s8656_s2 + $0xc78] sm:$0xff] }
 0x21b   :  { %v8074_v50 = vpop.f32.mrb[4].mxu1  ;;  %v8076_v51 = vpop.f32.mrb[5].mxu0 }
 0x21c   :  { %v8084_v55 = vpop.f32.mrb[5].mxu1  ;;  %v4371_v56 = vpop.f32.mrb[6].mxu0  ;;  %4770 = vmatpush1.bf16.msra.mxu0 %v5687_v42  ;;  %v371_v42 = vld [vmem:[%s8656_s2 + $0xa78] sm:$0xff] }
 0x21d   :  { %v4494_v58 = vpop.f32.mrb[6].mxu1  ;;  %4893 = vmatpush1.bf16.msra.mxu1 %v5689_v43  ;;  %v4372_v59 = vpop.f32.mrb[7].mxu0  ;;  %4771 = vmatprep.subr.bf16.mxu0 %v5704_v45  ;;  %v5783_v43 = vcombine.low %v346_v26, %v354_v28  ;;  %v387_v56 = vld [vmem:[%s8656_s2 + $0xaf8] sm:$0xff] }
 0x21e   :  { %v4495_v63 = vpop.f32.mrb[7].mxu1  ;;  %4894 = vmatprep.subr.bf16.mxu1 %v5706_v47  ;;  %v5800_v47 = vcombine.high %v362_v39, %v370_v40  ;;  %v5816_v59 = vcombine.high %v378_v49, %v386_v52  ;;  %v5817_v4 = vcombine.low %v379_v53, %v387_v56  ;;  %v451_v26 = vld [vmem:[%s8656_s2 + $0xcf8] sm:$0xff] }
 0x21f   :  { %v402_v63 = vld [vmem:[%s8656_s2 + $0xb70] sm:$0xff]  ;;  %v483_v49 = vld [vmem:[%s8656_s2 + $0xdf8] sm:$0xff] }
 0x220   :  { %4772 = vmatpush1.bf16.msra.mxu0 %v5703_v57  ;;  %v5799_v57 = vcombine.low %v362_v39, %v370_v40  ;;  %v467_v39 = vld [vmem:[%s8656_s2 + $0xd78] sm:$0xff] }
 0x221   :  { %4895 = vmatpush1.bf16.msra.mxu1 %v5705_v61  ;;  %4773 = vmatprep.subr.bf16.mxu0 %v5720_v62  ;;  %v5818_v61 = vcombine.high %v379_v53, %v387_v56  ;;  %v394_v62 = vld [vmem:[%s8656_s2 + $0xb30] sm:$0xff] }
 0x222   :  { %4896 = vmatprep.subr.bf16.mxu1 %v5722_v1  ;;  %v395_v1 = vld [vmem:[%s8656_s2 + $0xb38] sm:$0xff]  ;;  %v5832_v5 = vcombine.high %v394_v62, %v402_v63  ;;  %v5831_v11 = vcombine.low %v394_v62, %v402_v63 }
 0x223   :  { %v5833_v12 = vcombine.low %v395_v1, %v403_v2  ;;  %v499_v62 = vld [vmem:[%s8656_s2 + $0xe78] sm:$0xff] }
 0x224   :  { %4774 = vmatpush1.bf16.msra.mxu0 %v5719_v10  ;;  %v5834_v10 = vcombine.high %v395_v1, %v403_v2 }
 0x225   :  { %4897 = vmatpush1.bf16.msra.mxu1 %v5721_v6  ;;  %4784 = vmatprep.subr.bf16.mxu0 %v5736_v7  ;;  %v410_v6 = vld [vmem:[%s8656_s2 + $0xbb0] sm:$0xff] }
 0x226   :  { %4907 = vmatprep.subr.bf16.mxu1 %v5738_v8  ;;  %v418_v7 = vld [vmem:[%s8656_s2 + $0xbf0] sm:$0xff]  ;;  %v411_v8 = vld [vmem:[%s8656_s2 + $0xbb8] sm:$0xff] }
 0x227   :  { %4776 = vmatmul.mubr.bf16.vlgmr.msra.gmra.mrb[12].mxu0 %v6602_v27  ;;  %v5848_v13 = vcombine.high %v410_v6, %v418_v7  ;;  %v5847_v19 = vcombine.low %v410_v6, %v418_v7  ;;  %v5849_v20 = vcombine.low %v411_v8, %v419_v9  ;;  %v515_v6 = vld [vmem:[%s8656_s2 + $0xef8] sm:$0xff] }
 0x228   :  { %4785 = vmatpush1.bf16.msra.mxu0 %v5735_v14  ;;  %4899 = vmatmul.mubr.bf16.vlgmr.msra.gmra.mrb[12].mxu1 %v6602_v27  ;;  %v347_v27 = vld [vmem:[%s8656_s2 + $0x9b8] sm:$0xff]  ;;  %v5850_v14 = vcombine.high %v411_v8, %v419_v9 }
 0x229   :  { %4908 = vmatpush1.bf16.msra.mxu1 %v5737_v15  ;;  %4786 = vmatprep.subr.bf16.mxu0 %v5752_v16  ;;  %v5786_v36 = vcombine.high %v347_v27, %v355_v30  ;;  %v5785_v45 = vcombine.low %v347_v27, %v355_v30  ;;  %v426_v15 = vld [vmem:[%s8656_s2 + $0xc30] sm:$0xff] }
 0x22a   :  { %4909 = vmatprep.subr.bf16.mxu1 %v5754_v17  ;;  %4816 = vmatprep.mubr.bf16.mxu0 %v6624_v38  ;;  %v434_v16 = vld [vmem:[%s8656_s2 + $0xc70] sm:$0xff]  ;;  %v427_v17 = vld [vmem:[%s8656_s2 + $0xc38] sm:$0xff] }
 0x22b   :  { %4939 = vmatprep.mubr.bf16.mxu1 %v6624_v38  ;;  %v363_v38 = vld [vmem:[%s8656_s2 + $0xa38] sm:$0xff]  ;;  %v5864_v21 = vcombine.high %v426_v15, %v434_v16  ;;  %v5863_v28 = vcombine.low %v426_v15, %v434_v16  ;;  %v5865_v27 = vcombine.low %v427_v17, %v435_v18 }
 0x22c   :  { %4787 = vmatpush1.bf16.msra.mxu0 %v5751_v22  ;;  %v5802_v48 = vcombine.high %v363_v38, %v371_v42  ;;  %v5801_v58 = vcombine.low %v363_v38, %v371_v42  ;;  %v5866_v22 = vcombine.high %v427_v17, %v435_v18  ;;  %v531_v15 = vld [vmem:[%s8656_s2 + $0xf78] sm:$0xff] }
 0x22d   :  { %4910 = vmatpush1.bf16.msra.mxu1 %v5753_v23  ;;  %4788 = vmatprep.subr.bf16.mxu0 %v5768_v24  ;;  %v442_v23 = vld [vmem:[%s8656_s2 + $0xcb0] sm:$0xff] }
 0x22e   :  { %4911 = vmatprep.subr.bf16.mxu1 %v5770_v25  ;;  %v450_v24 = vld [vmem:[%s8656_s2 + $0xcf0] sm:$0xff]  ;;  %v443_v25 = vld [vmem:[%s8656_s2 + $0xcb8] sm:$0xff] }
 0x22f   :  { %v5880_v30 = vcombine.high %v442_v23, %v450_v24  ;;  %v5879_v40 = vcombine.low %v442_v23, %v450_v24  ;;  %v5881_v38 = vcombine.low %v443_v25, %v451_v26  ;;  %v547_v23 = vld [vmem:[%s8656_s2 + $0xff8] sm:$0xff] }
 0x230   :  { %4789 = vmatpush1.bf16.msra.mxu0 %v5767_v31  ;;  %v5882_v31 = vcombine.high %v443_v25, %v451_v26 }
 0x231   :  { %4912 = vmatpush1.bf16.msra.mxu1 %v5769_v34  ;;  %4790 = vmatprep.subr.bf16.mxu0 %v5784_v0  ;;  %v458_v34 = vld [vmem:[%s8656_s2 + $0xd30] sm:$0xff] }
 0x232   :  { %4913 = vmatprep.subr.bf16.mxu1 %v5786_v36  ;;  %v466_v0 = vld [vmem:[%s8656_s2 + $0xd70] sm:$0xff]  ;;  %v459_v36 = vld [vmem:[%s8656_s2 + $0xd38] sm:$0xff] }
 0x233   :  { %v5896_v42 = vcombine.high %v458_v34, %v466_v0  ;;  %v5895_v52 = vcombine.low %v458_v34, %v466_v0  ;;  %v5897_v53 = vcombine.low %v459_v36, %v467_v39  ;;  %v563_v34 = vld [vmem:[%s8656_s2 + $0x1078] sm:$0xff] }
 0x234   :  { %4791 = vmatpush1.bf16.msra.mxu0 %v5783_v43  ;;  %v5898_v43 = vcombine.high %v459_v36, %v467_v39 }
 0x235   :  { %4914 = vmatpush1.bf16.msra.mxu1 %v5785_v45  ;;  %4792 = vmatprep.subr.bf16.mxu0 %v5800_v47  ;;  %v474_v45 = vld [vmem:[%s8656_s2 + $0xdb0] sm:$0xff] }
 0x236   :  { %4915 = vmatprep.subr.bf16.mxu1 %v5802_v48  ;;  %v482_v47 = vld [vmem:[%s8656_s2 + $0xdf0] sm:$0xff]  ;;  %v475_v48 = vld [vmem:[%s8656_s2 + $0xdb8] sm:$0xff] }
 0x237   :  { %v5912_v56 = vcombine.high %v474_v45, %v482_v47  ;;  %v5911_v63 = vcombine.low %v474_v45, %v482_v47  ;;  %v5913_v1 = vcombine.low %v475_v48, %v483_v49  ;;  %v579_v45 = vld [vmem:[%s8656_s2 + $0x10f8] sm:$0xff] }
 0x238   :  { %4793 = vmatpush1.bf16.msra.mxu0 %v5799_v57  ;;  %v5914_v57 = vcombine.high %v475_v48, %v483_v49 }
 0x239   :  { %4916 = vmatpush1.bf16.msra.mxu1 %v5801_v58  ;;  %4794 = vmatprep.subr.bf16.mxu0 %v5816_v59  ;;  %v490_v58 = vld [vmem:[%s8656_s2 + $0xe30] sm:$0xff] }
 0x23a   :  { %4917 = vmatprep.subr.bf16.mxu1 %v5818_v61  ;;  %v498_v59 = vld [vmem:[%s8656_s2 + $0xe70] sm:$0xff]  ;;  %v491_v61 = vld [vmem:[%s8656_s2 + $0xe38] sm:$0xff] }
 0x23b   :  { %v5928_v2 = vcombine.high %v490_v58, %v498_v59  ;;  %v5927_v7 = vcombine.low %v490_v58, %v498_v59  ;;  %v5929_v8 = vcombine.low %v491_v61, %v499_v62  ;;  %v595_v58 = vld [vmem:[%s8656_s2 + $0x1178] sm:$0xff] }
 0x23c   :  { %4795 = vmatpush1.bf16.msra.mxu0 %v5815_v3  ;;  %v5930_v3 = vcombine.high %v491_v61, %v499_v62 }
 0x23d   :  { %4918 = vmatpush1.bf16.msra.mxu1 %v5817_v4  ;;  %4796 = vmatprep.subr.bf16.mxu0 %v5832_v5  ;;  %v506_v4 = vld [vmem:[%s8656_s2 + $0xeb0] sm:$0xff] }
 0x23e   :  { %4919 = vmatprep.subr.bf16.mxu1 %v5834_v10  ;;  %v514_v5 = vld [vmem:[%s8656_s2 + $0xef0] sm:$0xff]  ;;  %v507_v10 = vld [vmem:[%s8656_s2 + $0xeb8] sm:$0xff] }
 0x23f   :  { %v5944_v9 = vcombine.high %v506_v4, %v514_v5  ;;  %v5943_v16 = vcombine.low %v506_v4, %v514_v5  ;;  %v5945_v17 = vcombine.low %v507_v10, %v515_v6 }
 0x240   :  { %4797 = vmatpush1.bf16.msra.mxu0 %v5831_v11  ;;  %v5946_v11 = vcombine.high %v507_v10, %v515_v6 }
 0x241   :  { %4920 = vmatpush1.bf16.msra.mxu1 %v5833_v12  ;;  %4798 = vmatprep.subr.bf16.mxu0 %v5848_v13  ;;  %v522_v12 = vld [vmem:[%s8656_s2 + $0xf30] sm:$0xff] }
 0x242   :  { %4921 = vmatprep.subr.bf16.mxu1 %v5850_v14  ;;  %v530_v13 = vld [vmem:[%s8656_s2 + $0xf70] sm:$0xff]  ;;  %v523_v14 = vld [vmem:[%s8656_s2 + $0xf38] sm:$0xff] }
 0x243   :  { %v5960_v18 = vcombine.high %v522_v12, %v530_v13  ;;  %v5959_v24 = vcombine.low %v522_v12, %v530_v13  ;;  %v5961_v25 = vcombine.low %v523_v14, %v531_v15 }
 0x244   :  { %4799 = vmatpush1.bf16.msra.mxu0 %v5847_v19  ;;  %v5962_v19 = vcombine.high %v523_v14, %v531_v15  ;;  %v634_v15 = vld [vmem:[%s8656_s2 + $0x12b0] sm:$0xff] }
 0x245   :  { %4922 = vmatpush1.bf16.msra.mxu1 %v5849_v20  ;;  %4800 = vmatprep.subr.bf16.mxu0 %v5864_v21  ;;  %v538_v20 = vld [vmem:[%s8656_s2 + $0xfb0] sm:$0xff] }
 0x246   :  { %4923 = vmatprep.subr.bf16.mxu1 %v5866_v22  ;;  %v546_v21 = vld [vmem:[%s8656_s2 + $0xff0] sm:$0xff]  ;;  %v539_v22 = vld [vmem:[%s8656_s2 + $0xfb8] sm:$0xff] }
 0x247   :  { %v5976_v26 = vcombine.high %v538_v20, %v546_v21  ;;  %v5975_v0 = vcombine.low %v538_v20, %v546_v21  ;;  %v5977_v36 = vcombine.low %v539_v22, %v547_v23 }
 0x248   :  { %4801 = vmatpush1.bf16.msra.mxu0 %v5863_v28  ;;  %v5978_v28 = vcombine.high %v539_v22, %v547_v23  ;;  %v650_v23 = vld [vmem:[%s8656_s2 + $0x1330] sm:$0xff] }
 0x249   :  { %4924 = vmatpush1.bf16.msra.mxu1 %v5865_v27  ;;  %4802 = vmatprep.subr.bf16.mxu0 %v5880_v30  ;;  %v554_v27 = vld [vmem:[%s8656_s2 + $0x1030] sm:$0xff] }
 0x24a   :  { %4925 = vmatprep.subr.bf16.mxu1 %v5882_v31  ;;  %v562_v30 = vld [vmem:[%s8656_s2 + $0x1070] sm:$0xff]  ;;  %v555_v31 = vld [vmem:[%s8656_s2 + $0x1038] sm:$0xff] }
 0x24b   :  { %v5992_v39 = vcombine.high %v554_v27, %v562_v30  ;;  %v5991_v47 = vcombine.low %v554_v27, %v562_v30  ;;  %v5993_v48 = vcombine.low %v555_v31, %v563_v34 }
 0x24c   :  { %4803 = vmatpush1.bf16.msra.mxu0 %v5879_v40  ;;  %v5994_v40 = vcombine.high %v555_v31, %v563_v34  ;;  %v666_v34 = vld [vmem:[%s8656_s2 + $0x13b0] sm:$0xff] }
 0x24d   :  { %4926 = vmatpush1.bf16.msra.mxu1 %v5881_v38  ;;  %4804 = vmatprep.subr.bf16.mxu0 %v5896_v42  ;;  %v570_v38 = vld [vmem:[%s8656_s2 + $0x10b0] sm:$0xff] }
 0x24e   :  { %4927 = vmatprep.subr.bf16.mxu1 %v5898_v43  ;;  %v578_v42 = vld [vmem:[%s8656_s2 + $0x10f0] sm:$0xff]  ;;  %v571_v43 = vld [vmem:[%s8656_s2 + $0x10b8] sm:$0xff] }
 0x24f   :  { %v6008_v49 = vcombine.high %v570_v38, %v578_v42  ;;  %v6007_v59 = vcombine.low %v570_v38, %v578_v42  ;;  %v6009_v61 = vcombine.low %v571_v43, %v579_v45 }
 0x250   :  { %4805 = vmatpush1.bf16.msra.mxu0 %v5895_v52  ;;  %v6010_v52 = vcombine.high %v571_v43, %v579_v45 }
 0x251   :  { %4928 = vmatpush1.bf16.msra.mxu1 %v5897_v53  ;;  %4806 = vmatprep.subr.bf16.mxu0 %v5912_v56  ;;  %v586_v53 = vld [vmem:[%s8656_s2 + $0x1130] sm:$0xff] }
 0x252   :  { %4929 = vmatprep.subr.bf16.mxu1 %v5914_v57  ;;  %v594_v56 = vld [vmem:[%s8656_s2 + $0x1170] sm:$0xff]  ;;  %v587_v57 = vld [vmem:[%s8656_s2 + $0x1138] sm:$0xff] }
 0x253   :  { %v6024_v62 = vcombine.high %v586_v53, %v594_v56  ;;  %v6023_v4 = vcombine.low %v586_v53, %v594_v56  ;;  %v6025_v5 = vcombine.low %v587_v57, %v595_v58  ;;  %v6242_v53 = vld [vmem:[%s8658_s4 + $0x10] sm:$0xff]   ;;  %v5278_v56 = vld [vmem:[%s8655_s1] sm:$0x1] }
 0x254   :  { %4807 = vmatpush1.bf16.msra.mxu0 %v5911_v63  ;;  %v6026_v63 = vcombine.high %v587_v57, %v595_v58 }
 0x255   :  { %4930 = vmatpush1.bf16.msra.mxu1 %v5913_v1  ;;  %4808 = vmatprep.subr.bf16.mxu0 %v5928_v2  ;;  %v602_v1 = vld [vmem:[%s8656_s2 + $0x11b0] sm:$0xff] }
 0x256   :  { %4931 = vmatprep.subr.bf16.mxu1 %v5930_v3  ;;  %v610_v2 = vld [vmem:[%s8656_s2 + $0x11f0] sm:$0xff]  ;;  %v611_v3 = vld [vmem:[%s8656_s2 + $0x11f8] sm:$0xff] }
 0x257   :  { %v6040_v10 = vcombine.high %v602_v1, %v610_v2 }
 0x258   :  { %4809 = vmatpush1.bf16.msra.mxu0 %v5927_v7  ;;  %v618_v7 = vld [vmem:[%s8656_s2 + $0x1230] sm:$0xff] }
 0x259   :  { %4932 = vmatpush1.bf16.msra.mxu1 %v5929_v8  ;;  %4810 = vmatprep.subr.bf16.mxu0 %v5944_v9  ;;  %v626_v8 = vld [vmem:[%s8656_s2 + $0x1270] sm:$0xff]  ;;  %v627_v9 = vld [vmem:[%s8656_s2 + $0x1278] sm:$0xff] }
 0x25a   :  { %4933 = vmatprep.subr.bf16.mxu1 %v5946_v11  ;;  %v6039_v11 = vcombine.low %v602_v1, %v610_v2  ;;  %v6056_v13 = vcombine.high %v618_v7, %v626_v8 }
 0x25c   :  { %4811 = vmatpush1.bf16.msra.mxu0 %v5943_v16  ;;  %v642_v16 = vld [vmem:[%s8656_s2 + $0x12f0] sm:$0xff] }
 0x25d   :  { %4934 = vmatpush1.bf16.msra.mxu1 %v5945_v17  ;;  %4812 = vmatprep.subr.bf16.mxu0 %v5960_v18  ;;  %v635_v17 = vld [vmem:[%s8656_s2 + $0x12b8] sm:$0xff]  ;;  %v6072_v21 = vcombine.high %v634_v15, %v642_v16 }
 0x25e   :  { %4935 = vmatprep.subr.bf16.mxu1 %v5962_v19  ;;  %v643_v18 = vld [vmem:[%s8656_s2 + $0x12f8] sm:$0xff]  ;;  %v6055_v19 = vcombine.low %v618_v7, %v626_v8  ;;  %v676_v7 = vld [vmem:[%s8657_s3] sm:$0xff] }
 0x25f   :  { %v6074_v22 = vcombine.high %v635_v17, %v643_v18  ;;  %v6073_v27 = vcombine.low %v635_v17, %v643_v18 }
 0x260   :  { %4813 = vmatpush1.bf16.msra.mxu0 %v5959_v24  ;;  %v658_v24 = vld [vmem:[%s8656_s2 + $0x1370] sm:$0xff] }
 0x261   :  { %4936 = vmatpush1.bf16.msra.mxu1 %v5961_v25  ;;  %4814 = vmatprep.subr.bf16.mxu0 %v5976_v26  ;;  %v651_v25 = vld [vmem:[%s8656_s2 + $0x1338] sm:$0xff]  ;;  %v6088_v30 = vcombine.high %v650_v23, %v658_v24 }
 0x262   :  { %4937 = vmatprep.subr.bf16.mxu1 %v5978_v28  ;;  %v659_v26 = vld [vmem:[%s8656_s2 + $0x1378] sm:$0xff]  ;;  %v6071_v28 = vcombine.low %v634_v15, %v642_v16  ;;  %v698_v15 = vsub.s32 4, %v6434_v44 }
 0x263   :  { %v6090_v31 = vcombine.high %v651_v25, %v659_v26  ;;  %v6089_v38 = vcombine.low %v651_v25, %v659_v26 }
 0x264   :  { %4815 = vmatpush1.bf16.msra.mxu0 %v5975_v0  ;;  %v674_v0 = vld [vmem:[%s8656_s2 + $0x13f0] sm:$0xff] }
 0x265   :  { %4938 = vmatpush1.bf16.msra.mxu1 %v5977_v36  ;;  %4825 = vmatprep.subr.bf16.mxu0 %v5992_v39  ;;  %v667_v36 = vld [vmem:[%s8656_s2 + $0x13b8] sm:$0xff]  ;;  %v6104_v42 = vcombine.high %v666_v34, %v674_v0  ;;  %v6103_v45 = vcombine.low %v666_v34, %v674_v0  ;;  %v677_v0 = vld [vmem:[%s8657_s3 + $0x8] sm:$0xff] }
 0x266   :  { %4948 = vmatprep.subr.bf16.mxu1 %v5994_v40  ;;  %v675_v39 = vld [vmem:[%s8656_s2 + $0x13f8] sm:$0xff]  ;;  %v6087_v40 = vcombine.low %v650_v23, %v658_v24 }
 0x267   :  { %4817 = vmatmul.mubr.bf16.vlgmr.msra.gmra.mrb[12].mxu0 %v6806_v41  ;;  %v6106_v43 = vcombine.high %v667_v36, %v675_v39 }
 0x268   :  { %4826 = vmatpush1.bf16.msra.mxu0 %v5991_v47  ;;  %4940 = vmatmul.mubr.bf16.vlgmr.msra.gmra.mrb[12].mxu1 %v6806_v41  ;;  %v603_v41 = vld [vmem:[%s8656_s2 + $0x11b8] sm:$0xff]  ;;  %v6105_v47 = vcombine.low %v667_v36, %v675_v39 }
 0x269   :  { %4949 = vmatpush1.bf16.msra.mxu1 %v5993_v48  ;;  %4827 = vmatprep.subr.bf16.mxu0 %v6008_v49  ;;  %v6042_v6 = vcombine.high %v603_v41, %v611_v3  ;;  %v6041_v12 = vcombine.low %v603_v41, %v611_v3  ;;  %v6240_v48 = vld [vmem:[%s8658_s4] sm:$0xff]   ;;  %v6310_v49 = vmov 0.0   ;;  %v6245_v3 = vld [vmem:[%s8660_s6 + $0x8] sm:$0xff]  }
 0x26a   :  { %4950 = vmatprep.subr.bf16.mxu1 %v6010_v52  ;;  %4857 = vmatprep.mubr.bf16.mxu0 %v6309_v60  ;;  %v6241_v52 = vld [vmem:[%s8658_s4 + $0x8] sm:$0xff]   ;;  %v6244_v41 = vld [vmem:[%s8660_s6] sm:$0xff]  }
 0x26b   :  { %4980 = vmatprep.mubr.bf16.mxu1 %v6309_v60  ;;  %v619_v60 = vld [vmem:[%s8656_s2 + $0x1238] sm:$0xff] }
 0x26c   :  { %4828 = vmatpush1.bf16.msra.mxu0 %v6007_v59  ;;  %v6058_v14 = vcombine.high %v619_v60, %v627_v9  ;;  %v6057_v20 = vcombine.low %v619_v60, %v627_v9  ;;  %v686_v9 = vsub.s32 1, %v6434_v44 }
 0x26d   :  { %4951 = vmatpush1.bf16.msra.mxu1 %v6009_v61  ;;  %4829 = vmatprep.subr.bf16.mxu0 %v6024_v62 }
 0x26e   :  { %4952 = vmatprep.subr.bf16.mxu1 %v6026_v63 }
 0x270   :  { %4830 = vmatpush1.bf16.msra.mxu0 %v6023_v4  ;;  %v6246_v4 = vld [vmem:[%s8660_s6 + $0x10] sm:$0xff]  }
 0x271   :  { %4953 = vmatpush1.bf16.msra.mxu1 %v6025_v5  ;;  %4831 = vmatprep.subr.bf16.mxu0 %v6040_v10  ;;  %v6247_v5 = vld [vmem:[%s8660_s6 + $0x18] sm:$0xff]   ;;  %v682_v10 = vsub.s32 0, %v6434_v44 }
 0x272   :  { %4954 = vmatprep.subr.bf16.mxu1 %v6042_v6  ;;  %v690_v6 = vsub.s32 2, %v6434_v44 }
 0x273   :  { %v683_v8 = vrot.slane %v676_v7, %v682_v10 }
 0x274   :  { %4832 = vmatpush1.bf16.msra.mxu0 %v6039_v11  ;;  %v691_v60 = vrot.slane %v676_v7, %v690_v6 }
 0x275   :  { %4955 = vmatpush1.bf16.msra.mxu1 %v6041_v12  ;;  %4833 = vmatprep.subr.bf16.mxu0 %v6056_v13  ;;  %v8427_v11 = vadd.f32 %v7566_v29, %v683_v8  ;;  %v687_v13 = vrot.slane %v676_v7, %v686_v9 }
 0x276   :  { %4956 = vmatprep.subr.bf16.mxu1 %v6058_v14  ;;  %v8430_v12 = vadd.f32 %v7574_v35, %v691_v60  ;;  %v694_v14 = vsub.s32 3, %v6434_v44  ;;  %v731_v60 = vrot.slane %v677_v0, %v698_v15 }
 0x277   :  { %v4989_v16 = vmax.f32 %v8427_v11, 0.0  ;;  %v8437_v18 = vadd.f32 %v7576_v54, %v687_v13 }
 0x278   :  { %4834 = vmatpush1.bf16.msra.mxu0 %v6055_v19  ;;  %v4991_v17 = vmax.f32 %v8430_v12, 0.0  ;;  %v695_v19 = vrot.slane %v676_v7, %v694_v14 }
 0x279   :  { %4957 = vmatpush1.bf16.msra.mxu1 %v6057_v20  ;;  %4835 = vmatprep.subr.bf16.mxu0 %v6072_v21  ;;  %v699_v20 = vrot.slane %v676_v7, %v698_v15  ;;  %v5055_v29 = vsel %vm5054_vm2, %v4989_v16, -inf  ;;  %v4990_v21 = vmax.f32 %v8437_v18, 0.0 }
 0x27a   :  { %4958 = vmatprep.subr.bf16.mxu1 %v6074_v22  ;;  %v5057_v35 = vsel %vm5054_vm2, %v4991_v17, -inf  ;;  %v706_v22 = vsub.s32 6, %v6434_v44  ;;  %v8448_v23 = vadd.f32 %v7584_v37, %v695_v19 }
 0x27b   :  { %v8451_v54 = vadd.f32 %v8066_v46, %v699_v20  ;;  %v5060_v24 = vmax.f32 %v5055_v29, %v5057_v35  ;;  %v5056_v25 = vsel %vm5054_vm2, %v4990_v21, -inf  ;;  %v710_v46 = vsub.s32 7, %v6434_v44 }
 0x27c   :  { %4836 = vmatpush1.bf16.msra.mxu0 %v6071_v28  ;;  %v707_v26 = vrot.slane %v676_v7, %v706_v22  ;;  %v702_v28 = vsub.s32 5, %v6434_v44  ;;  %v739_v13 = vrot.slane %v677_v0, %v706_v22 }
 0x27d   :  { %4959 = vmatpush1.bf16.msra.mxu1 %v6073_v27  ;;  %4837 = vmatprep.subr.bf16.mxu0 %v6088_v30  ;;  %v4992_v27 = vmax.f32 %v8448_v23, 0.0  ;;  %v4993_v30 = vmax.f32 %v8451_v54, 0.0  ;;  %v743_v20 = vrot.slane %v677_v0, %v710_v46 }
 0x27e   :  { %4960 = vmatprep.subr.bf16.mxu1 %v6090_v31  ;;  %v5064_v31 = vmax.f32 %v5056_v25, %v5060_v24  ;;  %v8460_v34 = vadd.f32 %v8074_v50, %v707_v26  ;;  %v703_v37 = vrot.slane %v676_v7, %v702_v28  ;;  %v735_v19 = vrot.slane %v677_v0, %v702_v28 }
 0x27f   :  { %v5058_v36 = vsel %vm5054_vm2, %v4992_v27, -inf  ;;  %v5059_v39 = vsel %vm5054_vm2, %v4993_v30, -inf }
 0x280   :  { %4838 = vmatpush1.bf16.msra.mxu0 %v6087_v40  ;;  %v5062_v40 = vmax.f32 %v5058_v36, %v5064_v31  ;;  %v8474_v50 = vadd.f32 %v8076_v51, %v703_v37 }
 0x281   :  { %4961 = vmatpush1.bf16.msra.mxu1 %v6089_v38  ;;  %4839 = vmatprep.subr.bf16.mxu0 %v6104_v42  ;;  %v4995_v38 = vmax.f32 %v8460_v34, 0.0  ;;  %v711_v42 = vrot.slane %v676_v7, %v710_v46 }
 0x282   :  { %4962 = vmatprep.subr.bf16.mxu1 %v6106_v43  ;;  %v715_v43 = vrot.slane %v677_v0, %v682_v10 }
 0x284   :  { %4840 = vmatpush1.bf16.msra.mxu0 %v6103_v45  ;;  %v5066_v45 = vmax.f32 %v5059_v39, %v5062_v40 }
 0x285   :  { %4963 = vmatpush1.bf16.msra.mxu1 %v6105_v47  ;;  %6129 = vmatprep.subr.bf16.mxu0 %v6310_v49  ;;  %v5063_v47 = vsel %vm5054_vm2, %v4995_v38, -inf }
 0x286   :  { %6141 = vmatprep.subr.bf16.mxu1 %v6310_v49 }
 0x287   :  { %4858 = vmatmul.mubr.bf16.vlgmr.msra.gmra.mrb[12].mxu0 %v6520_v32 }
 0x288   :  { %4981 = vmatmul.mubr.bf16.vlgmr.msra.gmra.mrb[12].mxu1 %v6520_v32  ;;  %6130 = vmatpush3.bf16.msra.mxu0 %v6240_v48  ;;  %v6243_v32 = vld [vmem:[%s8658_s4 + $0x18] sm:$0xff]   ;;  %v4994_v48 = vmax.f32 %v8474_v50, 0.0 }
 0x289   :  { %6131 = vmatprep.subr.bf16.mxu0 %v6310_v49  ;;  %6137 = vmatprep.mubr.msk.bf16.mxu0 %vm6311_vm0, %v6310_v49 }
 0x28a   :  { %6149 = vmatprep.mubr.msk.bf16.mxu1 %vm6311_vm0, %v6310_v49  ;;  %6142 = vmatpush3.bf16.msra.mxu1 %v6244_v41  ;;  %v5061_v51 = vsel %vm5054_vm2, %v4994_v48, -inf }
 0x28b   :  { %6143 = vmatprep.subr.bf16.mxu1 %v6310_v49 }
 0x28c   :  { %6132 = vmatpush3.bf16.msra.mxu0 %v6241_v52 }
 0x28d   :  { %6133 = vmatprep.subr.bf16.mxu0 %v6310_v49 }
 0x28e   :  { %6144 = vmatpush3.bf16.msra.mxu1 %v6245_v3 }
 0x28f   :  { %6145 = vmatprep.subr.bf16.mxu1 %v6310_v49 }
 0x290   :  { %6134 = vmatpush3.bf16.msra.mxu0 %v6242_v53  ;;  %v5068_v53 = vmax.f32 %v5063_v47, %v5066_v45 }
 0x291   :  { %6135 = vmatprep.subr.bf16.mxu0 %v6310_v49 }
 0x292   :  { %6146 = vmatpush3.bf16.msra.mxu1 %v6246_v4 }
 0x293   :  { %6147 = vmatprep.subr.bf16.mxu1 %v6310_v49  ;;  %v8481_v49 = vadd.f32 %v8084_v55, %v711_v42 }
 0x294   :  { %6136 = vmatpush3.bf16.msra.mxu0 %v6243_v32  ;;  %v723_v32 = vrot.slane %v677_v0, %v690_v6 }
 0x296   :  { %6148 = vmatpush3.bf16.msra.mxu1 %v6247_v5  ;;  %v727_v5 = vrot.slane %v677_v0, %v694_v14 }
 0x297   :  { %6138 = vmatmul.mubr.msk.bf16.vlgmr.msra.gmra.mrb[16].mxu0 %vm5318_vm1, %v5278_v56  ;;  %v4996_v56 = vmax.f32 %v8481_v49, 0.0 }
 0x299   :  { %v5065_v55 = vsel %vm5054_vm2, %v4996_v56, -inf }
 0x2ba   :  { %v8400_v57 = vpop.f32.mrb[8].mxu0 }
 0x2bb   :  { %v8402_v58 = vpop.f32.mrb[8].mxu1  ;;  %v8404_v59 = vpop.f32.mrb[9].mxu0  ;;  %v8484_v52 = vadd.f32 %v8400_v57, %v715_v43 }
 0x2bc   :  { %v8406_v61 = vpop.f32.mrb[9].mxu1  ;;  %v4617_v62 = vpop.f32.mrb[10].mxu0 }
 0x2bd   :  { %v4740_v63 = vpop.f32.mrb[10].mxu1  ;;  %v4618_v1 = vpop.f32.mrb[11].mxu0  ;;  %v4997_v62 = vmax.f32 %v8484_v52, 0.0  ;;  %v8509_v7 = vadd.f32 %v8406_v61, %v727_v5  ;;  %v6107_v5 = vld [vmem:[%s8659_s5] ss:$0 sm:$0xff] }
 0x2be   :  { %v4741_v2 = vpop.f32.mrb[11].mxu1  ;;  %v5072_v63 = vmax.f32 %v5061_v51, %v5068_v53  ;;  %v8492_v1 = vadd.f32 %v8402_v58, %v723_v32 }
 0x2bf   :  { %v719_v2 = vrot.slane %v677_v0, %v686_v9  ;;  %v5067_v57 = vsel %vm5054_vm2, %v4997_v62, -inf  ;;  %v5006_v9 = vand.u32 127, %v680_v33  ;;  %v5000_v14 = vmax.f32 %v8509_v7, 0.0 }
 0x2c0   :  { %v5070_v41 = vmax.f32 %v5065_v55, %v5072_v63  ;;  %v4999_v3 = vmax.f32 %v8492_v1, 0.0 }
 0x2c1   :  { %v8502_v4 = vadd.f32 %v8404_v59, %v719_v2  ;;  %v5021_v26 = vadd.s32 1920, %v5006_v9  ;;  %v5073_v28 = vsel %vm5054_vm2, %v5000_v14, -inf }
 0x2c2   :  { %v5074_v10 = vmax.f32 %v5067_v57, %v5070_v41  ;;  %v5071_v58 = vsel %vm5054_vm2, %v4999_v3, -inf }
 0x2c3   :  { %v4998_v6 = vmax.f32 %v8502_v4, 0.0  ;;  %vm5037_vm3 = vcmp.lt.s32.totalorder %v5021_v26, 1968 }
 0x2c4   :  { %v5076_v8 = vmax.f32 %v5071_v58, %v5074_v10 }
 0x2c5   :  { %v5069_v59 = vsel %vm5054_vm2, %v4998_v6, -inf }
 0x2c6   :  { %v5078_v29 = vmax.f32 %v5069_v59, %v5076_v8 }
 0x2c8   :  { %v5080_v39 = vmax.f32 %v5073_v28, %v5078_v29 }
 0x35a   :  { %v4859_v35 = vpop.f32.mrb[12].mxu0 }
 0x35b   :  { %v8516_v24 = vadd.f32 %v4859_v35, %v731_v60  ;;  %v4982_v25 = vpop.f32.mrb[12].mxu1  ;;  %v4861_v61 = vpop.f32.mrb[13].mxu0 }
 0x35c   :  { %v8518_v31 = vadd.f32 %v4982_v25, %v739_v13  ;;  %v8520_v15 = vadd.f32 %v4861_v61, %v735_v19  ;;  %v4984_v33 = vpop.f32.mrb[13].mxu1  ;;  %v4863_v22 = vpop.f32.mrb[14].mxu0 }
 0x35d   :  { %v5001_v37 = vmax.f32 %v8516_v24, 0.0  ;;  %v6168_v46 = vadd.f32 %v4984_v33, %v743_v20  ;;  %v4986_v0 = vpop.f32.mrb[14].mxu1  ;;  %v4864_v36 = vpop.f32.mrb[15].mxu0 }
 0x35e   :  { %v5003_v40 = vmax.f32 %v8518_v31, 0.0  ;;  %v4987_v42 = vpop.f32.mrb[15].mxu1  ;;  %v5002_v45 = vmax.f32 %v8520_v15, 0.0 }
 0x35f   :  { %v5075_v43 = vsel %vm5054_vm2, %v5001_v37, -inf  ;;  %v5004_v47 = vmax.f32 %v6168_v46, 0.0 }
 0x360   :  { %v5082_v53 = vmax.f32 %v5075_v43, %v5080_v39  ;;  %v5079_v32 = vsel %vm5054_vm2, %v5003_v40, -inf  ;;  %v5077_v2 = vsel %vm5054_vm2, %v5002_v45, -inf }
 0x361   :  { %v8534_v63 = vsel %vm5037_vm3, %v5004_v47, -1e+30 }
 0x362   :  { %v5083_v51 = vmax.f32 %v5079_v32, %v5082_v53  ;;  %v5081_v57 = vsel %vm5054_vm2, %v8534_v63, -inf }
 0x364   :  { %v5084_v55 = vmax.f32 %v5077_v2, %v5083_v51 }
 0x366   :  { %v5085_v41 = vmax.f32 %v5081_v57, %v5084_v55 }
 0x368   :  { %5086 = vmax.xlane.f32.xlu0 %v5085_v41 }
 0x36a   :  { %v5356_v10 = vpop.f32.mrb[16].mxu0 }
 0x36b   :  { %v5357_v58 = vadd.f32 %v6107_v5, %v5356_v10  ;;  %v6139_v8 = vpop.f32.mrb[17].mxu0 }
 0x36c   :  { %v5359_v60 = vpop.f32.mrb[18].mxu0 }
 0x36d   :  { %v5362_v9 = vmax.f32 %v5357_v58, 0.0  ;;  %v6140_v13 = vpop.f32.mrb[19].mxu0 }
 0x36f   :  { %v5363_v19 = vpack.c.bf16 %v5362_v9, %v5362_v9 }
 0x371   :  { %6150 = vmatmul.mubr.msk.bf16.vlgmr.msra.gmra.mrb[16].mxu1 %vm5318_vm1, %v5363_v19 }
 0x3f5   :  { %v8545_v59 = vpop.xlane.xlu0 %5086 }
 0x3f6   :  { %v5088_v20 = vsub.f32 %v4989_v16, %v8545_v59  ;;  %v5089_v29 = vsub.f32 %v4990_v21, %v8545_v59  ;;  %v5090_v35 = vsub.f32 %v4991_v17, %v8545_v59  ;;  %v5091_v25 = vsub.f32 %v4992_v27, %v8545_v59 }
 0x3f7   :  { %v5092_v61 = vsub.f32 %v4993_v30, %v8545_v59  ;;  %v5093_v16 = vsub.f32 %v4994_v48, %v8545_v59  ;;  %v5094_v12 = vsub.f32 %v4995_v38, %v8545_v59  ;;  %v5095_v21 = vsub.f32 %v4996_v56, %v8545_v59 }
 0x3f8   :  { %v5104_v26 = vmul.f32 1.442695, %v5088_v20  ;;  %v5106_v33 = vmul.f32 1.442695, %v5089_v29  ;;  %v5108_v11 = vmul.f32 1.442695, %v5090_v35  ;;  %v5096_v54 = vsub.f32 %v4997_v62, %v8545_v59 }
 0x3f9   :  { %v5110_v18 = vmul.f32 1.442695, %v5091_v25  ;;  %v5112_v17 = vmul.f32 1.442695, %v5092_v61  ;;  %v5114_v23 = vmul.f32 1.442695, %v5093_v16  ;;  %v5097_v30 = vsub.f32 %v4998_v6, %v8545_v59 }
 0x3fa   :  { %6248 = vpow2.f32 %v5104_v26  ;;  %v5116_v27 = vmul.f32 1.442695, %v5094_v12  ;;  %v5118_v34 = vmul.f32 1.442695, %v5095_v21  ;;  %v5098_v38 = vsub.f32 %v4999_v3, %v8545_v59 }
 0x3fb   :  { %6250 = vpow2.f32 %v5106_v33  ;;  %v5120_v50 = vmul.f32 1.442695, %v5096_v54  ;;  %v5099_v52 = vsub.f32 %v5000_v14, %v8545_v59  ;;  %v5122_v56 = vmul.f32 1.442695, %v5097_v30  ;;  %v6113_v30 = vld [vmem:[#allocation2] ss:$0 sm:$0xff] }
 0x3fc   :  { %6252 = vpow2.f32 %v5108_v11  ;;  %v5100_v6 = vsub.f32 %v5001_v37, %v8545_v59  ;;  %v5124_v22 = vmul.f32 1.442695, %v5098_v38  ;;  %v5101_v46 = vsub.f32 %v5002_v45, %v8545_v59 }
 0x3fd   :  { %6254 = vpow2.f32 %v5110_v18  ;;  %v5126_v0 = vmul.f32 1.442695, %v5099_v52  ;;  %v5102_v37 = vsub.f32 %v5003_v40, %v8545_v59  ;;  %v5103_v45 = vsub.f32 %v8534_v63, %v8545_v59 }
 0x3fe   :  { %6256 = vpow2.f32 %v5112_v17  ;;  %v5128_v42 = vmul.f32 1.442695, %v5100_v6  ;;  %v5130_v53 = vmul.f32 1.442695, %v5101_v46  ;;  %v6312_v6 = vmov 1983009808  }
 0x3ff   :  { %6258 = vpow2.f32 %v5114_v23  ;;  %v5132_v31 = vmul.f32 1.442695, %v5102_v37  ;;  %v5134_v41 = vmul.f32 1.442695, %v5103_v45 }
 0x400   :  { %6260 = vpow2.f32 %v5116_v27 }
 0x401   :  { %6262 = vpow2.f32 %v5118_v34 }
 0x402   :  { %6264 = vpow2.f32 %v5120_v50 }
 0x403   :  { %6266 = vpow2.f32 %v5122_v56 }
 0x404   :  { %v8580_v48 = vpop.eup %6248  ;;  %6268 = vpow2.f32 %v5124_v22  ;;  %v5205_v22 = vunpack.c.l.s4 %v6312_v6 }
 0x405   :  { %v8582_v49 = vpop.eup %6250  ;;  %v5136_v62 = vsel %vm5054_vm2, %v8580_v48, 0.0  ;;  %6270 = vpow2.f32 %v5126_v0 }
 0x406   :  { %v8589_v4 = vpop.eup %6252  ;;  %v5137_v1 = vsel %vm5054_vm2, %v8582_v49, 0.0  ;;  %6272 = vpow2.f32 %v5128_v42 }
 0x407   :  { %v8593_v3 = vpop.eup %6254  ;;  %v5138_v7 = vadd.f32 %v5137_v1, %v5136_v62  ;;  %v5139_v14 = vsel %vm5054_vm2, %v8589_v4, 0.0  ;;  %6274 = vpow2.f32 %v5130_v53 }
 0x408   :  { %v8600_v28 = vpop.eup %6256  ;;  %v5141_v39 = vsel %vm5054_vm2, %v8593_v3, 0.0  ;;  %6276 = vpow2.f32 %v5132_v31 }
 0x409   :  { %v5140_v36 = vadd.f32 %v5139_v14, %v5138_v7  ;;  %v8607_v24 = vpop.eup %6258  ;;  %v5143_v47 = vsel %vm5054_vm2, %v8600_v28, 0.0  ;;  %6278 = vpow2.f32 %v5134_v41  ;;  %v5206_v7 = vunpack.c.0.s8 %v5205_v22 }
 0x40a   :  { %v8614_v15 = vpop.eup %6260  ;;  %v5145_v51 = vsel %vm5054_vm2, %v8607_v24, 0.0 }
 0x40b   :  { %v5142_v43 = vadd.f32 %v5141_v39, %v5140_v36  ;;  %v6263_v2 = vpop.eup %6262  ;;  %v5147_v55 = vsel %vm5054_vm2, %v8614_v15, 0.0  ;;  %v5209_v46 = vsub.s32 %v5206_v7, %v6434_v44 }
 0x40c   :  { %v6265_v57 = vpop.eup %6264  ;;  %v5149_v10 = vsel %vm5054_vm2, %v6263_v2, 0.0 }
 0x40d   :  { %v5144_v32 = vadd.f32 %v5143_v47, %v5142_v43  ;;  %v6267_v63 = vpop.eup %6266  ;;  %v5151_v8 = vsel %vm5054_vm2, %v6265_v57, 0.0 }
 0x40e   :  { %v6269_v60 = vpop.eup %6268  ;;  %v5153_v13 = vsel %vm5054_vm2, %v6267_v63, 0.0 }
 0x40f   :  { %v5146_v40 = vadd.f32 %v5145_v51, %v5144_v32  ;;  %v6271_v19 = vpop.eup %6270  ;;  %v5155_v20 = vsel %vm5054_vm2, %v6269_v60, 0.0 }
 0x410   :  { %v6273_v29 = vpop.eup %6272  ;;  %v5157_v25 = vsel %vm5054_vm2, %v6271_v19, 0.0 }
 0x411   :  { %v5148_v5 = vadd.f32 %v5147_v55, %v5146_v40  ;;  %v6275_v61 = vpop.eup %6274  ;;  %v5159_v33 = vsel %vm5054_vm2, %v6273_v29, 0.0 }
 0x412   :  { %v6277_v11 = vpop.eup %6276  ;;  %v5161_v18 = vsel %vm5054_vm2, %v6275_v61, 0.0 }
 0x413   :  { %v5150_v58 = vadd.f32 %v5149_v10, %v5148_v5  ;;  %v6279_v12 = vpop.eup %6278  ;;  %v5163_v21 = vsel %vm5054_vm2, %v6277_v11, 0.0 }
 0x414   :  { %v5165_v54 = vsel %vm5054_vm2, %v6279_v12, 0.0 }
 0x415   :  { %v5152_v9 = vadd.f32 %v5151_v8, %v5150_v58 }
 0x417   :  { %v5154_v59 = vadd.f32 %v5153_v13, %v5152_v9 }
 0x419   :  { %v5156_v35 = vadd.f32 %v5155_v20, %v5154_v59 }
 0x41b   :  { %v5158_v26 = vadd.f32 %v5157_v25, %v5156_v35 }
 0x41d   :  { %v5160_v16 = vadd.f32 %v5159_v33, %v5158_v26 }
 0x41f   :  { %v5162_v17 = vadd.f32 %v5161_v18, %v5160_v16 }
 0x421   :  { %v5164_v23 = vadd.f32 %v5163_v21, %v5162_v17 }
 0x423   :  { %v5166_v27 = vadd.f32 %v5165_v54, %v5164_v23 }
 0x425   :  { %5167 = vadd.xlane.f32.xlu0 %v5166_v27 }
 0x444   :  { %v5440_v34 = vpop.f32.mrb[16].mxu1 }
 0x445   :  { %v5441_v38 = vadd.f32 %v6113_v30, %v5440_v34  ;;  %v6151_v50 = vpop.f32.mrb[17].mxu1 }
 0x446   :  { %v5443_v52 = vpop.f32.mrb[18].mxu1 }
 0x447   :  { %6280 = vtanh.f32 %v5441_v38  ;;  %v6152_v56 = vpop.f32.mrb[19].mxu1 }
 0x451   :  { %v6281_v62 = vpop.eup %6280 }
 0x452   :  { %5448 = vst.msk [vmem:[%s8663_s9] sm:$0x3] %vm5447_vm4, %v6281_v62  ;;  %s6313_s9 = smov [#allocation3]  }
 0x453   :  { %s5455_s26 = sshll.u32 %s6313_s9, 4  ;;  %s5456_s26 = int_to_ptr.vmem [resolvable:$true] %s5455_s26 }
 0x454   :  { %s6284_s27 = scalar_lea.vmem %s5456_s26, 512  ;;  %p6289_p1 = scmp.lt.s32.totalorder %s5456_s26, %s5456_s26 }
 0x455   :  { %p6285_p0 = scmp.ne.s32.totalorder %s5456_s26, %s6284_s27  ;;  %p6290_p2 = scmp.lt.s32.totalorder %s6284_s27, %s6284_s27 }
 0x457   :  { %p6291_p3 = por %p6290_p2, %p6289_p1 }
 0x459   :  { %p6292_p4 = pnand %p6291_p3, %p6285_p0 }
 0x4b2   :  { %v5168_v1 = vpop.xlane.xlu0 %5167 }
 0x4b3   :  { %6282 = vrcp.f32 %v5168_v1 }
 0x4bd   :  { %v6283_v14 = vpop.eup %6282 }
 0x4be   :  { %v5170_v0 = vmul.f32 %v6283_v14, %v8580_v48  ;;  %v5171_v36 = vmul.f32 %v6283_v14, %v8582_v49  ;;  %v5172_v39 = vmul.f32 %v6283_v14, %v8589_v4  ;;  %v5173_v37 = vmul.f32 %v6283_v14, %v8593_v3 }
 0x4bf   :  { %v5174_v42 = vmul.f32 %v6283_v14, %v8600_v28  ;;  %v5175_v43 = vmul.f32 %v6283_v14, %v8607_v24  ;;  %v5176_v47 = vmul.f32 %v6283_v14, %v8614_v15  ;;  %v5177_v45 = vmul.f32 %v6283_v14, %v6263_v2 }
 0x4c0   :  { %v5178_v53 = vmul.f32 %v6283_v14, %v6265_v57  ;;  %v5179_v32 = vmul.f32 %v6283_v14, %v6267_v63  ;;  %v5180_v51 = vmul.f32 %v6283_v14, %v6269_v60  ;;  %v5181_v31 = vmul.f32 %v6283_v14, %v6271_v19 }
 0x4c1   :  { %v5182_v44 = vmul.f32 %v6283_v14, %v6273_v29  ;;  %v5183_v40 = vmul.f32 %v6283_v14, %v6275_v61  ;;  %v5184_v48 = vmul.f32 %v6283_v14, %v6277_v11  ;;  %v5185_v55 = vmul.f32 %v6283_v14, %v6279_v12 }
 0x4c2   :  { %v5202_v49 = vcombine.low %v5170_v0, %v5171_v36  ;;  %v5203_v41 = vcombine.low %v5172_v39, %v5173_v37  ;;  %v5219_v4 = vcombine.low %v5174_v42, %v5175_v43  ;;  %v5220_v5 = vcombine.low %v5176_v47, %v5177_v45 }
 0x4c3   :  { %v5236_v3 = vcombine.low %v5178_v53, %v5179_v32  ;;  %v5237_v10 = vcombine.low %v5180_v51, %v5181_v31  ;;  %v5253_v28 = vcombine.low %v5182_v44, %v5183_v40  ;;  %v5254_v58 = vcombine.low %v5184_v48, %v5185_v55 }
 0x4c4   :  { %v5210_v24 = vrot.slane %v5202_v49, %v5209_v46  ;;  %v5217_v8 = vrot.slane %v5203_v41, %v5209_v46  ;;  %v5227_v15 = vrot.slane %v5219_v4, %v5209_v46  ;;  %v5234_v2 = vrot.slane %v5220_v5, %v5209_v46 }
 0x4c5   :  { %v5244_v57 = vrot.slane %v5236_v3, %v5209_v46  ;;  %v5251_v63 = vrot.slane %v5237_v10, %v5209_v46  ;;  %v5261_v60 = vrot.slane %v5253_v28, %v5209_v46  ;;  %v5268_v9 = vrot.slane %v5254_v58, %v5209_v46 }
 0x4c6   :  { %v5218_v13 = vcombine.low %v5210_v24, %v5217_v8  ;;  %v5235_v19 = vcombine.low %v5227_v15, %v5234_v2 }
 0x4c7   :  { %v5252_v59 = vcombine.low %v5244_v57, %v5251_v63  ;;  %v5269_v20 = vcombine.low %v5261_v60, %v5268_v9 }
 0x4c8   :  { %5274 = vst [vmem:[#allocation3] sm:$0xff] %v5218_v13  ;;  %5275 = vst [vmem:[#allocation3 + $0x8] sm:$0xff] %v5235_v19 }
 0x4c9   :  { %5276 = vst [vmem:[#allocation3 + $0x10] sm:$0xff] %v5252_v59  ;;  %5277 = vst [vmem:[#allocation3 + $0x18] sm:$0xff] %v5269_v20 }
 0x4ca   :  { %6295 = shalt.err (!%p6292_p4)
}
 0x4cb   :  { %s6296_s30 = scalar_lea.hbm %s8662_s8, 512 }
 0x4cc   :  { %p6297_p5 = scmp.ne.s32.totalorder %s8662_s8, %s6296_s30  ;;  %p6300_p6 = scmp.lt.u32.totalorder %s6296_s30, %s8662_s8 }
 0x4ce   :  { %p6302_p7 = pnand %p6300_p6, %p6297_p5 }
 0x4d0   :  { %6305 = shalt.err (!%p6302_p7)
}
 0x4d1   :  { %5458 = dma.vmem_to_hbm [thread:$0]  %s5456_s26, 512, %s8662_s8, [#allocation4]  }
 0x4d2   :  { %6306 = dma.done.wait [#allocation4], 512  }
 0x4d3   :  { %6307 = vsyncadd [#allocation4], 4294966784 }
 0x4d4   :  { %5466 = vsyncpa [#allocation4], 1 }

</bundles_post_ra>
